<compile_context>
chip_gen: v6e
topology: v6e:2x2x1
jax: 0.10.0
libtpu: 0.0.40
codegen_flags: <defaults>
</compile_context>

<pallas_src>
import random
import functools

import jax
import jax.numpy as jnp
from jax.experimental import pallas as pl
from jax.experimental.pallas import tpu as pltpu


def _round_up(x, m):
    return ((x + m - 1) // m) * m


def _largest_divisor(n, cap, multiple_of=1):
    """Largest d <= cap with n % d == 0 and d % multiple_of == 0."""
    d = min(n, cap)
    while d >= multiple_of:
        if n % d == 0 and d % multiple_of == 0:
            return d
        d -= 1
    return multiple_of


def _compiler_params(semantics, resident_bytes):
    # 2x for double-buffered streamed blocks + slack, capped at v7x physical VMEM.
    vmem = min(int(resident_bytes) * 2 + (4 << 20), 64 << 20)
    return pltpu.CompilerParams(dimension_semantics=semantics,
                                vmem_limit_bytes=vmem)


# ----------------------------- Pallas kernels ------------------------------

def _matmul_bias_kernel(x_ref, w_ref, b_ref, out_ref):
    """out = x @ w + b (f32 accumulation, bf16 store)."""
    out_ref[...] = (
        jnp.dot(x_ref[...], w_ref[...], preferred_element_type=jnp.float32)
        + b_ref[...]
    ).astype(out_ref.dtype)


def _encoder_kernel(xg_ref, w_hh_ref, h_ref, c_ref, *, steps):
    """Fused encoder recurrence, `steps` timesteps per grid step.

    xg_ref: [K, B_pad, 4*H_pad] bf16  precomputed x @ w_ih + b
    w_hh_ref: [H_pad, 4*H_pad]  bf16  (VMEM-resident, constant block)
    h_ref/c_ref: [B_pad, H_pad] f32   output-resident state carry
    """
    tb = pl.program_id(0)

    @pl.when(tb == 0)
    def _():
        h_ref[...] = jnp.zeros_like(h_ref)
        c_ref[...] = jnp.zeros_like(c_ref)

    h = h_ref[...]
    c = c_ref[...]
    Hp = h.shape[-1]

    for k in range(steps):                      # static unroll (K small)
        gates = xg_ref[k].astype(jnp.float32) + jnp.dot(
            h.astype(w_hh_ref.dtype), w_hh_ref[...],
            preferred_element_type=jnp.float32)
        i_g = jax.nn.sigmoid(gates[:, 0 * Hp:1 * Hp])
        f_g = jax.nn.sigmoid(gates[:, 1 * Hp:2 * Hp])
        g_g = jnp.tanh(gates[:, 2 * Hp:3 * Hp])
        o_g = jax.nn.sigmoid(gates[:, 3 * Hp:4 * Hp])
        c = f_g * c + i_g * g_g
        h = o_g * jnp.tanh(c)

    h_ref[...] = h
    c_ref[...] = c


def _decoder_kernel(tf_ref,                    # scalar prefetch: [T] int32 (SMEM)
                    xg_ref,                    # [K, B_pad, 4*H_pad] bf16 teacher gates
                    h0_ref, c0_ref,            # [B_pad, H_pad] f32
                    emb_ref,                   # [V_pad, E] bf16
                    w_ih_ref,                  # [E, 4*H_pad] bf16
                    w_hh_ref,                  # [H_pad, 4*H_pad] bf16
                    b_ref,                     # [1, 4*H_pad] f32
                    fc_w_ref,                  # [H_pad, V_pad] bf16
                    fc_b_ref,                  # [1, V_pad] f32
                    out_ref,                   # [K, B_pad, V_pad] f32
                    h_scr, c_scr, g_scr,       # VMEM scratch carries
                    *, steps, total_steps, out_vocab):
    """Fused decoder: `steps` timesteps per grid step, greedy path gated by pl.when."""
    tb = pl.program_id(0)

    @pl.when(tb == 0)
    def _():
        h_scr[...] = h0_ref[...]
        c_scr[...] = c0_ref[...]
        g_scr[...] = jnp.zeros_like(g_scr)

    h = h_scr[...]
    c = c_scr[...]
    Hp = h.shape[-1]

    for k in range(steps):                      # static unroll
        t = tb * steps + k

        # Input gates for step t: teacher-forced gates were precomputed outside the
        # recurrence; greedy gates (if step t-1 declined teacher forcing) are in g_scr.
        tm1 = jnp.maximum(t - 1, 0)
        use_teacher = jnp.logical_or(t == 0, tf_ref[tm1] != 0)
        xg = jnp.where(use_teacher, xg_ref[k].astype(jnp.float32), g_scr[...])

        gates = xg + jnp.dot(h.astype(w_hh_ref.dtype), w_hh_ref[...],
                             preferred_element_type=jnp.float32)
        i_g = jax.nn.sigmoid(gates[:, 0 * Hp:1 * Hp])
        f_g = jax.nn.sigmoid(gates[:, 1 * Hp:2 * Hp])
        g_g = jnp.tanh(gates[:, 2 * Hp:3 * Hp])
        o_g = jax.nn.sigmoid(gates[:, 3 * Hp:4 * Hp])
        c = f_g * c + i_g * g_g
        h = o_g * jnp.tanh(c)

        logits = (jnp.dot(h.astype(fc_w_ref.dtype), fc_w_ref[...],
                          preferred_element_type=jnp.float32) + fc_b_ref[...])
        out_ref[k] = logits                     # lane-dense [B_pad, V_pad] store

        # Only run argmax -> embedding -> input-gate matmuls when the NEXT step will
        # actually consume the greedy token (teacher forcing declined at step t).
        need_greedy = jnp.logical_and(t + 1 < total_steps, tf_ref[t] == 0)

        @pl.when(need_greedy)
        def _(logits=logits):
            Bp, Vp = logits.shape
            col = jax.lax.broadcasted_iota(jnp.int32, (Bp, Vp), 1)
            valid = col < out_vocab
            masked = jnp.where(valid, logits, -1e30)
            vmax = jnp.max(masked, axis=-1, keepdims=True)
            cand = jnp.where(jnp.logical_and(masked == vmax, valid), col, Vp)
            top1 = jnp.min(cand, axis=-1, keepdims=True)   # first-max tie-break (torch.argmax)
            one_hot = (col == top1).astype(emb_ref.dtype)
            # TODO(synk): at realistic vocab sizes replace one-hot @ emb with a per-row
            # embedding gather to avoid the O(B*V*E) MACs.
            x = jnp.dot(one_hot, emb_ref[...], preferred_element_type=jnp.float32)
            g_scr[...] = (jnp.dot(x.astype(w_ih_ref.dtype), w_ih_ref[...],
                                  preferred_element_type=jnp.float32) + b_ref[...])

    h_scr[...] = h
    c_scr[...] = c


# ------------------------------ pallas wrappers ------------------------------

def _precompute_gates(x_flat, w_ih, b):
    """x_flat: [M, E] bf16 -> [M, 4*H_pad] bf16 (x @ w_ih + b, f32 accumulation)."""
    M, E = x_flat.shape
    G = w_ih.shape[1]
    tm = _largest_divisor(M, 512, multiple_of=8)
    resident = tm * E * 2 + E * G * 2 + G * 4 + tm * G * 2
    return pl.pallas_call(
        _matmul_bias_kernel,
        out_shape=jax.ShapeDtypeStruct((M, G), jnp.bfloat16),
        grid_spec=pltpu.PrefetchScalarGridSpec(
            num_scalar_prefetch=0,
            grid=(M // tm,),
            in_specs=[
                pl.BlockSpec((tm, E), lambda i: (i, 0)),
                pl.BlockSpec((E, G), lambda i: (0, 0)),
                pl.BlockSpec((1, G), lambda i: (0, 0)),
            ],
            out_specs=pl.BlockSpec((tm, G), lambda i: (i, 0)),
        ),
        compiler_params=_compiler_params(("parallel",), resident),
    )(x_flat, w_ih, b)


def _encoder_recurrence(x_gates, w_hh):
    """x_gates: [S, B_pad, 4*H_pad] bf16 -> (h_final, c_final) each [B_pad, H_pad] f32."""
    S, B_pad, G = x_gates.shape
    H_pad = w_hh.shape[0]
    K = _largest_divisor(S, 8)
    resident = K * B_pad * G * 2 + H_pad * G * 2 + 2 * B_pad * H_pad * 4
    grid_spec = pltpu.PrefetchScalarGridSpec(
        num_scalar_prefetch=0,
        grid=(S // K,),
        in_specs=[
            pl.BlockSpec((K, B_pad, G), lambda t: (t, 0, 0)),
            pl.BlockSpec((H_pad, G), lambda t: (0, 0)),
        ],
        out_specs=(
            pl.BlockSpec((B_pad, H_pad), lambda t: (0, 0)),
            pl.BlockSpec((B_pad, H_pad), lambda t: (0, 0)),
        ),
    )
    return pl.pallas_call(
        functools.partial(_encoder_kernel, steps=K),
        out_shape=(jax.ShapeDtypeStruct((B_pad, H_pad), jnp.float32),
                   jax.ShapeDtypeStruct((B_pad, H_pad), jnp.float32)),
        grid_spec=grid_spec,
        compiler_params=_compiler_params(("arbitrary",), resident),
    )(x_gates, w_hh)


def _decoder_recurrence(tf_mask, xg_dec, h0, c0, dec, out_vocab):
    """Fused decode over all T steps -> padded logits [T, B_pad, V_pad] f32."""
    T, B_pad, G = xg_dec.shape
    H_pad = h0.shape[1]
    E = dec['emb'].shape[1]
    V_pad = dec['fc_w'].shape[1]
    K = _largest_divisor(T, 8)

    resident = (K * B_pad * G * 2                       # teacher-gate block
                + 2 * B_pad * H_pad * 4                 # h0 / c0
                + V_pad * E * 2 + E * G * 2 + H_pad * G * 2 + G * 4
                + H_pad * V_pad * 2 + V_pad * 4         # fc weights
                + K * B_pad * V_pad * 4                 # output block
                + 2 * B_pad * H_pad * 4 + B_pad * G * 4)  # scratch

    grid_spec = pltpu.PrefetchScalarGridSpec(
        num_scalar_prefetch=1,
        grid=(T // K,),
        in_specs=[
            pl.BlockSpec((K, B_pad, G), lambda t, tf: (t, 0, 0)),    # teacher gates
            pl.BlockSpec((B_pad, H_pad), lambda t, tf: (0, 0)),      # h0
            pl.BlockSpec((B_pad, H_pad), lambda t, tf: (0, 0)),      # c0
            pl.BlockSpec((V_pad, E), lambda t, tf: (0, 0)),          # dec emb
            pl.BlockSpec((E, G), lambda t, tf: (0, 0)),              # w_ih
            pl.BlockSpec((H_pad, G), lambda t, tf: (0, 0)),          # w_hh
            pl.BlockSpec((1, G), lambda t, tf: (0, 0)),              # b
            pl.BlockSpec((H_pad, V_pad), lambda t, tf: (0, 0)),      # fc_w
            pl.BlockSpec((1, V_pad), lambda t, tf: (0, 0)),          # fc_b
        ],
        out_specs=pl.BlockSpec((K, B_pad, V_pad), lambda t, tf: (t, 0, 0)),
        scratch_shapes=[
            pltpu.VMEM((B_pad, H_pad), jnp.float32),   # h carry
            pltpu.VMEM((B_pad, H_pad), jnp.float32),   # c carry
            pltpu.VMEM((B_pad, G), jnp.float32),       # greedy-path gate carry
        ],
    )
    return pl.pallas_call(
        functools.partial(_decoder_kernel, steps=K, total_steps=T, out_vocab=out_vocab),
        out_shape=jax.ShapeDtypeStruct((T, B_pad, V_pad), jnp.float32),
        grid_spec=grid_spec,
        compiler_params=_compiler_params(("arbitrary",), resident),
    )(tf_mask, xg_dec, h0, c0, dec['emb'], dec['w_ih'], dec['w_hh'], dec['b'],
      dec['fc_w'], dec['fc_b'])


# ------------------------------ parameter init ------------------------------

def init_params(key, *, in_vocab, out_vocab, emb_dim, hid_dim):
    """Logical weights, placed into 128-aligned padded containers (zero padding)."""
    H = hid_dim
    H_pad = _round_up(H, 128)
    V_pad = _round_up(out_vocab, 128)
    ks = jax.random.split(key, 10)
    s = 0.1

    def n(k, shape):
        return (s * jax.random.normal(k, shape)).astype(jnp.float32)

    def pad_gate_w(w, K_pad=None):
        # w: [K, 4H] -> [K_pad, 4*H_pad] bf16; gate g occupies cols [g*H_pad, g*H_pad+H)
        K = w.shape[0]
        if K_pad is None:
            K_pad = K
        out = jnp.zeros((K_pad, 4 * H_pad), jnp.float32)
        for g in range(4):
            out = out.at[:K, g * H_pad:g * H_pad + H].set(w[:, g * H:(g + 1) * H])
        return out.astype(jnp.bfloat16)

    def pad_gate_b(b):
        out = jnp.zeros((1, 4 * H_pad), jnp.float32)
        for g in range(4):
            out = out.at[:, g * H_pad:g * H_pad + H].set(b[:, g * H:(g + 1) * H])
        return out

    enc = dict(
        emb=n(ks[0], (in_vocab, emb_dim)),
        w_ih=pad_gate_w(n(ks[1], (emb_dim, 4 * H))),
        w_hh=pad_gate_w(n(ks[2], (H, 4 * H)), K_pad=H_pad),
        b=pad_gate_b(n(ks[3], (1, 4 * H))),
    )

    dec_emb = jnp.zeros((V_pad, emb_dim), jnp.float32).at[:out_vocab].set(
        n(ks[4], (out_vocab, emb_dim)))
    fc_w = jnp.zeros((H_pad, V_pad), jnp.float32).at[:H, :out_vocab].set(
        n(ks[8], (H, out_vocab)))
    # padded vocab columns are plain zeros; the in-kernel argmax masks them via iota.
    fc_b = jnp.zeros((1, V_pad), jnp.float32).at[:, :out_vocab].set(
        n(ks[9], (1, out_vocab)))

    dec = dict(
        emb=dec_emb.astype(jnp.bfloat16),
        w_ih=pad_gate_w(n(ks[5], (emb_dim, 4 * H))),
        w_hh=pad_gate_w(n(ks[6], (H, 4 * H)), K_pad=H_pad),
        b=pad_gate_b(n(ks[7], (1, 4 * H))),
        fc_w=fc_w.astype(jnp.bfloat16),
        fc_b=fc_b,
    )
    params = dict(enc=enc, dec=dec)
    meta = dict(hid_dim=H, output_dim=out_vocab)
    return params, meta


# -------------------------------- Seq2Seq.forward ---------------------------

@functools.partial(jax.jit, static_argnames=('out_vocab',))
def _seq2seq_fused(params, src, trg, tf_mask, *, out_vocab):
    enc = params['enc']
    dec = params['dec']
    B, S = src.shape
    T = trg.shape[1]
    E = enc['emb'].shape[1]
    B_pad = _round_up(max(B, 8), 8)

    # ---- encoder: hoist x @ w_ih + b for all timesteps, then fused recurrence ----
    x = enc['emb'][src]                                   # [B, S, E] gather (glue)
    x = jnp.transpose(x, (1, 0, 2))                       # [S, B, E]
    x = jnp.pad(x, ((0, 0), (0, B_pad - B), (0, 0))).astype(jnp.bfloat16)
    xg_enc = _precompute_gates(x.reshape(S * B_pad, E), enc['w_ih'], enc['b'])
    xg_enc = xg_enc.reshape(S, B_pad, -1)                 # [S, B_pad, 4*H_pad] bf16
    h0, c0 = _encoder_recurrence(xg_enc, enc['w_hh'])
    # TODO(synk): the encoder's per-step `result` tensor is not materialized; the
    # reference only returns it when there is no decoder, which never happens here.

    # ---- decoder: hoist the teacher-forced input gates for all T steps ----
    # Step-t teacher input is trg[:, 0] for t == 0, else trg[:, t-1] (reference quirk:
    # it feeds trg[:, t] -- not t+1 -- as the next input).
    trg_in = jnp.concatenate([trg[:, :1], trg[:, :-1]], axis=1)   # [B, T]
    xd = dec['emb'][trg_in]                               # [B, T, E] bf16 gather (glue)
    xd = jnp.transpose(xd, (1, 0, 2))                     # [T, B, E]
    xd = jnp.pad(xd, ((0, 0), (0, B_pad - B), (0, 0)))
    xg_dec = _precompute_gates(xd.reshape(T * B_pad, E), dec['w_ih'], dec['b'])
    xg_dec = xg_dec.reshape(T, B_pad, -1)                 # [T, B_pad, 4*H_pad] bf16

    outputs = _decoder_recurrence(tf_mask, xg_dec, h0, c0, dec, out_vocab)
    return outputs                                        # [T, B_pad, V_pad] f32


def seq2seq_forward(params, meta, src, trg, teacher_forcing_ratio=0.5):
    """Mirrors Seq2Seq.forward; returns [target_length, batch, output_dim] f32."""
    batch_size, target_length = trg.shape
    # host-side coin flips (same as `random.random() < teacher_forcing_ratio` per step),
    # precomputed so the whole decode stays on-device and compiles once (mask is data).
    tf_mask = jnp.asarray(
        [1 if random.random() < teacher_forcing_ratio else 0
         for _ in range(target_length)], dtype=jnp.int32)
    outputs_padded = _seq2seq_fused(params, src, trg, tf_mask,
                                    out_vocab=meta['output_dim'])
    return outputs_padded[:, :batch_size, :meta['output_dim']]


# ----------------------------------- main ------------------------------------

if __name__ == "__main__":
    BATCH = 2
    SRC_LEN = 8
    TRG_LEN = 8
    EMB_DIM = 32
    HID_DIM = 32
    IN_VOCAB = 16
    OUT_VOCAB = 16

    random.seed(0)  # deterministic teacher-forcing decisions

    key = jax.random.PRNGKey(0)
    k_par, k_src, k_trg = jax.random.split(key, 3)

    params, meta = init_params(k_par, in_vocab=IN_VOCAB, out_vocab=OUT_VOCAB,
                               emb_dim=EMB_DIM, hid_dim=HID_DIM)

    src = jax.random.randint(k_src, (BATCH, SRC_LEN), 0, IN_VOCAB, dtype=jnp.int32)
    trg = jax.random.randint(k_trg, (BATCH, TRG_LEN), 0, OUT_VOCAB, dtype=jnp.int32)

    outputs = seq2seq_forward(params, meta, src, trg, teacher_forcing_ratio=0.5)
    outputs = jax.block_until_ready(outputs)

    assert outputs.shape == (TRG_LEN, BATCH, OUT_VOCAB), outputs.shape
    assert outputs.dtype == jnp.float32
    assert bool(jnp.all(jnp.isfinite(outputs)))
    print("KERNEL_OK")
</pallas_src>

<mosaic_0001>
module attributes {stable_mosaic.version = 11 : i64} {
  func.func @_matmul_bias_kernel(%arg0: i32, %arg1: memref<64x32xbf16, #tpu.memory_space<vmem>>, %arg2: memref<32x512xbf16, #tpu.memory_space<vmem>>, %arg3: memref<1x512xf32, #tpu.memory_space<vmem>>, %arg4: memref<64x512xbf16, #tpu.memory_space<vmem>>) attributes {dimension_semantics = [#tpu.dimension_semantics<parallel>], iteration_bounds = array<i64: 1>, scalar_prefetch = 0 : i64, scratch_operands = 0 : i64, tpu.core_type = #tpu.core_type<tc>, window_params = [{transform_indices = @transform_0, window_bounds = array<i64: 64, 32>}, {pipeline_mode = #tpu.pipeline_mode<synchronous>, transform_indices = @transform_1, window_bounds = array<i64: 32, 512>}, {pipeline_mode = #tpu.pipeline_mode<synchronous>, transform_indices = @transform_2, window_bounds = array<i64: 1, 512>}, {transform_indices = @transform_3, window_bounds = array<i64: 64, 512>}]} {
    %c0 = arith.constant 0 : index
    %c0_0 = arith.constant 0 : index
    %0 = vector.load %arg1[%c0, %c0_0] : memref<64x32xbf16, #tpu.memory_space<vmem>>, vector<64x32xbf16>
    %c0_1 = arith.constant 0 : index
    %c0_2 = arith.constant 0 : index
    %1 = vector.load %arg2[%c0_1, %c0_2] : memref<32x512xbf16, #tpu.memory_space<vmem>>, vector<32x512xbf16>
    %cst = arith.constant dense<0.000000e+00> : vector<64x512xf32>
    %2 = tpu.matmul %0, %1, %cst {dimension_numbers = #tpu.dot_dimension_numbers<[1], [0], [0], [1], [0, 0, 1, 1], [], []>} : vector<64x32xbf16>, vector<32x512xbf16>, vector<64x512xf32> -> vector<64x512xf32>
    %c0_3 = arith.constant 0 : index
    %c0_4 = arith.constant 0 : index
    %3 = vector.load %arg3[%c0_3, %c0_4] : memref<1x512xf32, #tpu.memory_space<vmem>>, vector<1x512xf32>
    %4 = vector.broadcast %3 : vector<1x512xf32> to vector<64x512xf32>
    %5 = arith.addf %2, %4 : vector<64x512xf32>
    %6 = arith.truncf %5 : vector<64x512xf32> to vector<64x512xbf16>
    %c0_5 = arith.constant 0 : index
    %c0_6 = arith.constant 0 : index
    %7 = vector.load %arg4[%c0_5, %c0_6] : memref<64x512xbf16, #tpu.memory_space<vmem>>, vector<64x512xbf16>
    tpu.vector_store %arg4[%c0_5, %c0_6], %6 {strides = array<i32>} : memref<64x512xbf16, #tpu.memory_space<vmem>>, vector<64x512xbf16>,
    return
  }
  func.func @transform_0(%arg0: i32) -> (i32, i32) {
    %c0_i32 = arith.constant 0 : i32
    %c0_i32_0 = arith.constant 0 : i32
    return %arg0, %c0_i32 : i32, i32
  }
  func.func @transform_1(%arg0: i32) -> (i32, i32) {
    %c0_i32 = arith.constant 0 : i32
    %c0_i32_0 = arith.constant 0 : i32
    %c0_i32_1 = arith.constant 0 : i32
    return %c0_i32, %c0_i32_0 : i32, i32
  }
  func.func @transform_2(%arg0: i32) -> (i32, i32) {
    %c0_i32 = arith.constant 0 : i32
    %c0_i32_0 = arith.constant 0 : i32
    %c0_i32_1 = arith.constant 0 : i32
    return %c0_i32, %c0_i32_0 : i32, i32
  }
  func.func @transform_3(%arg0: i32) -> (i32, i32) {
    %c0_i32 = arith.constant 0 : i32
    %c0_i32_0 = arith.constant 0 : i32
    return %arg0, %c0_i32 : i32, i32
  }
}

module attributes {stable_mosaic.version = 11 : i64} {
  func.func @_encoder_kernel(%arg0: i32, %arg1: memref<8x8x512xbf16, #tpu.memory_space<vmem>>, %arg2: memref<128x512xbf16, #tpu.memory_space<vmem>>, %arg3: memref<8x128xf32, #tpu.memory_space<vmem>>, %arg4: memref<8x128xf32, #tpu.memory_space<vmem>>) attributes {dimension_semantics = [#tpu.dimension_semantics<arbitrary>], iteration_bounds = array<i64: 1>, scalar_prefetch = 0 : i64, scratch_operands = 0 : i64, tpu.core_type = #tpu.core_type<tc>, window_params = [{transform_indices = @transform_0, window_bounds = array<i64: 8, 8, 512>}, {pipeline_mode = #tpu.pipeline_mode<synchronous>, transform_indices = @transform_1, window_bounds = array<i64: 128, 512>}, {pipeline_mode = #tpu.pipeline_mode<synchronous>, transform_indices = @transform_2, window_bounds = array<i64: 8, 128>}, {pipeline_mode = #tpu.pipeline_mode<synchronous>, transform_indices = @transform_3, window_bounds = array<i64: 8, 128>}]} {
    %c0_i32 = arith.constant 0 : i32
    %0 = arith.cmpi eq, %arg0, %c0_i32 : i32
    %1 = arith.extui %0 : i1 to i32
    %c0_i32_0 = arith.constant 0 : i32
    %2 = arith.cmpi ne, %1, %c0_i32_0 : i32
    scf.if %2 {
      %cst_72 = arith.constant 0.000000e+00 : f32
      %263 = vector.broadcast %cst_72 : f32 to vector<8x128xf32>
      %c0_73 = arith.constant 0 : index
      %c0_74 = arith.constant 0 : index
      %264 = vector.load %arg3[%c0_73, %c0_74] : memref<8x128xf32, #tpu.memory_space<vmem>>, vector<8x128xf32>
      tpu.vector_store %arg3[%c0_73, %c0_74], %263 {strides = array<i32>} : memref<8x128xf32, #tpu.memory_space<vmem>>, vector<8x128xf32>,
      %cst_75 = arith.constant 0.000000e+00 : f32
      %265 = vector.broadcast %cst_75 : f32 to vector<8x128xf32>
      %c0_76 = arith.constant 0 : index
      %c0_77 = arith.constant 0 : index
      %266 = vector.load %arg4[%c0_76, %c0_77] : memref<8x128xf32, #tpu.memory_space<vmem>>, vector<8x128xf32>
      tpu.vector_store %arg4[%c0_76, %c0_77], %265 {strides = array<i32>} : memref<8x128xf32, #tpu.memory_space<vmem>>, vector<8x128xf32>,
    } else {
    }
    %c0 = arith.constant 0 : index
    %c0_1 = arith.constant 0 : index
    %3 = vector.load %arg3[%c0, %c0_1] : memref<8x128xf32, #tpu.memory_space<vmem>>, vector<8x128xf32>
    %c0_2 = arith.constant 0 : index
    %c0_3 = arith.constant 0 : index
    %4 = vector.load %arg4[%c0_2, %c0_3] : memref<8x128xf32, #tpu.memory_space<vmem>>, vector<8x128xf32>
    %c0_4 = arith.constant 0 : index
    %c0_5 = arith.constant 0 : index
    %c0_6 = arith.constant 0 : index
    %5 = vector.load %arg1[%c0_4, %c0_5, %c0_6] : memref<8x8x512xbf16, #tpu.memory_space<vmem>>, vector<1x8x512xbf16>
    %6 = vector.shape_cast %5 : vector<1x8x512xbf16> to vector<8x512xbf16>
    %7 = arith.extf %6 : vector<8x512xbf16> to vector<8x512xf32>
    %8 = arith.truncf %3 : vector<8x128xf32> to vector<8x128xbf16>
    %c0_7 = arith.constant 0 : index
    %c0_8 = arith.constant 0 : index
    %9 = vector.load %arg2[%c0_7, %c0_8] : memref<128x512xbf16, #tpu.memory_space<vmem>>, vector<128x512xbf16>
    %cst = arith.constant dense<0.000000e+00> : vector<8x512xf32>
    %10 = tpu.matmul %8, %9, %cst {dimension_numbers = #tpu.dot_dimension_numbers<[1], [0], [0], [1], [0, 0, 1, 1], [], []>} : vector<8x128xbf16>, vector<128x512xbf16>, vector<8x512xf32> -> vector<8x512xf32>
    %11 = arith.addf %7, %10 : vector<8x512xf32>
    %12 = vector.extract_strided_slice %11 {offsets = [0, 0], sizes = [8, 128], strides = [1, 1]} : vector<8x512xf32> to vector<8x128xf32>
    %13 = arith.negf %12 : vector<8x128xf32>
    %14 = math.exp %13 : vector<8x128xf32>
    %cst_9 = arith.constant 1.000000e+00 : f32
    %15 = vector.broadcast %cst_9 : f32 to vector<8x128xf32>
    %16 = arith.addf %15, %14 : vector<8x128xf32>
    %17 = arith.divf %15, %16 : vector<8x128xf32>
    %18 = vector.extract_strided_slice %11 {offsets = [0, 128], sizes = [8, 128], strides = [1, 1]} : vector<8x512xf32> to vector<8x128xf32>
    %19 = arith.negf %18 : vector<8x128xf32>
    %20 = math.exp %19 : vector<8x128xf32>
    %cst_10 = arith.constant 1.000000e+00 : f32
    %21 = vector.broadcast %cst_10 : f32 to vector<8x128xf32>
    %22 = arith.addf %21, %20 : vector<8x128xf32>
    %23 = arith.divf %21, %22 : vector<8x128xf32>
    %24 = vector.extract_strided_slice %11 {offsets = [0, 256], sizes = [8, 128], strides = [1, 1]} : vector<8x512xf32> to vector<8x128xf32>
    %25 = math.tanh %24 : vector<8x128xf32>
    %26 = vector.extract_strided_slice %11 {offsets = [0, 384], sizes = [8, 128], strides = [1, 1]} : vector<8x512xf32> to vector<8x128xf32>
    %27 = arith.negf %26 : vector<8x128xf32>
    %28 = math.exp %27 : vector<8x128xf32>
    %cst_11 = arith.constant 1.000000e+00 : f32
    %29 = vector.broadcast %cst_11 : f32 to vector<8x128xf32>
    %30 = arith.addf %29, %28 : vector<8x128xf32>
    %31 = arith.divf %29, %30 : vector<8x128xf32>
    %32 = arith.mulf %23, %4 : vector<8x128xf32>
    %33 = arith.mulf %17, %25 : vector<8x128xf32>
    %34 = arith.addf %32, %33 : vector<8x128xf32>
    %35 = math.tanh %34 : vector<8x128xf32>
    %36 = arith.mulf %31, %35 : vector<8x128xf32>
    %c1 = arith.constant 1 : index
    %c0_12 = arith.constant 0 : index
    %c0_13 = arith.constant 0 : index
    %37 = vector.load %arg1[%c1, %c0_12, %c0_13] : memref<8x8x512xbf16, #tpu.memory_space<vmem>>, vector<1x8x512xbf16>
    %38 = vector.shape_cast %37 : vector<1x8x512xbf16> to vector<8x512xbf16>
    %39 = arith.extf %38 : vector<8x512xbf16> to vector<8x512xf32>
    %40 = arith.truncf %36 : vector<8x128xf32> to vector<8x128xbf16>
    %c0_14 = arith.constant 0 : index
    %c0_15 = arith.constant 0 : index
    %41 = vector.load %arg2[%c0_14, %c0_15] : memref<128x512xbf16, #tpu.memory_space<vmem>>, vector<128x512xbf16>
    %cst_16 = arith.constant dense<0.000000e+00> : vector<8x512xf32>
    %42 = tpu.matmul %40, %41, %cst_16 {dimension_numbers = #tpu.dot_dimension_numbers<[1], [0], [0], [1], [0, 0, 1, 1], [], []>} : vector<8x128xbf16>, vector<128x512xbf16>, vector<8x512xf32> -> vector<8x512xf32>
    %43 = arith.addf %39, %42 : vector<8x512xf32>
    %44 = vector.extract_strided_slice %43 {offsets = [0, 0], sizes = [8, 128], strides = [1, 1]} : vector<8x512xf32> to vector<8x128xf32>
    %45 = arith.negf %44 : vector<8x128xf32>
    %46 = math.exp %45 : vector<8x128xf32>
    %cst_17 = arith.constant 1.000000e+00 : f32
    %47 = vector.broadcast %cst_17 : f32 to vector<8x128xf32>
    %48 = arith.addf %47, %46 : vector<8x128xf32>
    %49 = arith.divf %47, %48 : vector<8x128xf32>
    %50 = vector.extract_strided_slice %43 {offsets = [0, 128], sizes = [8, 128], strides = [1, 1]} : vector<8x512xf32> to vector<8x128xf32>
    %51 = arith.negf %50 : vector<8x128xf32>
    %52 = math.exp %51 : vector<8x128xf32>
    %cst_18 = arith.constant 1.000000e+00 : f32
    %53 = vector.broadcast %cst_18 : f32 to vector<8x128xf32>
    %54 = arith.addf %53, %52 : vector<8x128xf32>
    %55 = arith.divf %53, %54 : vector<8x128xf32>
    %56 = vector.extract_strided_slice %43 {offsets = [0, 256], sizes = [8, 128], strides = [1, 1]} : vector<8x512xf32> to vector<8x128xf32>
    %57 = math.tanh %56 : vector<8x128xf32>
    %58 = vector.extract_strided_slice %43 {offsets = [0, 384], sizes = [8, 128], strides = [1, 1]} : vector<8x512xf32> to vector<8x128xf32>
    %59 = arith.negf %58 : vector<8x128xf32>
    %60 = math.exp %59 : vector<8x128xf32>
    %cst_19 = arith.constant 1.000000e+00 : f32
    %61 = vector.broadcast %cst_19 : f32 to vector<8x128xf32>
    %62 = arith.addf %61, %60 : vector<8x128xf32>
    %63 = arith.divf %61, %62 : vector<8x128xf32>
    %64 = arith.mulf %55, %34 : vector<8x128xf32>
    %65 = arith.mulf %49, %57 : vector<8x128xf32>
    %66 = arith.addf %64, %65 : vector<8x128xf32>
    %67 = math.tanh %66 : vector<8x128xf32>
    %68 = arith.mulf %63, %67 : vector<8x128xf32>
    %c2 = arith.constant 2 : index
    %c0_20 = arith.constant 0 : index
    %c0_21 = arith.constant 0 : index
    %69 = vector.load %arg1[%c2, %c0_20, %c0_21] : memref<8x8x512xbf16, #tpu.memory_space<vmem>>, vector<1x8x512xbf16>
    %70 = vector.shape_cast %69 : vector<1x8x512xbf16> to vector<8x512xbf16>
    %71 = arith.extf %70 : vector<8x512xbf16> to vector<8x512xf32>
    %72 = arith.truncf %68 : vector<8x128xf32> to vector<8x128xbf16>
    %c0_22 = arith.constant 0 : index
    %c0_23 = arith.constant 0 : index
    %73 = vector.load %arg2[%c0_22, %c0_23] : memref<128x512xbf16, #tpu.memory_space<vmem>>, vector<128x512xbf16>
    %cst_24 = arith.constant dense<0.000000e+00> : vector<8x512xf32>
    %74 = tpu.matmul %72, %73, %cst_24 {dimension_numbers = #tpu.dot_dimension_numbers<[1], [0], [0], [1], [0, 0, 1, 1], [], []>} : vector<8x128xbf16>, vector<128x512xbf16>, vector<8x512xf32> -> vector<8x512xf32>
    %75 = arith.addf %71, %74 : vector<8x512xf32>
    %76 = vector.extract_strided_slice %75 {offsets = [0, 0], sizes = [8, 128], strides = [1, 1]} : vector<8x512xf32> to vector<8x128xf32>
    %77 = arith.negf %76 : vector<8x128xf32>
    %78 = math.exp %77 : vector<8x128xf32>
    %cst_25 = arith.constant 1.000000e+00 : f32
    %79 = vector.broadcast %cst_25 : f32 to vector<8x128xf32>
    %80 = arith.addf %79, %78 : vector<8x128xf32>
    %81 = arith.divf %79, %80 : vector<8x128xf32>
    %82 = vector.extract_strided_slice %75 {offsets = [0, 128], sizes = [8, 128], strides = [1, 1]} : vector<8x512xf32> to vector<8x128xf32>
    %83 = arith.negf %82 : vector<8x128xf32>
    %84 = math.exp %83 : vector<8x128xf32>
    %cst_26 = arith.constant 1.000000e+00 : f32
    %85 = vector.broadcast %cst_26 : f32 to vector<8x128xf32>
    %86 = arith.addf %85, %84 : vector<8x128xf32>
    %87 = arith.divf %85, %86 : vector<8x128xf32>
    %88 = vector.extract_strided_slice %75 {offsets = [0, 256], sizes = [8, 128], strides = [1, 1]} : vector<8x512xf32> to vector<8x128xf32>
    %89 = math.tanh %88 : vector<8x128xf32>
    %90 = vector.extract_strided_slice %75 {offsets = [0, 384], sizes = [8, 128], strides = [1, 1]} : vector<8x512xf32> to vector<8x128xf32>
    %91 = arith.negf %90 : vector<8x128xf32>
    %92 = math.exp %91 : vector<8x128xf32>
    %cst_27 = arith.constant 1.000000e+00 : f32
    %93 = vector.broadcast %cst_27 : f32 to vector<8x128xf32>
    %94 = arith.addf %93, %92 : vector<8x128xf32>
    %95 = arith.divf %93, %94 : vector<8x128xf32>
    %96 = arith.mulf %87, %66 : vector<8x128xf32>
    %97 = arith.mulf %81, %89 : vector<8x128xf32>
    %98 = arith.addf %96, %97 : vector<8x128xf32>
    %99 = math.tanh %98 : vector<8x128xf32>
    %100 = arith.mulf %95, %99 : vector<8x128xf32>
    %c3 = arith.constant 3 : index
    %c0_28 = arith.constant 0 : index
    %c0_29 = arith.constant 0 : index
    %101 = vector.load %arg1[%c3, %c0_28, %c0_29] : memref<8x8x512xbf16, #tpu.memory_space<vmem>>, vector<1x8x512xbf16>
    %102 = vector.shape_cast %101 : vector<1x8x512xbf16> to vector<8x512xbf16>
    %103 = arith.extf %102 : vector<8x512xbf16> to vector<8x512xf32>
    %104 = arith.truncf %100 : vector<8x128xf32> to vector<8x128xbf16>
    %c0_30 = arith.constant 0 : index
    %c0_31 = arith.constant 0 : index
    %105 = vector.load %arg2[%c0_30, %c0_31] : memref<128x512xbf16, #tpu.memory_space<vmem>>, vector<128x512xbf16>
    %cst_32 = arith.constant dense<0.000000e+00> : vector<8x512xf32>
    %106 = tpu.matmul %104, %105, %cst_32 {dimension_numbers = #tpu.dot_dimension_numbers<[1], [0], [0], [1], [0, 0, 1, 1], [], []>} : vector<8x128xbf16>, vector<128x512xbf16>, vector<8x512xf32> -> vector<8x512xf32>
    %107 = arith.addf %103, %106 : vector<8x512xf32>
    %108 = vector.extract_strided_slice %107 {offsets = [0, 0], sizes = [8, 128], strides = [1, 1]} : vector<8x512xf32> to vector<8x128xf32>
    %109 = arith.negf %108 : vector<8x128xf32>
    %110 = math.exp %109 : vector<8x128xf32>
    %cst_33 = arith.constant 1.000000e+00 : f32
    %111 = vector.broadcast %cst_33 : f32 to vector<8x128xf32>
    %112 = arith.addf %111, %110 : vector<8x128xf32>
    %113 = arith.divf %111, %112 : vector<8x128xf32>
    %114 = vector.extract_strided_slice %107 {offsets = [0, 128], sizes = [8, 128], strides = [1, 1]} : vector<8x512xf32> to vector<8x128xf32>
    %115 = arith.negf %114 : vector<8x128xf32>
    %116 = math.exp %115 : vector<8x128xf32>
    %cst_34 = arith.constant 1.000000e+00 : f32
    %117 = vector.broadcast %cst_34 : f32 to vector<8x128xf32>
    %118 = arith.addf %117, %116 : vector<8x128xf32>
    %119 = arith.divf %117, %118 : vector<8x128xf32>
    %120 = vector.extract_strided_slice %107 {offsets = [0, 256], sizes = [8, 128], strides = [1, 1]} : vector<8x512xf32> to vector<8x128xf32>
    %121 = math.tanh %120 : vector<8x128xf32>
    %122 = vector.extract_strided_slice %107 {offsets = [0, 384], sizes = [8, 128], strides = [1, 1]} : vector<8x512xf32> to vector<8x128xf32>
    %123 = arith.negf %122 : vector<8x128xf32>
    %124 = math.exp %123 : vector<8x128xf32>
    %cst_35 = arith.constant 1.000000e+00 : f32
    %125 = vector.broadcast %cst_35 : f32 to vector<8x128xf32>
    %126 = arith.addf %125, %124 : vector<8x128xf32>
    %127 = arith.divf %125, %126 : vector<8x128xf32>
    %128 = arith.mulf %119, %98 : vector<8x128xf32>
    %129 = arith.mulf %113, %121 : vector<8x128xf32>
    %130 = arith.addf %128, %129 : vector<8x128xf32>
    %131 = math.tanh %130 : vector<8x128xf32>
    %132 = arith.mulf %127, %131 : vector<8x128xf32>
    %c4 = arith.constant 4 : index
    %c0_36 = arith.constant 0 : index
    %c0_37 = arith.constant 0 : index
    %133 = vector.load %arg1[%c4, %c0_36, %c0_37] : memref<8x8x512xbf16, #tpu.memory_space<vmem>>, vector<1x8x512xbf16>
    %134 = vector.shape_cast %133 : vector<1x8x512xbf16> to vector<8x512xbf16>
    %135 = arith.extf %134 : vector<8x512xbf16> to vector<8x512xf32>
    %136 = arith.truncf %132 : vector<8x128xf32> to vector<8x128xbf16>
    %c0_38 = arith.constant 0 : index
    %c0_39 = arith.constant 0 : index
    %137 = vector.load %arg2[%c0_38, %c0_39] : memref<128x512xbf16, #tpu.memory_space<vmem>>, vector<128x512xbf16>
    %cst_40 = arith.constant dense<0.000000e+00> : vector<8x512xf32>
    %138 = tpu.matmul %136, %137, %cst_40 {dimension_numbers = #tpu.dot_dimension_numbers<[1], [0], [0], [1], [0, 0, 1, 1], [], []>} : vector<8x128xbf16>, vector<128x512xbf16>, vector<8x512xf32> -> vector<8x512xf32>
    %139 = arith.addf %135, %138 : vector<8x512xf32>
    %140 = vector.extract_strided_slice %139 {offsets = [0, 0], sizes = [8, 128], strides = [1, 1]} : vector<8x512xf32> to vector<8x128xf32>
    %141 = arith.negf %140 : vector<8x128xf32>
    %142 = math.exp %141 : vector<8x128xf32>
    %cst_41 = arith.constant 1.000000e+00 : f32
    %143 = vector.broadcast %cst_41 : f32 to vector<8x128xf32>
    %144 = arith.addf %143, %142 : vector<8x128xf32>
    %145 = arith.divf %143, %144 : vector<8x128xf32>
    %146 = vector.extract_strided_slice %139 {offsets = [0, 128], sizes = [8, 128], strides = [1, 1]} : vector<8x512xf32> to vector<8x128xf32>
    %147 = arith.negf %146 : vector<8x128xf32>
    %148 = math.exp %147 : vector<8x128xf32>
    %cst_42 = arith.constant 1.000000e+00 : f32
    %149 = vector.broadcast %cst_42 : f32 to vector<8x128xf32>
    %150 = arith.addf %149, %148 : vector<8x128xf32>
    %151 = arith.divf %149, %150 : vector<8x128xf32>
    %152 = vector.extract_strided_slice %139 {offsets = [0, 256], sizes = [8, 128], strides = [1, 1]} : vector<8x512xf32> to vector<8x128xf32>
    %153 = math.tanh %152 : vector<8x128xf32>
    %154 = vector.extract_strided_slice %139 {offsets = [0, 384], sizes = [8, 128], strides = [1, 1]} : vector<8x512xf32> to vector<8x128xf32>
    %155 = arith.negf %154 : vector<8x128xf32>
    %156 = math.exp %155 : vector<8x128xf32>
    %cst_43 = arith.constant 1.000000e+00 : f32
    %157 = vector.broadcast %cst_43 : f32 to vector<8x128xf32>
    %158 = arith.addf %157, %156 : vector<8x128xf32>
    %159 = arith.divf %157, %158 : vector<8x128xf32>
    %160 = arith.mulf %151, %130 : vector<8x128xf32>
    %161 = arith.mulf %145, %153 : vector<8x128xf32>
    %162 = arith.addf %160, %161 : vector<8x128xf32>
    %163 = math.tanh %162 : vector<8x128xf32>
    %164 = arith.mulf %159, %163 : vector<8x128xf32>
    %c5 = arith.constant 5 : index
    %c0_44 = arith.constant 0 : index
    %c0_45 = arith.constant 0 : index
    %165 = vector.load %arg1[%c5, %c0_44, %c0_45] : memref<8x8x512xbf16, #tpu.memory_space<vmem>>, vector<1x8x512xbf16>
    %166 = vector.shape_cast %165 : vector<1x8x512xbf16> to vector<8x512xbf16>
    %167 = arith.extf %166 : vector<8x512xbf16> to vector<8x512xf32>
    %168 = arith.truncf %164 : vector<8x128xf32> to vector<8x128xbf16>
    %c0_46 = arith.constant 0 : index
    %c0_47 = arith.constant 0 : index
    %169 = vector.load %arg2[%c0_46, %c0_47] : memref<128x512xbf16, #tpu.memory_space<vmem>>, vector<128x512xbf16>
    %cst_48 = arith.constant dense<0.000000e+00> : vector<8x512xf32>
    %170 = tpu.matmul %168, %169, %cst_48 {dimension_numbers = #tpu.dot_dimension_numbers<[1], [0], [0], [1], [0, 0, 1, 1], [], []>} : vector<8x128xbf16>, vector<128x512xbf16>, vector<8x512xf32> -> vector<8x512xf32>
    %171 = arith.addf %167, %170 : vector<8x512xf32>
    %172 = vector.extract_strided_slice %171 {offsets = [0, 0], sizes = [8, 128], strides = [1, 1]} : vector<8x512xf32> to vector<8x128xf32>
    %173 = arith.negf %172 : vector<8x128xf32>
    %174 = math.exp %173 : vector<8x128xf32>
    %cst_49 = arith.constant 1.000000e+00 : f32
    %175 = vector.broadcast %cst_49 : f32 to vector<8x128xf32>
    %176 = arith.addf %175, %174 : vector<8x128xf32>
    %177 = arith.divf %175, %176 : vector<8x128xf32>
    %178 = vector.extract_strided_slice %171 {offsets = [0, 128], sizes = [8, 128], strides = [1, 1]} : vector<8x512xf32> to vector<8x128xf32>
    %179 = arith.negf %178 : vector<8x128xf32>
    %180 = math.exp %179 : vector<8x128xf32>
    %cst_50 = arith.constant 1.000000e+00 : f32
    %181 = vector.broadcast %cst_50 : f32 to vector<8x128xf32>
    %182 = arith.addf %181, %180 : vector<8x128xf32>
    %183 = arith.divf %181, %182 : vector<8x128xf32>
    %184 = vector.extract_strided_slice %171 {offsets = [0, 256], sizes = [8, 128], strides = [1, 1]} : vector<8x512xf32> to vector<8x128xf32>
    %185 = math.tanh %184 : vector<8x128xf32>
    %186 = vector.extract_strided_slice %171 {offsets = [0, 384], sizes = [8, 128], strides = [1, 1]} : vector<8x512xf32> to vector<8x128xf32>
    %187 = arith.negf %186 : vector<8x128xf32>
    %188 = math.exp %187 : vector<8x128xf32>
    %cst_51 = arith.constant 1.000000e+00 : f32
    %189 = vector.broadcast %cst_51 : f32 to vector<8x128xf32>
    %190 = arith.addf %189, %188 : vector<8x128xf32>
    %191 = arith.divf %189, %190 : vector<8x128xf32>
    %192 = arith.mulf %183, %162 : vector<8x128xf32>
    %193 = arith.mulf %177, %185 : vector<8x128xf32>
    %194 = arith.addf %192, %193 : vector<8x128xf32>
    %195 = math.tanh %194 : vector<8x128xf32>
    %196 = arith.mulf %191, %195 : vector<8x128xf32>
    %c6 = arith.constant 6 : index
    %c0_52 = arith.constant 0 : index
    %c0_53 = arith.constant 0 : index
    %197 = vector.load %arg1[%c6, %c0_52, %c0_53] : memref<8x8x512xbf16, #tpu.memory_space<vmem>>, vector<1x8x512xbf16>
    %198 = vector.shape_cast %197 : vector<1x8x512xbf16> to vector<8x512xbf16>
    %199 = arith.extf %198 : vector<8x512xbf16> to vector<8x512xf32>
    %200 = arith.truncf %196 : vector<8x128xf32> to vector<8x128xbf16>
    %c0_54 = arith.constant 0 : index
    %c0_55 = arith.constant 0 : index
    %201 = vector.load %arg2[%c0_54, %c0_55] : memref<128x512xbf16, #tpu.memory_space<vmem>>, vector<128x512xbf16>
    %cst_56 = arith.constant dense<0.000000e+00> : vector<8x512xf32>
    %202 = tpu.matmul %200, %201, %cst_56 {dimension_numbers = #tpu.dot_dimension_numbers<[1], [0], [0], [1], [0, 0, 1, 1], [], []>} : vector<8x128xbf16>, vector<128x512xbf16>, vector<8x512xf32> -> vector<8x512xf32>
    %203 = arith.addf %199, %202 : vector<8x512xf32>
    %204 = vector.extract_strided_slice %203 {offsets = [0, 0], sizes = [8, 128], strides = [1, 1]} : vector<8x512xf32> to vector<8x128xf32>
    %205 = arith.negf %204 : vector<8x128xf32>
    %206 = math.exp %205 : vector<8x128xf32>
    %cst_57 = arith.constant 1.000000e+00 : f32
    %207 = vector.broadcast %cst_57 : f32 to vector<8x128xf32>
    %208 = arith.addf %207, %206 : vector<8x128xf32>
    %209 = arith.divf %207, %208 : vector<8x128xf32>
    %210 = vector.extract_strided_slice %203 {offsets = [0, 128], sizes = [8, 128], strides = [1, 1]} : vector<8x512xf32> to vector<8x128xf32>
    %211 = arith.negf %210 : vector<8x128xf32>
    %212 = math.exp %211 : vector<8x128xf32>
    %cst_58 = arith.constant 1.000000e+00 : f32
    %213 = vector.broadcast %cst_58 : f32 to vector<8x128xf32>
    %214 = arith.addf %213, %212 : vector<8x128xf32>
    %215 = arith.divf %213, %214 : vector<8x128xf32>
    %216 = vector.extract_strided_slice %203 {offsets = [0, 256], sizes = [8, 128], strides = [1, 1]} : vector<8x512xf32> to vector<8x128xf32>
    %217 = math.tanh %216 : vector<8x128xf32>
    %218 = vector.extract_strided_slice %203 {offsets = [0, 384], sizes = [8, 128], strides = [1, 1]} : vector<8x512xf32> to vector<8x128xf32>
    %219 = arith.negf %218 : vector<8x128xf32>
    %220 = math.exp %219 : vector<8x128xf32>
    %cst_59 = arith.constant 1.000000e+00 : f32
    %221 = vector.broadcast %cst_59 : f32 to vector<8x128xf32>
    %222 = arith.addf %221, %220 : vector<8x128xf32>
    %223 = arith.divf %221, %222 : vector<8x128xf32>
    %224 = arith.mulf %215, %194 : vector<8x128xf32>
    %225 = arith.mulf %209, %217 : vector<8x128xf32>
    %226 = arith.addf %224, %225 : vector<8x128xf32>
    %227 = math.tanh %226 : vector<8x128xf32>
    %228 = arith.mulf %223, %227 : vector<8x128xf32>
    %c7 = arith.constant 7 : index
    %c0_60 = arith.constant 0 : index
    %c0_61 = arith.constant 0 : index
    %229 = vector.load %arg1[%c7, %c0_60, %c0_61] : memref<8x8x512xbf16, #tpu.memory_space<vmem>>, vector<1x8x512xbf16>
    %230 = vector.shape_cast %229 : vector<1x8x512xbf16> to vector<8x512xbf16>
    %231 = arith.extf %230 : vector<8x512xbf16> to vector<8x512xf32>
    %232 = arith.truncf %228 : vector<8x128xf32> to vector<8x128xbf16>
    %c0_62 = arith.constant 0 : index
    %c0_63 = arith.constant 0 : index
    %233 = vector.load %arg2[%c0_62, %c0_63] : memref<128x512xbf16, #tpu.memory_space<vmem>>, vector<128x512xbf16>
    %cst_64 = arith.constant dense<0.000000e+00> : vector<8x512xf32>
    %234 = tpu.matmul %232, %233, %cst_64 {dimension_numbers = #tpu.dot_dimension_numbers<[1], [0], [0], [1], [0, 0, 1, 1], [], []>} : vector<8x128xbf16>, vector<128x512xbf16>, vector<8x512xf32> -> vector<8x512xf32>
    %235 = arith.addf %231, %234 : vector<8x512xf32>
    %236 = vector.extract_strided_slice %235 {offsets = [0, 0], sizes = [8, 128], strides = [1, 1]} : vector<8x512xf32> to vector<8x128xf32>
    %237 = arith.negf %236 : vector<8x128xf32>
    %238 = math.exp %237 : vector<8x128xf32>
    %cst_65 = arith.constant 1.000000e+00 : f32
    %239 = vector.broadcast %cst_65 : f32 to vector<8x128xf32>
    %240 = arith.addf %239, %238 : vector<8x128xf32>
    %241 = arith.divf %239, %240 : vector<8x128xf32>
    %242 = vector.extract_strided_slice %235 {offsets = [0, 128], sizes = [8, 128], strides = [1, 1]} : vector<8x512xf32> to vector<8x128xf32>
    %243 = arith.negf %242 : vector<8x128xf32>
    %244 = math.exp %243 : vector<8x128xf32>
    %cst_66 = arith.constant 1.000000e+00 : f32
    %245 = vector.broadcast %cst_66 : f32 to vector<8x128xf32>
    %246 = arith.addf %245, %244 : vector<8x128xf32>
    %247 = arith.divf %245, %246 : vector<8x128xf32>
    %248 = vector.extract_strided_slice %235 {offsets = [0, 256], sizes = [8, 128], strides = [1, 1]} : vector<8x512xf32> to vector<8x128xf32>
    %249 = math.tanh %248 : vector<8x128xf32>
    %250 = vector.extract_strided_slice %235 {offsets = [0, 384], sizes = [8, 128], strides = [1, 1]} : vector<8x512xf32> to vector<8x128xf32>
    %251 = arith.negf %250 : vector<8x128xf32>
    %252 = math.exp %251 : vector<8x128xf32>
    %cst_67 = arith.constant 1.000000e+00 : f32
    %253 = vector.broadcast %cst_67 : f32 to vector<8x128xf32>
    %254 = arith.addf %253, %252 : vector<8x128xf32>
    %255 = arith.divf %253, %254 : vector<8x128xf32>
    %256 = arith.mulf %247, %226 : vector<8x128xf32>
    %257 = arith.mulf %241, %249 : vector<8x128xf32>
    %258 = arith.addf %256, %257 : vector<8x128xf32>
    %259 = math.tanh %258 : vector<8x128xf32>
    %260 = arith.mulf %255, %259 : vector<8x128xf32>
    %c0_68 = arith.constant 0 : index
    %c0_69 = arith.constant 0 : index
    %261 = vector.load %arg3[%c0_68, %c0_69] : memref<8x128xf32, #tpu.memory_space<vmem>>, vector<8x128xf32>
    tpu.vector_store %arg3[%c0_68, %c0_69], %260 {strides = array<i32>} : memref<8x128xf32, #tpu.memory_space<vmem>>, vector<8x128xf32>,
    %c0_70 = arith.constant 0 : index
    %c0_71 = arith.constant 0 : index
    %262 = vector.load %arg4[%c0_70, %c0_71] : memref<8x128xf32, #tpu.memory_space<vmem>>, vector<8x128xf32>
    tpu.vector_store %arg4[%c0_70, %c0_71], %258 {strides = array<i32>} : memref<8x128xf32, #tpu.memory_space<vmem>>, vector<8x128xf32>,
    return
  }
  func.func @transform_0(%arg0: i32) -> (i32, i32, i32) {
    %c0_i32 = arith.constant 0 : i32
    %c0_i32_0 = arith.constant 0 : i32
    %c0_i32_1 = arith.constant 0 : i32
    return %arg0, %c0_i32, %c0_i32_0 : i32, i32, i32
  }
  func.func @transform_1(%arg0: i32) -> (i32, i32) {
    %c0_i32 = arith.constant 0 : i32
    %c0_i32_0 = arith.constant 0 : i32
    %c0_i32_1 = arith.constant 0 : i32
    return %c0_i32, %c0_i32_0 : i32, i32
  }
  func.func @transform_2(%arg0: i32) -> (i32, i32) {
    %c0_i32 = arith.constant 0 : i32
    %c0_i32_0 = arith.constant 0 : i32
    %c0_i32_1 = arith.constant 0 : i32
    return %c0_i32, %c0_i32_0 : i32, i32
  }
  func.func @transform_3(%arg0: i32) -> (i32, i32) {
    %c0_i32 = arith.constant 0 : i32
    %c0_i32_0 = arith.constant 0 : i32
    %c0_i32_1 = arith.constant 0 : i32
    return %c0_i32, %c0_i32_0 : i32, i32
  }
}

module attributes {stable_mosaic.version = 11 : i64} {
  func.func @_decoder_kernel(%arg0: i32, %arg1: memref<8xi32, #tpu.memory_space<smem>>, %arg2: memref<8x8x512xbf16, #tpu.memory_space<vmem>>, %arg3: memref<8x128xf32, #tpu.memory_space<vmem>>, %arg4: memref<8x128xf32, #tpu.memory_space<vmem>>, %arg5: memref<128x32xbf16, #tpu.memory_space<vmem>>, %arg6: memref<32x512xbf16, #tpu.memory_space<vmem>>, %arg7: memref<128x512xbf16, #tpu.memory_space<vmem>>, %arg8: memref<1x512xf32, #tpu.memory_space<vmem>>, %arg9: memref<128x128xbf16, #tpu.memory_space<vmem>>, %arg10: memref<1x128xf32, #tpu.memory_space<vmem>>, %arg11: memref<8x8x128xf32, #tpu.memory_space<vmem>>, %arg12: memref<8x128xf32, #tpu.memory_space<vmem>>, %arg13: memref<8x128xf32, #tpu.memory_space<vmem>>, %arg14: memref<8x512xf32, #tpu.memory_space<vmem>>) attributes {dimension_semantics = [#tpu.dimension_semantics<arbitrary>], iteration_bounds = array<i64: 1>, scalar_prefetch = 1 : i64, scratch_operands = 3 : i64, tpu.core_type = #tpu.core_type<tc>, window_params = [{transform_indices = @transform_0, window_bounds = array<i64: 8, 8, 512>}, {pipeline_mode = #tpu.pipeline_mode<synchronous>, transform_indices = @transform_1, window_bounds = array<i64: 8, 128>}, {pipeline_mode = #tpu.pipeline_mode<synchronous>, transform_indices = @transform_2, window_bounds = array<i64: 8, 128>}, {pipeline_mode = #tpu.pipeline_mode<synchronous>, transform_indices = @transform_3, window_bounds = array<i64: 128, 32>}, {pipeline_mode = #tpu.pipeline_mode<synchronous>, transform_indices = @transform_4, window_bounds = array<i64: 32, 512>}, {pipeline_mode = #tpu.pipeline_mode<synchronous>, transform_indices = @transform_5, window_bounds = array<i64: 128, 512>}, {pipeline_mode = #tpu.pipeline_mode<synchronous>, transform_indices = @transform_6, window_bounds = array<i64: 1, 512>}, {pipeline_mode = #tpu.pipeline_mode<synchronous>, transform_indices = @transform_7, window_bounds = array<i64: 128, 128>}, {pipeline_mode = #tpu.pipeline_mode<synchronous>, transform_indices = @transform_8, window_bounds = array<i64: 1, 128>}, {transform_indices = @transform_9, window_bounds = array<i64: 8, 8, 128>}]} {
    %c0_i32 = arith.constant 0 : i32
    %0 = arith.cmpi eq, %arg0, %c0_i32 : i32
    %1 = arith.extui %0 : i1 to i32
    %c0_i32_0 = arith.constant 0 : i32
    %2 = arith.cmpi ne, %1, %c0_i32_0 : i32
    scf.if %2 {
      %c0_224 = arith.constant 0 : index
      %c0_225 = arith.constant 0 : index
      %487 = vector.load %arg3[%c0_224, %c0_225] : memref<8x128xf32, #tpu.memory_space<vmem>>, vector<8x128xf32>
      %c0_226 = arith.constant 0 : index
      %c0_227 = arith.constant 0 : index
      %488 = vector.load %arg12[%c0_226, %c0_227] : memref<8x128xf32, #tpu.memory_space<vmem>>, vector<8x128xf32>
      tpu.vector_store %arg12[%c0_226, %c0_227], %487 {strides = array<i32>} : memref<8x128xf32, #tpu.memory_space<vmem>>, vector<8x128xf32>,
      %c0_228 = arith.constant 0 : index
      %c0_229 = arith.constant 0 : index
      %489 = vector.load %arg4[%c0_228, %c0_229] : memref<8x128xf32, #tpu.memory_space<vmem>>, vector<8x128xf32>
      %c0_230 = arith.constant 0 : index
      %c0_231 = arith.constant 0 : index
      %490 = vector.load %arg13[%c0_230, %c0_231] : memref<8x128xf32, #tpu.memory_space<vmem>>, vector<8x128xf32>
      tpu.vector_store %arg13[%c0_230, %c0_231], %489 {strides = array<i32>} : memref<8x128xf32, #tpu.memory_space<vmem>>, vector<8x128xf32>,
      %cst_232 = arith.constant 0.000000e+00 : f32
      %491 = vector.broadcast %cst_232 : f32 to vector<8x512xf32>
      %c0_233 = arith.constant 0 : index
      %c0_234 = arith.constant 0 : index
      %492 = vector.load %arg14[%c0_233, %c0_234] : memref<8x512xf32, #tpu.memory_space<vmem>>, vector<8x512xf32>
      tpu.vector_store %arg14[%c0_233, %c0_234], %491 {strides = array<i32>} : memref<8x512xf32, #tpu.memory_space<vmem>>, vector<8x512xf32>,
    } else {
    }
    %c0 = arith.constant 0 : index
    %c0_1 = arith.constant 0 : index
    %3 = vector.load %arg12[%c0, %c0_1] : memref<8x128xf32, #tpu.memory_space<vmem>>, vector<8x128xf32>
    %c0_2 = arith.constant 0 : index
    %c0_3 = arith.constant 0 : index
    %4 = vector.load %arg13[%c0_2, %c0_3] : memref<8x128xf32, #tpu.memory_space<vmem>>, vector<8x128xf32>
    %c8_i32 = arith.constant 8 : i32
    %5 = arith.muli %arg0, %c8_i32 : i32
    %c0_i32_4 = arith.constant 0 : i32
    %6 = arith.addi %5, %c0_i32_4 : i32
    %c1_i32 = arith.constant 1 : i32
    %7 = arith.subi %6, %c1_i32 : i32
    %c0_i32_5 = arith.constant 0 : i32
    %8 = arith.maxsi %7, %c0_i32_5 : i32
    %c0_i32_6 = arith.constant 0 : i32
    %9 = arith.cmpi eq, %6, %c0_i32_6 : i32
    %10 = arith.index_cast %8 : i32 to index
    %11 = memref.load %arg1[%10] : memref<8xi32, #tpu.memory_space<smem>>
    %c0_i32_7 = arith.constant 0 : i32
    %12 = arith.cmpi ne, %11, %c0_i32_7 : i32
    %13 = arith.ori %9, %12 : i1
    %c0_8 = arith.constant 0 : index
    %c0_9 = arith.constant 0 : index
    %c0_10 = arith.constant 0 : index
    %14 = vector.load %arg2[%c0_8, %c0_9, %c0_10] : memref<8x8x512xbf16, #tpu.memory_space<vmem>>, vector<1x8x512xbf16>
    %15 = vector.shape_cast %14 : vector<1x8x512xbf16> to vector<8x512xbf16>
    %16 = arith.extf %15 : vector<8x512xbf16> to vector<8x512xf32>
    %c0_11 = arith.constant 0 : index
    %c0_12 = arith.constant 0 : index
    %17 = vector.load %arg14[%c0_11, %c0_12] : memref<8x512xf32, #tpu.memory_space<vmem>>, vector<8x512xf32>
    %18 = arith.select %13, %16, %17 : vector<8x512xf32>
    %19 = arith.truncf %3 : vector<8x128xf32> to vector<8x128xbf16>
    %c0_13 = arith.constant 0 : index
    %c0_14 = arith.constant 0 : index
    %20 = vector.load %arg7[%c0_13, %c0_14] : memref<128x512xbf16, #tpu.memory_space<vmem>>, vector<128x512xbf16>
    %cst = arith.constant dense<0.000000e+00> : vector<8x512xf32>
    %21 = tpu.matmul %19, %20, %cst {dimension_numbers = #tpu.dot_dimension_numbers<[1], [0], [0], [1], [0, 0, 1, 1], [], []>} : vector<8x128xbf16>, vector<128x512xbf16>, vector<8x512xf32> -> vector<8x512xf32>
    %22 = arith.addf %18, %21 : vector<8x512xf32>
    %23 = vector.extract_strided_slice %22 {offsets = [0, 0], sizes = [8, 128], strides = [1, 1]} : vector<8x512xf32> to vector<8x128xf32>
    %24 = arith.negf %23 : vector<8x128xf32>
    %25 = math.exp %24 : vector<8x128xf32>
    %cst_15 = arith.constant 1.000000e+00 : f32
    %26 = vector.broadcast %cst_15 : f32 to vector<8x128xf32>
    %27 = arith.addf %26, %25 : vector<8x128xf32>
    %28 = arith.divf %26, %27 : vector<8x128xf32>
    %29 = vector.extract_strided_slice %22 {offsets = [0, 128], sizes = [8, 128], strides = [1, 1]} : vector<8x512xf32> to vector<8x128xf32>
    %30 = arith.negf %29 : vector<8x128xf32>
    %31 = math.exp %30 : vector<8x128xf32>
    %cst_16 = arith.constant 1.000000e+00 : f32
    %32 = vector.broadcast %cst_16 : f32 to vector<8x128xf32>
    %33 = arith.addf %32, %31 : vector<8x128xf32>
    %34 = arith.divf %32, %33 : vector<8x128xf32>
    %35 = vector.extract_strided_slice %22 {offsets = [0, 256], sizes = [8, 128], strides = [1, 1]} : vector<8x512xf32> to vector<8x128xf32>
    %36 = math.tanh %35 : vector<8x128xf32>
    %37 = vector.extract_strided_slice %22 {offsets = [0, 384], sizes = [8, 128], strides = [1, 1]} : vector<8x512xf32> to vector<8x128xf32>
    %38 = arith.negf %37 : vector<8x128xf32>
    %39 = math.exp %38 : vector<8x128xf32>
    %cst_17 = arith.constant 1.000000e+00 : f32
    %40 = vector.broadcast %cst_17 : f32 to vector<8x128xf32>
    %41 = arith.addf %40, %39 : vector<8x128xf32>
    %42 = arith.divf %40, %41 : vector<8x128xf32>
    %43 = arith.mulf %34, %4 : vector<8x128xf32>
    %44 = arith.mulf %28, %36 : vector<8x128xf32>
    %45 = arith.addf %43, %44 : vector<8x128xf32>
    %46 = math.tanh %45 : vector<8x128xf32>
    %47 = arith.mulf %42, %46 : vector<8x128xf32>
    %48 = arith.truncf %47 : vector<8x128xf32> to vector<8x128xbf16>
    %c0_18 = arith.constant 0 : index
    %c0_19 = arith.constant 0 : index
    %49 = vector.load %arg9[%c0_18, %c0_19] : memref<128x128xbf16, #tpu.memory_space<vmem>>, vector<128x128xbf16>
    %cst_20 = arith.constant dense<0.000000e+00> : vector<8x128xf32>
    %50 = tpu.matmul %48, %49, %cst_20 {dimension_numbers = #tpu.dot_dimension_numbers<[1], [0], [0], [1], [0, 0, 1, 1], [], []>} : vector<8x128xbf16>, vector<128x128xbf16>, vector<8x128xf32> -> vector<8x128xf32>
    %c0_21 = arith.constant 0 : index
    %c0_22 = arith.constant 0 : index
    %51 = vector.load %arg10[%c0_21, %c0_22] : memref<1x128xf32, #tpu.memory_space<vmem>>, vector<1x128xf32>
    %52 = vector.broadcast %51 : vector<1x128xf32> to vector<8x128xf32>
    %53 = arith.addf %50, %52 : vector<8x128xf32>
    %c0_23 = arith.constant 0 : index
    %c0_24 = arith.constant 0 : index
    %c0_25 = arith.constant 0 : index
    %54 = vector.load %arg11[%c0_23, %c0_24, %c0_25] : memref<8x8x128xf32, #tpu.memory_space<vmem>>, vector<1x8x128xf32>
    %55 = vector.shape_cast %54 : vector<1x8x128xf32> to vector<8x128xf32>
    %56 = vector.shape_cast %53 : vector<8x128xf32> to vector<1x8x128xf32>
    tpu.vector_store %arg11[%c0_23, %c0_24, %c0_25], %56 {strides = array<i32>} : memref<8x8x128xf32, #tpu.memory_space<vmem>>, vector<1x8x128xf32>,
    %c1_i32_26 = arith.constant 1 : i32
    %57 = arith.addi %6, %c1_i32_26 : i32
    %c8_i32_27 = arith.constant 8 : i32
    %58 = arith.cmpi slt, %57, %c8_i32_27 : i32
    %59 = arith.index_cast %6 : i32 to index
    %60 = memref.load %arg1[%59] : memref<8xi32, #tpu.memory_space<smem>>
    %c0_i32_28 = arith.constant 0 : i32
    %61 = arith.cmpi eq, %60, %c0_i32_28 : i32
    %62 = arith.andi %58, %61 : i1
    %63 = arith.extui %62 : i1 to i32
    %c0_i32_29 = arith.constant 0 : i32
    %64 = arith.cmpi ne, %63, %c0_i32_29 : i32
    scf.if %64 {
      %487 = tpu.iota {dimensions = array<i32: 1>} : vector<8x128xi32>
      %c16_i32 = arith.constant 16 : i32
      %488 = vector.broadcast %c16_i32 : i32 to vector<8x128xi32>
      %489 = arith.cmpi slt, %487, %488 : vector<8x128xi32>
      %cst_224 = arith.constant -1.000000e+30 : f32
      %490 = vector.broadcast %cst_224 : f32 to vector<8x128xf32>
      %491 = arith.select %489, %53, %490 : vector<8x128xi1>, vector<8x128xf32>
      %cst_225 = arith.constant dense<0xFF800000> : vector<8xf32>
      %492 = vector.multi_reduction <maximumf>, %491, %cst_225 [1] : vector<8x128xf32> to vector<8xf32>
      %493 = vector.shape_cast %492 : vector<8xf32> to vector<8x1xf32>
      %494 = vector.broadcast %493 : vector<8x1xf32> to vector<8x128xf32>
      %495 = arith.cmpf oeq, %491, %494 : vector<8x128xf32>
      %496 = arith.andi %495, %489 : vector<8x128xi1>
      %c128_i32 = arith.constant 128 : i32
      %497 = vector.broadcast %c128_i32 : i32 to vector<8x128xi32>
      %498 = arith.select %496, %487, %497 : vector<8x128xi1>, vector<8x128xi32>
      %cst_226 = arith.constant dense<2147483647> : vector<8xi32>
      %499 = vector.multi_reduction <minsi>, %498, %cst_226 [1] : vector<8x128xi32> to vector<8xi32>
      %500 = vector.shape_cast %499 : vector<8xi32> to vector<8x1xi32>
      %501 = vector.broadcast %500 : vector<8x1xi32> to vector<8x128xi32>
      %502 = arith.cmpi eq, %487, %501 : vector<8x128xi32>
      %503 = arith.extui %502 : vector<8x128xi1> to vector<8x128xi32>
      %504 = arith.sitofp %503 : vector<8x128xi32> to vector<8x128xf32>
      %505 = arith.truncf %504 : vector<8x128xf32> to vector<8x128xbf16>
      %c0_227 = arith.constant 0 : index
      %c0_228 = arith.constant 0 : index
      %506 = vector.load %arg5[%c0_227, %c0_228] : memref<128x32xbf16, #tpu.memory_space<vmem>>, vector<128x32xbf16>
      %cst_229 = arith.constant dense<0.000000e+00> : vector<8x32xf32>
      %507 = tpu.matmul %505, %506, %cst_229 {dimension_numbers = #tpu.dot_dimension_numbers<[1], [0], [0], [1], [0, 0, 1, 1], [], []>} : vector<8x128xbf16>, vector<128x32xbf16>, vector<8x32xf32> -> vector<8x32xf32>
      %508 = arith.truncf %507 : vector<8x32xf32> to vector<8x32xbf16>
      %c0_230 = arith.constant 0 : index
      %c0_231 = arith.constant 0 : index
      %509 = vector.load %arg6[%c0_230, %c0_231] : memref<32x512xbf16, #tpu.memory_space<vmem>>, vector<32x512xbf16>
      %cst_232 = arith.constant dense<0.000000e+00> : vector<8x512xf32>
      %510 = tpu.matmul %508, %509, %cst_232 {dimension_numbers = #tpu.dot_dimension_numbers<[1], [0], [0], [1], [0, 0, 1, 1], [], []>} : vector<8x32xbf16>, vector<32x512xbf16>, vector<8x512xf32> -> vector<8x512xf32>
      %c0_233 = arith.constant 0 : index
      %c0_234 = arith.constant 0 : index
      %511 = vector.load %arg8[%c0_233, %c0_234] : memref<1x512xf32, #tpu.memory_space<vmem>>, vector<1x512xf32>
      %512 = vector.broadcast %511 : vector<1x512xf32> to vector<8x512xf32>
      %513 = arith.addf %510, %512 : vector<8x512xf32>
      %c0_235 = arith.constant 0 : index
      %c0_236 = arith.constant 0 : index
      %514 = vector.load %arg14[%c0_235, %c0_236] : memref<8x512xf32, #tpu.memory_space<vmem>>, vector<8x512xf32>
      tpu.vector_store %arg14[%c0_235, %c0_236], %513 {strides = array<i32>} : memref<8x512xf32, #tpu.memory_space<vmem>>, vector<8x512xf32>,
    } else {
    }
    %c8_i32_30 = arith.constant 8 : i32
    %65 = arith.muli %arg0, %c8_i32_30 : i32
    %c1_i32_31 = arith.constant 1 : i32
    %66 = arith.addi %65, %c1_i32_31 : i32
    %c1_i32_32 = arith.constant 1 : i32
    %67 = arith.subi %66, %c1_i32_32 : i32
    %c0_i32_33 = arith.constant 0 : i32
    %68 = arith.maxsi %67, %c0_i32_33 : i32
    %c0_i32_34 = arith.constant 0 : i32
    %69 = arith.cmpi eq, %66, %c0_i32_34 : i32
    %70 = arith.index_cast %68 : i32 to index
    %71 = memref.load %arg1[%70] : memref<8xi32, #tpu.memory_space<smem>>
    %c0_i32_35 = arith.constant 0 : i32
    %72 = arith.cmpi ne, %71, %c0_i32_35 : i32
    %73 = arith.ori %69, %72 : i1
    %c1 = arith.constant 1 : index
    %c0_36 = arith.constant 0 : index
    %c0_37 = arith.constant 0 : index
    %74 = vector.load %arg2[%c1, %c0_36, %c0_37] : memref<8x8x512xbf16, #tpu.memory_space<vmem>>, vector<1x8x512xbf16>
    %75 = vector.shape_cast %74 : vector<1x8x512xbf16> to vector<8x512xbf16>
    %76 = arith.extf %75 : vector<8x512xbf16> to vector<8x512xf32>
    %c0_38 = arith.constant 0 : index
    %c0_39 = arith.constant 0 : index
    %77 = vector.load %arg14[%c0_38, %c0_39] : memref<8x512xf32, #tpu.memory_space<vmem>>, vector<8x512xf32>
    %78 = arith.select %73, %76, %77 : vector<8x512xf32>
    %79 = arith.truncf %47 : vector<8x128xf32> to vector<8x128xbf16>
    %c0_40 = arith.constant 0 : index
    %c0_41 = arith.constant 0 : index
    %80 = vector.load %arg7[%c0_40, %c0_41] : memref<128x512xbf16, #tpu.memory_space<vmem>>, vector<128x512xbf16>
    %cst_42 = arith.constant dense<0.000000e+00> : vector<8x512xf32>
    %81 = tpu.matmul %79, %80, %cst_42 {dimension_numbers = #tpu.dot_dimension_numbers<[1], [0], [0], [1], [0, 0, 1, 1], [], []>} : vector<8x128xbf16>, vector<128x512xbf16>, vector<8x512xf32> -> vector<8x512xf32>
    %82 = arith.addf %78, %81 : vector<8x512xf32>
    %83 = vector.extract_strided_slice %82 {offsets = [0, 0], sizes = [8, 128], strides = [1, 1]} : vector<8x512xf32> to vector<8x128xf32>
    %84 = arith.negf %83 : vector<8x128xf32>
    %85 = math.exp %84 : vector<8x128xf32>
    %cst_43 = arith.constant 1.000000e+00 : f32
    %86 = vector.broadcast %cst_43 : f32 to vector<8x128xf32>
    %87 = arith.addf %86, %85 : vector<8x128xf32>
    %88 = arith.divf %86, %87 : vector<8x128xf32>
    %89 = vector.extract_strided_slice %82 {offsets = [0, 128], sizes = [8, 128], strides = [1, 1]} : vector<8x512xf32> to vector<8x128xf32>
    %90 = arith.negf %89 : vector<8x128xf32>
    %91 = math.exp %90 : vector<8x128xf32>
    %cst_44 = arith.constant 1.000000e+00 : f32
    %92 = vector.broadcast %cst_44 : f32 to vector<8x128xf32>
    %93 = arith.addf %92, %91 : vector<8x128xf32>
    %94 = arith.divf %92, %93 : vector<8x128xf32>
    %95 = vector.extract_strided_slice %82 {offsets = [0, 256], sizes = [8, 128], strides = [1, 1]} : vector<8x512xf32> to vector<8x128xf32>
    %96 = math.tanh %95 : vector<8x128xf32>
    %97 = vector.extract_strided_slice %82 {offsets = [0, 384], sizes = [8, 128], strides = [1, 1]} : vector<8x512xf32> to vector<8x128xf32>
    %98 = arith.negf %97 : vector<8x128xf32>
    %99 = math.exp %98 : vector<8x128xf32>
    %cst_45 = arith.constant 1.000000e+00 : f32
    %100 = vector.broadcast %cst_45 : f32 to vector<8x128xf32>
    %101 = arith.addf %100, %99 : vector<8x128xf32>
    %102 = arith.divf %100, %101 : vector<8x128xf32>
    %103 = arith.mulf %94, %45 : vector<8x128xf32>
    %104 = arith.mulf %88, %96 : vector<8x128xf32>
    %105 = arith.addf %103, %104 : vector<8x128xf32>
    %106 = math.tanh %105 : vector<8x128xf32>
    %107 = arith.mulf %102, %106 : vector<8x128xf32>
    %108 = arith.truncf %107 : vector<8x128xf32> to vector<8x128xbf16>
    %c0_46 = arith.constant 0 : index
    %c0_47 = arith.constant 0 : index
    %109 = vector.load %arg9[%c0_46, %c0_47] : memref<128x128xbf16, #tpu.memory_space<vmem>>, vector<128x128xbf16>
    %cst_48 = arith.constant dense<0.000000e+00> : vector<8x128xf32>
    %110 = tpu.matmul %108, %109, %cst_48 {dimension_numbers = #tpu.dot_dimension_numbers<[1], [0], [0], [1], [0, 0, 1, 1], [], []>} : vector<8x128xbf16>, vector<128x128xbf16>, vector<8x128xf32> -> vector<8x128xf32>
    %c0_49 = arith.constant 0 : index
    %c0_50 = arith.constant 0 : index
    %111 = vector.load %arg10[%c0_49, %c0_50] : memref<1x128xf32, #tpu.memory_space<vmem>>, vector<1x128xf32>
    %112 = vector.broadcast %111 : vector<1x128xf32> to vector<8x128xf32>
    %113 = arith.addf %110, %112 : vector<8x128xf32>
    %c1_51 = arith.constant 1 : index
    %c0_52 = arith.constant 0 : index
    %c0_53 = arith.constant 0 : index
    %114 = vector.load %arg11[%c1_51, %c0_52, %c0_53] : memref<8x8x128xf32, #tpu.memory_space<vmem>>, vector<1x8x128xf32>
    %115 = vector.shape_cast %114 : vector<1x8x128xf32> to vector<8x128xf32>
    %116 = vector.shape_cast %113 : vector<8x128xf32> to vector<1x8x128xf32>
    tpu.vector_store %arg11[%c1_51, %c0_52, %c0_53], %116 {strides = array<i32>} : memref<8x8x128xf32, #tpu.memory_space<vmem>>, vector<1x8x128xf32>,
    %c1_i32_54 = arith.constant 1 : i32
    %117 = arith.addi %66, %c1_i32_54 : i32
    %c8_i32_55 = arith.constant 8 : i32
    %118 = arith.cmpi slt, %117, %c8_i32_55 : i32
    %119 = arith.index_cast %66 : i32 to index
    %120 = memref.load %arg1[%119] : memref<8xi32, #tpu.memory_space<smem>>
    %c0_i32_56 = arith.constant 0 : i32
    %121 = arith.cmpi eq, %120, %c0_i32_56 : i32
    %122 = arith.andi %118, %121 : i1
    %123 = arith.extui %122 : i1 to i32
    %c0_i32_57 = arith.constant 0 : i32
    %124 = arith.cmpi ne, %123, %c0_i32_57 : i32
    scf.if %124 {
      %487 = tpu.iota {dimensions = array<i32: 1>} : vector<8x128xi32>
      %c16_i32 = arith.constant 16 : i32
      %488 = vector.broadcast %c16_i32 : i32 to vector<8x128xi32>
      %489 = arith.cmpi slt, %487, %488 : vector<8x128xi32>
      %cst_224 = arith.constant -1.000000e+30 : f32
      %490 = vector.broadcast %cst_224 : f32 to vector<8x128xf32>
      %491 = arith.select %489, %113, %490 : vector<8x128xi1>, vector<8x128xf32>
      %cst_225 = arith.constant dense<0xFF800000> : vector<8xf32>
      %492 = vector.multi_reduction <maximumf>, %491, %cst_225 [1] : vector<8x128xf32> to vector<8xf32>
      %493 = vector.shape_cast %492 : vector<8xf32> to vector<8x1xf32>
      %494 = vector.broadcast %493 : vector<8x1xf32> to vector<8x128xf32>
      %495 = arith.cmpf oeq, %491, %494 : vector<8x128xf32>
      %496 = arith.andi %495, %489 : vector<8x128xi1>
      %c128_i32 = arith.constant 128 : i32
      %497 = vector.broadcast %c128_i32 : i32 to vector<8x128xi32>
      %498 = arith.select %496, %487, %497 : vector<8x128xi1>, vector<8x128xi32>
      %cst_226 = arith.constant dense<2147483647> : vector<8xi32>
      %499 = vector.multi_reduction <minsi>, %498, %cst_226 [1] : vector<8x128xi32> to vector<8xi32>
      %500 = vector.shape_cast %499 : vector<8xi32> to vector<8x1xi32>
      %501 = vector.broadcast %500 : vector<8x1xi32> to vector<8x128xi32>
      %502 = arith.cmpi eq, %487, %501 : vector<8x128xi32>
      %503 = arith.extui %502 : vector<8x128xi1> to vector<8x128xi32>
      %504 = arith.sitofp %503 : vector<8x128xi32> to vector<8x128xf32>
      %505 = arith.truncf %504 : vector<8x128xf32> to vector<8x128xbf16>
      %c0_227 = arith.constant 0 : index
      %c0_228 = arith.constant 0 : index
      %506 = vector.load %arg5[%c0_227, %c0_228] : memref<128x32xbf16, #tpu.memory_space<vmem>>, vector<128x32xbf16>
      %cst_229 = arith.constant dense<0.000000e+00> : vector<8x32xf32>
      %507 = tpu.matmul %505, %506, %cst_229 {dimension_numbers = #tpu.dot_dimension_numbers<[1], [0], [0], [1], [0, 0, 1, 1], [], []>} : vector<8x128xbf16>, vector<128x32xbf16>, vector<8x32xf32> -> vector<8x32xf32>
      %508 = arith.truncf %507 : vector<8x32xf32> to vector<8x32xbf16>
      %c0_230 = arith.constant 0 : index
      %c0_231 = arith.constant 0 : index
      %509 = vector.load %arg6[%c0_230, %c0_231] : memref<32x512xbf16, #tpu.memory_space<vmem>>, vector<32x512xbf16>
      %cst_232 = arith.constant dense<0.000000e+00> : vector<8x512xf32>
      %510 = tpu.matmul %508, %509, %cst_232 {dimension_numbers = #tpu.dot_dimension_numbers<[1], [0], [0], [1], [0, 0, 1, 1], [], []>} : vector<8x32xbf16>, vector<32x512xbf16>, vector<8x512xf32> -> vector<8x512xf32>
      %c0_233 = arith.constant 0 : index
      %c0_234 = arith.constant 0 : index
      %511 = vector.load %arg8[%c0_233, %c0_234] : memref<1x512xf32, #tpu.memory_space<vmem>>, vector<1x512xf32>
      %512 = vector.broadcast %511 : vector<1x512xf32> to vector<8x512xf32>
      %513 = arith.addf %510, %512 : vector<8x512xf32>
      %c0_235 = arith.constant 0 : index
      %c0_236 = arith.constant 0 : index
      %514 = vector.load %arg14[%c0_235, %c0_236] : memref<8x512xf32, #tpu.memory_space<vmem>>, vector<8x512xf32>
      tpu.vector_store %arg14[%c0_235, %c0_236], %513 {strides = array<i32>} : memref<8x512xf32, #tpu.memory_space<vmem>>, vector<8x512xf32>,
    } else {
    }
    %c8_i32_58 = arith.constant 8 : i32
    %125 = arith.muli %arg0, %c8_i32_58 : i32
    %c2_i32 = arith.constant 2 : i32
    %126 = arith.addi %125, %c2_i32 : i32
    %c1_i32_59 = arith.constant 1 : i32
    %127 = arith.subi %126, %c1_i32_59 : i32
    %c0_i32_60 = arith.constant 0 : i32
    %128 = arith.maxsi %127, %c0_i32_60 : i32
    %c0_i32_61 = arith.constant 0 : i32
    %129 = arith.cmpi eq, %126, %c0_i32_61 : i32
    %130 = arith.index_cast %128 : i32 to index
    %131 = memref.load %arg1[%130] : memref<8xi32, #tpu.memory_space<smem>>
    %c0_i32_62 = arith.constant 0 : i32
    %132 = arith.cmpi ne, %131, %c0_i32_62 : i32
    %133 = arith.ori %129, %132 : i1
    %c2 = arith.constant 2 : index
    %c0_63 = arith.constant 0 : index
    %c0_64 = arith.constant 0 : index
    %134 = vector.load %arg2[%c2, %c0_63, %c0_64] : memref<8x8x512xbf16, #tpu.memory_space<vmem>>, vector<1x8x512xbf16>
    %135 = vector.shape_cast %134 : vector<1x8x512xbf16> to vector<8x512xbf16>
    %136 = arith.extf %135 : vector<8x512xbf16> to vector<8x512xf32>
    %c0_65 = arith.constant 0 : index
    %c0_66 = arith.constant 0 : index
    %137 = vector.load %arg14[%c0_65, %c0_66] : memref<8x512xf32, #tpu.memory_space<vmem>>, vector<8x512xf32>
    %138 = arith.select %133, %136, %137 : vector<8x512xf32>
    %139 = arith.truncf %107 : vector<8x128xf32> to vector<8x128xbf16>
    %c0_67 = arith.constant 0 : index
    %c0_68 = arith.constant 0 : index
    %140 = vector.load %arg7[%c0_67, %c0_68] : memref<128x512xbf16, #tpu.memory_space<vmem>>, vector<128x512xbf16>
    %cst_69 = arith.constant dense<0.000000e+00> : vector<8x512xf32>
    %141 = tpu.matmul %139, %140, %cst_69 {dimension_numbers = #tpu.dot_dimension_numbers<[1], [0], [0], [1], [0, 0, 1, 1], [], []>} : vector<8x128xbf16>, vector<128x512xbf16>, vector<8x512xf32> -> vector<8x512xf32>
    %142 = arith.addf %138, %141 : vector<8x512xf32>
    %143 = vector.extract_strided_slice %142 {offsets = [0, 0], sizes = [8, 128], strides = [1, 1]} : vector<8x512xf32> to vector<8x128xf32>
    %144 = arith.negf %143 : vector<8x128xf32>
    %145 = math.exp %144 : vector<8x128xf32>
    %cst_70 = arith.constant 1.000000e+00 : f32
    %146 = vector.broadcast %cst_70 : f32 to vector<8x128xf32>
    %147 = arith.addf %146, %145 : vector<8x128xf32>
    %148 = arith.divf %146, %147 : vector<8x128xf32>
    %149 = vector.extract_strided_slice %142 {offsets = [0, 128], sizes = [8, 128], strides = [1, 1]} : vector<8x512xf32> to vector<8x128xf32>
    %150 = arith.negf %149 : vector<8x128xf32>
    %151 = math.exp %150 : vector<8x128xf32>
    %cst_71 = arith.constant 1.000000e+00 : f32
    %152 = vector.broadcast %cst_71 : f32 to vector<8x128xf32>
    %153 = arith.addf %152, %151 : vector<8x128xf32>
    %154 = arith.divf %152, %153 : vector<8x128xf32>
    %155 = vector.extract_strided_slice %142 {offsets = [0, 256], sizes = [8, 128], strides = [1, 1]} : vector<8x512xf32> to vector<8x128xf32>
    %156 = math.tanh %155 : vector<8x128xf32>
    %157 = vector.extract_strided_slice %142 {offsets = [0, 384], sizes = [8, 128], strides = [1, 1]} : vector<8x512xf32> to vector<8x128xf32>
    %158 = arith.negf %157 : vector<8x128xf32>
    %159 = math.exp %158 : vector<8x128xf32>
    %cst_72 = arith.constant 1.000000e+00 : f32
    %160 = vector.broadcast %cst_72 : f32 to vector<8x128xf32>
    %161 = arith.addf %160, %159 : vector<8x128xf32>
    %162 = arith.divf %160, %161 : vector<8x128xf32>
    %163 = arith.mulf %154, %105 : vector<8x128xf32>
    %164 = arith.mulf %148, %156 : vector<8x128xf32>
    %165 = arith.addf %163, %164 : vector<8x128xf32>
    %166 = math.tanh %165 : vector<8x128xf32>
    %167 = arith.mulf %162, %166 : vector<8x128xf32>
    %168 = arith.truncf %167 : vector<8x128xf32> to vector<8x128xbf16>
    %c0_73 = arith.constant 0 : index
    %c0_74 = arith.constant 0 : index
    %169 = vector.load %arg9[%c0_73, %c0_74] : memref<128x128xbf16, #tpu.memory_space<vmem>>, vector<128x128xbf16>
    %cst_75 = arith.constant dense<0.000000e+00> : vector<8x128xf32>
    %170 = tpu.matmul %168, %169, %cst_75 {dimension_numbers = #tpu.dot_dimension_numbers<[1], [0], [0], [1], [0, 0, 1, 1], [], []>} : vector<8x128xbf16>, vector<128x128xbf16>, vector<8x128xf32> -> vector<8x128xf32>
    %c0_76 = arith.constant 0 : index
    %c0_77 = arith.constant 0 : index
    %171 = vector.load %arg10[%c0_76, %c0_77] : memref<1x128xf32, #tpu.memory_space<vmem>>, vector<1x128xf32>
    %172 = vector.broadcast %171 : vector<1x128xf32> to vector<8x128xf32>
    %173 = arith.addf %170, %172 : vector<8x128xf32>
    %c2_78 = arith.constant 2 : index
    %c0_79 = arith.constant 0 : index
    %c0_80 = arith.constant 0 : index
    %174 = vector.load %arg11[%c2_78, %c0_79, %c0_80] : memref<8x8x128xf32, #tpu.memory_space<vmem>>, vector<1x8x128xf32>
    %175 = vector.shape_cast %174 : vector<1x8x128xf32> to vector<8x128xf32>
    %176 = vector.shape_cast %173 : vector<8x128xf32> to vector<1x8x128xf32>
    tpu.vector_store %arg11[%c2_78, %c0_79, %c0_80], %176 {strides = array<i32>} : memref<8x8x128xf32, #tpu.memory_space<vmem>>, vector<1x8x128xf32>,
    %c1_i32_81 = arith.constant 1 : i32
    %177 = arith.addi %126, %c1_i32_81 : i32
    %c8_i32_82 = arith.constant 8 : i32
    %178 = arith.cmpi slt, %177, %c8_i32_82 : i32
    %179 = arith.index_cast %126 : i32 to index
    %180 = memref.load %arg1[%179] : memref<8xi32, #tpu.memory_space<smem>>
    %c0_i32_83 = arith.constant 0 : i32
    %181 = arith.cmpi eq, %180, %c0_i32_83 : i32
    %182 = arith.andi %178, %181 : i1
    %183 = arith.extui %182 : i1 to i32
    %c0_i32_84 = arith.constant 0 : i32
    %184 = arith.cmpi ne, %183, %c0_i32_84 : i32
    scf.if %184 {
      %487 = tpu.iota {dimensions = array<i32: 1>} : vector<8x128xi32>
      %c16_i32 = arith.constant 16 : i32
      %488 = vector.broadcast %c16_i32 : i32 to vector<8x128xi32>
      %489 = arith.cmpi slt, %487, %488 : vector<8x128xi32>
      %cst_224 = arith.constant -1.000000e+30 : f32
      %490 = vector.broadcast %cst_224 : f32 to vector<8x128xf32>
      %491 = arith.select %489, %173, %490 : vector<8x128xi1>, vector<8x128xf32>
      %cst_225 = arith.constant dense<0xFF800000> : vector<8xf32>
      %492 = vector.multi_reduction <maximumf>, %491, %cst_225 [1] : vector<8x128xf32> to vector<8xf32>
      %493 = vector.shape_cast %492 : vector<8xf32> to vector<8x1xf32>
      %494 = vector.broadcast %493 : vector<8x1xf32> to vector<8x128xf32>
      %495 = arith.cmpf oeq, %491, %494 : vector<8x128xf32>
      %496 = arith.andi %495, %489 : vector<8x128xi1>
      %c128_i32 = arith.constant 128 : i32
      %497 = vector.broadcast %c128_i32 : i32 to vector<8x128xi32>
      %498 = arith.select %496, %487, %497 : vector<8x128xi1>, vector<8x128xi32>
      %cst_226 = arith.constant dense<2147483647> : vector<8xi32>
      %499 = vector.multi_reduction <minsi>, %498, %cst_226 [1] : vector<8x128xi32> to vector<8xi32>
      %500 = vector.shape_cast %499 : vector<8xi32> to vector<8x1xi32>
      %501 = vector.broadcast %500 : vector<8x1xi32> to vector<8x128xi32>
      %502 = arith.cmpi eq, %487, %501 : vector<8x128xi32>
      %503 = arith.extui %502 : vector<8x128xi1> to vector<8x128xi32>
      %504 = arith.sitofp %503 : vector<8x128xi32> to vector<8x128xf32>
      %505 = arith.truncf %504 : vector<8x128xf32> to vector<8x128xbf16>
      %c0_227 = arith.constant 0 : index
      %c0_228 = arith.constant 0 : index
      %506 = vector.load %arg5[%c0_227, %c0_228] : memref<128x32xbf16, #tpu.memory_space<vmem>>, vector<128x32xbf16>
      %cst_229 = arith.constant dense<0.000000e+00> : vector<8x32xf32>
      %507 = tpu.matmul %505, %506, %cst_229 {dimension_numbers = #tpu.dot_dimension_numbers<[1], [0], [0], [1], [0, 0, 1, 1], [], []>} : vector<8x128xbf16>, vector<128x32xbf16>, vector<8x32xf32> -> vector<8x32xf32>
      %508 = arith.truncf %507 : vector<8x32xf32> to vector<8x32xbf16>
      %c0_230 = arith.constant 0 : index
      %c0_231 = arith.constant 0 : index
      %509 = vector.load %arg6[%c0_230, %c0_231] : memref<32x512xbf16, #tpu.memory_space<vmem>>, vector<32x512xbf16>
      %cst_232 = arith.constant dense<0.000000e+00> : vector<8x512xf32>
      %510 = tpu.matmul %508, %509, %cst_232 {dimension_numbers = #tpu.dot_dimension_numbers<[1], [0], [0], [1], [0, 0, 1, 1], [], []>} : vector<8x32xbf16>, vector<32x512xbf16>, vector<8x512xf32> -> vector<8x512xf32>
      %c0_233 = arith.constant 0 : index
      %c0_234 = arith.constant 0 : index
      %511 = vector.load %arg8[%c0_233, %c0_234] : memref<1x512xf32, #tpu.memory_space<vmem>>, vector<1x512xf32>
      %512 = vector.broadcast %511 : vector<1x512xf32> to vector<8x512xf32>
      %513 = arith.addf %510, %512 : vector<8x512xf32>
      %c0_235 = arith.constant 0 : index
      %c0_236 = arith.constant 0 : index
      %514 = vector.load %arg14[%c0_235, %c0_236] : memref<8x512xf32, #tpu.memory_space<vmem>>, vector<8x512xf32>
      tpu.vector_store %arg14[%c0_235, %c0_236], %513 {strides = array<i32>} : memref<8x512xf32, #tpu.memory_space<vmem>>, vector<8x512xf32>,
    } else {
    }
    %c8_i32_85 = arith.constant 8 : i32
    %185 = arith.muli %arg0, %c8_i32_85 : i32
    %c3_i32 = arith.constant 3 : i32
    %186 = arith.addi %185, %c3_i32 : i32
    %c1_i32_86 = arith.constant 1 : i32
    %187 = arith.subi %186, %c1_i32_86 : i32
    %c0_i32_87 = arith.constant 0 : i32
    %188 = arith.maxsi %187, %c0_i32_87 : i32
    %c0_i32_88 = arith.constant 0 : i32
    %189 = arith.cmpi eq, %186, %c0_i32_88 : i32
    %190 = arith.index_cast %188 : i32 to index
    %191 = memref.load %arg1[%190] : memref<8xi32, #tpu.memory_space<smem>>
    %c0_i32_89 = arith.constant 0 : i32
    %192 = arith.cmpi ne, %191, %c0_i32_89 : i32
    %193 = arith.ori %189, %192 : i1
    %c3 = arith.constant 3 : index
    %c0_90 = arith.constant 0 : index
    %c0_91 = arith.constant 0 : index
    %194 = vector.load %arg2[%c3, %c0_90, %c0_91] : memref<8x8x512xbf16, #tpu.memory_space<vmem>>, vector<1x8x512xbf16>
    %195 = vector.shape_cast %194 : vector<1x8x512xbf16> to vector<8x512xbf16>
    %196 = arith.extf %195 : vector<8x512xbf16> to vector<8x512xf32>
    %c0_92 = arith.constant 0 : index
    %c0_93 = arith.constant 0 : index
    %197 = vector.load %arg14[%c0_92, %c0_93] : memref<8x512xf32, #tpu.memory_space<vmem>>, vector<8x512xf32>
    %198 = arith.select %193, %196, %197 : vector<8x512xf32>
    %199 = arith.truncf %167 : vector<8x128xf32> to vector<8x128xbf16>
    %c0_94 = arith.constant 0 : index
    %c0_95 = arith.constant 0 : index
    %200 = vector.load %arg7[%c0_94, %c0_95] : memref<128x512xbf16, #tpu.memory_space<vmem>>, vector<128x512xbf16>
    %cst_96 = arith.constant dense<0.000000e+00> : vector<8x512xf32>
    %201 = tpu.matmul %199, %200, %cst_96 {dimension_numbers = #tpu.dot_dimension_numbers<[1], [0], [0], [1], [0, 0, 1, 1], [], []>} : vector<8x128xbf16>, vector<128x512xbf16>, vector<8x512xf32> -> vector<8x512xf32>
    %202 = arith.addf %198, %201 : vector<8x512xf32>
    %203 = vector.extract_strided_slice %202 {offsets = [0, 0], sizes = [8, 128], strides = [1, 1]} : vector<8x512xf32> to vector<8x128xf32>
    %204 = arith.negf %203 : vector<8x128xf32>
    %205 = math.exp %204 : vector<8x128xf32>
    %cst_97 = arith.constant 1.000000e+00 : f32
    %206 = vector.broadcast %cst_97 : f32 to vector<8x128xf32>
    %207 = arith.addf %206, %205 : vector<8x128xf32>
    %208 = arith.divf %206, %207 : vector<8x128xf32>
    %209 = vector.extract_strided_slice %202 {offsets = [0, 128], sizes = [8, 128], strides = [1, 1]} : vector<8x512xf32> to vector<8x128xf32>
    %210 = arith.negf %209 : vector<8x128xf32>
    %211 = math.exp %210 : vector<8x128xf32>
    %cst_98 = arith.constant 1.000000e+00 : f32
    %212 = vector.broadcast %cst_98 : f32 to vector<8x128xf32>
    %213 = arith.addf %212, %211 : vector<8x128xf32>
    %214 = arith.divf %212, %213 : vector<8x128xf32>
    %215 = vector.extract_strided_slice %202 {offsets = [0, 256], sizes = [8, 128], strides = [1, 1]} : vector<8x512xf32> to vector<8x128xf32>
    %216 = math.tanh %215 : vector<8x128xf32>
    %217 = vector.extract_strided_slice %202 {offsets = [0, 384], sizes = [8, 128], strides = [1, 1]} : vector<8x512xf32> to vector<8x128xf32>
    %218 = arith.negf %217 : vector<8x128xf32>
    %219 = math.exp %218 : vector<8x128xf32>
    %cst_99 = arith.constant 1.000000e+00 : f32
    %220 = vector.broadcast %cst_99 : f32 to vector<8x128xf32>
    %221 = arith.addf %220, %219 : vector<8x128xf32>
    %222 = arith.divf %220, %221 : vector<8x128xf32>
    %223 = arith.mulf %214, %165 : vector<8x128xf32>
    %224 = arith.mulf %208, %216 : vector<8x128xf32>
    %225 = arith.addf %223, %224 : vector<8x128xf32>
    %226 = math.tanh %225 : vector<8x128xf32>
    %227 = arith.mulf %222, %226 : vector<8x128xf32>
    %228 = arith.truncf %227 : vector<8x128xf32> to vector<8x128xbf16>
    %c0_100 = arith.constant 0 : index
    %c0_101 = arith.constant 0 : index
    %229 = vector.load %arg9[%c0_100, %c0_101] : memref<128x128xbf16, #tpu.memory_space<vmem>>, vector<128x128xbf16>
    %cst_102 = arith.constant dense<0.000000e+00> : vector<8x128xf32>
    %230 = tpu.matmul %228, %229, %cst_102 {dimension_numbers = #tpu.dot_dimension_numbers<[1], [0], [0], [1], [0, 0, 1, 1], [], []>} : vector<8x128xbf16>, vector<128x128xbf16>, vector<8x128xf32> -> vector<8x128xf32>
    %c0_103 = arith.constant 0 : index
    %c0_104 = arith.constant 0 : index
    %231 = vector.load %arg10[%c0_103, %c0_104] : memref<1x128xf32, #tpu.memory_space<vmem>>, vector<1x128xf32>
    %232 = vector.broadcast %231 : vector<1x128xf32> to vector<8x128xf32>
    %233 = arith.addf %230, %232 : vector<8x128xf32>
    %c3_105 = arith.constant 3 : index
    %c0_106 = arith.constant 0 : index
    %c0_107 = arith.constant 0 : index
    %234 = vector.load %arg11[%c3_105, %c0_106, %c0_107] : memref<8x8x128xf32, #tpu.memory_space<vmem>>, vector<1x8x128xf32>
    %235 = vector.shape_cast %234 : vector<1x8x128xf32> to vector<8x128xf32>
    %236 = vector.shape_cast %233 : vector<8x128xf32> to vector<1x8x128xf32>
    tpu.vector_store %arg11[%c3_105, %c0_106, %c0_107], %236 {strides = array<i32>} : memref<8x8x128xf32, #tpu.memory_space<vmem>>, vector<1x8x128xf32>,
    %c1_i32_108 = arith.constant 1 : i32
    %237 = arith.addi %186, %c1_i32_108 : i32
    %c8_i32_109 = arith.constant 8 : i32
    %238 = arith.cmpi slt, %237, %c8_i32_109 : i32
    %239 = arith.index_cast %186 : i32 to index
    %240 = memref.load %arg1[%239] : memref<8xi32, #tpu.memory_space<smem>>
    %c0_i32_110 = arith.constant 0 : i32
    %241 = arith.cmpi eq, %240, %c0_i32_110 : i32
    %242 = arith.andi %238, %241 : i1
    %243 = arith.extui %242 : i1 to i32
    %c0_i32_111 = arith.constant 0 : i32
    %244 = arith.cmpi ne, %243, %c0_i32_111 : i32
    scf.if %244 {
      %487 = tpu.iota {dimensions = array<i32: 1>} : vector<8x128xi32>
      %c16_i32 = arith.constant 16 : i32
      %488 = vector.broadcast %c16_i32 : i32 to vector<8x128xi32>
      %489 = arith.cmpi slt, %487, %488 : vector<8x128xi32>
      %cst_224 = arith.constant -1.000000e+30 : f32
      %490 = vector.broadcast %cst_224 : f32 to vector<8x128xf32>
      %491 = arith.select %489, %233, %490 : vector<8x128xi1>, vector<8x128xf32>
      %cst_225 = arith.constant dense<0xFF800000> : vector<8xf32>
      %492 = vector.multi_reduction <maximumf>, %491, %cst_225 [1] : vector<8x128xf32> to vector<8xf32>
      %493 = vector.shape_cast %492 : vector<8xf32> to vector<8x1xf32>
      %494 = vector.broadcast %493 : vector<8x1xf32> to vector<8x128xf32>
      %495 = arith.cmpf oeq, %491, %494 : vector<8x128xf32>
      %496 = arith.andi %495, %489 : vector<8x128xi1>
      %c128_i32 = arith.constant 128 : i32
      %497 = vector.broadcast %c128_i32 : i32 to vector<8x128xi32>
      %498 = arith.select %496, %487, %497 : vector<8x128xi1>, vector<8x128xi32>
      %cst_226 = arith.constant dense<2147483647> : vector<8xi32>
      %499 = vector.multi_reduction <minsi>, %498, %cst_226 [1] : vector<8x128xi32> to vector<8xi32>
      %500 = vector.shape_cast %499 : vector<8xi32> to vector<8x1xi32>
      %501 = vector.broadcast %500 : vector<8x1xi32> to vector<8x128xi32>
      %502 = arith.cmpi eq, %487, %501 : vector<8x128xi32>
      %503 = arith.extui %502 : vector<8x128xi1> to vector<8x128xi32>
      %504 = arith.sitofp %503 : vector<8x128xi32> to vector<8x128xf32>
      %505 = arith.truncf %504 : vector<8x128xf32> to vector<8x128xbf16>
      %c0_227 = arith.constant 0 : index
      %c0_228 = arith.constant 0 : index
      %506 = vector.load %arg5[%c0_227, %c0_228] : memref<128x32xbf16, #tpu.memory_space<vmem>>, vector<128x32xbf16>
      %cst_229 = arith.constant dense<0.000000e+00> : vector<8x32xf32>
      %507 = tpu.matmul %505, %506, %cst_229 {dimension_numbers = #tpu.dot_dimension_numbers<[1], [0], [0], [1], [0, 0, 1, 1], [], []>} : vector<8x128xbf16>, vector<128x32xbf16>, vector<8x32xf32> -> vector<8x32xf32>
      %508 = arith.truncf %507 : vector<8x32xf32> to vector<8x32xbf16>
      %c0_230 = arith.constant 0 : index
      %c0_231 = arith.constant 0 : index
      %509 = vector.load %arg6[%c0_230, %c0_231] : memref<32x512xbf16, #tpu.memory_space<vmem>>, vector<32x512xbf16>
      %cst_232 = arith.constant dense<0.000000e+00> : vector<8x512xf32>
      %510 = tpu.matmul %508, %509, %cst_232 {dimension_numbers = #tpu.dot_dimension_numbers<[1], [0], [0], [1], [0, 0, 1, 1], [], []>} : vector<8x32xbf16>, vector<32x512xbf16>, vector<8x512xf32> -> vector<8x512xf32>
      %c0_233 = arith.constant 0 : index
      %c0_234 = arith.constant 0 : index
      %511 = vector.load %arg8[%c0_233, %c0_234] : memref<1x512xf32, #tpu.memory_space<vmem>>, vector<1x512xf32>
      %512 = vector.broadcast %511 : vector<1x512xf32> to vector<8x512xf32>
      %513 = arith.addf %510, %512 : vector<8x512xf32>
      %c0_235 = arith.constant 0 : index
      %c0_236 = arith.constant 0 : index
      %514 = vector.load %arg14[%c0_235, %c0_236] : memref<8x512xf32, #tpu.memory_space<vmem>>, vector<8x512xf32>
      tpu.vector_store %arg14[%c0_235, %c0_236], %513 {strides = array<i32>} : memref<8x512xf32, #tpu.memory_space<vmem>>, vector<8x512xf32>,
    } else {
    }
    %c8_i32_112 = arith.constant 8 : i32
    %245 = arith.muli %arg0, %c8_i32_112 : i32
    %c4_i32 = arith.constant 4 : i32
    %246 = arith.addi %245, %c4_i32 : i32
    %c1_i32_113 = arith.constant 1 : i32
    %247 = arith.subi %246, %c1_i32_113 : i32
    %c0_i32_114 = arith.constant 0 : i32
    %248 = arith.maxsi %247, %c0_i32_114 : i32
    %c0_i32_115 = arith.constant 0 : i32
    %249 = arith.cmpi eq, %246, %c0_i32_115 : i32
    %250 = arith.index_cast %248 : i32 to index
    %251 = memref.load %arg1[%250] : memref<8xi32, #tpu.memory_space<smem>>
    %c0_i32_116 = arith.constant 0 : i32
    %252 = arith.cmpi ne, %251, %c0_i32_116 : i32
    %253 = arith.ori %249, %252 : i1
    %c4 = arith.constant 4 : index
    %c0_117 = arith.constant 0 : index
    %c0_118 = arith.constant 0 : index
    %254 = vector.load %arg2[%c4, %c0_117, %c0_118] : memref<8x8x512xbf16, #tpu.memory_space<vmem>>, vector<1x8x512xbf16>
    %255 = vector.shape_cast %254 : vector<1x8x512xbf16> to vector<8x512xbf16>
    %256 = arith.extf %255 : vector<8x512xbf16> to vector<8x512xf32>
    %c0_119 = arith.constant 0 : index
    %c0_120 = arith.constant 0 : index
    %257 = vector.load %arg14[%c0_119, %c0_120] : memref<8x512xf32, #tpu.memory_space<vmem>>, vector<8x512xf32>
    %258 = arith.select %253, %256, %257 : vector<8x512xf32>
    %259 = arith.truncf %227 : vector<8x128xf32> to vector<8x128xbf16>
    %c0_121 = arith.constant 0 : index
    %c0_122 = arith.constant 0 : index
    %260 = vector.load %arg7[%c0_121, %c0_122] : memref<128x512xbf16, #tpu.memory_space<vmem>>, vector<128x512xbf16>
    %cst_123 = arith.constant dense<0.000000e+00> : vector<8x512xf32>
    %261 = tpu.matmul %259, %260, %cst_123 {dimension_numbers = #tpu.dot_dimension_numbers<[1], [0], [0], [1], [0, 0, 1, 1], [], []>} : vector<8x128xbf16>, vector<128x512xbf16>, vector<8x512xf32> -> vector<8x512xf32>
    %262 = arith.addf %258, %261 : vector<8x512xf32>
    %263 = vector.extract_strided_slice %262 {offsets = [0, 0], sizes = [8, 128], strides = [1, 1]} : vector<8x512xf32> to vector<8x128xf32>
    %264 = arith.negf %263 : vector<8x128xf32>
    %265 = math.exp %264 : vector<8x128xf32>
    %cst_124 = arith.constant 1.000000e+00 : f32
    %266 = vector.broadcast %cst_124 : f32 to vector<8x128xf32>
    %267 = arith.addf %266, %265 : vector<8x128xf32>
    %268 = arith.divf %266, %267 : vector<8x128xf32>
    %269 = vector.extract_strided_slice %262 {offsets = [0, 128], sizes = [8, 128], strides = [1, 1]} : vector<8x512xf32> to vector<8x128xf32>
    %270 = arith.negf %269 : vector<8x128xf32>
    %271 = math.exp %270 : vector<8x128xf32>
    %cst_125 = arith.constant 1.000000e+00 : f32
    %272 = vector.broadcast %cst_125 : f32 to vector<8x128xf32>
    %273 = arith.addf %272, %271 : vector<8x128xf32>
    %274 = arith.divf %272, %273 : vector<8x128xf32>
    %275 = vector.extract_strided_slice %262 {offsets = [0, 256], sizes = [8, 128], strides = [1, 1]} : vector<8x512xf32> to vector<8x128xf32>
    %276 = math.tanh %275 : vector<8x128xf32>
    %277 = vector.extract_strided_slice %262 {offsets = [0, 384], sizes = [8, 128], strides = [1, 1]} : vector<8x512xf32> to vector<8x128xf32>
    %278 = arith.negf %277 : vector<8x128xf32>
    %279 = math.exp %278 : vector<8x128xf32>
    %cst_126 = arith.constant 1.000000e+00 : f32
    %280 = vector.broadcast %cst_126 : f32 to vector<8x128xf32>
    %281 = arith.addf %280, %279 : vector<8x128xf32>
    %282 = arith.divf %280, %281 : vector<8x128xf32>
    %283 = arith.mulf %274, %225 : vector<8x128xf32>
    %284 = arith.mulf %268, %276 : vector<8x128xf32>
    %285 = arith.addf %283, %284 : vector<8x128xf32>
    %286 = math.tanh %285 : vector<8x128xf32>
    %287 = arith.mulf %282, %286 : vector<8x128xf32>
    %288 = arith.truncf %287 : vector<8x128xf32> to vector<8x128xbf16>
    %c0_127 = arith.constant 0 : index
    %c0_128 = arith.constant 0 : index
    %289 = vector.load %arg9[%c0_127, %c0_128] : memref<128x128xbf16, #tpu.memory_space<vmem>>, vector<128x128xbf16>
    %cst_129 = arith.constant dense<0.000000e+00> : vector<8x128xf32>
    %290 = tpu.matmul %288, %289, %cst_129 {dimension_numbers = #tpu.dot_dimension_numbers<[1], [0], [0], [1], [0, 0, 1, 1], [], []>} : vector<8x128xbf16>, vector<128x128xbf16>, vector<8x128xf32> -> vector<8x128xf32>
    %c0_130 = arith.constant 0 : index
    %c0_131 = arith.constant 0 : index
    %291 = vector.load %arg10[%c0_130, %c0_131] : memref<1x128xf32, #tpu.memory_space<vmem>>, vector<1x128xf32>
    %292 = vector.broadcast %291 : vector<1x128xf32> to vector<8x128xf32>
    %293 = arith.addf %290, %292 : vector<8x128xf32>
    %c4_132 = arith.constant 4 : index
    %c0_133 = arith.constant 0 : index
    %c0_134 = arith.constant 0 : index
    %294 = vector.load %arg11[%c4_132, %c0_133, %c0_134] : memref<8x8x128xf32, #tpu.memory_space<vmem>>, vector<1x8x128xf32>
    %295 = vector.shape_cast %294 : vector<1x8x128xf32> to vector<8x128xf32>
    %296 = vector.shape_cast %293 : vector<8x128xf32> to vector<1x8x128xf32>
    tpu.vector_store %arg11[%c4_132, %c0_133, %c0_134], %296 {strides = array<i32>} : memref<8x8x128xf32, #tpu.memory_space<vmem>>, vector<1x8x128xf32>,
    %c1_i32_135 = arith.constant 1 : i32
    %297 = arith.addi %246, %c1_i32_135 : i32
    %c8_i32_136 = arith.constant 8 : i32
    %298 = arith.cmpi slt, %297, %c8_i32_136 : i32
    %299 = arith.index_cast %246 : i32 to index
    %300 = memref.load %arg1[%299] : memref<8xi32, #tpu.memory_space<smem>>
    %c0_i32_137 = arith.constant 0 : i32
    %301 = arith.cmpi eq, %300, %c0_i32_137 : i32
    %302 = arith.andi %298, %301 : i1
    %303 = arith.extui %302 : i1 to i32
    %c0_i32_138 = arith.constant 0 : i32
    %304 = arith.cmpi ne, %303, %c0_i32_138 : i32
    scf.if %304 {
      %487 = tpu.iota {dimensions = array<i32: 1>} : vector<8x128xi32>
      %c16_i32 = arith.constant 16 : i32
      %488 = vector.broadcast %c16_i32 : i32 to vector<8x128xi32>
      %489 = arith.cmpi slt, %487, %488 : vector<8x128xi32>
      %cst_224 = arith.constant -1.000000e+30 : f32
      %490 = vector.broadcast %cst_224 : f32 to vector<8x128xf32>
      %491 = arith.select %489, %293, %490 : vector<8x128xi1>, vector<8x128xf32>
      %cst_225 = arith.constant dense<0xFF800000> : vector<8xf32>
      %492 = vector.multi_reduction <maximumf>, %491, %cst_225 [1] : vector<8x128xf32> to vector<8xf32>
      %493 = vector.shape_cast %492 : vector<8xf32> to vector<8x1xf32>
      %494 = vector.broadcast %493 : vector<8x1xf32> to vector<8x128xf32>
      %495 = arith.cmpf oeq, %491, %494 : vector<8x128xf32>
      %496 = arith.andi %495, %489 : vector<8x128xi1>
      %c128_i32 = arith.constant 128 : i32
      %497 = vector.broadcast %c128_i32 : i32 to vector<8x128xi32>
      %498 = arith.select %496, %487, %497 : vector<8x128xi1>, vector<8x128xi32>
      %cst_226 = arith.constant dense<2147483647> : vector<8xi32>
      %499 = vector.multi_reduction <minsi>, %498, %cst_226 [1] : vector<8x128xi32> to vector<8xi32>
      %500 = vector.shape_cast %499 : vector<8xi32> to vector<8x1xi32>
      %501 = vector.broadcast %500 : vector<8x1xi32> to vector<8x128xi32>
      %502 = arith.cmpi eq, %487, %501 : vector<8x128xi32>
      %503 = arith.extui %502 : vector<8x128xi1> to vector<8x128xi32>
      %504 = arith.sitofp %503 : vector<8x128xi32> to vector<8x128xf32>
      %505 = arith.truncf %504 : vector<8x128xf32> to vector<8x128xbf16>
      %c0_227 = arith.constant 0 : index
      %c0_228 = arith.constant 0 : index
      %506 = vector.load %arg5[%c0_227, %c0_228] : memref<128x32xbf16, #tpu.memory_space<vmem>>, vector<128x32xbf16>
      %cst_229 = arith.constant dense<0.000000e+00> : vector<8x32xf32>
      %507 = tpu.matmul %505, %506, %cst_229 {dimension_numbers = #tpu.dot_dimension_numbers<[1], [0], [0], [1], [0, 0, 1, 1], [], []>} : vector<8x128xbf16>, vector<128x32xbf16>, vector<8x32xf32> -> vector<8x32xf32>
      %508 = arith.truncf %507 : vector<8x32xf32> to vector<8x32xbf16>
      %c0_230 = arith.constant 0 : index
      %c0_231 = arith.constant 0 : index
      %509 = vector.load %arg6[%c0_230, %c0_231] : memref<32x512xbf16, #tpu.memory_space<vmem>>, vector<32x512xbf16>
      %cst_232 = arith.constant dense<0.000000e+00> : vector<8x512xf32>
      %510 = tpu.matmul %508, %509, %cst_232 {dimension_numbers = #tpu.dot_dimension_numbers<[1], [0], [0], [1], [0, 0, 1, 1], [], []>} : vector<8x32xbf16>, vector<32x512xbf16>, vector<8x512xf32> -> vector<8x512xf32>
      %c0_233 = arith.constant 0 : index
      %c0_234 = arith.constant 0 : index
      %511 = vector.load %arg8[%c0_233, %c0_234] : memref<1x512xf32, #tpu.memory_space<vmem>>, vector<1x512xf32>
      %512 = vector.broadcast %511 : vector<1x512xf32> to vector<8x512xf32>
      %513 = arith.addf %510, %512 : vector<8x512xf32>
      %c0_235 = arith.constant 0 : index
      %c0_236 = arith.constant 0 : index
      %514 = vector.load %arg14[%c0_235, %c0_236] : memref<8x512xf32, #tpu.memory_space<vmem>>, vector<8x512xf32>
      tpu.vector_store %arg14[%c0_235, %c0_236], %513 {strides = array<i32>} : memref<8x512xf32, #tpu.memory_space<vmem>>, vector<8x512xf32>,
    } else {
    }
    %c8_i32_139 = arith.constant 8 : i32
    %305 = arith.muli %arg0, %c8_i32_139 : i32
    %c5_i32 = arith.constant 5 : i32
    %306 = arith.addi %305, %c5_i32 : i32
    %c1_i32_140 = arith.constant 1 : i32
    %307 = arith.subi %306, %c1_i32_140 : i32
    %c0_i32_141 = arith.constant 0 : i32
    %308 = arith.maxsi %307, %c0_i32_141 : i32
    %c0_i32_142 = arith.constant 0 : i32
    %309 = arith.cmpi eq, %306, %c0_i32_142 : i32
    %310 = arith.index_cast %308 : i32 to index
    %311 = memref.load %arg1[%310] : memref<8xi32, #tpu.memory_space<smem>>
    %c0_i32_143 = arith.constant 0 : i32
    %312 = arith.cmpi ne, %311, %c0_i32_143 : i32
    %313 = arith.ori %309, %312 : i1
    %c5 = arith.constant 5 : index
    %c0_144 = arith.constant 0 : index
    %c0_145 = arith.constant 0 : index
    %314 = vector.load %arg2[%c5, %c0_144, %c0_145] : memref<8x8x512xbf16, #tpu.memory_space<vmem>>, vector<1x8x512xbf16>
    %315 = vector.shape_cast %314 : vector<1x8x512xbf16> to vector<8x512xbf16>
    %316 = arith.extf %315 : vector<8x512xbf16> to vector<8x512xf32>
    %c0_146 = arith.constant 0 : index
    %c0_147 = arith.constant 0 : index
    %317 = vector.load %arg14[%c0_146, %c0_147] : memref<8x512xf32, #tpu.memory_space<vmem>>, vector<8x512xf32>
    %318 = arith.select %313, %316, %317 : vector<8x512xf32>
    %319 = arith.truncf %287 : vector<8x128xf32> to vector<8x128xbf16>
    %c0_148 = arith.constant 0 : index
    %c0_149 = arith.constant 0 : index
    %320 = vector.load %arg7[%c0_148, %c0_149] : memref<128x512xbf16, #tpu.memory_space<vmem>>, vector<128x512xbf16>
    %cst_150 = arith.constant dense<0.000000e+00> : vector<8x512xf32>
    %321 = tpu.matmul %319, %320, %cst_150 {dimension_numbers = #tpu.dot_dimension_numbers<[1], [0], [0], [1], [0, 0, 1, 1], [], []>} : vector<8x128xbf16>, vector<128x512xbf16>, vector<8x512xf32> -> vector<8x512xf32>
    %322 = arith.addf %318, %321 : vector<8x512xf32>
    %323 = vector.extract_strided_slice %322 {offsets = [0, 0], sizes = [8, 128], strides = [1, 1]} : vector<8x512xf32> to vector<8x128xf32>
    %324 = arith.negf %323 : vector<8x128xf32>
    %325 = math.exp %324 : vector<8x128xf32>
    %cst_151 = arith.constant 1.000000e+00 : f32
    %326 = vector.broadcast %cst_151 : f32 to vector<8x128xf32>
    %327 = arith.addf %326, %325 : vector<8x128xf32>
    %328 = arith.divf %326, %327 : vector<8x128xf32>
    %329 = vector.extract_strided_slice %322 {offsets = [0, 128], sizes = [8, 128], strides = [1, 1]} : vector<8x512xf32> to vector<8x128xf32>
    %330 = arith.negf %329 : vector<8x128xf32>
    %331 = math.exp %330 : vector<8x128xf32>
    %cst_152 = arith.constant 1.000000e+00 : f32
    %332 = vector.broadcast %cst_152 : f32 to vector<8x128xf32>
    %333 = arith.addf %332, %331 : vector<8x128xf32>
    %334 = arith.divf %332, %333 : vector<8x128xf32>
    %335 = vector.extract_strided_slice %322 {offsets = [0, 256], sizes = [8, 128], strides = [1, 1]} : vector<8x512xf32> to vector<8x128xf32>
    %336 = math.tanh %335 : vector<8x128xf32>
    %337 = vector.extract_strided_slice %322 {offsets = [0, 384], sizes = [8, 128], strides = [1, 1]} : vector<8x512xf32> to vector<8x128xf32>
    %338 = arith.negf %337 : vector<8x128xf32>
    %339 = math.exp %338 : vector<8x128xf32>
    %cst_153 = arith.constant 1.000000e+00 : f32
    %340 = vector.broadcast %cst_153 : f32 to vector<8x128xf32>
    %341 = arith.addf %340, %339 : vector<8x128xf32>
    %342 = arith.divf %340, %341 : vector<8x128xf32>
    %343 = arith.mulf %334, %285 : vector<8x128xf32>
    %344 = arith.mulf %328, %336 : vector<8x128xf32>
    %345 = arith.addf %343, %344 : vector<8x128xf32>
    %346 = math.tanh %345 : vector<8x128xf32>
    %347 = arith.mulf %342, %346 : vector<8x128xf32>
    %348 = arith.truncf %347 : vector<8x128xf32> to vector<8x128xbf16>
    %c0_154 = arith.constant 0 : index
    %c0_155 = arith.constant 0 : index
    %349 = vector.load %arg9[%c0_154, %c0_155] : memref<128x128xbf16, #tpu.memory_space<vmem>>, vector<128x128xbf16>
    %cst_156 = arith.constant dense<0.000000e+00> : vector<8x128xf32>
    %350 = tpu.matmul %348, %349, %cst_156 {dimension_numbers = #tpu.dot_dimension_numbers<[1], [0], [0], [1], [0, 0, 1, 1], [], []>} : vector<8x128xbf16>, vector<128x128xbf16>, vector<8x128xf32> -> vector<8x128xf32>
    %c0_157 = arith.constant 0 : index
    %c0_158 = arith.constant 0 : index
    %351 = vector.load %arg10[%c0_157, %c0_158] : memref<1x128xf32, #tpu.memory_space<vmem>>, vector<1x128xf32>
    %352 = vector.broadcast %351 : vector<1x128xf32> to vector<8x128xf32>
    %353 = arith.addf %350, %352 : vector<8x128xf32>
    %c5_159 = arith.constant 5 : index
    %c0_160 = arith.constant 0 : index
    %c0_161 = arith.constant 0 : index
    %354 = vector.load %arg11[%c5_159, %c0_160, %c0_161] : memref<8x8x128xf32, #tpu.memory_space<vmem>>, vector<1x8x128xf32>
    %355 = vector.shape_cast %354 : vector<1x8x128xf32> to vector<8x128xf32>
    %356 = vector.shape_cast %353 : vector<8x128xf32> to vector<1x8x128xf32>
    tpu.vector_store %arg11[%c5_159, %c0_160, %c0_161], %356 {strides = array<i32>} : memref<8x8x128xf32, #tpu.memory_space<vmem>>, vector<1x8x128xf32>,
    %c1_i32_162 = arith.constant 1 : i32
    %357 = arith.addi %306, %c1_i32_162 : i32
    %c8_i32_163 = arith.constant 8 : i32
    %358 = arith.cmpi slt, %357, %c8_i32_163 : i32
    %359 = arith.index_cast %306 : i32 to index
    %360 = memref.load %arg1[%359] : memref<8xi32, #tpu.memory_space<smem>>
    %c0_i32_164 = arith.constant 0 : i32
    %361 = arith.cmpi eq, %360, %c0_i32_164 : i32
    %362 = arith.andi %358, %361 : i1
    %363 = arith.extui %362 : i1 to i32
    %c0_i32_165 = arith.constant 0 : i32
    %364 = arith.cmpi ne, %363, %c0_i32_165 : i32
    scf.if %364 {
      %487 = tpu.iota {dimensions = array<i32: 1>} : vector<8x128xi32>
      %c16_i32 = arith.constant 16 : i32
      %488 = vector.broadcast %c16_i32 : i32 to vector<8x128xi32>
      %489 = arith.cmpi slt, %487, %488 : vector<8x128xi32>
      %cst_224 = arith.constant -1.000000e+30 : f32
      %490 = vector.broadcast %cst_224 : f32 to vector<8x128xf32>
      %491 = arith.select %489, %353, %490 : vector<8x128xi1>, vector<8x128xf32>
      %cst_225 = arith.constant dense<0xFF800000> : vector<8xf32>
      %492 = vector.multi_reduction <maximumf>, %491, %cst_225 [1] : vector<8x128xf32> to vector<8xf32>
      %493 = vector.shape_cast %492 : vector<8xf32> to vector<8x1xf32>
      %494 = vector.broadcast %493 : vector<8x1xf32> to vector<8x128xf32>
      %495 = arith.cmpf oeq, %491, %494 : vector<8x128xf32>
      %496 = arith.andi %495, %489 : vector<8x128xi1>
      %c128_i32 = arith.constant 128 : i32
      %497 = vector.broadcast %c128_i32 : i32 to vector<8x128xi32>
      %498 = arith.select %496, %487, %497 : vector<8x128xi1>, vector<8x128xi32>
      %cst_226 = arith.constant dense<2147483647> : vector<8xi32>
      %499 = vector.multi_reduction <minsi>, %498, %cst_226 [1] : vector<8x128xi32> to vector<8xi32>
      %500 = vector.shape_cast %499 : vector<8xi32> to vector<8x1xi32>
      %501 = vector.broadcast %500 : vector<8x1xi32> to vector<8x128xi32>
      %502 = arith.cmpi eq, %487, %501 : vector<8x128xi32>
      %503 = arith.extui %502 : vector<8x128xi1> to vector<8x128xi32>
      %504 = arith.sitofp %503 : vector<8x128xi32> to vector<8x128xf32>
      %505 = arith.truncf %504 : vector<8x128xf32> to vector<8x128xbf16>
      %c0_227 = arith.constant 0 : index
      %c0_228 = arith.constant 0 : index
      %506 = vector.load %arg5[%c0_227, %c0_228] : memref<128x32xbf16, #tpu.memory_space<vmem>>, vector<128x32xbf16>
      %cst_229 = arith.constant dense<0.000000e+00> : vector<8x32xf32>
      %507 = tpu.matmul %505, %506, %cst_229 {dimension_numbers = #tpu.dot_dimension_numbers<[1], [0], [0], [1], [0, 0, 1, 1], [], []>} : vector<8x128xbf16>, vector<128x32xbf16>, vector<8x32xf32> -> vector<8x32xf32>
      %508 = arith.truncf %507 : vector<8x32xf32> to vector<8x32xbf16>
      %c0_230 = arith.constant 0 : index
      %c0_231 = arith.constant 0 : index
      %509 = vector.load %arg6[%c0_230, %c0_231] : memref<32x512xbf16, #tpu.memory_space<vmem>>, vector<32x512xbf16>
      %cst_232 = arith.constant dense<0.000000e+00> : vector<8x512xf32>
      %510 = tpu.matmul %508, %509, %cst_232 {dimension_numbers = #tpu.dot_dimension_numbers<[1], [0], [0], [1], [0, 0, 1, 1], [], []>} : vector<8x32xbf16>, vector<32x512xbf16>, vector<8x512xf32> -> vector<8x512xf32>
      %c0_233 = arith.constant 0 : index
      %c0_234 = arith.constant 0 : index
      %511 = vector.load %arg8[%c0_233, %c0_234] : memref<1x512xf32, #tpu.memory_space<vmem>>, vector<1x512xf32>
      %512 = vector.broadcast %511 : vector<1x512xf32> to vector<8x512xf32>
      %513 = arith.addf %510, %512 : vector<8x512xf32>
      %c0_235 = arith.constant 0 : index
      %c0_236 = arith.constant 0 : index
      %514 = vector.load %arg14[%c0_235, %c0_236] : memref<8x512xf32, #tpu.memory_space<vmem>>, vector<8x512xf32>
      tpu.vector_store %arg14[%c0_235, %c0_236], %513 {strides = array<i32>} : memref<8x512xf32, #tpu.memory_space<vmem>>, vector<8x512xf32>,
    } else {
    }
    %c8_i32_166 = arith.constant 8 : i32
    %365 = arith.muli %arg0, %c8_i32_166 : i32
    %c6_i32 = arith.constant 6 : i32
    %366 = arith.addi %365, %c6_i32 : i32
    %c1_i32_167 = arith.constant 1 : i32
    %367 = arith.subi %366, %c1_i32_167 : i32
    %c0_i32_168 = arith.constant 0 : i32
    %368 = arith.maxsi %367, %c0_i32_168 : i32
    %c0_i32_169 = arith.constant 0 : i32
    %369 = arith.cmpi eq, %366, %c0_i32_169 : i32
    %370 = arith.index_cast %368 : i32 to index
    %371 = memref.load %arg1[%370] : memref<8xi32, #tpu.memory_space<smem>>
    %c0_i32_170 = arith.constant 0 : i32
    %372 = arith.cmpi ne, %371, %c0_i32_170 : i32
    %373 = arith.ori %369, %372 : i1
    %c6 = arith.constant 6 : index
    %c0_171 = arith.constant 0 : index
    %c0_172 = arith.constant 0 : index
    %374 = vector.load %arg2[%c6, %c0_171, %c0_172] : memref<8x8x512xbf16, #tpu.memory_space<vmem>>, vector<1x8x512xbf16>
    %375 = vector.shape_cast %374 : vector<1x8x512xbf16> to vector<8x512xbf16>
    %376 = arith.extf %375 : vector<8x512xbf16> to vector<8x512xf32>
    %c0_173 = arith.constant 0 : index
    %c0_174 = arith.constant 0 : index
    %377 = vector.load %arg14[%c0_173, %c0_174] : memref<8x512xf32, #tpu.memory_space<vmem>>, vector<8x512xf32>
    %378 = arith.select %373, %376, %377 : vector<8x512xf32>
    %379 = arith.truncf %347 : vector<8x128xf32> to vector<8x128xbf16>
    %c0_175 = arith.constant 0 : index
    %c0_176 = arith.constant 0 : index
    %380 = vector.load %arg7[%c0_175, %c0_176] : memref<128x512xbf16, #tpu.memory_space<vmem>>, vector<128x512xbf16>
    %cst_177 = arith.constant dense<0.000000e+00> : vector<8x512xf32>
    %381 = tpu.matmul %379, %380, %cst_177 {dimension_numbers = #tpu.dot_dimension_numbers<[1], [0], [0], [1], [0, 0, 1, 1], [], []>} : vector<8x128xbf16>, vector<128x512xbf16>, vector<8x512xf32> -> vector<8x512xf32>
    %382 = arith.addf %378, %381 : vector<8x512xf32>
    %383 = vector.extract_strided_slice %382 {offsets = [0, 0], sizes = [8, 128], strides = [1, 1]} : vector<8x512xf32> to vector<8x128xf32>
    %384 = arith.negf %383 : vector<8x128xf32>
    %385 = math.exp %384 : vector<8x128xf32>
    %cst_178 = arith.constant 1.000000e+00 : f32
    %386 = vector.broadcast %cst_178 : f32 to vector<8x128xf32>
    %387 = arith.addf %386, %385 : vector<8x128xf32>
    %388 = arith.divf %386, %387 : vector<8x128xf32>
    %389 = vector.extract_strided_slice %382 {offsets = [0, 128], sizes = [8, 128], strides = [1, 1]} : vector<8x512xf32> to vector<8x128xf32>
    %390 = arith.negf %389 : vector<8x128xf32>
    %391 = math.exp %390 : vector<8x128xf32>
    %cst_179 = arith.constant 1.000000e+00 : f32
    %392 = vector.broadcast %cst_179 : f32 to vector<8x128xf32>
    %393 = arith.addf %392, %391 : vector<8x128xf32>
    %394 = arith.divf %392, %393 : vector<8x128xf32>
    %395 = vector.extract_strided_slice %382 {offsets = [0, 256], sizes = [8, 128], strides = [1, 1]} : vector<8x512xf32> to vector<8x128xf32>
    %396 = math.tanh %395 : vector<8x128xf32>
    %397 = vector.extract_strided_slice %382 {offsets = [0, 384], sizes = [8, 128], strides = [1, 1]} : vector<8x512xf32> to vector<8x128xf32>
    %398 = arith.negf %397 : vector<8x128xf32>
    %399 = math.exp %398 : vector<8x128xf32>
    %cst_180 = arith.constant 1.000000e+00 : f32
    %400 = vector.broadcast %cst_180 : f32 to vector<8x128xf32>
    %401 = arith.addf %400, %399 : vector<8x128xf32>
    %402 = arith.divf %400, %401 : vector<8x128xf32>
    %403 = arith.mulf %394, %345 : vector<8x128xf32>
    %404 = arith.mulf %388, %396 : vector<8x128xf32>
    %405 = arith.addf %403, %404 : vector<8x128xf32>
    %406 = math.tanh %405 : vector<8x128xf32>
    %407 = arith.mulf %402, %406 : vector<8x128xf32>
    %408 = arith.truncf %407 : vector<8x128xf32> to vector<8x128xbf16>
    %c0_181 = arith.constant 0 : index
    %c0_182 = arith.constant 0 : index
    %409 = vector.load %arg9[%c0_181, %c0_182] : memref<128x128xbf16, #tpu.memory_space<vmem>>, vector<128x128xbf16>
    %cst_183 = arith.constant dense<0.000000e+00> : vector<8x128xf32>
    %410 = tpu.matmul %408, %409, %cst_183 {dimension_numbers = #tpu.dot_dimension_numbers<[1], [0], [0], [1], [0, 0, 1, 1], [], []>} : vector<8x128xbf16>, vector<128x128xbf16>, vector<8x128xf32> -> vector<8x128xf32>
    %c0_184 = arith.constant 0 : index
    %c0_185 = arith.constant 0 : index
    %411 = vector.load %arg10[%c0_184, %c0_185] : memref<1x128xf32, #tpu.memory_space<vmem>>, vector<1x128xf32>
    %412 = vector.broadcast %411 : vector<1x128xf32> to vector<8x128xf32>
    %413 = arith.addf %410, %412 : vector<8x128xf32>
    %c6_186 = arith.constant 6 : index
    %c0_187 = arith.constant 0 : index
    %c0_188 = arith.constant 0 : index
    %414 = vector.load %arg11[%c6_186, %c0_187, %c0_188] : memref<8x8x128xf32, #tpu.memory_space<vmem>>, vector<1x8x128xf32>
    %415 = vector.shape_cast %414 : vector<1x8x128xf32> to vector<8x128xf32>
    %416 = vector.shape_cast %413 : vector<8x128xf32> to vector<1x8x128xf32>
    tpu.vector_store %arg11[%c6_186, %c0_187, %c0_188], %416 {strides = array<i32>} : memref<8x8x128xf32, #tpu.memory_space<vmem>>, vector<1x8x128xf32>,
    %c1_i32_189 = arith.constant 1 : i32
    %417 = arith.addi %366, %c1_i32_189 : i32
    %c8_i32_190 = arith.constant 8 : i32
    %418 = arith.cmpi slt, %417, %c8_i32_190 : i32
    %419 = arith.index_cast %366 : i32 to index
    %420 = memref.load %arg1[%419] : memref<8xi32, #tpu.memory_space<smem>>
    %c0_i32_191 = arith.constant 0 : i32
    %421 = arith.cmpi eq, %420, %c0_i32_191 : i32
    %422 = arith.andi %418, %421 : i1
    %423 = arith.extui %422 : i1 to i32
    %c0_i32_192 = arith.constant 0 : i32
    %424 = arith.cmpi ne, %423, %c0_i32_192 : i32
    scf.if %424 {
      %487 = tpu.iota {dimensions = array<i32: 1>} : vector<8x128xi32>
      %c16_i32 = arith.constant 16 : i32
      %488 = vector.broadcast %c16_i32 : i32 to vector<8x128xi32>
      %489 = arith.cmpi slt, %487, %488 : vector<8x128xi32>
      %cst_224 = arith.constant -1.000000e+30 : f32
      %490 = vector.broadcast %cst_224 : f32 to vector<8x128xf32>
      %491 = arith.select %489, %413, %490 : vector<8x128xi1>, vector<8x128xf32>
      %cst_225 = arith.constant dense<0xFF800000> : vector<8xf32>
      %492 = vector.multi_reduction <maximumf>, %491, %cst_225 [1] : vector<8x128xf32> to vector<8xf32>
      %493 = vector.shape_cast %492 : vector<8xf32> to vector<8x1xf32>
      %494 = vector.broadcast %493 : vector<8x1xf32> to vector<8x128xf32>
      %495 = arith.cmpf oeq, %491, %494 : vector<8x128xf32>
      %496 = arith.andi %495, %489 : vector<8x128xi1>
      %c128_i32 = arith.constant 128 : i32
      %497 = vector.broadcast %c128_i32 : i32 to vector<8x128xi32>
      %498 = arith.select %496, %487, %497 : vector<8x128xi1>, vector<8x128xi32>
      %cst_226 = arith.constant dense<2147483647> : vector<8xi32>
      %499 = vector.multi_reduction <minsi>, %498, %cst_226 [1] : vector<8x128xi32> to vector<8xi32>
      %500 = vector.shape_cast %499 : vector<8xi32> to vector<8x1xi32>
      %501 = vector.broadcast %500 : vector<8x1xi32> to vector<8x128xi32>
      %502 = arith.cmpi eq, %487, %501 : vector<8x128xi32>
      %503 = arith.extui %502 : vector<8x128xi1> to vector<8x128xi32>
      %504 = arith.sitofp %503 : vector<8x128xi32> to vector<8x128xf32>
      %505 = arith.truncf %504 : vector<8x128xf32> to vector<8x128xbf16>
      %c0_227 = arith.constant 0 : index
      %c0_228 = arith.constant 0 : index
      %506 = vector.load %arg5[%c0_227, %c0_228] : memref<128x32xbf16, #tpu.memory_space<vmem>>, vector<128x32xbf16>
      %cst_229 = arith.constant dense<0.000000e+00> : vector<8x32xf32>
      %507 = tpu.matmul %505, %506, %cst_229 {dimension_numbers = #tpu.dot_dimension_numbers<[1], [0], [0], [1], [0, 0, 1, 1], [], []>} : vector<8x128xbf16>, vector<128x32xbf16>, vector<8x32xf32> -> vector<8x32xf32>
      %508 = arith.truncf %507 : vector<8x32xf32> to vector<8x32xbf16>
      %c0_230 = arith.constant 0 : index
      %c0_231 = arith.constant 0 : index
      %509 = vector.load %arg6[%c0_230, %c0_231] : memref<32x512xbf16, #tpu.memory_space<vmem>>, vector<32x512xbf16>
      %cst_232 = arith.constant dense<0.000000e+00> : vector<8x512xf32>
      %510 = tpu.matmul %508, %509, %cst_232 {dimension_numbers = #tpu.dot_dimension_numbers<[1], [0], [0], [1], [0, 0, 1, 1], [], []>} : vector<8x32xbf16>, vector<32x512xbf16>, vector<8x512xf32> -> vector<8x512xf32>
      %c0_233 = arith.constant 0 : index
      %c0_234 = arith.constant 0 : index
      %511 = vector.load %arg8[%c0_233, %c0_234] : memref<1x512xf32, #tpu.memory_space<vmem>>, vector<1x512xf32>
      %512 = vector.broadcast %511 : vector<1x512xf32> to vector<8x512xf32>
      %513 = arith.addf %510, %512 : vector<8x512xf32>
      %c0_235 = arith.constant 0 : index
      %c0_236 = arith.constant 0 : index
      %514 = vector.load %arg14[%c0_235, %c0_236] : memref<8x512xf32, #tpu.memory_space<vmem>>, vector<8x512xf32>
      tpu.vector_store %arg14[%c0_235, %c0_236], %513 {strides = array<i32>} : memref<8x512xf32, #tpu.memory_space<vmem>>, vector<8x512xf32>,
    } else {
    }
    %c8_i32_193 = arith.constant 8 : i32
    %425 = arith.muli %arg0, %c8_i32_193 : i32
    %c7_i32 = arith.constant 7 : i32
    %426 = arith.addi %425, %c7_i32 : i32
    %c1_i32_194 = arith.constant 1 : i32
    %427 = arith.subi %426, %c1_i32_194 : i32
    %c0_i32_195 = arith.constant 0 : i32
    %428 = arith.maxsi %427, %c0_i32_195 : i32
    %c0_i32_196 = arith.constant 0 : i32
    %429 = arith.cmpi eq, %426, %c0_i32_196 : i32
    %430 = arith.index_cast %428 : i32 to index
    %431 = memref.load %arg1[%430] : memref<8xi32, #tpu.memory_space<smem>>
    %c0_i32_197 = arith.constant 0 : i32
    %432 = arith.cmpi ne, %431, %c0_i32_197 : i32
    %433 = arith.ori %429, %432 : i1
    %c7 = arith.constant 7 : index
    %c0_198 = arith.constant 0 : index
    %c0_199 = arith.constant 0 : index
    %434 = vector.load %arg2[%c7, %c0_198, %c0_199] : memref<8x8x512xbf16, #tpu.memory_space<vmem>>, vector<1x8x512xbf16>
    %435 = vector.shape_cast %434 : vector<1x8x512xbf16> to vector<8x512xbf16>
    %436 = arith.extf %435 : vector<8x512xbf16> to vector<8x512xf32>
    %c0_200 = arith.constant 0 : index
    %c0_201 = arith.constant 0 : index
    %437 = vector.load %arg14[%c0_200, %c0_201] : memref<8x512xf32, #tpu.memory_space<vmem>>, vector<8x512xf32>
    %438 = arith.select %433, %436, %437 : vector<8x512xf32>
    %439 = arith.truncf %407 : vector<8x128xf32> to vector<8x128xbf16>
    %c0_202 = arith.constant 0 : index
    %c0_203 = arith.constant 0 : index
    %440 = vector.load %arg7[%c0_202, %c0_203] : memref<128x512xbf16, #tpu.memory_space<vmem>>, vector<128x512xbf16>
    %cst_204 = arith.constant dense<0.000000e+00> : vector<8x512xf32>
    %441 = tpu.matmul %439, %440, %cst_204 {dimension_numbers = #tpu.dot_dimension_numbers<[1], [0], [0], [1], [0, 0, 1, 1], [], []>} : vector<8x128xbf16>, vector<128x512xbf16>, vector<8x512xf32> -> vector<8x512xf32>
    %442 = arith.addf %438, %441 : vector<8x512xf32>
    %443 = vector.extract_strided_slice %442 {offsets = [0, 0], sizes = [8, 128], strides = [1, 1]} : vector<8x512xf32> to vector<8x128xf32>
    %444 = arith.negf %443 : vector<8x128xf32>
    %445 = math.exp %444 : vector<8x128xf32>
    %cst_205 = arith.constant 1.000000e+00 : f32
    %446 = vector.broadcast %cst_205 : f32 to vector<8x128xf32>
    %447 = arith.addf %446, %445 : vector<8x128xf32>
    %448 = arith.divf %446, %447 : vector<8x128xf32>
    %449 = vector.extract_strided_slice %442 {offsets = [0, 128], sizes = [8, 128], strides = [1, 1]} : vector<8x512xf32> to vector<8x128xf32>
    %450 = arith.negf %449 : vector<8x128xf32>
    %451 = math.exp %450 : vector<8x128xf32>
    %cst_206 = arith.constant 1.000000e+00 : f32
    %452 = vector.broadcast %cst_206 : f32 to vector<8x128xf32>
    %453 = arith.addf %452, %451 : vector<8x128xf32>
    %454 = arith.divf %452, %453 : vector<8x128xf32>
    %455 = vector.extract_strided_slice %442 {offsets = [0, 256], sizes = [8, 128], strides = [1, 1]} : vector<8x512xf32> to vector<8x128xf32>
    %456 = math.tanh %455 : vector<8x128xf32>
    %457 = vector.extract_strided_slice %442 {offsets = [0, 384], sizes = [8, 128], strides = [1, 1]} : vector<8x512xf32> to vector<8x128xf32>
    %458 = arith.negf %457 : vector<8x128xf32>
    %459 = math.exp %458 : vector<8x128xf32>
    %cst_207 = arith.constant 1.000000e+00 : f32
    %460 = vector.broadcast %cst_207 : f32 to vector<8x128xf32>
    %461 = arith.addf %460, %459 : vector<8x128xf32>
    %462 = arith.divf %460, %461 : vector<8x128xf32>
    %463 = arith.mulf %454, %405 : vector<8x128xf32>
    %464 = arith.mulf %448, %456 : vector<8x128xf32>
    %465 = arith.addf %463, %464 : vector<8x128xf32>
    %466 = math.tanh %465 : vector<8x128xf32>
    %467 = arith.mulf %462, %466 : vector<8x128xf32>
    %468 = arith.truncf %467 : vector<8x128xf32> to vector<8x128xbf16>
    %c0_208 = arith.constant 0 : index
    %c0_209 = arith.constant 0 : index
    %469 = vector.load %arg9[%c0_208, %c0_209] : memref<128x128xbf16, #tpu.memory_space<vmem>>, vector<128x128xbf16>
    %cst_210 = arith.constant dense<0.000000e+00> : vector<8x128xf32>
    %470 = tpu.matmul %468, %469, %cst_210 {dimension_numbers = #tpu.dot_dimension_numbers<[1], [0], [0], [1], [0, 0, 1, 1], [], []>} : vector<8x128xbf16>, vector<128x128xbf16>, vector<8x128xf32> -> vector<8x128xf32>
    %c0_211 = arith.constant 0 : index
    %c0_212 = arith.constant 0 : index
    %471 = vector.load %arg10[%c0_211, %c0_212] : memref<1x128xf32, #tpu.memory_space<vmem>>, vector<1x128xf32>
    %472 = vector.broadcast %471 : vector<1x128xf32> to vector<8x128xf32>
    %473 = arith.addf %470, %472 : vector<8x128xf32>
    %c7_213 = arith.constant 7 : index
    %c0_214 = arith.constant 0 : index
    %c0_215 = arith.constant 0 : index
    %474 = vector.load %arg11[%c7_213, %c0_214, %c0_215] : memref<8x8x128xf32, #tpu.memory_space<vmem>>, vector<1x8x128xf32>
    %475 = vector.shape_cast %474 : vector<1x8x128xf32> to vector<8x128xf32>
    %476 = vector.shape_cast %473 : vector<8x128xf32> to vector<1x8x128xf32>
    tpu.vector_store %arg11[%c7_213, %c0_214, %c0_215], %476 {strides = array<i32>} : memref<8x8x128xf32, #tpu.memory_space<vmem>>, vector<1x8x128xf32>,
    %c1_i32_216 = arith.constant 1 : i32
    %477 = arith.addi %426, %c1_i32_216 : i32
    %c8_i32_217 = arith.constant 8 : i32
    %478 = arith.cmpi slt, %477, %c8_i32_217 : i32
    %479 = arith.index_cast %426 : i32 to index
    %480 = memref.load %arg1[%479] : memref<8xi32, #tpu.memory_space<smem>>
    %c0_i32_218 = arith.constant 0 : i32
    %481 = arith.cmpi eq, %480, %c0_i32_218 : i32
    %482 = arith.andi %478, %481 : i1
    %483 = arith.extui %482 : i1 to i32
    %c0_i32_219 = arith.constant 0 : i32
    %484 = arith.cmpi ne, %483, %c0_i32_219 : i32
    scf.if %484 {
      %487 = tpu.iota {dimensions = array<i32: 1>} : vector<8x128xi32>
      %c16_i32 = arith.constant 16 : i32
      %488 = vector.broadcast %c16_i32 : i32 to vector<8x128xi32>
      %489 = arith.cmpi slt, %487, %488 : vector<8x128xi32>
      %cst_224 = arith.constant -1.000000e+30 : f32
      %490 = vector.broadcast %cst_224 : f32 to vector<8x128xf32>
      %491 = arith.select %489, %473, %490 : vector<8x128xi1>, vector<8x128xf32>
      %cst_225 = arith.constant dense<0xFF800000> : vector<8xf32>
      %492 = vector.multi_reduction <maximumf>, %491, %cst_225 [1] : vector<8x128xf32> to vector<8xf32>
      %493 = vector.shape_cast %492 : vector<8xf32> to vector<8x1xf32>
      %494 = vector.broadcast %493 : vector<8x1xf32> to vector<8x128xf32>
      %495 = arith.cmpf oeq, %491, %494 : vector<8x128xf32>
      %496 = arith.andi %495, %489 : vector<8x128xi1>
      %c128_i32 = arith.constant 128 : i32
      %497 = vector.broadcast %c128_i32 : i32 to vector<8x128xi32>
      %498 = arith.select %496, %487, %497 : vector<8x128xi1>, vector<8x128xi32>
      %cst_226 = arith.constant dense<2147483647> : vector<8xi32>
      %499 = vector.multi_reduction <minsi>, %498, %cst_226 [1] : vector<8x128xi32> to vector<8xi32>
      %500 = vector.shape_cast %499 : vector<8xi32> to vector<8x1xi32>
      %501 = vector.broadcast %500 : vector<8x1xi32> to vector<8x128xi32>
      %502 = arith.cmpi eq, %487, %501 : vector<8x128xi32>
      %503 = arith.extui %502 : vector<8x128xi1> to vector<8x128xi32>
      %504 = arith.sitofp %503 : vector<8x128xi32> to vector<8x128xf32>
      %505 = arith.truncf %504 : vector<8x128xf32> to vector<8x128xbf16>
      %c0_227 = arith.constant 0 : index
      %c0_228 = arith.constant 0 : index
      %506 = vector.load %arg5[%c0_227, %c0_228] : memref<128x32xbf16, #tpu.memory_space<vmem>>, vector<128x32xbf16>
      %cst_229 = arith.constant dense<0.000000e+00> : vector<8x32xf32>
      %507 = tpu.matmul %505, %506, %cst_229 {dimension_numbers = #tpu.dot_dimension_numbers<[1], [0], [0], [1], [0, 0, 1, 1], [], []>} : vector<8x128xbf16>, vector<128x32xbf16>, vector<8x32xf32> -> vector<8x32xf32>
      %508 = arith.truncf %507 : vector<8x32xf32> to vector<8x32xbf16>
      %c0_230 = arith.constant 0 : index
      %c0_231 = arith.constant 0 : index
      %509 = vector.load %arg6[%c0_230, %c0_231] : memref<32x512xbf16, #tpu.memory_space<vmem>>, vector<32x512xbf16>
      %cst_232 = arith.constant dense<0.000000e+00> : vector<8x512xf32>
      %510 = tpu.matmul %508, %509, %cst_232 {dimension_numbers = #tpu.dot_dimension_numbers<[1], [0], [0], [1], [0, 0, 1, 1], [], []>} : vector<8x32xbf16>, vector<32x512xbf16>, vector<8x512xf32> -> vector<8x512xf32>
      %c0_233 = arith.constant 0 : index
      %c0_234 = arith.constant 0 : index
      %511 = vector.load %arg8[%c0_233, %c0_234] : memref<1x512xf32, #tpu.memory_space<vmem>>, vector<1x512xf32>
      %512 = vector.broadcast %511 : vector<1x512xf32> to vector<8x512xf32>
      %513 = arith.addf %510, %512 : vector<8x512xf32>
      %c0_235 = arith.constant 0 : index
      %c0_236 = arith.constant 0 : index
      %514 = vector.load %arg14[%c0_235, %c0_236] : memref<8x512xf32, #tpu.memory_space<vmem>>, vector<8x512xf32>
      tpu.vector_store %arg14[%c0_235, %c0_236], %513 {strides = array<i32>} : memref<8x512xf32, #tpu.memory_space<vmem>>, vector<8x512xf32>,
    } else {
    }
    %c0_220 = arith.constant 0 : index
    %c0_221 = arith.constant 0 : index
    %485 = vector.load %arg12[%c0_220, %c0_221] : memref<8x128xf32, #tpu.memory_space<vmem>>, vector<8x128xf32>
    tpu.vector_store %arg12[%c0_220, %c0_221], %467 {strides = array<i32>} : memref<8x128xf32, #tpu.memory_space<vmem>>, vector<8x128xf32>,
    %c0_222 = arith.constant 0 : index
    %c0_223 = arith.constant 0 : index
    %486 = vector.load %arg13[%c0_222, %c0_223] : memref<8x128xf32, #tpu.memory_space<vmem>>, vector<8x128xf32>
    tpu.vector_store %arg13[%c0_222, %c0_223], %465 {strides = array<i32>} : memref<8x128xf32, #tpu.memory_space<vmem>>, vector<8x128xf32>,
    return
  }
  func.func @transform_0(%arg0: i32, %arg1: memref<8xi32, #tpu.memory_space<smem>>) -> (i32, i32, i32) {
    %c0_i32 = arith.constant 0 : i32
    %c0_i32_0 = arith.constant 0 : i32
    %c0_i32_1 = arith.constant 0 : i32
    return %arg0, %c0_i32, %c0_i32_0 : i32, i32, i32
  }
  func.func @transform_1(%arg0: i32, %arg1: memref<8xi32, #tpu.memory_space<smem>>) -> (i32, i32) {
    %c0_i32 = arith.constant 0 : i32
    %c0_i32_0 = arith.constant 0 : i32
    %c0_i32_1 = arith.constant 0 : i32
    return %c0_i32, %c0_i32_0 : i32, i32
  }
  func.func @transform_2(%arg0: i32, %arg1: memref<8xi32, #tpu.memory_space<smem>>) -> (i32, i32) {
    %c0_i32 = arith.constant 0 : i32
    %c0_i32_0 = arith.constant 0 : i32
    %c0_i32_1 = arith.constant 0 : i32
    return %c0_i32, %c0_i32_0 : i32, i32
  }
  func.func @transform_3(%arg0: i32, %arg1: memref<8xi32, #tpu.memory_space<smem>>) -> (i32, i32) {
    %c0_i32 = arith.constant 0 : i32
    %c0_i32_0 = arith.constant 0 : i32
    %c0_i32_1 = arith.constant 0 : i32
    return %c0_i32, %c0_i32_0 : i32, i32
  }
  func.func @transform_4(%arg0: i32, %arg1: memref<8xi32, #tpu.memory_space<smem>>) -> (i32, i32) {
    %c0_i32 = arith.constant 0 : i32
    %c0_i32_0 = arith.constant 0 : i32
    %c0_i32_1 = arith.constant 0 : i32
    return %c0_i32, %c0_i32_0 : i32, i32
  }
  func.func @transform_5(%arg0: i32, %arg1: memref<8xi32, #tpu.memory_space<smem>>) -> (i32, i32) {
    %c0_i32 = arith.constant 0 : i32
    %c0_i32_0 = arith.constant 0 : i32
    %c0_i32_1 = arith.constant 0 : i32
    return %c0_i32, %c0_i32_0 : i32, i32
  }
  func.func @transform_6(%arg0: i32, %arg1: memref<8xi32, #tpu.memory_space<smem>>) -> (i32, i32) {
    %c0_i32 = arith.constant 0 : i32
    %c0_i32_0 = arith.constant 0 : i32
    %c0_i32_1 = arith.constant 0 : i32
    return %c0_i32, %c0_i32_0 : i32, i32
  }
  func.func @transform_7(%arg0: i32, %arg1: memref<8xi32, #tpu.memory_space<smem>>) -> (i32, i32) {
    %c0_i32 = arith.constant 0 : i32
    %c0_i32_0 = arith.constant 0 : i32
    %c0_i32_1 = arith.constant 0 : i32
    return %c0_i32, %c0_i32_0 : i32, i32
  }
  func.func @transform_8(%arg0: i32, %arg1: memref<8xi32, #tpu.memory_space<smem>>) -> (i32, i32) {
    %c0_i32 = arith.constant 0 : i32
    %c0_i32_0 = arith.constant 0 : i32
    %c0_i32_1 = arith.constant 0 : i32
    return %c0_i32, %c0_i32_0 : i32, i32
  }
  func.func @transform_9(%arg0: i32, %arg1: memref<8xi32, #tpu.memory_space<smem>>) -> (i32, i32, i32) {
    %c0_i32 = arith.constant 0 : i32
    %c0_i32_0 = arith.constant 0 : i32
    %c0_i32_1 = arith.constant 0 : i32
    return %arg0, %c0_i32, %c0_i32_0 : i32, i32, i32
  }
}

</mosaic_0001>

<bundles_post_ra>
// kernel: _seq2seq_fused.6
= control target key start
LH: loop header
LB: loop body
LE: loop exit
PB: predicated region body
PF: predicated region fallthrough
CT: control target
= control target key end

     0   :  { %v457_v1 = vmov 0   ;;  %vm113_vm0 = vcmask 261120   ;;  %v33_v13 = vlaneseq  ;;  %s613_s1 = inlined_call_operand.vmem [shape: bf16[32,512], index: 1, kind: input, shape index: {}]   ;;  %s614_s0 = inlined_call_operand.vmem [shape: bf16[64,32], index: 0, kind: input, shape index: {}]   ;;  %s615_s2 = inlined_call_operand.vmem [shape: f32[1,512], index: 2, kind: input, shape index: {}]   ;;  %s616_s3 = inlined_call_operand.vmem [shape: bf16[64,512], index: 3, kind: output, shape index: {}]  }
   0x1   :  { %v441_v0 = vld [vmem:[%s613_s1 + $0x24] ss:$16 sps:$4 sm:$0xff]   ;;  %158 = vmatprep.mubr.bf16.mxu0 %v457_v1  ;;  %231 = vmatprep.mubr.bf16.mxu1 %v457_v1  ;;  %v443_v2 = vld [vmem:[%s613_s1 + $0x2c] ss:$16 sps:$4 sm:$0xff]   ;;  %v445_v3 = vld [vmem:[%s613_s1 + $0x20] ss:$16 sps:$4 sm:$0xff]  }
   0x2   :  { %138 = vmatprep.subr.bf16.mxu0 %v441_v0  ;;  %v446_v4 = vld [vmem:[%s613_s1 + $0x28] ss:$16 sps:$4 sm:$0xff]   ;;  %211 = vmatprep.subr.bf16.mxu1 %v443_v2  ;;  %v447_v5 = vld [vmem:[%s613_s1 + $0x4] ss:$16 sps:$4 sm:$0xff]   ;;  %v449_v6 = vld [vmem:[%s613_s1 + $0xc] ss:$16 sps:$4 sm:$0xff]  }
   0x3   :  { %139 = vmatpush1.bf16.msra.mxu0 %v445_v3  ;;  %212 = vmatpush1.bf16.msra.mxu1 %v446_v4  ;;  %v451_v7 = vld [vmem:[%s613_s1] ss:$16 sps:$4 sm:$0xff]   ;;  %v452_v8 = vld [vmem:[%s613_s1 + $0x8] ss:$16 sps:$4 sm:$0xff]   ;;  %v34_v14 = vshrl.u32 %v33_v13, 7 }
   0x4   :  { %140 = vmatprep.subr.bf16.mxu0 %v447_v5  ;;  %213 = vmatprep.subr.bf16.mxu1 %v449_v6  ;;  %v453_v9 = vld [vmem:[%s614_s0] sm:$0xff]   ;;  %v454_v10 = vld [vmem:[%s614_s0 + $0x8] sm:$0xff]   ;;  %v455_v11 = vld [vmem:[%s614_s0 + $0x10] sm:$0xff]  }
   0x5   :  { %v456_v12 = vld [vmem:[%s614_s0 + $0x18] sm:$0xff]   ;;  %v35_v15 = vsub.s32 0, %v34_v14  ;;  %v43_v16 = vsub.s32 2, %v34_v14  ;;  %v39_v17 = vsub.s32 1, %v34_v14  ;;  %v47_v18 = vsub.s32 3, %v34_v14 }
   0x6   :  { %v31_v19 = vld [vmem:[%s615_s2] sm:$0xf] }
   0x7   :  { %141 = vmatpush1.bf16.msra.mxu0 %v451_v7  ;;  %214 = vmatpush1.bf16.msra.mxu1 %v452_v8  ;;  %v525_v20 = vrot.slane %v31_v19, %v35_v15  ;;  %v527_v21 = vrot.slane %v31_v19, %v43_v16  ;;  %v529_v22 = vrot.slane %v31_v19, %v39_v17 }
   0x8   :  { %v531_v23 = vrot.slane %v31_v19, %v47_v18 }
   0xa   :  { %400 = vmatmul.mubr.msk.bf16.vlgmr.msra.gmra.mxu0 %vm113_vm0, %v453_v9  ;;  %404 = vmatmul.mubr.msk.bf16.vlgmr.msra.gmra.mxu1 %vm113_vm0, %v453_v9 }
   0xb   :  { %168 = vmatprep.mubr.bf16.mxu0 %v457_v1  ;;  %241 = vmatprep.mubr.bf16.mxu1 %v457_v1 }
  0x12   :  { %401 = vmatmul.mubr.msk.bf16.gmra.mxu0 %vm113_vm0, %v454_v10  ;;  %405 = vmatmul.mubr.msk.bf16.gmra.mxu1 %vm113_vm0, %v454_v10 }
  0x13   :  { %178 = vmatprep.mubr.bf16.mxu0 %v457_v1  ;;  %251 = vmatprep.mubr.bf16.mxu1 %v457_v1 }
  0x1a   :  { %402 = vmatmul.mubr.msk.bf16.gmra.mxu0 %vm113_vm0, %v455_v11  ;;  %406 = vmatmul.mubr.msk.bf16.gmra.mxu1 %vm113_vm0, %v455_v11 }
  0x1b   :  { %188 = vmatprep.mubr.bf16.mxu0 %v457_v1  ;;  %261 = vmatprep.mubr.bf16.mxu1 %v457_v1 }
  0x22   :  { %403 = vmatmul.mubr.msk.bf16.gmra.mxu0 %vm113_vm0, %v456_v12  ;;  %407 = vmatmul.mubr.msk.bf16.gmra.mxu1 %vm113_vm0, %v456_v12 }
  0xca   :  { %v160_v24 = vpop.f32.mrf.mxu0  ;;  %v233_v25 = vpop.f32.mrf.mxu1 }
  0xcb   :  { %v161_v28 = vadd.f32 %v160_v24, %v525_v20  ;;  %v234_v29 = vadd.f32 %v233_v25, %v527_v21 }
  0xcc   :  { %v162_v26 = vpop.f32.mrf.mxu0  ;;  %v235_v27 = vpop.f32.mrf.mxu1 }
  0xcd   :  { %v163_v30 = vadd.f32 %v162_v26, %v529_v22  ;;  %v236_v31 = vadd.f32 %v235_v27, %v531_v23 }
  0xce   :  { %v164_v32 = vpop.f32.mrf.mxu0  ;;  %v237_v33 = vpop.f32.mrf.mxu1 }
  0xcf   :  { %v424_v34 = vpack.c.bf16 %v163_v30, %v161_v28  ;;  %v425_v35 = vpack.c.bf16 %v236_v31, %v234_v29  ;;  %v165_v38 = vadd.f32 %v164_v32, %v525_v20  ;;  %v238_v39 = vadd.f32 %v237_v33, %v527_v21 }
  0xd0   :  { %v166_v36 = vpop.f32.mrf.mxu0  ;;  %v239_v37 = vpop.f32.mrf.mxu1 }
  0xd1   :  { %368 = vst [vmem:[%s616_s3] sm:$0xff] %v424_v34  ;;  %369 = vst [vmem:[%s616_s3 + $0x8] sm:$0xff] %v425_v35  ;;  %v167_v40 = vadd.f32 %v166_v36, %v529_v22  ;;  %v240_v41 = vadd.f32 %v239_v37, %v531_v23 }
  0xd2   :  { %v170_v42 = vpop.f32.mrf.mxu0  ;;  %v243_v43 = vpop.f32.mrf.mxu1 }
  0xd3   :  { %v426_v44 = vpack.c.bf16 %v167_v40, %v165_v38  ;;  %v427_v45 = vpack.c.bf16 %v240_v41, %v238_v39  ;;  %v171_v48 = vadd.f32 %v170_v42, %v525_v20  ;;  %v244_v49 = vadd.f32 %v243_v43, %v527_v21 }
  0xd4   :  { %v172_v46 = vpop.f32.mrf.mxu0  ;;  %v245_v47 = vpop.f32.mrf.mxu1 }
  0xd5   :  { %370 = vst [vmem:[%s616_s3 + $0x10] sm:$0xff] %v426_v44  ;;  %371 = vst [vmem:[%s616_s3 + $0x18] sm:$0xff] %v427_v45  ;;  %v173_v50 = vadd.f32 %v172_v46, %v529_v22  ;;  %v246_v51 = vadd.f32 %v245_v47, %v531_v23 }
  0xd6   :  { %v174_v52 = vpop.f32.mrf.mxu0  ;;  %v247_v53 = vpop.f32.mrf.mxu1 }
  0xd7   :  { %v428_v54 = vpack.c.bf16 %v173_v50, %v171_v48  ;;  %v429_v55 = vpack.c.bf16 %v246_v51, %v244_v49  ;;  %v175_v58 = vadd.f32 %v174_v52, %v525_v20  ;;  %v248_v59 = vadd.f32 %v247_v53, %v527_v21 }
  0xd8   :  { %v176_v56 = vpop.f32.mrf.mxu0  ;;  %v249_v57 = vpop.f32.mrf.mxu1 }
  0xd9   :  { %372 = vst [vmem:[%s616_s3 + $0x20] sm:$0xff] %v428_v54  ;;  %373 = vst [vmem:[%s616_s3 + $0x28] sm:$0xff] %v429_v55  ;;  %v177_v60 = vadd.f32 %v176_v56, %v529_v22  ;;  %v250_v61 = vadd.f32 %v249_v57, %v531_v23 }
  0xda   :  { %v180_v62 = vpop.f32.mrf.mxu0  ;;  %v253_v63 = vpop.f32.mrf.mxu1 }
  0xdb   :  { %v430_v0 = vpack.c.bf16 %v177_v60, %v175_v58  ;;  %v431_v1 = vpack.c.bf16 %v250_v61, %v248_v59  ;;  %v181_v4 = vadd.f32 %v180_v62, %v525_v20  ;;  %v254_v5 = vadd.f32 %v253_v63, %v527_v21 }
  0xdc   :  { %v182_v2 = vpop.f32.mrf.mxu0  ;;  %v255_v3 = vpop.f32.mrf.mxu1 }
  0xdd   :  { %374 = vst [vmem:[%s616_s3 + $0x30] sm:$0xff] %v430_v0  ;;  %375 = vst [vmem:[%s616_s3 + $0x38] sm:$0xff] %v431_v1  ;;  %v183_v6 = vadd.f32 %v182_v2, %v529_v22  ;;  %v256_v7 = vadd.f32 %v255_v3, %v531_v23 }
  0xde   :  { %v184_v8 = vpop.f32.mrf.mxu0  ;;  %v257_v9 = vpop.f32.mrf.mxu1 }
  0xdf   :  { %v432_v10 = vpack.c.bf16 %v183_v6, %v181_v4  ;;  %v433_v11 = vpack.c.bf16 %v256_v7, %v254_v5  ;;  %v185_v14 = vadd.f32 %v184_v8, %v525_v20  ;;  %v258_v15 = vadd.f32 %v257_v9, %v527_v21 }
  0xe0   :  { %v186_v12 = vpop.f32.mrf.mxu0  ;;  %v259_v13 = vpop.f32.mrf.mxu1 }
  0xe1   :  { %376 = vst [vmem:[%s616_s3 + $0x40] sm:$0xff] %v432_v10  ;;  %377 = vst [vmem:[%s616_s3 + $0x48] sm:$0xff] %v433_v11  ;;  %v187_v16 = vadd.f32 %v186_v12, %v529_v22  ;;  %v260_v17 = vadd.f32 %v259_v13, %v531_v23 }
  0xe2   :  { %v190_v18 = vpop.f32.mrf.mxu0  ;;  %v263_v19 = vpop.f32.mrf.mxu1 }
  0xe3   :  { %v434_v24 = vpack.c.bf16 %v187_v16, %v185_v14  ;;  %v435_v25 = vpack.c.bf16 %v260_v17, %v258_v15  ;;  %v191_v28 = vadd.f32 %v190_v18, %v525_v20  ;;  %v264_v29 = vadd.f32 %v263_v19, %v527_v21 }
  0xe4   :  { %v192_v26 = vpop.f32.mrf.mxu0  ;;  %v265_v27 = vpop.f32.mrf.mxu1 }
  0xe5   :  { %378 = vst [vmem:[%s616_s3 + $0x50] sm:$0xff] %v434_v24  ;;  %379 = vst [vmem:[%s616_s3 + $0x58] sm:$0xff] %v435_v25  ;;  %v193_v30 = vadd.f32 %v192_v26, %v529_v22  ;;  %v266_v31 = vadd.f32 %v265_v27, %v531_v23 }
  0xe6   :  { %v194_v32 = vpop.f32.mrf.mxu0  ;;  %v267_v33 = vpop.f32.mrf.mxu1 }
  0xe7   :  { %v436_v34 = vpack.c.bf16 %v193_v30, %v191_v28  ;;  %v437_v35 = vpack.c.bf16 %v266_v31, %v264_v29  ;;  %v195_v38 = vadd.f32 %v194_v32, %v525_v20  ;;  %v268_v39 = vadd.f32 %v267_v33, %v527_v21 }
  0xe8   :  { %v196_v36 = vpop.f32.mrf.mxu0  ;;  %v269_v37 = vpop.f32.mrf.mxu1 }
  0xe9   :  { %380 = vst [vmem:[%s616_s3 + $0x60] sm:$0xff] %v436_v34  ;;  %381 = vst [vmem:[%s616_s3 + $0x68] sm:$0xff] %v437_v35  ;;  %v197_v40 = vadd.f32 %v196_v36, %v529_v22  ;;  %v270_v41 = vadd.f32 %v269_v37, %v531_v23 }
  0xeb   :  { %v438_v42 = vpack.c.bf16 %v197_v40, %v195_v38  ;;  %v439_v43 = vpack.c.bf16 %v270_v41, %v268_v39 }
  0xed   :  { %382 = vst [vmem:[%s616_s3 + $0x70] sm:$0xff] %v438_v42  ;;  %383 = vst [vmem:[%s616_s3 + $0x78] sm:$0xff] %v439_v43 }

// kernel: _seq2seq_fused.5
= control target key start
LH: loop header
LB: loop body
LE: loop exit
PB: predicated region body
PF: predicated region fallthrough
CT: control target
= control target key end

     0   :  { %v1447_v1 = vmov 0   ;;  %v1448_v33 = vmov 0.0|0.0   ;;  %s2043_s1 = inlined_call_operand.vmem [shape: bf16[128,512], index: 1, kind: input, shape index: {}]   ;;  %s2044_s0 = inlined_call_operand.vmem [shape: bf16[8,8,512], index: 0, kind: input, shape index: {}]   ;;  %s2045_s3 = inlined_call_operand.vmem [shape: f32[8,128], index: 3, kind: output, shape index: {1}]   ;;  %s2046_s2 = inlined_call_operand.vmem [shape: f32[8,128], index: 2, kind: output, shape index: {0}]  }
   0x1   :  { %v1472_v0 = vld [vmem:[%s2043_s1 + $0xe4] ss:$16 sps:$4 sm:$0xff]   ;;  %253 = vmatprep.mubr.bf16.mxu0 %v1447_v1  ;;  %294 = vmatprep.mubr.bf16.mxu1 %v1447_v1  ;;  %v1479_v2 = vld [vmem:[%s2043_s1 + $0xe0] ss:$16 sps:$4 sm:$0xff]   ;;  %v1502_v6 = vld [vmem:[%s2043_s1 + $0xec] ss:$16 sps:$4 sm:$0xff]  }
   0x2   :  { %221 = vmatprep.subr.bf16.mxu0 %v1472_v0  ;;  %v1485_v3 = vld [vmem:[%s2043_s1 + $0xc4] ss:$16 sps:$4 sm:$0xff]   ;;  %v1491_v4 = vld [vmem:[%s2043_s1 + $0xc0] ss:$16 sps:$4 sm:$0xff]   ;;  %v1507_v7 = vld [vmem:[%s2043_s1 + $0xe8] ss:$16 sps:$4 sm:$0xff]   ;;  %262 = vmatprep.subr.bf16.mxu1 %v1502_v6 }
   0x3   :  { %222 = vmatpush1.bf16.msra.mxu0 %v1479_v2  ;;  %v1497_v5 = vld [vmem:[%s2043_s1 + $0xa4] ss:$16 sps:$4 sm:$0xff]   ;;  %v1513_v8 = vld [vmem:[%s2043_s1 + $0xa0] ss:$16 sps:$4 sm:$0xff]   ;;  %263 = vmatpush1.bf16.msra.mxu1 %v1507_v7  ;;  %v1526_v10 = vld [vmem:[%s2043_s1 + $0xcc] ss:$16 sps:$4 sm:$0xff]  }
   0x4   :  { %223 = vmatprep.subr.bf16.mxu0 %v1485_v3  ;;  %v1520_v9 = vld [vmem:[%s2043_s1 + $0x84] ss:$16 sps:$4 sm:$0xff]   ;;  %v1531_v11 = vld [vmem:[%s2043_s1 + $0xc8] ss:$16 sps:$4 sm:$0xff]   ;;  %264 = vmatprep.subr.bf16.mxu1 %v1526_v10  ;;  %v1538_v12 = vld [vmem:[%s2043_s1 + $0x80] ss:$16 sps:$4 sm:$0xff]  }
   0x5   :  { %v1543_v13 = vld [vmem:[%s2043_s1 + $0x64] ss:$16 sps:$4 sm:$0xff]   ;;  %v1548_v14 = vld [vmem:[%s2043_s1 + $0xac] ss:$16 sps:$4 sm:$0xff]   ;;  %v1555_v15 = vld [vmem:[%s2043_s1 + $0xa8] ss:$16 sps:$4 sm:$0xff]  }
   0x6   :  { %v1561_v16 = vld [vmem:[%s2043_s1 + $0x8c] ss:$16 sps:$4 sm:$0xff]   ;;  %v1567_v17 = vld [vmem:[%s2043_s1 + $0x60] ss:$16 sps:$4 sm:$0xff]   ;;  %v1573_v18 = vld [vmem:[%s2043_s1 + $0x44] ss:$16 sps:$4 sm:$0xff]  }
   0x7   :  { %224 = vmatpush1.bf16.msra.mxu0 %v1491_v4  ;;  %265 = vmatpush1.bf16.msra.mxu1 %v1531_v11  ;;  %v1579_v19 = vld [vmem:[%s2043_s1 + $0x88] ss:$16 sps:$4 sm:$0xff]   ;;  %v1585_v20 = vld [vmem:[%s2043_s1 + $0x6c] ss:$16 sps:$4 sm:$0xff]   ;;  %v1591_v21 = vld [vmem:[%s2043_s1 + $0x40] ss:$16 sps:$4 sm:$0xff]  }
   0x8   :  { %225 = vmatprep.subr.bf16.mxu0 %v1497_v5  ;;  %266 = vmatprep.subr.bf16.mxu1 %v1548_v14  ;;  %v1596_v22 = vld [vmem:[%s2043_s1 + $0x24] ss:$16 sps:$4 sm:$0xff]   ;;  %v1603_v23 = vld [vmem:[%s2043_s1 + $0x68] ss:$16 sps:$4 sm:$0xff]   ;;  %v1609_v24 = vld [vmem:[%s2043_s1 + $0x4c] ss:$16 sps:$4 sm:$0xff]  }
   0x9   :  { %v1615_v25 = vld [vmem:[%s2043_s1 + $0x20] ss:$16 sps:$4 sm:$0xff]   ;;  %v1621_v26 = vld [vmem:[%s2043_s1 + $0x4] ss:$16 sps:$4 sm:$0xff]   ;;  %v1627_v27 = vld [vmem:[%s2043_s1 + $0x48] ss:$16 sps:$4 sm:$0xff]  }
   0xa   :  { %v1633_v28 = vld [vmem:[%s2043_s1 + $0x2c] ss:$16 sps:$4 sm:$0xff]   ;;  %v1639_v29 = vld [vmem:[%s2043_s1] ss:$16 sps:$4 sm:$0xff]   ;;  %v1646_v30 = vld [vmem:[%s2043_s1 + $0x28] ss:$16 sps:$4 sm:$0xff]  }
   0xb   :  { %226 = vmatpush1.bf16.msra.mxu0 %v1513_v8  ;;  %267 = vmatpush1.bf16.msra.mxu1 %v1555_v15  ;;  %v1652_v31 = vld [vmem:[%s2043_s1 + $0xc] ss:$16 sps:$4 sm:$0xff]   ;;  %v1659_v32 = vld [vmem:[%s2043_s1 + $0x8] ss:$16 sps:$4 sm:$0xff]   ;;  %v22_v34 = vld [vmem:[%s2044_s0] sm:$0xff] }
   0xc   :  { %227 = vmatprep.subr.bf16.mxu0 %v1520_v9  ;;  %268 = vmatprep.subr.bf16.mxu1 %v1561_v16  ;;  %v24_v35 = vunpack.c.l.bf16 %v22_v34  ;;  %v25_v36 = vunpack.c.h.bf16 %v22_v34  ;;  %v23_v44 = vld [vmem:[%s2044_s0 + $0x8] sm:$0xff] }
   0xd   :  { %v27_v48 = vunpack.c.h.bf16 %v23_v44  ;;  %v26_v50 = vunpack.c.l.bf16 %v23_v44 }
   0xf   :  { %228 = vmatpush1.bf16.msra.mxu0 %v1538_v12  ;;  %269 = vmatpush1.bf16.msra.mxu1 %v1579_v19 }
  0x10   :  { %229 = vmatprep.subr.bf16.mxu0 %v1543_v13  ;;  %270 = vmatprep.subr.bf16.mxu1 %v1585_v20 }
  0x13   :  { %230 = vmatpush1.bf16.msra.mxu0 %v1567_v17  ;;  %271 = vmatpush1.bf16.msra.mxu1 %v1603_v23 }
  0x14   :  { %231 = vmatprep.subr.bf16.mxu0 %v1573_v18  ;;  %272 = vmatprep.subr.bf16.mxu1 %v1609_v24 }
  0x17   :  { %232 = vmatpush1.bf16.msra.mxu0 %v1591_v21  ;;  %273 = vmatpush1.bf16.msra.mxu1 %v1627_v27 }
  0x18   :  { %233 = vmatprep.subr.bf16.mxu0 %v1596_v22  ;;  %274 = vmatprep.subr.bf16.mxu1 %v1633_v28 }
  0x1b   :  { %234 = vmatpush1.bf16.msra.mxu0 %v1615_v25  ;;  %275 = vmatpush1.bf16.msra.mxu1 %v1646_v30 }
  0x1c   :  { %235 = vmatprep.subr.bf16.mxu0 %v1621_v26  ;;  %276 = vmatprep.subr.bf16.mxu1 %v1652_v31 }
  0x1f   :  { %236 = vmatpush1.bf16.msra.mxu0 %v1639_v29  ;;  %277 = vmatpush1.bf16.msra.mxu1 %v1659_v32 }
  0x20   :  { %339 = vmatprep.subr.bf16.mxu0 %v1472_v0  ;;  %380 = vmatprep.subr.bf16.mxu1 %v1502_v6 }
  0x22   :  { %254 = vmatmul.mubr.bf16.vlgmr.msra.gmra.mxu0 %v1448_v33  ;;  %295 = vmatmul.mubr.bf16.vlgmr.msra.gmra.mxu1 %v1448_v33 }
  0x23   :  { %340 = vmatpush1.bf16.msra.mxu0 %v1479_v2  ;;  %371 = vmatprep.mubr.bf16.mxu0 %v1447_v1 }
  0x24   :  { %341 = vmatprep.subr.bf16.mxu0 %v1485_v3  ;;  %381 = vmatpush1.bf16.msra.mxu1 %v1507_v7 }
  0x25   :  { %382 = vmatprep.subr.bf16.mxu1 %v1526_v10  ;;  %412 = vmatprep.mubr.bf16.mxu1 %v1447_v1 }
  0x27   :  { %342 = vmatpush1.bf16.msra.mxu0 %v1491_v4 }
  0x28   :  { %343 = vmatprep.subr.bf16.mxu0 %v1497_v5  ;;  %383 = vmatpush1.bf16.msra.mxu1 %v1531_v11 }
  0x29   :  { %384 = vmatprep.subr.bf16.mxu1 %v1548_v14 }
  0x2b   :  { %344 = vmatpush1.bf16.msra.mxu0 %v1513_v8 }
  0x2c   :  { %345 = vmatprep.subr.bf16.mxu0 %v1520_v9  ;;  %385 = vmatpush1.bf16.msra.mxu1 %v1555_v15 }
  0x2d   :  { %386 = vmatprep.subr.bf16.mxu1 %v1561_v16 }
  0x2f   :  { %346 = vmatpush1.bf16.msra.mxu0 %v1538_v12 }
  0x30   :  { %347 = vmatprep.subr.bf16.mxu0 %v1543_v13  ;;  %387 = vmatpush1.bf16.msra.mxu1 %v1579_v19 }
  0x31   :  { %388 = vmatprep.subr.bf16.mxu1 %v1585_v20 }
  0x33   :  { %348 = vmatpush1.bf16.msra.mxu0 %v1567_v17 }
  0x34   :  { %349 = vmatprep.subr.bf16.mxu0 %v1573_v18  ;;  %389 = vmatpush1.bf16.msra.mxu1 %v1603_v23 }
  0x35   :  { %390 = vmatprep.subr.bf16.mxu1 %v1609_v24 }
  0x37   :  { %350 = vmatpush1.bf16.msra.mxu0 %v1591_v21 }
  0x38   :  { %351 = vmatprep.subr.bf16.mxu0 %v1596_v22  ;;  %391 = vmatpush1.bf16.msra.mxu1 %v1627_v27 }
  0x39   :  { %392 = vmatprep.subr.bf16.mxu1 %v1633_v28 }
  0x3b   :  { %352 = vmatpush1.bf16.msra.mxu0 %v1615_v25 }
  0x3c   :  { %353 = vmatprep.subr.bf16.mxu0 %v1621_v26  ;;  %393 = vmatpush1.bf16.msra.mxu1 %v1646_v30 }
  0x3d   :  { %394 = vmatprep.subr.bf16.mxu1 %v1652_v31 }
  0x3f   :  { %354 = vmatpush1.bf16.msra.mxu0 %v1639_v29 }
  0x40   :  { %457 = vmatprep.subr.bf16.mxu0 %v1472_v0  ;;  %395 = vmatpush1.bf16.msra.mxu1 %v1659_v32 }
  0x41   :  { %498 = vmatprep.subr.bf16.mxu1 %v1502_v6 }
  0xe2   :  { %v255_v37 = vpop.f32.mrf.mxu0  ;;  %v296_v45 = vpop.f32.mrf.mxu1 }
  0xe3   :  { %v303_v38 = vadd.f32 %v255_v37, %v24_v35  ;;  %v305_v53 = vadd.f32 %v296_v45, %v26_v50 }
  0xe4   :  { %v257_v39 = vpop.f32.mrf.mxu0  ;;  %v298_v47 = vpop.f32.mrf.mxu1 }
  0xe5   :  { %v1199_v40 = vmul.f32 -1.442695, %v303_v38  ;;  %v304_v41 = vadd.f32 %v257_v39, %v25_v36  ;;  %v306_v52 = vadd.f32 %v298_v47, %v27_v48 }
  0xe6   :  { %v259_v42 = vpop.f32.mrf.mxu0  ;;  %v300_v49 = vpop.f32.mrf.mxu1 }
  0xe7   :  { %1287 = vpow2.f32 %v1199_v40  ;;  %v1200_v43 = vmul.f32 -1.442695, %v304_v41  ;;  %v1201_v54 = vmul.f32 -1.442695, %v306_v52  ;;  %v1202_v40 = vld [vmem:[%s2044_s0 + $0x10] sm:$0xff] }
  0xe8   :  { %v260_v46 = vpop.f32.mrf.mxu0  ;;  %v301_v51 = vpop.f32.mrf.mxu1  ;;  %v334_v41 = vunpack.c.l.bf16 %v1202_v40  ;;  %v335_v42 = vunpack.c.h.bf16 %v1202_v40 }
  0xe9   :  { %1289 = vpow2.f32 %v1200_v43 }
  0xea   :  { %1291 = vtanh.f32 %v305_v53 }
  0xeb   :  { %1293 = vpow2.f32 %v1201_v54 }
  0xf4   :  { %v1288_v55 = vpop.eup %1287 }
  0xf5   :  { %v310_v56 = vadd.f32 1.0, %v1288_v55  ;;  %v1203_v55 = vld [vmem:[%s2044_s0 + $0x18] sm:$0xff] }
  0xf6   :  { %v1290_v57 = vpop.eup %1289 }
  0xf7   :  { %1295 = vrcp.f32 %v310_v56  ;;  %v316_v58 = vadd.f32 1.0, %v1290_v57  ;;  %v1292_v59 = vpop.eup %1291  ;;  %v337_v56 = vunpack.c.h.bf16 %v1203_v55 }
  0xf8   :  { %v1294_v60 = vpop.eup %1293 }
  0xf9   :  { %1297 = vrcp.f32 %v316_v58  ;;  %v323_v63 = vadd.f32 1.0, %v1294_v60  ;;  %v336_v58 = vunpack.c.l.bf16 %v1203_v55 }
  0xfb   :  { %1299 = vrcp.f32 %v323_v63 }
 0x104   :  { %v1296_v61 = vpop.eup %1295 }
 0x105   :  { %v327_v34 = vmul.f32 %v1296_v61, %v1292_v59 }
 0x106   :  { %v1298_v62 = vpop.eup %1297 }
 0x107   :  { %v326_v33 = vmul.f32 0.0, %v1298_v62 }
 0x108   :  { %v1300_v36 = vpop.eup %1299 }
 0x109   :  { %v1705_v35 = vadd.f32 %v327_v34, %v326_v33 }
 0x10b   :  { %1301 = vtanh.f32 %v1705_v35 }
 0x118   :  { %v1302_v37 = vpop.eup %1301 }
 0x119   :  { %v330_v38 = vmul.f32 %v1302_v37, %v1300_v36 }
 0x11b   :  { %v338_v39 = vpack.c.bf16 %v330_v38, %v330_v38 }
 0x11d   :  { %372 = vmatmul.mubr.bf16.vlgmr.msra.gmra.mxu0 %v338_v39  ;;  %413 = vmatmul.mubr.bf16.vlgmr.msra.gmra.mxu1 %v338_v39 }
 0x11e   :  { %458 = vmatpush1.bf16.msra.mxu0 %v1479_v2  ;;  %499 = vmatpush1.bf16.msra.mxu1 %v1507_v7 }
 0x11f   :  { %459 = vmatprep.subr.bf16.mxu0 %v1485_v3  ;;  %500 = vmatprep.subr.bf16.mxu1 %v1526_v10 }
 0x120   :  { %489 = vmatprep.mubr.bf16.mxu0 %v1447_v1  ;;  %530 = vmatprep.mubr.bf16.mxu1 %v1447_v1 }
 0x122   :  { %460 = vmatpush1.bf16.msra.mxu0 %v1491_v4  ;;  %501 = vmatpush1.bf16.msra.mxu1 %v1531_v11 }
 0x123   :  { %461 = vmatprep.subr.bf16.mxu0 %v1497_v5  ;;  %502 = vmatprep.subr.bf16.mxu1 %v1548_v14 }
 0x126   :  { %462 = vmatpush1.bf16.msra.mxu0 %v1513_v8  ;;  %503 = vmatpush1.bf16.msra.mxu1 %v1555_v15 }
 0x127   :  { %463 = vmatprep.subr.bf16.mxu0 %v1520_v9  ;;  %504 = vmatprep.subr.bf16.mxu1 %v1561_v16 }
 0x12a   :  { %464 = vmatpush1.bf16.msra.mxu0 %v1538_v12  ;;  %505 = vmatpush1.bf16.msra.mxu1 %v1579_v19 }
 0x12b   :  { %465 = vmatprep.subr.bf16.mxu0 %v1543_v13  ;;  %506 = vmatprep.subr.bf16.mxu1 %v1585_v20 }
 0x12e   :  { %466 = vmatpush1.bf16.msra.mxu0 %v1567_v17  ;;  %507 = vmatpush1.bf16.msra.mxu1 %v1603_v23 }
 0x12f   :  { %467 = vmatprep.subr.bf16.mxu0 %v1573_v18  ;;  %508 = vmatprep.subr.bf16.mxu1 %v1609_v24 }
 0x132   :  { %468 = vmatpush1.bf16.msra.mxu0 %v1591_v21  ;;  %509 = vmatpush1.bf16.msra.mxu1 %v1627_v27 }
 0x133   :  { %469 = vmatprep.subr.bf16.mxu0 %v1596_v22  ;;  %510 = vmatprep.subr.bf16.mxu1 %v1633_v28 }
 0x136   :  { %470 = vmatpush1.bf16.msra.mxu0 %v1615_v25  ;;  %511 = vmatpush1.bf16.msra.mxu1 %v1646_v30 }
 0x137   :  { %471 = vmatprep.subr.bf16.mxu0 %v1621_v26  ;;  %512 = vmatprep.subr.bf16.mxu1 %v1652_v31 }
 0x13a   :  { %472 = vmatpush1.bf16.msra.mxu0 %v1639_v29  ;;  %513 = vmatpush1.bf16.msra.mxu1 %v1659_v32 }
 0x13b   :  { %575 = vmatprep.subr.bf16.mxu0 %v1472_v0  ;;  %616 = vmatprep.subr.bf16.mxu1 %v1502_v6 }
 0x1dd   :  { %v373_v43 = vpop.f32.mrf.mxu0  ;;  %v414_v44 = vpop.f32.mrf.mxu1 }
 0x1de   :  { %v421_v45 = vadd.f32 %v373_v43, %v334_v41  ;;  %v423_v61 = vadd.f32 %v414_v44, %v336_v58 }
 0x1df   :  { %v375_v46 = vpop.f32.mrf.mxu0  ;;  %v416_v47 = vpop.f32.mrf.mxu1 }
 0x1e0   :  { %v1204_v48 = vmul.f32 -1.442695, %v421_v45  ;;  %v422_v49 = vadd.f32 %v375_v46, %v335_v42  ;;  %v424_v57 = vadd.f32 %v416_v47, %v337_v56 }
 0x1e1   :  { %v377_v50 = vpop.f32.mrf.mxu0  ;;  %v418_v51 = vpop.f32.mrf.mxu1 }
 0x1e2   :  { %1303 = vpow2.f32 %v1204_v48  ;;  %v1205_v52 = vmul.f32 -1.442695, %v422_v49  ;;  %v1206_v59 = vmul.f32 -1.442695, %v424_v57 }
 0x1e3   :  { %v378_v53 = vpop.f32.mrf.mxu0  ;;  %v419_v54 = vpop.f32.mrf.mxu1 }
 0x1e4   :  { %1305 = vpow2.f32 %v1205_v52 }
 0x1e5   :  { %1307 = vpow2.f32 %v1206_v59 }
 0x1ef   :  { %v1304_v60 = vpop.eup %1303 }
 0x1f0   :  { %v428_v62 = vadd.f32 1.0, %v1304_v60 }
 0x1f1   :  { %v1306_v63 = vpop.eup %1305 }
 0x1f2   :  { %1309 = vrcp.f32 %v428_v62  ;;  %v434_v33 = vadd.f32 1.0, %v1306_v63  ;;  %v1308_v34 = vpop.eup %1307 }
 0x1f3   :  { %1311 = vtanh.f32 %v423_v61  ;;  %v441_v39 = vadd.f32 1.0, %v1308_v34  ;;  %v1208_v61 = vld [vmem:[%s2044_s0 + $0x28] sm:$0xff] }
 0x1f4   :  { %1313 = vrcp.f32 %v434_v33  ;;  %v455_v62 = vunpack.c.h.bf16 %v1208_v61  ;;  %v454_v33 = vunpack.c.l.bf16 %v1208_v61 }
 0x1f5   :  { %1315 = vrcp.f32 %v441_v39 }
 0x1ff   :  { %v1310_v36 = vpop.eup %1309 }
 0x200   :  { %v1312_v37 = vpop.eup %1311 }
 0x201   :  { %v1314_v38 = vpop.eup %1313  ;;  %v445_v40 = vmul.f32 %v1312_v37, %v1310_v36 }
 0x202   :  { %v444_v41 = vmul.f32 %v1314_v38, %v1705_v35  ;;  %v1316_v43 = vpop.eup %1315  ;;  %v1207_v35 = vld [vmem:[%s2044_s0 + $0x20] sm:$0xff] }
 0x203   :  { %v452_v47 = vunpack.c.l.bf16 %v1207_v35  ;;  %v453_v48 = vunpack.c.h.bf16 %v1207_v35 }
 0x204   :  { %v1749_v42 = vadd.f32 %v445_v40, %v444_v41 }
 0x206   :  { %1317 = vtanh.f32 %v1749_v42 }
 0x213   :  { %v1318_v44 = vpop.eup %1317 }
 0x214   :  { %v448_v45 = vmul.f32 %v1318_v44, %v1316_v43 }
 0x216   :  { %v456_v46 = vpack.c.bf16 %v448_v45, %v448_v45 }
 0x218   :  { %490 = vmatmul.mubr.bf16.vlgmr.msra.gmra.mxu0 %v456_v46  ;;  %531 = vmatmul.mubr.bf16.vlgmr.msra.gmra.mxu1 %v456_v46 }
 0x219   :  { %576 = vmatpush1.bf16.msra.mxu0 %v1479_v2  ;;  %617 = vmatpush1.bf16.msra.mxu1 %v1507_v7 }
 0x21a   :  { %577 = vmatprep.subr.bf16.mxu0 %v1485_v3  ;;  %618 = vmatprep.subr.bf16.mxu1 %v1526_v10 }
 0x21b   :  { %607 = vmatprep.mubr.bf16.mxu0 %v1447_v1  ;;  %648 = vmatprep.mubr.bf16.mxu1 %v1447_v1 }
 0x21d   :  { %578 = vmatpush1.bf16.msra.mxu0 %v1491_v4  ;;  %619 = vmatpush1.bf16.msra.mxu1 %v1531_v11 }
 0x21e   :  { %579 = vmatprep.subr.bf16.mxu0 %v1497_v5  ;;  %620 = vmatprep.subr.bf16.mxu1 %v1548_v14 }
 0x221   :  { %580 = vmatpush1.bf16.msra.mxu0 %v1513_v8  ;;  %621 = vmatpush1.bf16.msra.mxu1 %v1555_v15 }
 0x222   :  { %581 = vmatprep.subr.bf16.mxu0 %v1520_v9  ;;  %622 = vmatprep.subr.bf16.mxu1 %v1561_v16 }
 0x225   :  { %582 = vmatpush1.bf16.msra.mxu0 %v1538_v12  ;;  %623 = vmatpush1.bf16.msra.mxu1 %v1579_v19 }
 0x226   :  { %583 = vmatprep.subr.bf16.mxu0 %v1543_v13  ;;  %624 = vmatprep.subr.bf16.mxu1 %v1585_v20 }
 0x229   :  { %584 = vmatpush1.bf16.msra.mxu0 %v1567_v17  ;;  %625 = vmatpush1.bf16.msra.mxu1 %v1603_v23 }
 0x22a   :  { %585 = vmatprep.subr.bf16.mxu0 %v1573_v18  ;;  %626 = vmatprep.subr.bf16.mxu1 %v1609_v24 }
 0x22d   :  { %586 = vmatpush1.bf16.msra.mxu0 %v1591_v21  ;;  %627 = vmatpush1.bf16.msra.mxu1 %v1627_v27 }
 0x22e   :  { %587 = vmatprep.subr.bf16.mxu0 %v1596_v22  ;;  %628 = vmatprep.subr.bf16.mxu1 %v1633_v28 }
 0x231   :  { %588 = vmatpush1.bf16.msra.mxu0 %v1615_v25  ;;  %629 = vmatpush1.bf16.msra.mxu1 %v1646_v30 }
 0x232   :  { %589 = vmatprep.subr.bf16.mxu0 %v1621_v26  ;;  %630 = vmatprep.subr.bf16.mxu1 %v1652_v31 }
 0x235   :  { %590 = vmatpush1.bf16.msra.mxu0 %v1639_v29  ;;  %631 = vmatpush1.bf16.msra.mxu1 %v1659_v32 }
 0x236   :  { %693 = vmatprep.subr.bf16.mxu0 %v1472_v0  ;;  %734 = vmatprep.subr.bf16.mxu1 %v1502_v6 }
 0x2d8   :  { %v491_v49 = vpop.f32.mrf.mxu0  ;;  %v532_v50 = vpop.f32.mrf.mxu1 }
 0x2d9   :  { %v539_v51 = vadd.f32 %v491_v49, %v452_v47  ;;  %v541_v37 = vadd.f32 %v532_v50, %v454_v33 }
 0x2da   :  { %v493_v52 = vpop.f32.mrf.mxu0  ;;  %v534_v53 = vpop.f32.mrf.mxu1 }
 0x2db   :  { %v1209_v54 = vmul.f32 -1.442695, %v539_v51  ;;  %v540_v55 = vadd.f32 %v493_v52, %v453_v48  ;;  %v542_v63 = vadd.f32 %v534_v53, %v455_v62 }
 0x2dc   :  { %v495_v56 = vpop.f32.mrf.mxu0  ;;  %v536_v57 = vpop.f32.mrf.mxu1 }
 0x2dd   :  { %1319 = vpow2.f32 %v1209_v54  ;;  %v1210_v58 = vmul.f32 -1.442695, %v540_v55  ;;  %v1211_v34 = vmul.f32 -1.442695, %v542_v63 }
 0x2de   :  { %v496_v59 = vpop.f32.mrf.mxu0  ;;  %v537_v60 = vpop.f32.mrf.mxu1 }
 0x2df   :  { %1321 = vpow2.f32 %v1210_v58 }
 0x2e0   :  { %1323 = vpow2.f32 %v1211_v34 }
 0x2ea   :  { %v1320_v36 = vpop.eup %1319 }
 0x2eb   :  { %v546_v38 = vadd.f32 1.0, %v1320_v36 }
 0x2ec   :  { %v1322_v39 = vpop.eup %1321 }
 0x2ed   :  { %1325 = vrcp.f32 %v546_v38  ;;  %v552_v40 = vadd.f32 1.0, %v1322_v39  ;;  %v1324_v41 = vpop.eup %1323 }
 0x2ee   :  { %1327 = vtanh.f32 %v541_v37  ;;  %v559_v46 = vadd.f32 1.0, %v1324_v41  ;;  %v1213_v37 = vld [vmem:[%s2044_s0 + $0x38] sm:$0xff] }
 0x2ef   :  { %1329 = vrcp.f32 %v552_v40  ;;  %v573_v38 = vunpack.c.h.bf16 %v1213_v37  ;;  %v572_v40 = vunpack.c.l.bf16 %v1213_v37 }
 0x2f0   :  { %1331 = vrcp.f32 %v559_v46 }
 0x2fa   :  { %v1326_v43 = vpop.eup %1325 }
 0x2fb   :  { %v1328_v44 = vpop.eup %1327 }
 0x2fc   :  { %v1330_v45 = vpop.eup %1329  ;;  %v563_v35 = vmul.f32 %v1328_v44, %v1326_v43 }
 0x2fd   :  { %v562_v47 = vmul.f32 %v1330_v45, %v1749_v42  ;;  %v1332_v49 = vpop.eup %1331  ;;  %v1212_v42 = vld [vmem:[%s2044_s0 + $0x30] sm:$0xff] }
 0x2fe   :  { %v570_v53 = vunpack.c.l.bf16 %v1212_v42  ;;  %v571_v54 = vunpack.c.h.bf16 %v1212_v42 }
 0x2ff   :  { %v1793_v48 = vadd.f32 %v563_v35, %v562_v47 }
 0x301   :  { %1333 = vtanh.f32 %v1793_v48 }
 0x30e   :  { %v1334_v50 = vpop.eup %1333 }
 0x30f   :  { %v566_v51 = vmul.f32 %v1334_v50, %v1332_v49 }
 0x311   :  { %v574_v52 = vpack.c.bf16 %v566_v51, %v566_v51 }
 0x313   :  { %608 = vmatmul.mubr.bf16.vlgmr.msra.gmra.mxu0 %v574_v52  ;;  %649 = vmatmul.mubr.bf16.vlgmr.msra.gmra.mxu1 %v574_v52 }
 0x314   :  { %694 = vmatpush1.bf16.msra.mxu0 %v1479_v2  ;;  %735 = vmatpush1.bf16.msra.mxu1 %v1507_v7 }
 0x315   :  { %695 = vmatprep.subr.bf16.mxu0 %v1485_v3  ;;  %736 = vmatprep.subr.bf16.mxu1 %v1526_v10 }
 0x316   :  { %725 = vmatprep.mubr.bf16.mxu0 %v1447_v1  ;;  %766 = vmatprep.mubr.bf16.mxu1 %v1447_v1 }
 0x318   :  { %696 = vmatpush1.bf16.msra.mxu0 %v1491_v4  ;;  %737 = vmatpush1.bf16.msra.mxu1 %v1531_v11 }
 0x319   :  { %697 = vmatprep.subr.bf16.mxu0 %v1497_v5  ;;  %738 = vmatprep.subr.bf16.mxu1 %v1548_v14 }
 0x31c   :  { %698 = vmatpush1.bf16.msra.mxu0 %v1513_v8  ;;  %739 = vmatpush1.bf16.msra.mxu1 %v1555_v15 }
 0x31d   :  { %699 = vmatprep.subr.bf16.mxu0 %v1520_v9  ;;  %740 = vmatprep.subr.bf16.mxu1 %v1561_v16 }
 0x320   :  { %700 = vmatpush1.bf16.msra.mxu0 %v1538_v12  ;;  %741 = vmatpush1.bf16.msra.mxu1 %v1579_v19 }
 0x321   :  { %701 = vmatprep.subr.bf16.mxu0 %v1543_v13  ;;  %742 = vmatprep.subr.bf16.mxu1 %v1585_v20 }
 0x324   :  { %702 = vmatpush1.bf16.msra.mxu0 %v1567_v17  ;;  %743 = vmatpush1.bf16.msra.mxu1 %v1603_v23 }
 0x325   :  { %703 = vmatprep.subr.bf16.mxu0 %v1573_v18  ;;  %744 = vmatprep.subr.bf16.mxu1 %v1609_v24 }
 0x328   :  { %704 = vmatpush1.bf16.msra.mxu0 %v1591_v21  ;;  %745 = vmatpush1.bf16.msra.mxu1 %v1627_v27 }
 0x329   :  { %705 = vmatprep.subr.bf16.mxu0 %v1596_v22  ;;  %746 = vmatprep.subr.bf16.mxu1 %v1633_v28 }
 0x32c   :  { %706 = vmatpush1.bf16.msra.mxu0 %v1615_v25  ;;  %747 = vmatpush1.bf16.msra.mxu1 %v1646_v30 }
 0x32d   :  { %707 = vmatprep.subr.bf16.mxu0 %v1621_v26  ;;  %748 = vmatprep.subr.bf16.mxu1 %v1652_v31 }
 0x330   :  { %708 = vmatpush1.bf16.msra.mxu0 %v1639_v29  ;;  %749 = vmatpush1.bf16.msra.mxu1 %v1659_v32 }
 0x331   :  { %811 = vmatprep.subr.bf16.mxu0 %v1472_v0  ;;  %852 = vmatprep.subr.bf16.mxu1 %v1502_v6 }
 0x3d3   :  { %v609_v55 = vpop.f32.mrf.mxu0  ;;  %v650_v56 = vpop.f32.mrf.mxu1 }
 0x3d4   :  { %v657_v57 = vadd.f32 %v609_v55, %v570_v53  ;;  %v659_v44 = vadd.f32 %v650_v56, %v572_v40 }
 0x3d5   :  { %v611_v58 = vpop.f32.mrf.mxu0  ;;  %v652_v59 = vpop.f32.mrf.mxu1 }
 0x3d6   :  { %v1214_v60 = vmul.f32 -1.442695, %v657_v57  ;;  %v658_v61 = vadd.f32 %v611_v58, %v571_v54  ;;  %v660_v39 = vadd.f32 %v652_v59, %v573_v38 }
 0x3d7   :  { %v613_v62 = vpop.f32.mrf.mxu0  ;;  %v654_v63 = vpop.f32.mrf.mxu1 }
 0x3d8   :  { %1335 = vpow2.f32 %v1214_v60  ;;  %v1215_v33 = vmul.f32 -1.442695, %v658_v61  ;;  %v1216_v41 = vmul.f32 -1.442695, %v660_v39 }
 0x3d9   :  { %v614_v34 = vpop.f32.mrf.mxu0  ;;  %v655_v36 = vpop.f32.mrf.mxu1 }
 0x3da   :  { %1337 = vpow2.f32 %v1215_v33 }
 0x3db   :  { %1339 = vpow2.f32 %v1216_v41 }
 0x3e5   :  { %v1336_v43 = vpop.eup %1335 }
 0x3e6   :  { %v664_v45 = vadd.f32 1.0, %v1336_v43 }
 0x3e7   :  { %v1338_v46 = vpop.eup %1337 }
 0x3e8   :  { %1341 = vrcp.f32 %v664_v45  ;;  %v670_v35 = vadd.f32 1.0, %v1338_v46  ;;  %v1340_v47 = vpop.eup %1339 }
 0x3e9   :  { %1343 = vtanh.f32 %v659_v44  ;;  %v677_v52 = vadd.f32 1.0, %v1340_v47 }
 0x3ea   :  { %1345 = vrcp.f32 %v670_v35 }
 0x3eb   :  { %1347 = vrcp.f32 %v677_v52 }
 0x3f5   :  { %v1342_v49 = vpop.eup %1341 }
 0x3f6   :  { %v1344_v50 = vpop.eup %1343 }
 0x3f7   :  { %v1346_v51 = vpop.eup %1345  ;;  %v681_v42 = vmul.f32 %v1344_v50, %v1342_v49 }
 0x3f8   :  { %v680_v53 = vmul.f32 %v1346_v51, %v1793_v48  ;;  %v1348_v55 = vpop.eup %1347  ;;  %v1217_v48 = vld [vmem:[%s2044_s0 + $0x40] sm:$0xff] }
 0x3f9   :  { %v688_v59 = vunpack.c.l.bf16 %v1217_v48  ;;  %v689_v60 = vunpack.c.h.bf16 %v1217_v48 }
 0x3fa   :  { %v1837_v54 = vadd.f32 %v681_v42, %v680_v53 }
 0x3fc   :  { %1349 = vtanh.f32 %v1837_v54 }
 0x409   :  { %v1350_v56 = vpop.eup %1349 }
 0x40a   :  { %v684_v57 = vmul.f32 %v1350_v56, %v1348_v55 }
 0x40c   :  { %v692_v58 = vpack.c.bf16 %v684_v57, %v684_v57 }
 0x40e   :  { %726 = vmatmul.mubr.bf16.vlgmr.msra.gmra.mxu0 %v692_v58  ;;  %767 = vmatmul.mubr.bf16.vlgmr.msra.gmra.mxu1 %v692_v58 }
 0x40f   :  { %812 = vmatpush1.bf16.msra.mxu0 %v1479_v2  ;;  %853 = vmatpush1.bf16.msra.mxu1 %v1507_v7 }
 0x410   :  { %813 = vmatprep.subr.bf16.mxu0 %v1485_v3  ;;  %854 = vmatprep.subr.bf16.mxu1 %v1526_v10 }
 0x411   :  { %843 = vmatprep.mubr.bf16.mxu0 %v1447_v1  ;;  %884 = vmatprep.mubr.bf16.mxu1 %v1447_v1 }
 0x413   :  { %814 = vmatpush1.bf16.msra.mxu0 %v1491_v4  ;;  %855 = vmatpush1.bf16.msra.mxu1 %v1531_v11 }
 0x414   :  { %815 = vmatprep.subr.bf16.mxu0 %v1497_v5  ;;  %856 = vmatprep.subr.bf16.mxu1 %v1548_v14 }
 0x417   :  { %816 = vmatpush1.bf16.msra.mxu0 %v1513_v8  ;;  %857 = vmatpush1.bf16.msra.mxu1 %v1555_v15 }
 0x418   :  { %817 = vmatprep.subr.bf16.mxu0 %v1520_v9  ;;  %858 = vmatprep.subr.bf16.mxu1 %v1561_v16 }
 0x41b   :  { %818 = vmatpush1.bf16.msra.mxu0 %v1538_v12  ;;  %859 = vmatpush1.bf16.msra.mxu1 %v1579_v19 }
 0x41c   :  { %819 = vmatprep.subr.bf16.mxu0 %v1543_v13  ;;  %860 = vmatprep.subr.bf16.mxu1 %v1585_v20 }
 0x41f   :  { %820 = vmatpush1.bf16.msra.mxu0 %v1567_v17  ;;  %861 = vmatpush1.bf16.msra.mxu1 %v1603_v23 }
 0x420   :  { %821 = vmatprep.subr.bf16.mxu0 %v1573_v18  ;;  %862 = vmatprep.subr.bf16.mxu1 %v1609_v24 }
 0x423   :  { %822 = vmatpush1.bf16.msra.mxu0 %v1591_v21  ;;  %863 = vmatpush1.bf16.msra.mxu1 %v1627_v27 }
 0x424   :  { %823 = vmatprep.subr.bf16.mxu0 %v1596_v22  ;;  %864 = vmatprep.subr.bf16.mxu1 %v1633_v28 }
 0x427   :  { %824 = vmatpush1.bf16.msra.mxu0 %v1615_v25  ;;  %865 = vmatpush1.bf16.msra.mxu1 %v1646_v30 }
 0x428   :  { %825 = vmatprep.subr.bf16.mxu0 %v1621_v26  ;;  %866 = vmatprep.subr.bf16.mxu1 %v1652_v31 }
 0x42b   :  { %826 = vmatpush1.bf16.msra.mxu0 %v1639_v29  ;;  %867 = vmatpush1.bf16.msra.mxu1 %v1659_v32 }
 0x42c   :  { %929 = vmatprep.subr.bf16.mxu0 %v1472_v0  ;;  %970 = vmatprep.subr.bf16.mxu1 %v1502_v6  ;;  %v1218_v6 = vld [vmem:[%s2044_s0 + $0x48] sm:$0xff] }
 0x42d   :  { %v691_v43 = vunpack.c.h.bf16 %v1218_v6  ;;  %v690_v45 = vunpack.c.l.bf16 %v1218_v6  ;;  %v1419_v6 = vld [vmem:[%s2043_s1 + $0xc4] ss:$16 sps:$4 sm:$0xff]  }
 0x4ce   :  { %v727_v61 = vpop.f32.mrf.mxu0  ;;  %v768_v62 = vpop.f32.mrf.mxu1 }
 0x4cf   :  { %v775_v63 = vadd.f32 %v727_v61, %v688_v59  ;;  %v777_v47 = vadd.f32 %v768_v62, %v690_v45  ;;  %v1422_v45 = vld [vmem:[%s2043_s1 + $0xc8] ss:$16 sps:$4 sm:$0xff]  }
 0x4d0   :  { %v729_v33 = vpop.f32.mrf.mxu0  ;;  %v770_v34 = vpop.f32.mrf.mxu1 }
 0x4d1   :  { %v1219_v36 = vmul.f32 -1.442695, %v775_v63  ;;  %v776_v37 = vadd.f32 %v729_v33, %v689_v60  ;;  %v778_v44 = vadd.f32 %v770_v34, %v691_v43  ;;  %v1420_v43 = vld [vmem:[%s2043_s1 + $0xcc] ss:$16 sps:$4 sm:$0xff]  }
 0x4d2   :  { %v731_v38 = vpop.f32.mrf.mxu0  ;;  %v772_v39 = vpop.f32.mrf.mxu1 }
 0x4d3   :  { %1351 = vpow2.f32 %v1219_v36  ;;  %v1220_v40 = vmul.f32 -1.442695, %v776_v37  ;;  %v1221_v46 = vmul.f32 -1.442695, %v778_v44  ;;  %v1421_v44 = vld [vmem:[%s2043_s1 + $0xc0] ss:$16 sps:$4 sm:$0xff]  }
 0x4d4   :  { %v732_v0 = vpop.f32.mrf.mxu0  ;;  %v773_v41 = vpop.f32.mrf.mxu1 }
 0x4d5   :  { %1353 = vpow2.f32 %v1220_v40  ;;  %v1417_v0 = vld [vmem:[%s2043_s1 + $0xe0] ss:$16 sps:$4 sm:$0xff]   ;;  %v1418_v41 = vld [vmem:[%s2043_s1 + $0xe8] ss:$16 sps:$4 sm:$0xff]  }
 0x4d6   :  { %1355 = vpow2.f32 %v1221_v46  ;;  %v1423_v46 = vld [vmem:[%s2043_s1 + $0xa4] ss:$16 sps:$4 sm:$0xff]  }
 0x4e0   :  { %v1352_v35 = vpop.eup %1351 }
 0x4e1   :  { %v782_v49 = vadd.f32 1.0, %v1352_v35  ;;  %v1424_v35 = vld [vmem:[%s2043_s1 + $0xac] ss:$16 sps:$4 sm:$0xff]  }
 0x4e2   :  { %v1354_v50 = vpop.eup %1353 }
 0x4e3   :  { %1357 = vrcp.f32 %v782_v49  ;;  %v788_v51 = vadd.f32 1.0, %v1354_v50  ;;  %v1356_v52 = vpop.eup %1355  ;;  %v1427_v49 = vld [vmem:[%s2043_s1 + $0x84] ss:$16 sps:$4 sm:$0xff]   ;;  %v1428_v50 = vld [vmem:[%s2043_s1 + $0x8c] ss:$16 sps:$4 sm:$0xff]  }
 0x4e4   :  { %1359 = vtanh.f32 %v777_v47  ;;  %v795_v56 = vadd.f32 1.0, %v1356_v52  ;;  %v1426_v47 = vld [vmem:[%s2043_s1 + $0xa8] ss:$16 sps:$4 sm:$0xff]  }
 0x4e5   :  { %1361 = vrcp.f32 %v788_v51  ;;  %v1429_v51 = vld [vmem:[%s2043_s1 + $0x80] ss:$16 sps:$4 sm:$0xff]   ;;  %v1430_v52 = vld [vmem:[%s2043_s1 + $0x88] ss:$16 sps:$4 sm:$0xff]  }
 0x4e6   :  { %1363 = vrcp.f32 %v795_v56  ;;  %v1434_v56 = vld [vmem:[%s2043_s1 + $0x68] ss:$16 sps:$4 sm:$0xff]  }
 0x4f0   :  { %v1358_v42 = vpop.eup %1357 }
 0x4f1   :  { %v1360_v53 = vpop.eup %1359 }
 0x4f2   :  { %v1362_v55 = vpop.eup %1361  ;;  %v799_v57 = vmul.f32 %v1360_v53, %v1358_v42  ;;  %v1431_v42 = vld [vmem:[%s2043_s1 + $0x64] ss:$16 sps:$4 sm:$0xff]   ;;  %v1432_v53 = vld [vmem:[%s2043_s1 + $0x6c] ss:$16 sps:$4 sm:$0xff]  }
 0x4f3   :  { %v798_v58 = vmul.f32 %v1362_v55, %v1837_v54  ;;  %v1364_v59 = vpop.eup %1363  ;;  %v1433_v55 = vld [vmem:[%s2043_s1 + $0x60] ss:$16 sps:$4 sm:$0xff]  }
 0x4f5   :  { %v1881_v48 = vadd.f32 %v799_v57, %v798_v58  ;;  %v1435_v57 = vld [vmem:[%s2043_s1 + $0x44] ss:$16 sps:$4 sm:$0xff]   ;;  %v1436_v58 = vld [vmem:[%s2043_s1 + $0x4c] ss:$16 sps:$4 sm:$0xff]  }
 0x4f7   :  { %1365 = vtanh.f32 %v1881_v48 }
 0x504   :  { %v1366_v60 = vpop.eup %1365 }
 0x505   :  { %v802_v61 = vmul.f32 %v1366_v60, %v1364_v59  ;;  %v1438_v59 = vld [vmem:[%s2043_s1 + $0x48] ss:$16 sps:$4 sm:$0xff]   ;;  %v1439_v60 = vld [vmem:[%s2043_s1 + $0x24] ss:$16 sps:$4 sm:$0xff]  }
 0x507   :  { %v810_v62 = vpack.c.bf16 %v802_v61, %v802_v61  ;;  %v1440_v61 = vld [vmem:[%s2043_s1 + $0x2c] ss:$16 sps:$4 sm:$0xff]  }
 0x509   :  { %844 = vmatmul.mubr.bf16.vlgmr.msra.gmra.mxu0 %v810_v62  ;;  %885 = vmatmul.mubr.bf16.vlgmr.msra.gmra.mxu1 %v810_v62  ;;  %v1441_v62 = vld [vmem:[%s2043_s1 + $0x20] ss:$16 sps:$4 sm:$0xff]  }
 0x50a   :  { %930 = vmatpush1.bf16.msra.mxu0 %v1479_v2  ;;  %971 = vmatpush1.bf16.msra.mxu1 %v1507_v7  ;;  %v1415_v2 = vld [vmem:[%s2043_s1 + $0xe4] ss:$16 sps:$4 sm:$0xff]  }
 0x50b   :  { %931 = vmatprep.subr.bf16.mxu0 %v1485_v3  ;;  %972 = vmatprep.subr.bf16.mxu1 %v1526_v10  ;;  %v1416_v3 = vld [vmem:[%s2043_s1 + $0xec] ss:$16 sps:$4 sm:$0xff]  }
 0x50c   :  { %961 = vmatprep.mubr.bf16.mxu0 %v1447_v1  ;;  %1002 = vmatprep.mubr.bf16.mxu1 %v1447_v1 }
 0x50e   :  { %932 = vmatpush1.bf16.msra.mxu0 %v1491_v4  ;;  %973 = vmatpush1.bf16.msra.mxu1 %v1531_v11  ;;  %v1222_v4 = vld [vmem:[%s2044_s0 + $0x50] sm:$0xff] }
 0x50f   :  { %933 = vmatprep.subr.bf16.mxu0 %v1497_v5  ;;  %974 = vmatprep.subr.bf16.mxu1 %v1548_v14  ;;  %v806_v5 = vunpack.c.l.bf16 %v1222_v4  ;;  %v807_v7 = vunpack.c.h.bf16 %v1222_v4  ;;  %v1444_v4 = vld [vmem:[%s2043_s1 + $0xc] ss:$16 sps:$4 sm:$0xff]  }
 0x512   :  { %934 = vmatpush1.bf16.msra.mxu0 %v1513_v8  ;;  %975 = vmatpush1.bf16.msra.mxu1 %v1555_v15 }
 0x513   :  { %935 = vmatprep.subr.bf16.mxu0 %v1520_v9  ;;  %976 = vmatprep.subr.bf16.mxu1 %v1561_v16 }
 0x516   :  { %936 = vmatpush1.bf16.msra.mxu0 %v1538_v12  ;;  %977 = vmatpush1.bf16.msra.mxu1 %v1579_v19 }
 0x517   :  { %937 = vmatprep.subr.bf16.mxu0 %v1543_v13  ;;  %978 = vmatprep.subr.bf16.mxu1 %v1585_v20  ;;  %v1223_v20 = vld [vmem:[%s2044_s0 + $0x58] sm:$0xff] }
 0x51a   :  { %938 = vmatpush1.bf16.msra.mxu0 %v1567_v17  ;;  %979 = vmatpush1.bf16.msra.mxu1 %v1603_v23  ;;  %v808_v23 = vunpack.c.l.bf16 %v1223_v20 }
 0x51b   :  { %939 = vmatprep.subr.bf16.mxu0 %v1573_v18  ;;  %980 = vmatprep.subr.bf16.mxu1 %v1609_v24 }
 0x51e   :  { %940 = vmatpush1.bf16.msra.mxu0 %v1591_v21  ;;  %981 = vmatpush1.bf16.msra.mxu1 %v1627_v27  ;;  %v809_v21 = vunpack.c.h.bf16 %v1223_v20 }
 0x51f   :  { %941 = vmatprep.subr.bf16.mxu0 %v1596_v22  ;;  %982 = vmatprep.subr.bf16.mxu1 %v1633_v28 }
 0x522   :  { %942 = vmatpush1.bf16.msra.mxu0 %v1615_v25  ;;  %983 = vmatpush1.bf16.msra.mxu1 %v1646_v30 }
 0x523   :  { %943 = vmatprep.subr.bf16.mxu0 %v1621_v26  ;;  %984 = vmatprep.subr.bf16.mxu1 %v1652_v31 }
 0x526   :  { %944 = vmatpush1.bf16.msra.mxu0 %v1639_v29  ;;  %985 = vmatpush1.bf16.msra.mxu1 %v1659_v32 }
 0x527   :  { %1047 = vmatprep.subr.bf16.mxu0 %v1415_v2  ;;  %1088 = vmatprep.subr.bf16.mxu1 %v1416_v3  ;;  %v1442_v2 = vld [vmem:[%s2043_s1 + $0x28] ss:$16 sps:$4 sm:$0xff]   ;;  %v1443_v3 = vld [vmem:[%s2043_s1 + $0x4] ss:$16 sps:$4 sm:$0xff]  }
 0x5c9   :  { %v845_v8 = vpop.f32.mrf.mxu0  ;;  %v886_v9 = vpop.f32.mrf.mxu1 }
 0x5ca   :  { %v893_v10 = vadd.f32 %v845_v8, %v806_v5  ;;  %v895_v26 = vadd.f32 %v886_v9, %v808_v23  ;;  %v1445_v5 = vld [vmem:[%s2043_s1] ss:$16 sps:$4 sm:$0xff]   ;;  %v1228_v23 = vld [vmem:[%s2044_s0 + $0x68] sm:$0xff] }
 0x5cb   :  { %v847_v11 = vpop.f32.mrf.mxu0  ;;  %v888_v12 = vpop.f32.mrf.mxu1  ;;  %v1227_v8 = vld [vmem:[%s2044_s0 + $0x60] sm:$0xff] }
 0x5cc   :  { %v1224_v13 = vmul.f32 -1.442695, %v893_v10  ;;  %v894_v14 = vadd.f32 %v847_v11, %v807_v7  ;;  %v896_v22 = vadd.f32 %v888_v12, %v809_v21  ;;  %v1446_v7 = vld [vmem:[%s2043_s1 + $0x8] ss:$16 sps:$4 sm:$0xff]   ;;  %v924_v9 = vunpack.c.l.bf16 %v1227_v8 }
 0x5cd   :  { %v849_v15 = vpop.f32.mrf.mxu0  ;;  %v890_v16 = vpop.f32.mrf.mxu1  ;;  %v925_v10 = vunpack.c.h.bf16 %v1227_v8 }
 0x5ce   :  { %1367 = vpow2.f32 %v1224_v13  ;;  %v1225_v17 = vmul.f32 -1.442695, %v894_v14  ;;  %v1226_v24 = vmul.f32 -1.442695, %v896_v22 }
 0x5cf   :  { %v850_v18 = vpop.f32.mrf.mxu0  ;;  %v891_v19 = vpop.f32.mrf.mxu1 }
 0x5d0   :  { %1369 = vpow2.f32 %v1225_v17 }
 0x5d1   :  { %1371 = vpow2.f32 %v1226_v24  ;;  %v927_v24 = vunpack.c.h.bf16 %v1228_v23 }
 0x5db   :  { %v1368_v25 = vpop.eup %1367 }
 0x5dc   :  { %v900_v27 = vadd.f32 1.0, %v1368_v25 }
 0x5dd   :  { %v1370_v28 = vpop.eup %1369 }
 0x5de   :  { %1373 = vrcp.f32 %v900_v27  ;;  %v906_v29 = vadd.f32 1.0, %v1370_v28  ;;  %v1372_v30 = vpop.eup %1371 }
 0x5df   :  { %1375 = vtanh.f32 %v895_v26  ;;  %v913_v63 = vadd.f32 1.0, %v1372_v30  ;;  %v926_v26 = vunpack.c.l.bf16 %v1228_v23 }
 0x5e0   :  { %1377 = vrcp.f32 %v906_v29 }
 0x5e1   :  { %1379 = vrcp.f32 %v913_v63 }
 0x5eb   :  { %v1374_v31 = vpop.eup %1373 }
 0x5ec   :  { %v1376_v32 = vpop.eup %1375 }
 0x5ed   :  { %v1378_v54 = vpop.eup %1377  ;;  %v917_v33 = vmul.f32 %v1376_v32, %v1374_v31 }
 0x5ee   :  { %v916_v34 = vmul.f32 %v1378_v54, %v1881_v48  ;;  %v1380_v37 = vpop.eup %1379  ;;  %v1437_v48 = vld [vmem:[%s2043_s1 + $0x40] ss:$16 sps:$4 sm:$0xff]  }
 0x5f0   :  { %v1929_v36 = vadd.f32 %v917_v33, %v916_v34 }
 0x5f2   :  { %1381 = vtanh.f32 %v1929_v36 }
 0x5ff   :  { %v1382_v38 = vpop.eup %1381 }
 0x600   :  { %v920_v39 = vmul.f32 %v1382_v38, %v1380_v37 }
 0x602   :  { %v928_v40 = vpack.c.bf16 %v920_v39, %v920_v39 }
 0x604   :  { %962 = vmatmul.mubr.bf16.vlgmr.msra.gmra.mxu0 %v928_v40  ;;  %1003 = vmatmul.mubr.bf16.vlgmr.msra.gmra.mxu1 %v928_v40 }
 0x605   :  { %1048 = vmatpush1.bf16.msra.mxu0 %v1417_v0  ;;  %1089 = vmatpush1.bf16.msra.mxu1 %v1418_v41 }
 0x606   :  { %1049 = vmatprep.subr.bf16.mxu0 %v1419_v6  ;;  %1090 = vmatprep.subr.bf16.mxu1 %v1420_v43 }
 0x607   :  { %1079 = vmatprep.mubr.bf16.mxu0 %v1447_v1  ;;  %1120 = vmatprep.mubr.bf16.mxu1 %v1447_v1  ;;  %v1425_v1 = vld [vmem:[%s2043_s1 + $0xa0] ss:$16 sps:$4 sm:$0xff]  }
 0x609   :  { %1050 = vmatpush1.bf16.msra.mxu0 %v1421_v44  ;;  %1091 = vmatpush1.bf16.msra.mxu1 %v1422_v45  ;;  %v1232_v44 = vld [vmem:[%s2044_s0 + $0x70] sm:$0xff] }
 0x60a   :  { %1051 = vmatprep.subr.bf16.mxu0 %v1423_v46  ;;  %1092 = vmatprep.subr.bf16.mxu1 %v1424_v35  ;;  %v1042_v45 = vunpack.c.l.bf16 %v1232_v44  ;;  %v1043_v46 = vunpack.c.h.bf16 %v1232_v44 }
 0x60d   :  { %1052 = vmatpush1.bf16.msra.mxu0 %v1425_v1  ;;  %1093 = vmatpush1.bf16.msra.mxu1 %v1426_v47 }
 0x60e   :  { %1053 = vmatprep.subr.bf16.mxu0 %v1427_v49  ;;  %1094 = vmatprep.subr.bf16.mxu1 %v1428_v50 }
 0x611   :  { %1054 = vmatpush1.bf16.msra.mxu0 %v1429_v51  ;;  %1095 = vmatpush1.bf16.msra.mxu1 %v1430_v52 }
 0x612   :  { %1055 = vmatprep.subr.bf16.mxu0 %v1431_v42  ;;  %1096 = vmatprep.subr.bf16.mxu1 %v1432_v53 }
 0x615   :  { %1056 = vmatpush1.bf16.msra.mxu0 %v1433_v55  ;;  %1097 = vmatpush1.bf16.msra.mxu1 %v1434_v56 }
 0x616   :  { %1057 = vmatprep.subr.bf16.mxu0 %v1435_v57  ;;  %1098 = vmatprep.subr.bf16.mxu1 %v1436_v58  ;;  %v1233_v57 = vld [vmem:[%s2044_s0 + $0x78] sm:$0xff] }
 0x617   :  { %v1045_v58 = vunpack.c.h.bf16 %v1233_v57 }
 0x619   :  { %1058 = vmatpush1.bf16.msra.mxu0 %v1437_v48  ;;  %1099 = vmatpush1.bf16.msra.mxu1 %v1438_v59  ;;  %v1044_v59 = vunpack.c.l.bf16 %v1233_v57 }
 0x61a   :  { %1059 = vmatprep.subr.bf16.mxu0 %v1439_v60  ;;  %1100 = vmatprep.subr.bf16.mxu1 %v1440_v61 }
 0x61d   :  { %1060 = vmatpush1.bf16.msra.mxu0 %v1441_v62  ;;  %1101 = vmatpush1.bf16.msra.mxu1 %v1442_v2 }
 0x61e   :  { %1061 = vmatprep.subr.bf16.mxu0 %v1443_v3  ;;  %1102 = vmatprep.subr.bf16.mxu1 %v1444_v4 }
 0x621   :  { %1062 = vmatpush1.bf16.msra.mxu0 %v1445_v5  ;;  %1103 = vmatpush1.bf16.msra.mxu1 %v1446_v7 }
 0x6c4   :  { %v963_v11 = vpop.f32.mrf.mxu0  ;;  %v1004_v12 = vpop.f32.mrf.mxu1 }
 0x6c5   :  { %v1011_v13 = vadd.f32 %v963_v11, %v924_v9  ;;  %v1013_v29 = vadd.f32 %v1004_v12, %v926_v26 }
 0x6c6   :  { %v965_v14 = vpop.f32.mrf.mxu0  ;;  %v1006_v15 = vpop.f32.mrf.mxu1 }
 0x6c7   :  { %v1229_v16 = vmul.f32 -1.442695, %v1011_v13  ;;  %v1012_v17 = vadd.f32 %v965_v14, %v925_v10  ;;  %v1014_v25 = vadd.f32 %v1006_v15, %v927_v24 }
 0x6c8   :  { %v967_v18 = vpop.f32.mrf.mxu0  ;;  %v1008_v19 = vpop.f32.mrf.mxu1 }
 0x6c9   :  { %1383 = vpow2.f32 %v1229_v16  ;;  %v1230_v20 = vmul.f32 -1.442695, %v1012_v17  ;;  %v1231_v27 = vmul.f32 -1.442695, %v1014_v25 }
 0x6ca   :  { %v968_v21 = vpop.f32.mrf.mxu0  ;;  %v1009_v22 = vpop.f32.mrf.mxu1 }
 0x6cb   :  { %1385 = vpow2.f32 %v1230_v20 }
 0x6cc   :  { %1387 = vpow2.f32 %v1231_v27 }
 0x6d6   :  { %v1384_v28 = vpop.eup %1383 }
 0x6d7   :  { %v1018_v30 = vadd.f32 1.0, %v1384_v28 }
 0x6d8   :  { %v1386_v31 = vpop.eup %1385 }
 0x6d9   :  { %1389 = vrcp.f32 %v1018_v30  ;;  %v1024_v32 = vadd.f32 1.0, %v1386_v31  ;;  %v1388_v54 = vpop.eup %1387 }
 0x6da   :  { %1391 = vtanh.f32 %v1013_v29  ;;  %v1031_v37 = vadd.f32 1.0, %v1388_v54 }
 0x6db   :  { %1393 = vrcp.f32 %v1024_v32 }
 0x6dc   :  { %1395 = vrcp.f32 %v1031_v37 }
 0x6e6   :  { %v1390_v63 = vpop.eup %1389 }
 0x6e7   :  { %v1392_v33 = vpop.eup %1391 }
 0x6e8   :  { %v1394_v34 = vpop.eup %1393  ;;  %v1035_v38 = vmul.f32 %v1392_v33, %v1390_v63 }
 0x6e9   :  { %v1034_v39 = vmul.f32 %v1394_v34, %v1929_v36  ;;  %v1396_v0 = vpop.eup %1395 }
 0x6eb   :  { %v1036_v40 = vadd.f32 %v1035_v38, %v1034_v39 }
 0x6ed   :  { %1397 = vtanh.f32 %v1036_v40 }
 0x6fa   :  { %v1398_v41 = vpop.eup %1397 }
 0x6fb   :  { %v1038_v6 = vmul.f32 %v1398_v41, %v1396_v0 }
 0x6fd   :  { %v1046_v43 = vpack.c.bf16 %v1038_v6, %v1038_v6 }
 0x6ff   :  { %1080 = vmatmul.mubr.bf16.vlgmr.msra.gmra.mxu0 %v1046_v43  ;;  %1121 = vmatmul.mubr.bf16.vlgmr.msra.gmra.mxu1 %v1046_v43 }
 0x7bf   :  { %v1081_v35 = vpop.f32.mrf.mxu0  ;;  %v1122_v1 = vpop.f32.mrf.mxu1 }
 0x7c0   :  { %v1129_v47 = vadd.f32 %v1081_v35, %v1042_v45  ;;  %v1131_v62 = vadd.f32 %v1122_v1, %v1044_v59 }
 0x7c1   :  { %v1083_v49 = vpop.f32.mrf.mxu0  ;;  %v1124_v36 = vpop.f32.mrf.mxu1 }
 0x7c2   :  { %v1234_v50 = vmul.f32 -1.442695, %v1129_v47  ;;  %v1130_v51 = vadd.f32 %v1083_v49, %v1043_v46  ;;  %v1132_v48 = vadd.f32 %v1124_v36, %v1045_v58 }
 0x7c3   :  { %v1085_v52 = vpop.f32.mrf.mxu0  ;;  %v1126_v42 = vpop.f32.mrf.mxu1 }
 0x7c4   :  { %1399 = vpow2.f32 %v1234_v50  ;;  %v1235_v53 = vmul.f32 -1.442695, %v1130_v51  ;;  %v1236_v60 = vmul.f32 -1.442695, %v1132_v48 }
 0x7c5   :  { %v1086_v55 = vpop.f32.mrf.mxu0  ;;  %v1127_v56 = vpop.f32.mrf.mxu1 }
 0x7c6   :  { %1401 = vpow2.f32 %v1235_v53 }
 0x7c7   :  { %1403 = vpow2.f32 %v1236_v60 }
 0x7d1   :  { %v1400_v61 = vpop.eup %1399 }
 0x7d2   :  { %v1136_v2 = vadd.f32 1.0, %v1400_v61 }
 0x7d3   :  { %v1402_v3 = vpop.eup %1401 }
 0x7d4   :  { %1405 = vrcp.f32 %v1136_v2  ;;  %v1142_v4 = vadd.f32 1.0, %v1402_v3  ;;  %v1404_v5 = vpop.eup %1403 }
 0x7d5   :  { %1407 = vtanh.f32 %v1131_v62  ;;  %v1149_v10 = vadd.f32 1.0, %v1404_v5 }
 0x7d6   :  { %1409 = vrcp.f32 %v1142_v4 }
 0x7d7   :  { %1411 = vrcp.f32 %v1149_v10 }
 0x7e1   :  { %v1406_v7 = vpop.eup %1405 }
 0x7e2   :  { %v1408_v8 = vpop.eup %1407 }
 0x7e3   :  { %v1410_v9 = vpop.eup %1409  ;;  %v1153_v11 = vmul.f32 %v1408_v8, %v1406_v7 }
 0x7e4   :  { %v1152_v12 = vmul.f32 %v1410_v9, %v1036_v40  ;;  %v1412_v14 = vpop.eup %1411 }
 0x7e6   :  { %v1154_v13 = vadd.f32 %v1153_v11, %v1152_v12 }
 0x7e8   :  { %1413 = vtanh.f32 %v1154_v13  ;;  %1158 = vst [vmem:[%s2045_s3] sm:$0xff] %v1154_v13 }
 0x7f5   :  { %v1414_v15 = vpop.eup %1413 }
 0x7f6   :  { %v1156_v16 = vmul.f32 %v1414_v15, %v1412_v14 }
 0x7f8   :  { %1157 = vst [vmem:[%s2046_s2] sm:$0xff] %v1156_v16 }

// kernel: _seq2seq_fused.7
= control target key start
LH: loop header
LB: loop body
LE: loop exit
PB: predicated region body
PF: predicated region fallthrough
CT: control target
= control target key end

     0   :  { %s9532_s0 = inlined_call_operand.vmem [shape: s32[8], index: 0, kind: input, shape index: {}]   ;;  %s9533_s1 = inlined_call_operand.vmem [shape: bf16[8,8,512], index: 1, kind: input, shape index: {}]   ;;  %s9534_s2 = inlined_call_operand.vmem [shape: f32[8,128], index: 2, kind: input, shape index: {}]   ;;  %s9535_s3 = inlined_call_operand.vmem [shape: f32[8,128], index: 3, kind: input, shape index: {}]   ;;  %s9536_s4 = inlined_call_operand.vmem [shape: bf16[128,32], index: 4, kind: input, shape index: {}]   ;;  %s9537_s5 = inlined_call_operand.vmem [shape: bf16[32,512], index: 5, kind: input, shape index: {}]   ;;  %s9538_s6 = inlined_call_operand.vmem [shape: bf16[128,512], index: 6, kind: input, shape index: {}]   ;;  %s9539_s7 = inlined_call_operand.vmem [shape: f32[1,512], index: 7, kind: input, shape index: {}]   ;;  %s9540_s8 = inlined_call_operand.vmem [shape: bf16[128,128], index: 8, kind: input, shape index: {}]   ;;  %s9541_s9 = inlined_call_operand.vmem [shape: f32[1,128], index: 9, kind: input, shape index: {}]   ;;  %s9542_s10 = inlined_call_operand.hbm [shape: f32[8,8,128], index: 10, kind: output, shape index: {}]  }
   0x1   :  { %s15_s15 = sshll.u32 %s9532_s0, 4  ;;  %s16_s15 = int_to_ptr.vmem [resolvable:$true] %s15_s15 }
   0x2   :  { %s7741_s16 = scalar_lea.vmem %s16_s15, 16  ;;  %p7746_p1 = scmp.lt.s32.totalorder %s16_s15, %s16_s15 }
   0x3   :  { %p7742_p0 = scmp.ne.s32.totalorder %s16_s15, %s7741_s16  ;;  %p7747_p2 = scmp.lt.s32.totalorder %s7741_s16, %s7741_s16 }
   0x5   :  { %p7748_p3 = por %p7747_p2, %p7746_p1 }
   0x7   :  { %p7749_p4 = pnand %p7748_p3, %p7742_p0 }
   0x9   :  { %7752 = shalt.err (!%p7749_p4)  }
   0xa   :  { %s7777_s17 = smov [#allocation6]  }
   0xb   :  { %18 = dma.vmem_to_smem %s16_s15, 16, %s7777_s17, [#allocation5] }
   0xc   :  { %7773 = dma.done.wait [#allocation5], 16 }
   0xd   :  { %7774 = vsyncadd [#allocation5], 4294967280 }
   0xe   :  { %20 = sfence }
   0xf   :  { %21 = vsyncpa [#allocation8], 0  ;;  %v7025_v0 = vld [vmem:[%s9538_s6 + $0xe4] ss:$16 sps:$4 sm:$0xff]   ;;  %v7027_v1 = vld [vmem:[%s9538_s6 + $0xe0] ss:$16 sps:$4 sm:$0xff]  }
  0x10   :  { %v7778_v2 = vmov 0   ;;  %v7028_v3 = vld [vmem:[%s9538_s6 + $0xc4] ss:$16 sps:$4 sm:$0xff]   ;;  %273 = vmatprep.subr.bf16.mxu0 %v7025_v0  ;;  %v7030_v4 = vld [vmem:[%s9538_s6 + $0xc0] ss:$16 sps:$4 sm:$0xff]   ;;  %v7073_v36 = vld [vmem:[%s9540_s8 + $0x38] sm:$0xff]  }
  0x11   :  { %305 = vmatprep.mubr.bf16.mxu0 %v7778_v2  ;;  %346 = vmatprep.mubr.bf16.mxu1 %v7778_v2  ;;  %v7031_v5 = vld [vmem:[%s9538_s6 + $0xa4] ss:$16 sps:$4 sm:$0xff]   ;;  %v7036_v6 = vld [vmem:[%s9538_s6 + $0xec] ss:$16 sps:$4 sm:$0xff]   ;;  %v7039_v7 = vld [vmem:[%s9538_s6 + $0xe8] ss:$16 sps:$4 sm:$0xff]  }
  0x12   :  { %274 = vmatpush1.bf16.msra.mxu0 %v7027_v1  ;;  %v7033_v8 = vld [vmem:[%s9538_s6 + $0xa0] ss:$16 sps:$4 sm:$0xff]   ;;  %314 = vmatprep.subr.bf16.mxu1 %v7036_v6  ;;  %v7042_v9 = vld [vmem:[%s9538_s6 + $0xcc] ss:$16 sps:$4 sm:$0xff]   ;;  %v7034_v10 = vld [vmem:[%s9538_s6 + $0x84] ss:$16 sps:$4 sm:$0xff]  }
  0x13   :  { %275 = vmatprep.subr.bf16.mxu0 %v7028_v3  ;;  %315 = vmatpush1.bf16.msra.mxu1 %v7039_v7  ;;  %v7045_v11 = vld [vmem:[%s9538_s6 + $0xc8] ss:$16 sps:$4 sm:$0xff]   ;;  %v7038_v12 = vld [vmem:[%s9538_s6 + $0x80] ss:$16 sps:$4 sm:$0xff]   ;;  %v7048_v13 = vld [vmem:[%s9538_s6 + $0xac] ss:$16 sps:$4 sm:$0xff]  }
  0x14   :  { %316 = vmatprep.subr.bf16.mxu1 %v7042_v9  ;;  %v7040_v14 = vld [vmem:[%s9538_s6 + $0x64] ss:$16 sps:$4 sm:$0xff]   ;;  %v7051_v15 = vld [vmem:[%s9538_s6 + $0xa8] ss:$16 sps:$4 sm:$0xff]   ;;  %v7054_v16 = vld [vmem:[%s9538_s6 + $0x8c] ss:$16 sps:$4 sm:$0xff]  }
  0x15   :  { %v7044_v17 = vld [vmem:[%s9538_s6 + $0x60] ss:$16 sps:$4 sm:$0xff]   ;;  %v7046_v18 = vld [vmem:[%s9538_s6 + $0x44] ss:$16 sps:$4 sm:$0xff]   ;;  %v7057_v19 = vld [vmem:[%s9538_s6 + $0x88] ss:$16 sps:$4 sm:$0xff]  }
  0x16   :  { %276 = vmatpush1.bf16.msra.mxu0 %v7030_v4  ;;  %v45_v20 = vld [vmem:[%s9534_s2] sm:$0xff]  ;;  %v7060_v21 = vld [vmem:[%s9538_s6 + $0x6c] ss:$16 sps:$4 sm:$0xff]   ;;  %v7063_v24 = vld [vmem:[%s9538_s6 + $0x68] ss:$16 sps:$4 sm:$0xff]   ;;  %v7779_v37 = vmov 0.0  }
  0x17   :  { %277 = vmatprep.subr.bf16.mxu0 %v7031_v5  ;;  %317 = vmatpush1.bf16.msra.mxu1 %v7045_v11  ;;  %v7050_v22 = vld [vmem:[%s9538_s6 + $0x40] ss:$16 sps:$4 sm:$0xff]   ;;  %v7052_v23 = vld [vmem:[%s9538_s6 + $0x24] ss:$16 sps:$4 sm:$0xff]   ;;  %v7064_v26 = vld [vmem:[%s9538_s6 + $0x4c] ss:$16 sps:$4 sm:$0xff]   ;;  %v80_v33 = vpack.c.bf16 %v45_v20, %v45_v20 }
  0x18   :  { %318 = vmatprep.subr.bf16.mxu1 %v7048_v13  ;;  %v7056_v25 = vld [vmem:[%s9538_s6 + $0x20] ss:$16 sps:$4 sm:$0xff]   ;;  %v7058_v27 = vld [vmem:[%s9538_s6 + $0x4] ss:$16 sps:$4 sm:$0xff]   ;;  %v7066_v28 = vld [vmem:[%s9538_s6 + $0x48] ss:$16 sps:$4 sm:$0xff]  }
  0x19   :  { %v7067_v29 = vld [vmem:[%s9538_s6 + $0x2c] ss:$16 sps:$4 sm:$0xff]   ;;  %v7062_v30 = vld [vmem:[%s9538_s6] ss:$16 sps:$4 sm:$0xff]   ;;  %v7069_v31 = vld [vmem:[%s9538_s6 + $0x28] ss:$16 sps:$4 sm:$0xff]  }
  0x1a   :  { %278 = vmatpush1.bf16.msra.mxu0 %v7033_v8  ;;  %v7070_v32 = vld [vmem:[%s9538_s6 + $0xc] ss:$16 sps:$4 sm:$0xff]   ;;  %v7072_v34 = vld [vmem:[%s9538_s6 + $0x8] ss:$16 sps:$4 sm:$0xff]   ;;  %v7974_v35 = vld [vmem:[%s9535_s3] sm:$0xff]  ;;  %49 = vst [vmem:[#allocation4 + $0x10] sm:$0xff] %v7779_v37 }
  0x1b   :  { %279 = vmatprep.subr.bf16.mxu0 %v7034_v10  ;;  %319 = vmatpush1.bf16.msra.mxu1 %v7051_v15  ;;  %50 = vst [vmem:[#allocation4] sm:$0xff] %v7779_v37  ;;  %51 = vst [vmem:[#allocation4 + $0x18] sm:$0xff] %v7779_v37  ;;  %v7074_v38 = vld [vmem:[%s9540_s8 + $0x30] sm:$0xff]   ;;  %v7075_v39 = vld [vmem:[%s9540_s8 + $0x28] sm:$0xff]   ;;  %vm7780_vm0 = vmmov 0   ;;  %s498_s19 = sld [smem:[#allocation6]] }
  0x1c   :  { %320 = vmatprep.subr.bf16.mxu1 %v7054_v16  ;;  %52 = vst [vmem:[#allocation4 + $0x8] sm:$0xff] %v7779_v37  ;;  %v7076_v40 = vld [vmem:[%s9540_s8 + $0x20] sm:$0xff]   ;;  %v7077_v41 = vld [vmem:[%s9540_s8 + $0x18] sm:$0xff]   ;;  %v7078_v42 = vld [vmem:[%s9540_s8 + $0x10] sm:$0xff]  }
  0x1d   :  { %v7079_v43 = vld [vmem:[%s9540_s8 + $0x8] sm:$0xff]   ;;  %v7080_v44 = vld [vmem:[%s9540_s8] sm:$0xff]  }
  0x1e   :  { %280 = vmatpush1.bf16.msra.mxu0 %v7038_v12  ;;  %v63_v45 = vld [vmem:[%s9533_s1] sm:$0xff]  ;;  %v64_v55 = vld [vmem:[%s9533_s1 + $0x8] sm:$0xff] }
  0x1f   :  { %281 = vmatprep.subr.bf16.mxu0 %v7040_v14  ;;  %321 = vmatpush1.bf16.msra.mxu1 %v7057_v19  ;;  %v65_v46 = vunpack.c.l.bf16 %v63_v45  ;;  %v66_v47 = vunpack.c.h.bf16 %v63_v45  ;;  %v68_v59 = vunpack.c.h.bf16 %v64_v55  ;;  %v67_v61 = vunpack.c.l.bf16 %v64_v55  ;;  %v6029_v19 = vld [vmem:[%s9541_s9] ss:$0 sm:$0xff] }
  0x20   :  { %322 = vmatprep.subr.bf16.mxu1 %v7060_v21 }
  0x21   :  { %p499_p5 = scmp.eq.s32.totalorder %s498_s19, 0 }
  0x22   :  { %282 = vmatpush1.bf16.msra.mxu0 %v7044_v17  ;;  %v7104_v45 = vld [vmem:[%s9536_s4] sm:$0xff] (%p499_p5)   ;;  %vm7782_vm5 = vmmov (%p499_p5), 0   ;;  %v7783_v55 = vmov (%p499_p5), 1.0|1.0   ;;  %vm706_vm8 = vcmask (%p499_p5), 261120  }
  0x23   :  { %283 = vmatprep.subr.bf16.mxu0 %v7046_v18  ;;  %323 = vmatpush1.bf16.msra.mxu1 %v7063_v24 }
  0x24   :  { %324 = vmatprep.subr.bf16.mxu1 %v7064_v26 }
  0x26   :  { %284 = vmatpush1.bf16.msra.mxu0 %v7050_v22 }
  0x27   :  { %285 = vmatprep.subr.bf16.mxu0 %v7052_v23  ;;  %325 = vmatpush1.bf16.msra.mxu1 %v7066_v28 }
  0x28   :  { %326 = vmatprep.subr.bf16.mxu1 %v7067_v29 }
  0x2a   :  { %286 = vmatpush1.bf16.msra.mxu0 %v7056_v25  ;;  %v504_v25 = vlaneseq (%p499_p5) }
  0x2b   :  { %287 = vmatprep.subr.bf16.mxu0 %v7058_v27  ;;  %327 = vmatpush1.bf16.msra.mxu1 %v7069_v31 }
  0x2c   :  { %328 = vmatprep.subr.bf16.mxu1 %v7070_v32  ;;  %v505_v26 = vand.u32 (%p499_p5), 127, %v504_v25  ;;  %v7097_v32 = vld [vmem:[%s9536_s4 + $0x38] sm:$0xff] (%p499_p5)  }
  0x2e   :  { %288 = vmatpush1.bf16.msra.mxu0 %v7062_v30  ;;  %vm506_vm1 = vcmp.lt.s32.totalorder (%p499_p5), %v505_v26, 16 }
  0x2f   :  { %329 = vmatpush1.bf16.msra.mxu1 %v7072_v34  ;;  %6690 = vmatprep.subr.bf16.mxu0 %v7779_v37  ;;  %v7098_v34 = vld [vmem:[%s9536_s4 + $0x30] sm:$0xff] (%p499_p5)  }
  0x31   :  { %306 = vmatmul.mubr.bf16.vlgmr.msra.gmra.mxu0 %v80_v33 }
  0x32   :  { %347 = vmatmul.mubr.bf16.vlgmr.msra.gmra.mxu1 %v80_v33  ;;  %6691 = vmatpush3.bf16.msra.mxu0 %v7073_v36  ;;  %v7781_v33 = vmov (%p499_p5), 0.0   ;;  %v7100_v36 = vld [vmem:[%s9536_s4 + $0x20] sm:$0xff] (%p499_p5)  }
  0x33   :  { %6692 = vmatprep.subr.bf16.mxu0 %v7779_v37  ;;  %6706 = vmatprep.mubr.msk.bf16.mxu0 %vm7780_vm0, %v7779_v37 }
  0x36   :  { %6693 = vmatpush3.bf16.msra.mxu0 %v7074_v38  ;;  %v7101_v38 = vld [vmem:[%s9536_s4 + $0x18] sm:$0xff] (%p499_p5)  }
  0x37   :  { %6694 = vmatprep.subr.bf16.mxu0 %v7779_v37 }
  0x3a   :  { %6695 = vmatpush3.bf16.msra.mxu0 %v7075_v39  ;;  %v7102_v39 = vld [vmem:[%s9536_s4 + $0x10] sm:$0xff] (%p499_p5)  }
  0x3b   :  { %6696 = vmatprep.subr.bf16.mxu0 %v7779_v37 }
  0x3e   :  { %6697 = vmatpush3.bf16.msra.mxu0 %v7076_v40  ;;  %v7103_v40 = vld [vmem:[%s9536_s4 + $0x8] sm:$0xff] (%p499_p5)  }
  0x3f   :  { %6698 = vmatprep.subr.bf16.mxu0 %v7779_v37 }
  0x42   :  { %6699 = vmatpush3.bf16.msra.mxu0 %v7077_v41 }
  0x43   :  { %6700 = vmatprep.subr.bf16.mxu0 %v7779_v37 }
  0x46   :  { %6701 = vmatpush3.bf16.msra.mxu0 %v7078_v42 }
  0x47   :  { %6702 = vmatprep.subr.bf16.mxu0 %v7779_v37 }
  0x4a   :  { %6703 = vmatpush3.bf16.msra.mxu0 %v7079_v43 }
  0x4b   :  { %6704 = vmatprep.subr.bf16.mxu0 %v7779_v37 }
  0x4e   :  { %6705 = vmatpush3.bf16.msra.mxu0 %v7080_v44 }
  0x4f   :  { %6710 = vmatprep.subr.bf16.mxu0 (%p499_p5), %v7781_v33 }
  0xf1   :  { %v307_v48 = vpop.f32.mrf.mxu0 }
  0xf2   :  { %v355_v49 = vadd.f32 %v307_v48, %v65_v46  ;;  %v348_v56 = vpop.f32.mrf.mxu1  ;;  %v7105_v46 = vld [vmem:[%s9537_s5 + $0x24] ss:$16 sps:$4 sm:$0xff] (%p499_p5)  }
  0xf3   :  { %v309_v50 = vpop.f32.mrf.mxu0  ;;  %v357_v0 = vadd.f32 %v348_v56, %v67_v61  ;;  %v7108_v48 = vld [vmem:[%s9537_s5 + $0x4] ss:$16 sps:$4 sm:$0xff] (%p499_p5)   ;;  %722 = vmatprep.subr.bf16.mxu1 (%p499_p5), %v7105_v46  ;;  %v7113_v56 = vld [vmem:[%s9537_s5 + $0x2c] ss:$16 sps:$4 sm:$0xff] (%p499_p5)  }
  0xf4   :  { %v6026_v51 = vmul.f32 -1.442695, %v355_v49  ;;  %v356_v52 = vadd.f32 %v309_v50, %v66_v47  ;;  %v350_v58 = vpop.f32.mrf.mxu1  ;;  %v7107_v47 = vld [vmem:[%s9537_s5 + $0x20] ss:$16 sps:$4 sm:$0xff] (%p499_p5)   ;;  %v7116_v61 = vld [vmem:[%s9537_s5 + $0xc] ss:$16 sps:$4 sm:$0xff] (%p499_p5)  }
  0xf5   :  { %v311_v53 = vpop.f32.mrf.mxu0  ;;  %v358_v63 = vadd.f32 %v350_v58, %v68_v59  ;;  %723 = vmatpush1.bf16.msra.mxu1 (%p499_p5), %v7107_v47  ;;  %v7110_v49 = vld [vmem:[%s9537_s5] ss:$16 sps:$4 sm:$0xff] (%p499_p5)   ;;  %v7111_v59 = vld [vmem:[%s9537_s5 + $0x28] ss:$16 sps:$4 sm:$0xff] (%p499_p5)  }
  0xf6   :  { %7081 = vpow2.f32 %v6026_v51  ;;  %v6027_v54 = vmul.f32 -1.442695, %v356_v52  ;;  %v352_v60 = vpop.f32.mrf.mxu1  ;;  %724 = vmatprep.subr.bf16.mxu1 (%p499_p5), %v7108_v48 }
  0xf7   :  { %v312_v57 = vpop.f32.mrf.mxu0  ;;  %v6028_v1 = vmul.f32 -1.442695, %v358_v63 }
  0xf8   :  { %7083 = vpow2.f32 %v6027_v54  ;;  %v353_v62 = vpop.f32.mrf.mxu1  ;;  %v7784_v57 = vmov (%p499_p5), 0  }
  0xf9   :  { %7085 = vtanh.f32 %v357_v0  ;;  %725 = vmatpush1.bf16.msra.mxu1 (%p499_p5), %v7110_v49  ;;  %742 = vmatprep.mubr.bf16.mxu1 (%p499_p5), %v7784_v57  ;;  %v7114_v0 = vld [vmem:[%s9537_s5 + $0x8] ss:$16 sps:$4 sm:$0xff] (%p499_p5)  }
  0xfa   :  { %7087 = vpow2.f32 %v6028_v1  ;;  %763 = vmatprep.subr.bf16.mxu1 (%p499_p5), %v7113_v56 }
 0x103   :  { %v7082_v3 = vpop.eup %7081 }
 0x104   :  { %v362_v4 = vadd.f32 1.0, %v7082_v3  ;;  %v647_v3 = vshrl.u32 (%p499_p5), %v504_v25, 7 }
 0x105   :  { %v7084_v5 = vpop.eup %7083 }
 0x106   :  { %7089 = vrcp.f32 %v362_v4  ;;  %v368_v6 = vadd.f32 1.0, %v7084_v5  ;;  %v7086_v7 = vpop.eup %7085  ;;  %v648_v4 = vsub.s32 (%p499_p5), 0, %v647_v3  ;;  %v644_v5 = vld [vmem:[%s9539_s7] sm:$0xf] (%p499_p5) }
 0x107   :  { %v7088_v8 = vpop.eup %7087 }
 0x108   :  { %7091 = vrcp.f32 %v368_v6  ;;  %v375_v11 = vadd.f32 1.0, %v7088_v8  ;;  %v652_v6 = vsub.s32 (%p499_p5), 1, %v647_v3 }
 0x10a   :  { %7093 = vrcp.f32 %v375_v11  ;;  %v653_v8 = vrot.slane (%p499_p5), %v644_v5, %v652_v6  ;;  %v656_v11 = vsub.s32 (%p499_p5), 2, %v647_v3 }
 0x113   :  { %v7090_v9 = vpop.eup %7089 }
 0x114   :  { %v379_v13 = vmul.f32 %v7090_v9, %v7086_v7  ;;  %v649_v7 = vrot.slane (%p499_p5), %v644_v5, %v648_v4 }
 0x115   :  { %v7092_v10 = vpop.eup %7091 }
 0x116   :  { %v378_v12 = vmul.f32 %v7092_v10, %v7974_v35  ;;  %v7099_v35 = vld [vmem:[%s9536_s4 + $0x28] sm:$0xff] (%p499_p5)  }
 0x117   :  { %v7094_v15 = vpop.eup %7093 }
 0x118   :  { %v8021_v14 = vadd.f32 %v379_v13, %v378_v12 }
 0x11a   :  { %7095 = vtanh.f32 %v8021_v14 }
 0x127   :  { %v7096_v16 = vpop.eup %7095 }
 0x128   :  { %v382_v17 = vmul.f32 %v7096_v16, %v7094_v15  ;;  %v660_v15 = vsub.s32 (%p499_p5), 3, %v647_v3 }
 0x12a   :  { %v8024_v18 = vpack.c.bf16 %v382_v17, %v382_v17  ;;  %v657_v17 = vrot.slane (%p499_p5), %v644_v5, %v656_v11 }
 0x12c   :  { %6707 = vmatmul.mubr.bf16.vlgmr.msra.gmra.mxu0 %v8024_v18 }
 0x12d   :  { %6711 = vmatpush3.bf16.msra.mxu0 (%p499_p5), %v7097_v32  ;;  %6726 = vmatprep.mubr.msk.bf16.mxu0 (%p499_p5), %vm7782_vm5, %v7781_v33 }
 0x12e   :  { %6712 = vmatprep.subr.bf16.mxu0 (%p499_p5), %v7781_v33 }
 0x131   :  { %6713 = vmatpush3.bf16.msra.mxu0 (%p499_p5), %v7098_v34 }
 0x132   :  { %6714 = vmatprep.subr.bf16.mxu0 (%p499_p5), %v7781_v33 }
 0x135   :  { %6715 = vmatpush3.bf16.msra.mxu0 (%p499_p5), %v7099_v35 }
 0x136   :  { %6716 = vmatprep.subr.bf16.mxu0 (%p499_p5), %v7781_v33 }
 0x139   :  { %6717 = vmatpush3.bf16.msra.mxu0 (%p499_p5), %v7100_v36 }
 0x13a   :  { %6718 = vmatprep.subr.bf16.mxu0 (%p499_p5), %v7781_v33 }
 0x13d   :  { %6719 = vmatpush3.bf16.msra.mxu0 (%p499_p5), %v7101_v38 }
 0x13e   :  { %6720 = vmatprep.subr.bf16.mxu0 (%p499_p5), %v7781_v33 }
 0x141   :  { %6721 = vmatpush3.bf16.msra.mxu0 (%p499_p5), %v7102_v39 }
 0x142   :  { %6722 = vmatprep.subr.bf16.mxu0 (%p499_p5), %v7781_v33 }
 0x145   :  { %6723 = vmatpush3.bf16.msra.mxu0 (%p499_p5), %v7103_v40 }
 0x146   :  { %6724 = vmatprep.subr.bf16.mxu0 (%p499_p5), %v7781_v33 }
 0x149   :  { %6725 = vmatpush3.bf16.msra.mxu0 (%p499_p5), %v7104_v45 }
 0x1ec   :  { %v489_v20 = vpop.f32.mrf.mxu0 }
 0x1ed   :  { %v490_v21 = vadd.f32 %v6029_v19, %v489_v20  ;;  %v661_v20 = vrot.slane (%p499_p5), %v644_v5, %v660_v15 }
 0x1ee   :  { %v6708_v22 = vpop.f32.mrf.mxu0  ;;  %503 = sbr.rel (!%p499_p5) target bundleno = 1327 (0x52f), region = 45 }
 0x1ef   :  { %495 = vst [vmem:[#allocation7] sm:$0xff] %v490_v21  ;;  %v507_v27 = vsel (%p499_p5), %vm506_vm1, %v490_v21, -1e+30 }
 0x1f0   :  { %v492_v23 = vpop.f32.mrf.mxu0  ;;  %508 = vmax.xlane.f32.xlu0 (%p499_p5), %v507_v27 }
 0x1f2   :  { %v6709_v24 = vpop.f32.mrf.mxu0 }
 0x279   :  { %v509_v28 = vpop.xlane.xlu0 %508 }
 0x27a   :  { %vm510_vm2 = vcmp.eq.f32.partialorder %v507_v27, %v509_v28 }
 0x27b   :  { %vm511_vm3 = vmand %vm510_vm2, %vm506_vm1 }
 0x27c   :  { %v512_v29 = vsel %vm511_vm3, %v505_v26, 128 }
 0x27d   :  { %v514_v30 = vshra.s32 %v512_v29, 16  ;;  %v513_v41 = vand.u32 65535, %v512_v29 }
 0x27f   :  { %v516_v31 = vcvt.s32.f32 %v514_v30  ;;  %v515_v43 = vcvt.s32.f32 %v513_v41 }
 0x281   :  { %517 = vmin.xlane.f32.xlu0 %v516_v31 }
 0x30a   :  { %v518_v42 = vpop.xlane.xlu0 %517 }
 0x30b   :  { %vm519_vm4 = vcmp.eq.f32.partialorder %v516_v31, %v518_v42  ;;  %v524_v50 = vcvt.f32.s32 %v518_v42 }
 0x30c   :  { %v520_v44 = vsel %vm519_vm4, %v515_v43, inf }
 0x30d   :  { %521 = vmin.xlane.f32.xlu1 %v520_v44  ;;  %v525_v52 = vshll.u32 %v524_v50, 16 }
 0x396   :  { %v522_v51 = vpop.xlane.xlu1 %521 }
 0x397   :  { %v523_v53 = vcvt.f32.s32 %v522_v51 }
 0x399   :  { %v526_v54 = vadd.s32 %v525_v52, %v523_v53 }
 0x39b   :  { %vm527_vm6 = vcmp.eq.s32.totalorder %v505_v26, %v526_v54 }
 0x39c   :  { %vm6048_vm7 = vmpackc.low %vm527_vm6, %vm527_vm6 }
 0x39d   :  { %6727 = vmatmul.mubr.msk.bf16.vlgmr.msra.gmra.mxu0 %vm6048_vm7, %v7783_v55 }
 0x45d   :  { %v629_v58 = vpop.f32.mrf.mxu0 }
 0x45e   :  { %v635_v60 = vpack.c.bf16 %v629_v58, %v629_v58 }
 0x45f   :  { %v6728_v62 = vpop.f32.mrf.mxu0 }
 0x460   :  { %6058 = vmatmul.mubr.msk.bf16.vlgmr.msra.gmra.mxu1 %vm706_vm8, %v635_v60 }
 0x461   :  { %764 = vmatpush1.bf16.msra.mxu1 %v7111_v59  ;;  %v632_v63 = vpop.f32.mrf.mxu0  ;;  %783 = vmatprep.mubr.bf16.mxu1 %v7784_v57 }
 0x462   :  { %765 = vmatprep.subr.bf16.mxu1 %v7116_v61 }
 0x463   :  { %v6729_v1 = vpop.f32.mrf.mxu0 }
 0x465   :  { %766 = vmatpush1.bf16.msra.mxu1 %v7114_v0 }
 0x468   :  { %6059 = vmatmul.mubr.msk.bf16.vlgmr.msra.gmra.mxu1 %vm706_vm8, %v635_v60 }
 0x520   :  { %v744_v9 = vpop.f32.mrf.mxu1 }
 0x521   :  { %v745_v10 = vadd.f32 %v744_v9, %v649_v7 }
 0x522   :  { %v746_v12 = vpop.f32.mrf.mxu1 }
 0x523   :  { %792 = vst [vmem:[#allocation4 + $0x10] sm:$0xff] %v745_v10  ;;  %v747_v13 = vadd.f32 %v746_v12, %v653_v8 }
 0x524   :  { %v748_v16 = vpop.f32.mrf.mxu1 }
 0x525   :  { %793 = vst [vmem:[#allocation4] sm:$0xff] %v747_v13 }
 0x526   :  { %v749_v19 = vpop.f32.mrf.mxu1 }
 0x528   :  { %v785_v21 = vpop.f32.mrf.mxu1 }
 0x529   :  { %v786_v22 = vadd.f32 %v785_v21, %v657_v17 }
 0x52a   :  { %v787_v23 = vpop.f32.mrf.mxu1 }
 0x52b   :  { %794 = vst [vmem:[#allocation4 + $0x18] sm:$0xff] %v786_v22  ;;  %v788_v24 = vadd.f32 %v787_v23, %v661_v20 }
 0x52c   :  { %v789_v25 = vpop.f32.mrf.mxu1 }
 0x52d   :  { %795 = vst [vmem:[#allocation4 + $0x8] sm:$0xff] %v788_v24 }
 0x52e   :  { %v790_v26 = vpop.f32.mrf.mxu1 }
 0x52f PF:  { %v7117_v27 = vld [vmem:[%s9538_s6 + $0xe4] ss:$16 sps:$4 sm:$0xff]   ;;  %1044 = vmatprep.mubr.bf16.mxu0 %v7778_v2  ;;  %1085 = vmatprep.mubr.bf16.mxu1 %v7778_v2  ;;  %v7119_v28 = vld [vmem:[%s9538_s6 + $0xe0] ss:$16 sps:$4 sm:$0xff]   ;;  %v7128_v32 = vld [vmem:[%s9538_s6 + $0xec] ss:$16 sps:$4 sm:$0xff]  }
 0x530   :  { %1012 = vmatprep.subr.bf16.mxu0 %v7117_v27  ;;  %v7120_v29 = vld [vmem:[%s9538_s6 + $0xc4] ss:$16 sps:$4 sm:$0xff]   ;;  %v7122_v30 = vld [vmem:[%s9538_s6 + $0xc0] ss:$16 sps:$4 sm:$0xff]   ;;  %v7131_v33 = vld [vmem:[%s9538_s6 + $0xe8] ss:$16 sps:$4 sm:$0xff]   ;;  %1053 = vmatprep.subr.bf16.mxu1 %v7128_v32 }
 0x531   :  { %1013 = vmatpush1.bf16.msra.mxu0 %v7119_v28  ;;  %v7123_v31 = vld [vmem:[%s9538_s6 + $0xa4] ss:$16 sps:$4 sm:$0xff]   ;;  %v7125_v34 = vld [vmem:[%s9538_s6 + $0xa0] ss:$16 sps:$4 sm:$0xff]   ;;  %1054 = vmatpush1.bf16.msra.mxu1 %v7131_v33  ;;  %v7134_v36 = vld [vmem:[%s9538_s6 + $0xcc] ss:$16 sps:$4 sm:$0xff]  }
 0x532   :  { %1014 = vmatprep.subr.bf16.mxu0 %v7120_v29  ;;  %v7126_v35 = vld [vmem:[%s9538_s6 + $0x84] ss:$16 sps:$4 sm:$0xff]   ;;  %v7137_v38 = vld [vmem:[%s9538_s6 + $0xc8] ss:$16 sps:$4 sm:$0xff]   ;;  %1055 = vmatprep.subr.bf16.mxu1 %v7134_v36  ;;  %v7130_v39 = vld [vmem:[%s9538_s6 + $0x80] ss:$16 sps:$4 sm:$0xff]  }
 0x533   :  { %v7132_v40 = vld [vmem:[%s9538_s6 + $0x64] ss:$16 sps:$4 sm:$0xff]   ;;  %v7140_v41 = vld [vmem:[%s9538_s6 + $0xac] ss:$16 sps:$4 sm:$0xff]   ;;  %v7143_v42 = vld [vmem:[%s9538_s6 + $0xa8] ss:$16 sps:$4 sm:$0xff]  }
 0x534   :  { %v7146_v43 = vld [vmem:[%s9538_s6 + $0x8c] ss:$16 sps:$4 sm:$0xff]   ;;  %v7136_v44 = vld [vmem:[%s9538_s6 + $0x60] ss:$16 sps:$4 sm:$0xff]   ;;  %v7138_v45 = vld [vmem:[%s9538_s6 + $0x44] ss:$16 sps:$4 sm:$0xff]  }
 0x535   :  { %1015 = vmatpush1.bf16.msra.mxu0 %v7122_v30  ;;  %1056 = vmatpush1.bf16.msra.mxu1 %v7137_v38  ;;  %v7149_v46 = vld [vmem:[%s9538_s6 + $0x88] ss:$16 sps:$4 sm:$0xff]   ;;  %v7152_v47 = vld [vmem:[%s9538_s6 + $0x6c] ss:$16 sps:$4 sm:$0xff]   ;;  %v7142_v48 = vld [vmem:[%s9538_s6 + $0x40] ss:$16 sps:$4 sm:$0xff]  }
 0x536   :  { %1016 = vmatprep.subr.bf16.mxu0 %v7123_v31  ;;  %1057 = vmatprep.subr.bf16.mxu1 %v7140_v41  ;;  %v7144_v49 = vld [vmem:[%s9538_s6 + $0x24] ss:$16 sps:$4 sm:$0xff]   ;;  %v7155_v50 = vld [vmem:[%s9538_s6 + $0x68] ss:$16 sps:$4 sm:$0xff]   ;;  %v7148_v51 = vld [vmem:[%s9538_s6 + $0x20] ss:$16 sps:$4 sm:$0xff]  }
 0x537   :  { %v7156_v52 = vld [vmem:[%s9538_s6 + $0x4c] ss:$16 sps:$4 sm:$0xff]   ;;  %v7150_v53 = vld [vmem:[%s9538_s6 + $0x4] ss:$16 sps:$4 sm:$0xff]   ;;  %v7158_v54 = vld [vmem:[%s9538_s6 + $0x48] ss:$16 sps:$4 sm:$0xff]  }
 0x538   :  { %v7159_v55 = vld [vmem:[%s9538_s6 + $0x2c] ss:$16 sps:$4 sm:$0xff]   ;;  %v7154_v56 = vld [vmem:[%s9538_s6] ss:$16 sps:$4 sm:$0xff]   ;;  %v7161_v57 = vld [vmem:[%s9538_s6 + $0x28] ss:$16 sps:$4 sm:$0xff]  }
 0x539   :  { %1017 = vmatpush1.bf16.msra.mxu0 %v7125_v34  ;;  %1058 = vmatpush1.bf16.msra.mxu1 %v7143_v42  ;;  %v7162_v58 = vld [vmem:[%s9538_s6 + $0xc] ss:$16 sps:$4 sm:$0xff]   ;;  %v7164_v59 = vld [vmem:[%s9538_s6 + $0x8] ss:$16 sps:$4 sm:$0xff]   ;;  %v7166_v61 = vld [vmem:[%s9540_s8 + $0x30] sm:$0xff]   ;;  %s799_s0 = sld [smem:[#allocation6]] }
 0x53a   :  { %1018 = vmatprep.subr.bf16.mxu0 %v7126_v35  ;;  %1059 = vmatprep.subr.bf16.mxu1 %v7146_v43  ;;  %v7165_v60 = vld [vmem:[%s9540_s8 + $0x38] sm:$0xff]   ;;  %v7167_v62 = vld [vmem:[%s9540_s8 + $0x28] sm:$0xff]   ;;  %v7170_v0 = vld [vmem:[%s9540_s8 + $0x10] sm:$0xff]   ;;  %s6106_s24 = sld [smem:[#allocation6 + $0x1]] }
 0x53b   :  { %v7169_v63 = vld [vmem:[%s9540_s8 + $0x18] sm:$0xff]   ;;  %v7171_v1 = vld [vmem:[%s9540_s8 + $0x8] sm:$0xff]   ;;  %v7172_v3 = vld [vmem:[%s9540_s8] sm:$0xff]  }
 0x53c   :  { %v6060_v4 = vld [vmem:[%s9533_s1 + $0x10] sm:$0xff]  ;;  %v810_v10 = vld [vmem:[#allocation4] sm:$0xff]  ;;  %v6061_v17 = vld [vmem:[%s9533_s1 + $0x18] sm:$0xff] }
 0x53d   :  { %1019 = vmatpush1.bf16.msra.mxu0 %v7130_v39  ;;  %1060 = vmatpush1.bf16.msra.mxu1 %v7149_v46  ;;  %v805_v6 = vunpack.c.l.bf16 %v6060_v4  ;;  %v809_v7 = vld [vmem:[#allocation4 + $0x10] sm:$0xff]  ;;  %v806_v9 = vunpack.c.h.bf16 %v6060_v4  ;;  %v808_v24 = vunpack.c.h.bf16 %v6061_v17  ;;  %v812_v26 = vld [vmem:[#allocation4 + $0x8] sm:$0xff]  ;;  %v807_v28 = vunpack.c.l.bf16 %v6061_v17  ;;  %v811_v29 = vld [vmem:[#allocation4 + $0x18] sm:$0xff] }
 0x53e   :  { %1020 = vmatprep.subr.bf16.mxu0 %v7132_v40  ;;  %1061 = vmatprep.subr.bf16.mxu1 %v7152_v47 }
 0x53f   :  { %p800_p6 = scmp.ne.s32.totalorder %s799_s0, 0 }
 0x540   :  { %p1239_p7 = scmp.eq.s32.totalorder %s6106_s24, 0 }
 0x541   :  { %1021 = vmatpush1.bf16.msra.mxu0 %v7136_v44  ;;  %1062 = vmatpush1.bf16.msra.mxu1 %v7155_v50  ;;  %s813_s21 = scalar_select %p800_p6, 1, 0  ;;  %v7190_v4 = vld [vmem:[%s9536_s4 + $0x30] sm:$0xff] (%p1239_p7)   ;;  %vm7786_vm14 = vmmov (%p1239_p7), 0   ;;  %vm1446_vm2 = vcmask (%p1239_p7), 261120  }
 0x542   :  { %1022 = vmatprep.subr.bf16.mxu0 %v7138_v45  ;;  %1063 = vmatprep.subr.bf16.mxu1 %v7156_v52  ;;  %v7194_v8 = vld [vmem:[%s9536_s4 + $0x10] sm:$0xff] (%p1239_p7)  }
 0x543   :  { %v814_v5 = vstv %s813_s21  ;;  %v7199_v17 = vld [vmem:[%s9537_s5 + $0x20] ss:$16 sps:$4 sm:$0xff] (%p1239_p7)  }
 0x544   :  { %vm8220_vm9 = vcmp.eq.s32.totalorder %v814_v5, 1  ;;  %v7191_v5 = vld [vmem:[%s9536_s4 + $0x28] sm:$0xff] (%p1239_p7)  }
 0x545   :  { %1023 = vmatpush1.bf16.msra.mxu0 %v7142_v48  ;;  %1064 = vmatpush1.bf16.msra.mxu1 %v7158_v54  ;;  %v816_v11 = vsel %vm8220_vm9, %v805_v6, %v809_v7  ;;  %v817_v13 = vsel %vm8220_vm9, %v806_v9, %v810_v10  ;;  %v819_v30 = vsel %vm8220_vm9, %v808_v24, %v812_v26  ;;  %v6097_v54 = vld [vmem:[%s9541_s9] ss:$0 sm:$0xff]  ;;  %v7193_v7 = vld [vmem:[%s9536_s4 + $0x18] sm:$0xff] (%p1239_p7)   ;;  %v7195_v9 = vld [vmem:[%s9536_s4 + $0x8] sm:$0xff] (%p1239_p7)   ;;  %v7787_v26 = vmov (%p1239_p7), 1.0|1.0  }
 0x546   :  { %1024 = vmatprep.subr.bf16.mxu0 %v7144_v49  ;;  %1065 = vmatprep.subr.bf16.mxu1 %v7159_v55  ;;  %v818_v33 = vsel %vm8220_vm9, %v807_v28, %v811_v29  ;;  %v7192_v6 = vld [vmem:[%s9536_s4 + $0x20] sm:$0xff] (%p1239_p7)   ;;  %v7788_v28 = vmov (%p1239_p7), 0  }
 0x549   :  { %1025 = vmatpush1.bf16.msra.mxu0 %v7148_v51  ;;  %1066 = vmatpush1.bf16.msra.mxu1 %v7161_v57 }
 0x54a   :  { %1026 = vmatprep.subr.bf16.mxu0 %v7150_v53  ;;  %1067 = vmatprep.subr.bf16.mxu1 %v7162_v58 }
 0x54d   :  { %1027 = vmatpush1.bf16.msra.mxu0 %v7154_v56  ;;  %1068 = vmatpush1.bf16.msra.mxu1 %v7164_v59  ;;  %v1244_v59 = vlaneseq (%p1239_p7) }
 0x54e   :  { %6730 = vmatprep.subr.bf16.mxu0 %v7779_v37 }
 0x550   :  { %1045 = vmatmul.mubr.bf16.vlgmr.msra.gmra.mxu0 %v8024_v18  ;;  %1086 = vmatmul.mubr.bf16.vlgmr.msra.gmra.mxu1 %v8024_v18  ;;  %v7168_v18 = vld [vmem:[%s9540_s8 + $0x20] sm:$0xff]  }
 0x551   :  { %6746 = vmatprep.mubr.msk.bf16.mxu0 %vm7780_vm0, %v7779_v37  ;;  %6731 = vmatpush3.bf16.msra.mxu0 %v7165_v60  ;;  %v1245_v60 = vand.u32 (%p1239_p7), 127, %v1244_v59 }
 0x552   :  { %6732 = vmatprep.subr.bf16.mxu0 %v7779_v37  ;;  %1482 = vmatprep.mubr.bf16.mxu1 (%p1239_p7), %v7788_v28 }
 0x553   :  { %vm1246_vm10 = vcmp.lt.s32.totalorder (%p1239_p7), %v1245_v60, 16 }
 0x555   :  { %6733 = vmatpush3.bf16.msra.mxu0 %v7166_v61 }
 0x556   :  { %6734 = vmatprep.subr.bf16.mxu0 %v7779_v37 }
 0x559   :  { %6735 = vmatpush3.bf16.msra.mxu0 %v7167_v62 }
 0x55a   :  { %6736 = vmatprep.subr.bf16.mxu0 %v7779_v37 }
 0x55d   :  { %6737 = vmatpush3.bf16.msra.mxu0 %v7168_v18 }
 0x55e   :  { %6738 = vmatprep.subr.bf16.mxu0 %v7779_v37 }
 0x561   :  { %6739 = vmatpush3.bf16.msra.mxu0 %v7169_v63 }
 0x562   :  { %6740 = vmatprep.subr.bf16.mxu0 %v7779_v37 }
 0x565   :  { %6741 = vmatpush3.bf16.msra.mxu0 %v7170_v0 }
 0x566   :  { %6742 = vmatprep.subr.bf16.mxu0 %v7779_v37 }
 0x569   :  { %6743 = vmatpush3.bf16.msra.mxu0 %v7171_v1  ;;  %v7189_v1 = vld [vmem:[%s9536_s4 + $0x38] sm:$0xff] (%p1239_p7)  }
 0x56a   :  { %6744 = vmatprep.subr.bf16.mxu0 %v7779_v37 }
 0x56d   :  { %6745 = vmatpush3.bf16.msra.mxu0 %v7172_v3  ;;  %v7785_v3 = vmov (%p1239_p7), 0.0  }
 0x56e   :  { %6750 = vmatprep.subr.bf16.mxu0 (%p1239_p7), %v7785_v3 }
 0x610   :  { %v1046_v12 = vpop.f32.mrf.mxu0  ;;  %v1087_v23 = vpop.f32.mrf.mxu1 }
 0x611   :  { %v1094_v15 = vadd.f32 %v1046_v12, %v816_v11  ;;  %v1096_v35 = vadd.f32 %v1087_v23, %v818_v33 }
 0x612   :  { %v1048_v16 = vpop.f32.mrf.mxu0  ;;  %v1089_v27 = vpop.f32.mrf.mxu1 }
 0x613   :  { %v6094_v19 = vmul.f32 -1.442695, %v1094_v15  ;;  %v1095_v20 = vadd.f32 %v1048_v16, %v817_v13  ;;  %v1097_v34 = vadd.f32 %v1089_v27, %v819_v30  ;;  %v7196_v15 = vld [vmem:[%s9536_s4] sm:$0xff] (%p1239_p7)   ;;  %v7205_v27 = vld [vmem:[%s9537_s5 + $0x2c] ss:$16 sps:$4 sm:$0xff] (%p1239_p7)  }
 0x614   :  { %v1050_v21 = vpop.f32.mrf.mxu0  ;;  %v1091_v31 = vpop.f32.mrf.mxu1  ;;  %v7197_v16 = vld [vmem:[%s9537_s5 + $0x24] ss:$16 sps:$4 sm:$0xff] (%p1239_p7)   ;;  %v7203_v30 = vld [vmem:[%s9537_s5 + $0x28] ss:$16 sps:$4 sm:$0xff] (%p1239_p7)  }
 0x615   :  { %7173 = vpow2.f32 %v6094_v19  ;;  %v6095_v22 = vmul.f32 -1.442695, %v1095_v20  ;;  %v6096_v36 = vmul.f32 -1.442695, %v1097_v34  ;;  %v7200_v19 = vld [vmem:[%s9537_s5 + $0x4] ss:$16 sps:$4 sm:$0xff] (%p1239_p7)   ;;  %1462 = vmatprep.subr.bf16.mxu1 (%p1239_p7), %v7197_v16 }
 0x616   :  { %v1051_v25 = vpop.f32.mrf.mxu0  ;;  %v1092_v32 = vpop.f32.mrf.mxu1  ;;  %1463 = vmatpush1.bf16.msra.mxu1 (%p1239_p7), %v7199_v17  ;;  %v7202_v20 = vld [vmem:[%s9537_s5] ss:$16 sps:$4 sm:$0xff] (%p1239_p7)  }
 0x617   :  { %7175 = vpow2.f32 %v6095_v22  ;;  %1464 = vmatprep.subr.bf16.mxu1 (%p1239_p7), %v7200_v19  ;;  %v7208_v32 = vld [vmem:[%s9537_s5 + $0xc] ss:$16 sps:$4 sm:$0xff] (%p1239_p7)  }
 0x618   :  { %7177 = vtanh.f32 %v1096_v35  ;;  %v7206_v35 = vld [vmem:[%s9537_s5 + $0x8] ss:$16 sps:$4 sm:$0xff] (%p1239_p7)  }
 0x619   :  { %7179 = vpow2.f32 %v6096_v36 }
 0x61a   :  { %1465 = vmatpush1.bf16.msra.mxu1 (%p1239_p7), %v7202_v20 }
 0x61b   :  { %1503 = vmatprep.subr.bf16.mxu1 (%p1239_p7), %v7205_v27 }
 0x622   :  { %v7174_v38 = vpop.eup %7173 }
 0x623   :  { %v1101_v39 = vadd.f32 1.0, %v7174_v38  ;;  %v1387_v38 = vshrl.u32 (%p1239_p7), %v1244_v59, 7 }
 0x624   :  { %v7176_v40 = vpop.eup %7175 }
 0x625   :  { %7181 = vrcp.f32 %v1101_v39  ;;  %v1107_v41 = vadd.f32 1.0, %v7176_v40  ;;  %v7178_v42 = vpop.eup %7177  ;;  %v1388_v39 = vsub.s32 (%p1239_p7), 0, %v1387_v38  ;;  %v1384_v40 = vld [vmem:[%s9539_s7] sm:$0xf] (%p1239_p7) }
 0x626   :  { %v7180_v43 = vpop.eup %7179 }
 0x627   :  { %7183 = vrcp.f32 %v1107_v41  ;;  %v1114_v46 = vadd.f32 1.0, %v7180_v43  ;;  %v1392_v41 = vsub.s32 (%p1239_p7), 1, %v1387_v38 }
 0x629   :  { %7185 = vrcp.f32 %v1114_v46  ;;  %v1393_v43 = vrot.slane (%p1239_p7), %v1384_v40, %v1392_v41  ;;  %v1396_v46 = vsub.s32 (%p1239_p7), 2, %v1387_v38 }
 0x632   :  { %v7182_v44 = vpop.eup %7181 }
 0x633   :  { %v1118_v48 = vmul.f32 %v7182_v44, %v7178_v42  ;;  %v1389_v42 = vrot.slane (%p1239_p7), %v1384_v40, %v1388_v39 }
 0x634   :  { %v7184_v45 = vpop.eup %7183 }
 0x635   :  { %v1117_v47 = vmul.f32 %v7184_v45, %v8021_v14 }
 0x636   :  { %v7186_v50 = vpop.eup %7185 }
 0x637   :  { %v8236_v49 = vadd.f32 %v1118_v48, %v1117_v47 }
 0x639   :  { %7187 = vtanh.f32 %v8236_v49 }
 0x646   :  { %v7188_v51 = vpop.eup %7187 }
 0x647   :  { %v1121_v52 = vmul.f32 %v7188_v51, %v7186_v50  ;;  %v1400_v50 = vsub.s32 (%p1239_p7), 3, %v1387_v38 }
 0x649   :  { %v8239_v53 = vpack.c.bf16 %v1121_v52, %v1121_v52  ;;  %v1397_v52 = vrot.slane (%p1239_p7), %v1384_v40, %v1396_v46 }
 0x64b   :  { %6747 = vmatmul.mubr.bf16.vlgmr.msra.gmra.mxu0 %v8239_v53 }
 0x64c   :  { %6751 = vmatpush3.bf16.msra.mxu0 (%p1239_p7), %v7189_v1  ;;  %6766 = vmatprep.mubr.msk.bf16.mxu0 (%p1239_p7), %vm7786_vm14, %v7785_v3 }
 0x64d   :  { %6752 = vmatprep.subr.bf16.mxu0 (%p1239_p7), %v7785_v3 }
 0x650   :  { %6753 = vmatpush3.bf16.msra.mxu0 (%p1239_p7), %v7190_v4 }
 0x651   :  { %6754 = vmatprep.subr.bf16.mxu0 (%p1239_p7), %v7785_v3 }
 0x654   :  { %6755 = vmatpush3.bf16.msra.mxu0 (%p1239_p7), %v7191_v5 }
 0x655   :  { %6756 = vmatprep.subr.bf16.mxu0 (%p1239_p7), %v7785_v3 }
 0x658   :  { %6757 = vmatpush3.bf16.msra.mxu0 (%p1239_p7), %v7192_v6 }
 0x659   :  { %6758 = vmatprep.subr.bf16.mxu0 (%p1239_p7), %v7785_v3 }
 0x65c   :  { %6759 = vmatpush3.bf16.msra.mxu0 (%p1239_p7), %v7193_v7 }
 0x65d   :  { %6760 = vmatprep.subr.bf16.mxu0 (%p1239_p7), %v7785_v3 }
 0x660   :  { %6761 = vmatpush3.bf16.msra.mxu0 (%p1239_p7), %v7194_v8 }
 0x661   :  { %6762 = vmatprep.subr.bf16.mxu0 (%p1239_p7), %v7785_v3 }
 0x664   :  { %6763 = vmatpush3.bf16.msra.mxu0 (%p1239_p7), %v7195_v9 }
 0x665   :  { %6764 = vmatprep.subr.bf16.mxu0 (%p1239_p7), %v7785_v3 }
 0x668   :  { %6765 = vmatpush3.bf16.msra.mxu0 (%p1239_p7), %v7196_v15 }
 0x70b   :  { %v1228_v14 = vpop.f32.mrf.mxu0 }
 0x70c   :  { %v1229_v55 = vadd.f32 %v6097_v54, %v1228_v14  ;;  %v1401_v14 = vrot.slane (%p1239_p7), %v1384_v40, %v1400_v50 }
 0x70d   :  { %v6748_v56 = vpop.f32.mrf.mxu0  ;;  %1243 = sbr.rel (!%p1239_p7) target bundleno = 2638 (0xa4e), region = 49 }
 0x70e   :  { %1235 = vst [vmem:[#allocation7 + $0x8] sm:$0xff] %v1229_v55  ;;  %v1247_v61 = vsel (%p1239_p7), %vm1246_vm10, %v1229_v55, -1e+30 }
 0x70f   :  { %v1231_v57 = vpop.f32.mrf.mxu0  ;;  %1248 = vmax.xlane.f32.xlu0 (%p1239_p7), %v1247_v61 }
 0x711   :  { %v6749_v58 = vpop.f32.mrf.mxu0 }
 0x798   :  { %v1249_v62 = vpop.xlane.xlu0 %1248 }
 0x799   :  { %vm1250_vm11 = vcmp.eq.f32.partialorder %v1247_v61, %v1249_v62 }
 0x79a   :  { %vm1251_vm12 = vmand %vm1250_vm11, %vm1246_vm10 }
 0x79b   :  { %v1252_v18 = vsel %vm1251_vm12, %v1245_v60, 128 }
 0x79c   :  { %v1254_v63 = vshra.s32 %v1252_v18, 16  ;;  %v1253_v10 = vand.u32 65535, %v1252_v18 }
 0x79e   :  { %v1256_v0 = vcvt.s32.f32 %v1254_v63  ;;  %v1255_v12 = vcvt.s32.f32 %v1253_v10 }
 0x7a0   :  { %1257 = vmin.xlane.f32.xlu0 %v1256_v0 }
 0x829   :  { %v1258_v11 = vpop.xlane.xlu0 %1257 }
 0x82a   :  { %vm1259_vm13 = vcmp.eq.f32.partialorder %v1256_v0, %v1258_v11  ;;  %v1264_v21 = vcvt.f32.s32 %v1258_v11 }
 0x82b   :  { %v1260_v13 = vsel %vm1259_vm13, %v1255_v12, inf }
 0x82c   :  { %1261 = vmin.xlane.f32.xlu1 %v1260_v13  ;;  %v1265_v23 = vshll.u32 %v1264_v21, 16 }
 0x8b5   :  { %v1262_v22 = vpop.xlane.xlu1 %1261 }
 0x8b6   :  { %v1263_v24 = vcvt.f32.s32 %v1262_v22 }
 0x8b8   :  { %v1266_v25 = vadd.s32 %v1265_v23, %v1263_v24 }
 0x8ba   :  { %vm1267_vm15 = vcmp.eq.s32.totalorder %v1245_v60, %v1266_v25 }
 0x8bb   :  { %vm6117_vm1 = vmpackc.low %vm1267_vm15, %vm1267_vm15 }
 0x8bc   :  { %6767 = vmatmul.mubr.msk.bf16.vlgmr.msra.gmra.mxu0 %vm6117_vm1, %v7787_v26 }
 0x97c   :  { %v1369_v29 = vpop.f32.mrf.mxu0 }
 0x97d   :  { %v1375_v31 = vpack.c.bf16 %v1369_v29, %v1369_v29 }
 0x97e   :  { %v6768_v33 = vpop.f32.mrf.mxu0 }
 0x97f   :  { %6127 = vmatmul.mubr.msk.bf16.vlgmr.msra.gmra.mxu1 %vm1446_vm2, %v1375_v31 }
 0x980   :  { %1504 = vmatpush1.bf16.msra.mxu1 %v7203_v30  ;;  %v1372_v34 = vpop.f32.mrf.mxu0  ;;  %1523 = vmatprep.mubr.bf16.mxu1 %v7788_v28 }
 0x981   :  { %1505 = vmatprep.subr.bf16.mxu1 %v7208_v32 }
 0x982   :  { %v6769_v36 = vpop.f32.mrf.mxu0 }
 0x984   :  { %1506 = vmatpush1.bf16.msra.mxu1 %v7206_v35 }
 0x987   :  { %6128 = vmatmul.mubr.msk.bf16.vlgmr.msra.gmra.mxu1 %vm1446_vm2, %v1375_v31 }
 0xa3f   :  { %v1484_v44 = vpop.f32.mrf.mxu1 }
 0xa40   :  { %v1485_v45 = vadd.f32 %v1484_v44, %v1389_v42 }
 0xa41   :  { %v1486_v47 = vpop.f32.mrf.mxu1 }
 0xa42   :  { %1532 = vst [vmem:[#allocation4 + $0x10] sm:$0xff] %v1485_v45  ;;  %v1487_v48 = vadd.f32 %v1486_v47, %v1393_v43 }
 0xa43   :  { %v1488_v51 = vpop.f32.mrf.mxu1 }
 0xa44   :  { %1533 = vst [vmem:[#allocation4] sm:$0xff] %v1487_v48 }
 0xa45   :  { %v1489_v54 = vpop.f32.mrf.mxu1 }
 0xa47   :  { %v1525_v55 = vpop.f32.mrf.mxu1 }
 0xa48   :  { %v1526_v56 = vadd.f32 %v1525_v55, %v1397_v52 }
 0xa49   :  { %v1527_v57 = vpop.f32.mrf.mxu1 }
 0xa4a   :  { %1534 = vst [vmem:[#allocation4 + $0x18] sm:$0xff] %v1526_v56  ;;  %v1528_v58 = vadd.f32 %v1527_v57, %v1401_v14 }
 0xa4b   :  { %v1529_v59 = vpop.f32.mrf.mxu1 }
 0xa4c   :  { %1535 = vst [vmem:[#allocation4 + $0x8] sm:$0xff] %v1528_v58 }
 0xa4d   :  { %v1530_v60 = vpop.f32.mrf.mxu1 }
 0xa4e PF:  { %v7209_v61 = vld [vmem:[%s9538_s6 + $0xe4] ss:$16 sps:$4 sm:$0xff]   ;;  %1784 = vmatprep.mubr.bf16.mxu0 %v7778_v2  ;;  %1825 = vmatprep.mubr.bf16.mxu1 %v7778_v2  ;;  %v7211_v62 = vld [vmem:[%s9538_s6 + $0xe0] ss:$16 sps:$4 sm:$0xff]   ;;  %v7220_v1 = vld [vmem:[%s9538_s6 + $0xec] ss:$16 sps:$4 sm:$0xff]  }
 0xa4f   :  { %1752 = vmatprep.subr.bf16.mxu0 %v7209_v61  ;;  %v7212_v18 = vld [vmem:[%s9538_s6 + $0xc4] ss:$16 sps:$4 sm:$0xff]   ;;  %v7214_v63 = vld [vmem:[%s9538_s6 + $0xc0] ss:$16 sps:$4 sm:$0xff]   ;;  %v7223_v3 = vld [vmem:[%s9538_s6 + $0xe8] ss:$16 sps:$4 sm:$0xff]   ;;  %1793 = vmatprep.subr.bf16.mxu1 %v7220_v1 }
 0xa50   :  { %1753 = vmatpush1.bf16.msra.mxu0 %v7211_v62  ;;  %v7215_v0 = vld [vmem:[%s9538_s6 + $0xa4] ss:$16 sps:$4 sm:$0xff]   ;;  %v7217_v4 = vld [vmem:[%s9538_s6 + $0xa0] ss:$16 sps:$4 sm:$0xff]   ;;  %1794 = vmatpush1.bf16.msra.mxu1 %v7223_v3  ;;  %v7226_v6 = vld [vmem:[%s9538_s6 + $0xcc] ss:$16 sps:$4 sm:$0xff]  }
 0xa51   :  { %1754 = vmatprep.subr.bf16.mxu0 %v7212_v18  ;;  %v7218_v5 = vld [vmem:[%s9538_s6 + $0x84] ss:$16 sps:$4 sm:$0xff]   ;;  %v7229_v7 = vld [vmem:[%s9538_s6 + $0xc8] ss:$16 sps:$4 sm:$0xff]   ;;  %1795 = vmatprep.subr.bf16.mxu1 %v7226_v6  ;;  %v7222_v8 = vld [vmem:[%s9538_s6 + $0x80] ss:$16 sps:$4 sm:$0xff]  }
 0xa52   :  { %v7224_v9 = vld [vmem:[%s9538_s6 + $0x64] ss:$16 sps:$4 sm:$0xff]   ;;  %v7232_v10 = vld [vmem:[%s9538_s6 + $0xac] ss:$16 sps:$4 sm:$0xff]   ;;  %v7235_v11 = vld [vmem:[%s9538_s6 + $0xa8] ss:$16 sps:$4 sm:$0xff]  }
 0xa53   :  { %v7238_v12 = vld [vmem:[%s9538_s6 + $0x8c] ss:$16 sps:$4 sm:$0xff]   ;;  %v7228_v13 = vld [vmem:[%s9538_s6 + $0x60] ss:$16 sps:$4 sm:$0xff]   ;;  %v7230_v15 = vld [vmem:[%s9538_s6 + $0x44] ss:$16 sps:$4 sm:$0xff]  }
 0xa54   :  { %1755 = vmatpush1.bf16.msra.mxu0 %v7214_v63  ;;  %1796 = vmatpush1.bf16.msra.mxu1 %v7229_v7  ;;  %v7241_v16 = vld [vmem:[%s9538_s6 + $0x88] ss:$16 sps:$4 sm:$0xff]   ;;  %v7244_v17 = vld [vmem:[%s9538_s6 + $0x6c] ss:$16 sps:$4 sm:$0xff]   ;;  %v7234_v19 = vld [vmem:[%s9538_s6 + $0x40] ss:$16 sps:$4 sm:$0xff]  }
 0xa55   :  { %1756 = vmatprep.subr.bf16.mxu0 %v7215_v0  ;;  %1797 = vmatprep.subr.bf16.mxu1 %v7232_v10  ;;  %v7236_v20 = vld [vmem:[%s9538_s6 + $0x24] ss:$16 sps:$4 sm:$0xff]   ;;  %v7247_v21 = vld [vmem:[%s9538_s6 + $0x68] ss:$16 sps:$4 sm:$0xff]   ;;  %v7240_v22 = vld [vmem:[%s9538_s6 + $0x20] ss:$16 sps:$4 sm:$0xff]  }
 0xa56   :  { %v7248_v23 = vld [vmem:[%s9538_s6 + $0x4c] ss:$16 sps:$4 sm:$0xff]   ;;  %v7242_v24 = vld [vmem:[%s9538_s6 + $0x4] ss:$16 sps:$4 sm:$0xff]   ;;  %v7250_v25 = vld [vmem:[%s9538_s6 + $0x48] ss:$16 sps:$4 sm:$0xff]  }
 0xa57   :  { %v7251_v26 = vld [vmem:[%s9538_s6 + $0x2c] ss:$16 sps:$4 sm:$0xff]   ;;  %v7246_v27 = vld [vmem:[%s9538_s6] ss:$16 sps:$4 sm:$0xff]   ;;  %v7253_v28 = vld [vmem:[%s9538_s6 + $0x28] ss:$16 sps:$4 sm:$0xff]  }
 0xa58   :  { %1757 = vmatpush1.bf16.msra.mxu0 %v7217_v4  ;;  %1798 = vmatpush1.bf16.msra.mxu1 %v7235_v11  ;;  %v7254_v29 = vld [vmem:[%s9538_s6 + $0xc] ss:$16 sps:$4 sm:$0xff]   ;;  %v7256_v30 = vld [vmem:[%s9538_s6 + $0x8] ss:$16 sps:$4 sm:$0xff]   ;;  %v7258_v32 = vld [vmem:[%s9540_s8 + $0x30] sm:$0xff]   ;;  %s6129_s26 = sld [smem:[#allocation6 + $0x1]] }
 0xa59   :  { %1758 = vmatprep.subr.bf16.mxu0 %v7218_v5  ;;  %1799 = vmatprep.subr.bf16.mxu1 %v7238_v12  ;;  %v7257_v31 = vld [vmem:[%s9540_s8 + $0x38] sm:$0xff]   ;;  %v7259_v33 = vld [vmem:[%s9540_s8 + $0x28] sm:$0xff]   ;;  %v7262_v35 = vld [vmem:[%s9540_s8 + $0x10] sm:$0xff]   ;;  %s6176_s12 = sld [smem:[#allocation6 + $0x2]] }
 0xa5a   :  { %v7261_v34 = vld [vmem:[%s9540_s8 + $0x18] sm:$0xff]   ;;  %v7263_v36 = vld [vmem:[%s9540_s8 + $0x8] sm:$0xff]   ;;  %v7264_v38 = vld [vmem:[%s9540_s8] sm:$0xff]  }
 0xa5b   :  { %v6130_v39 = vld [vmem:[%s9533_s1 + $0x20] sm:$0xff]  ;;  %v1549_v42 = vld [vmem:[#allocation4 + $0x10] sm:$0xff]  ;;  %v6131_v52 = vld [vmem:[%s9533_s1 + $0x28] sm:$0xff] }
 0xa5c   :  { %1759 = vmatpush1.bf16.msra.mxu0 %v7222_v8  ;;  %1800 = vmatpush1.bf16.msra.mxu1 %v7241_v16  ;;  %v1545_v41 = vunpack.c.l.bf16 %v6130_v39  ;;  %v1546_v44 = vunpack.c.h.bf16 %v6130_v39  ;;  %v1550_v45 = vld [vmem:[#allocation4] sm:$0xff]  ;;  %v1548_v58 = vunpack.c.h.bf16 %v6131_v52  ;;  %v1552_v60 = vld [vmem:[#allocation4 + $0x8] sm:$0xff]  ;;  %v1547_v62 = vunpack.c.l.bf16 %v6131_v52  ;;  %v1551_v18 = vld [vmem:[#allocation4 + $0x18] sm:$0xff] }
 0xa5d   :  { %1760 = vmatprep.subr.bf16.mxu0 %v7224_v9  ;;  %1801 = vmatprep.subr.bf16.mxu1 %v7244_v17 }
 0xa5e   :  { %p1540_p8 = scmp.ne.s32.totalorder %s6129_s26, 0 }
 0xa5f   :  { %p1979_p9 = scmp.eq.s32.totalorder %s6176_s12, 0 }
 0xa60   :  { %1761 = vmatpush1.bf16.msra.mxu0 %v7228_v13  ;;  %1802 = vmatpush1.bf16.msra.mxu1 %v7247_v21  ;;  %s1553_s27 = scalar_select %p1540_p8, 1, 0  ;;  %v7282_v39 = vld [vmem:[%s9536_s4 + $0x30] sm:$0xff] (%p1979_p9)   ;;  %vm7790_vm8 = vmmov (%p1979_p9), 0   ;;  %vm2186_vm11 = vcmask (%p1979_p9), 261120  }
 0xa61   :  { %1762 = vmatprep.subr.bf16.mxu0 %v7230_v15  ;;  %1803 = vmatprep.subr.bf16.mxu1 %v7248_v23  ;;  %v7286_v43 = vld [vmem:[%s9536_s4 + $0x10] sm:$0xff] (%p1979_p9)  }
 0xa62   :  { %v1554_v40 = vstv %s1553_s27  ;;  %v7291_v52 = vld [vmem:[%s9537_s5 + $0x20] ss:$16 sps:$4 sm:$0xff] (%p1979_p9)  }
 0xa63   :  { %vm8435_vm3 = vcmp.eq.s32.totalorder %v1554_v40, 1  ;;  %v7283_v40 = vld [vmem:[%s9536_s4 + $0x28] sm:$0xff] (%p1979_p9)  }
 0xa64   :  { %1763 = vmatpush1.bf16.msra.mxu0 %v7234_v19  ;;  %1804 = vmatpush1.bf16.msra.mxu1 %v7250_v25  ;;  %v1556_v46 = vsel %vm8435_vm3, %v1545_v41, %v1549_v42  ;;  %v1557_v48 = vsel %vm8435_vm3, %v1546_v44, %v1550_v45  ;;  %v1559_v63 = vsel %vm8435_vm3, %v1548_v58, %v1552_v60  ;;  %v6167_v25 = vld [vmem:[%s9541_s9] ss:$0 sm:$0xff]  ;;  %v7285_v42 = vld [vmem:[%s9536_s4 + $0x18] sm:$0xff] (%p1979_p9)   ;;  %v7287_v44 = vld [vmem:[%s9536_s4 + $0x8] sm:$0xff] (%p1979_p9)   ;;  %v7791_v60 = vmov (%p1979_p9), 1.0|1.0  }
 0xa65   :  { %1764 = vmatprep.subr.bf16.mxu0 %v7236_v20  ;;  %1805 = vmatprep.subr.bf16.mxu1 %v7251_v26  ;;  %v1558_v3 = vsel %vm8435_vm3, %v1547_v62, %v1551_v18  ;;  %v7284_v41 = vld [vmem:[%s9536_s4 + $0x20] sm:$0xff] (%p1979_p9)   ;;  %v7792_v62 = vmov (%p1979_p9), 0  }
 0xa68   :  { %1765 = vmatpush1.bf16.msra.mxu0 %v7240_v22  ;;  %1806 = vmatpush1.bf16.msra.mxu1 %v7253_v28 }
 0xa69   :  { %1766 = vmatprep.subr.bf16.mxu0 %v7242_v24  ;;  %1807 = vmatprep.subr.bf16.mxu1 %v7254_v29 }
 0xa6c   :  { %1767 = vmatpush1.bf16.msra.mxu0 %v7246_v27  ;;  %1808 = vmatpush1.bf16.msra.mxu1 %v7256_v30  ;;  %v1984_v30 = vlaneseq (%p1979_p9) }
 0xa6d   :  { %6770 = vmatprep.subr.bf16.mxu0 %v7779_v37 }
 0xa6f   :  { %1785 = vmatmul.mubr.bf16.vlgmr.msra.gmra.mxu0 %v8239_v53  ;;  %1826 = vmatmul.mubr.bf16.vlgmr.msra.gmra.mxu1 %v8239_v53  ;;  %v7260_v53 = vld [vmem:[%s9540_s8 + $0x20] sm:$0xff]  }
 0xa70   :  { %6786 = vmatprep.mubr.msk.bf16.mxu0 %vm7780_vm0, %v7779_v37  ;;  %6771 = vmatpush3.bf16.msra.mxu0 %v7257_v31  ;;  %v1985_v31 = vand.u32 (%p1979_p9), 127, %v1984_v30 }
 0xa71   :  { %6772 = vmatprep.subr.bf16.mxu0 %v7779_v37  ;;  %2222 = vmatprep.mubr.bf16.mxu1 (%p1979_p9), %v7792_v62 }
 0xa72   :  { %vm1986_vm4 = vcmp.lt.s32.totalorder (%p1979_p9), %v1985_v31, 16 }
 0xa74   :  { %6773 = vmatpush3.bf16.msra.mxu0 %v7258_v32 }
 0xa75   :  { %6774 = vmatprep.subr.bf16.mxu0 %v7779_v37 }
 0xa78   :  { %6775 = vmatpush3.bf16.msra.mxu0 %v7259_v33 }
 0xa79   :  { %6776 = vmatprep.subr.bf16.mxu0 %v7779_v37 }
 0xa7c   :  { %6777 = vmatpush3.bf16.msra.mxu0 %v7260_v53 }
 0xa7d   :  { %6778 = vmatprep.subr.bf16.mxu0 %v7779_v37 }
 0xa80   :  { %6779 = vmatpush3.bf16.msra.mxu0 %v7261_v34 }
 0xa81   :  { %6780 = vmatprep.subr.bf16.mxu0 %v7779_v37 }
 0xa84   :  { %6781 = vmatpush3.bf16.msra.mxu0 %v7262_v35 }
 0xa85   :  { %6782 = vmatprep.subr.bf16.mxu0 %v7779_v37 }
 0xa88   :  { %6783 = vmatpush3.bf16.msra.mxu0 %v7263_v36  ;;  %v7281_v36 = vld [vmem:[%s9536_s4 + $0x38] sm:$0xff] (%p1979_p9)  }
 0xa89   :  { %6784 = vmatprep.subr.bf16.mxu0 %v7779_v37 }
 0xa8c   :  { %6785 = vmatpush3.bf16.msra.mxu0 %v7264_v38  ;;  %v7789_v38 = vmov (%p1979_p9), 0.0  }
 0xa8d   :  { %6790 = vmatprep.subr.bf16.mxu0 (%p1979_p9), %v7789_v38 }
 0xb2f   :  { %v1786_v47 = vpop.f32.mrf.mxu0  ;;  %v1827_v57 = vpop.f32.mrf.mxu1 }
 0xb30   :  { %v1834_v50 = vadd.f32 %v1786_v47, %v1556_v46  ;;  %v1836_v5 = vadd.f32 %v1827_v57, %v1558_v3 }
 0xb31   :  { %v1788_v51 = vpop.f32.mrf.mxu0  ;;  %v1829_v61 = vpop.f32.mrf.mxu1 }
 0xb32   :  { %v6164_v54 = vmul.f32 -1.442695, %v1834_v50  ;;  %v1835_v14 = vadd.f32 %v1788_v51, %v1557_v48  ;;  %v1837_v4 = vadd.f32 %v1829_v61, %v1559_v63  ;;  %v7288_v50 = vld [vmem:[%s9536_s4] sm:$0xff] (%p1979_p9)   ;;  %v7297_v61 = vld [vmem:[%s9537_s5 + $0x2c] ss:$16 sps:$4 sm:$0xff] (%p1979_p9)  }
 0xb33   :  { %v1790_v55 = vpop.f32.mrf.mxu0  ;;  %v1831_v0 = vpop.f32.mrf.mxu1  ;;  %v7289_v51 = vld [vmem:[%s9537_s5 + $0x24] ss:$16 sps:$4 sm:$0xff] (%p1979_p9)   ;;  %v7295_v63 = vld [vmem:[%s9537_s5 + $0x28] ss:$16 sps:$4 sm:$0xff] (%p1979_p9)  }
 0xb34   :  { %7265 = vpow2.f32 %v6164_v54  ;;  %v6165_v56 = vmul.f32 -1.442695, %v1835_v14  ;;  %v6166_v6 = vmul.f32 -1.442695, %v1837_v4  ;;  %v7292_v54 = vld [vmem:[%s9537_s5 + $0x4] ss:$16 sps:$4 sm:$0xff] (%p1979_p9)   ;;  %2202 = vmatprep.subr.bf16.mxu1 (%p1979_p9), %v7289_v51 }
 0xb35   :  { %v1791_v59 = vpop.f32.mrf.mxu0  ;;  %v1832_v1 = vpop.f32.mrf.mxu1  ;;  %2203 = vmatpush1.bf16.msra.mxu1 (%p1979_p9), %v7291_v52  ;;  %v7294_v14 = vld [vmem:[%s9537_s5] ss:$16 sps:$4 sm:$0xff] (%p1979_p9)  }
 0xb36   :  { %7267 = vpow2.f32 %v6165_v56  ;;  %2204 = vmatprep.subr.bf16.mxu1 (%p1979_p9), %v7292_v54  ;;  %v7300_v1 = vld [vmem:[%s9537_s5 + $0xc] ss:$16 sps:$4 sm:$0xff] (%p1979_p9)  }
 0xb37   :  { %7269 = vtanh.f32 %v1836_v5  ;;  %v7298_v5 = vld [vmem:[%s9537_s5 + $0x8] ss:$16 sps:$4 sm:$0xff] (%p1979_p9)  }
 0xb38   :  { %7271 = vpow2.f32 %v6166_v6 }
 0xb39   :  { %2205 = vmatpush1.bf16.msra.mxu1 (%p1979_p9), %v7294_v14 }
 0xb3a   :  { %2243 = vmatprep.subr.bf16.mxu1 (%p1979_p9), %v7297_v61 }
 0xb41   :  { %v7266_v7 = vpop.eup %7265 }
 0xb42   :  { %v1841_v8 = vadd.f32 1.0, %v7266_v7  ;;  %v2127_v7 = vshrl.u32 (%p1979_p9), %v1984_v30, 7 }
 0xb43   :  { %v7268_v9 = vpop.eup %7267 }
 0xb44   :  { %7273 = vrcp.f32 %v1841_v8  ;;  %v1847_v10 = vadd.f32 1.0, %v7268_v9  ;;  %v7270_v11 = vpop.eup %7269  ;;  %v2128_v8 = vsub.s32 (%p1979_p9), 0, %v2127_v7  ;;  %v2124_v9 = vld [vmem:[%s9539_s7] sm:$0xf] (%p1979_p9) }
 0xb45   :  { %v7272_v12 = vpop.eup %7271 }
 0xb46   :  { %7275 = vrcp.f32 %v1847_v10  ;;  %v1854_v16 = vadd.f32 1.0, %v7272_v12  ;;  %v2132_v10 = vsub.s32 (%p1979_p9), 1, %v2127_v7 }
 0xb48   :  { %7277 = vrcp.f32 %v1854_v16  ;;  %v2133_v12 = vrot.slane (%p1979_p9), %v2124_v9, %v2132_v10  ;;  %v2136_v16 = vsub.s32 (%p1979_p9), 2, %v2127_v7 }
 0xb51   :  { %v7274_v13 = vpop.eup %7273 }
 0xb52   :  { %v1858_v19 = vmul.f32 %v7274_v13, %v7270_v11  ;;  %v2129_v11 = vrot.slane (%p1979_p9), %v2124_v9, %v2128_v8 }
 0xb53   :  { %v7276_v15 = vpop.eup %7275 }
 0xb54   :  { %v1857_v17 = vmul.f32 %v7276_v15, %v8236_v49 }
 0xb55   :  { %v7278_v21 = vpop.eup %7277 }
 0xb56   :  { %v8451_v20 = vadd.f32 %v1858_v19, %v1857_v17 }
 0xb58   :  { %7279 = vtanh.f32 %v8451_v20 }
 0xb65   :  { %v7280_v22 = vpop.eup %7279 }
 0xb66   :  { %v1861_v23 = vmul.f32 %v7280_v22, %v7278_v21  ;;  %v2140_v21 = vsub.s32 (%p1979_p9), 3, %v2127_v7 }
 0xb68   :  { %v8454_v24 = vpack.c.bf16 %v1861_v23, %v1861_v23  ;;  %v2137_v23 = vrot.slane (%p1979_p9), %v2124_v9, %v2136_v16 }
 0xb6a   :  { %6787 = vmatmul.mubr.bf16.vlgmr.msra.gmra.mxu0 %v8454_v24 }
 0xb6b   :  { %6791 = vmatpush3.bf16.msra.mxu0 (%p1979_p9), %v7281_v36  ;;  %6806 = vmatprep.mubr.msk.bf16.mxu0 (%p1979_p9), %vm7790_vm8, %v7789_v38 }
 0xb6c   :  { %6792 = vmatprep.subr.bf16.mxu0 (%p1979_p9), %v7789_v38 }
 0xb6f   :  { %6793 = vmatpush3.bf16.msra.mxu0 (%p1979_p9), %v7282_v39 }
 0xb70   :  { %6794 = vmatprep.subr.bf16.mxu0 (%p1979_p9), %v7789_v38 }
 0xb73   :  { %6795 = vmatpush3.bf16.msra.mxu0 (%p1979_p9), %v7283_v40 }
 0xb74   :  { %6796 = vmatprep.subr.bf16.mxu0 (%p1979_p9), %v7789_v38 }
 0xb77   :  { %6797 = vmatpush3.bf16.msra.mxu0 (%p1979_p9), %v7284_v41 }
 0xb78   :  { %6798 = vmatprep.subr.bf16.mxu0 (%p1979_p9), %v7789_v38 }
 0xb7b   :  { %6799 = vmatpush3.bf16.msra.mxu0 (%p1979_p9), %v7285_v42 }
 0xb7c   :  { %6800 = vmatprep.subr.bf16.mxu0 (%p1979_p9), %v7789_v38 }
 0xb7f   :  { %6801 = vmatpush3.bf16.msra.mxu0 (%p1979_p9), %v7286_v43 }
 0xb80   :  { %6802 = vmatprep.subr.bf16.mxu0 (%p1979_p9), %v7789_v38 }
 0xb83   :  { %6803 = vmatpush3.bf16.msra.mxu0 (%p1979_p9), %v7287_v44 }
 0xb84   :  { %6804 = vmatprep.subr.bf16.mxu0 (%p1979_p9), %v7789_v38 }
 0xb87   :  { %6805 = vmatpush3.bf16.msra.mxu0 (%p1979_p9), %v7288_v50 }
 0xc2a   :  { %v1968_v49 = vpop.f32.mrf.mxu0 }
 0xc2b   :  { %v1969_v26 = vadd.f32 %v6167_v25, %v1968_v49  ;;  %v2141_v49 = vrot.slane (%p1979_p9), %v2124_v9, %v2140_v21 }
 0xc2c   :  { %v6788_v27 = vpop.f32.mrf.mxu0  ;;  %1983 = sbr.rel (!%p1979_p9) target bundleno = 3949 (0xf6d), region = 53 }
 0xc2d   :  { %1975 = vst [vmem:[#allocation7 + $0x10] sm:$0xff] %v1969_v26  ;;  %v1987_v32 = vsel (%p1979_p9), %vm1986_vm4, %v1969_v26, -1e+30 }
 0xc2e   :  { %v1971_v28 = vpop.f32.mrf.mxu0  ;;  %1988 = vmax.xlane.f32.xlu0 (%p1979_p9), %v1987_v32 }
 0xc30   :  { %v6789_v29 = vpop.f32.mrf.mxu0 }
 0xcb7   :  { %v1989_v33 = vpop.xlane.xlu0 %1988 }
 0xcb8   :  { %vm1990_vm5 = vcmp.eq.f32.partialorder %v1987_v32, %v1989_v33 }
 0xcb9   :  { %vm1991_vm6 = vmand %vm1990_vm5, %vm1986_vm4 }
 0xcba   :  { %v1992_v53 = vsel %vm1991_vm6, %v1985_v31, 128 }
 0xcbb   :  { %v1994_v34 = vshra.s32 %v1992_v53, 16  ;;  %v1993_v45 = vand.u32 65535, %v1992_v53 }
 0xcbd   :  { %v1996_v35 = vcvt.s32.f32 %v1994_v34  ;;  %v1995_v47 = vcvt.s32.f32 %v1993_v45 }
 0xcbf   :  { %1997 = vmin.xlane.f32.xlu0 %v1996_v35 }
 0xd48   :  { %v1998_v46 = vpop.xlane.xlu0 %1997 }
 0xd49   :  { %vm1999_vm7 = vcmp.eq.f32.partialorder %v1996_v35, %v1998_v46  ;;  %v2004_v55 = vcvt.f32.s32 %v1998_v46 }
 0xd4a   :  { %v2000_v48 = vsel %vm1999_vm7, %v1995_v47, inf }
 0xd4b   :  { %2001 = vmin.xlane.f32.xlu1 %v2000_v48  ;;  %v2005_v57 = vshll.u32 %v2004_v55, 16 }
 0xdd4   :  { %v2002_v56 = vpop.xlane.xlu1 %2001 }
 0xdd5   :  { %v2003_v58 = vcvt.f32.s32 %v2002_v56 }
 0xdd7   :  { %v2006_v59 = vadd.s32 %v2005_v57, %v2003_v58 }
 0xdd9   :  { %vm2007_vm9 = vcmp.eq.s32.totalorder %v1985_v31, %v2006_v59 }
 0xdda   :  { %vm6187_vm10 = vmpackc.low %vm2007_vm9, %vm2007_vm9 }
 0xddb   :  { %6807 = vmatmul.mubr.msk.bf16.vlgmr.msra.gmra.mxu0 %vm6187_vm10, %v7791_v60 }
 0xe9b   :  { %v2109_v18 = vpop.f32.mrf.mxu0 }
 0xe9c   :  { %v2115_v0 = vpack.c.bf16 %v2109_v18, %v2109_v18 }
 0xe9d   :  { %v6808_v3 = vpop.f32.mrf.mxu0 }
 0xe9e   :  { %6197 = vmatmul.mubr.msk.bf16.vlgmr.msra.gmra.mxu1 %vm2186_vm11, %v2115_v0 }
 0xe9f   :  { %2244 = vmatpush1.bf16.msra.mxu1 %v7295_v63  ;;  %v2112_v4 = vpop.f32.mrf.mxu0  ;;  %2263 = vmatprep.mubr.bf16.mxu1 %v7792_v62 }
 0xea0   :  { %2245 = vmatprep.subr.bf16.mxu1 %v7300_v1 }
 0xea1   :  { %v6809_v6 = vpop.f32.mrf.mxu0 }
 0xea3   :  { %2246 = vmatpush1.bf16.msra.mxu1 %v7298_v5 }
 0xea6   :  { %6198 = vmatmul.mubr.msk.bf16.vlgmr.msra.gmra.mxu1 %vm2186_vm11, %v2115_v0 }
 0xf5e   :  { %v2224_v13 = vpop.f32.mrf.mxu1 }
 0xf5f   :  { %v2225_v15 = vadd.f32 %v2224_v13, %v2129_v11 }
 0xf60   :  { %v2226_v17 = vpop.f32.mrf.mxu1 }
 0xf61   :  { %2272 = vst [vmem:[#allocation4 + $0x10] sm:$0xff] %v2225_v15  ;;  %v2227_v19 = vadd.f32 %v2226_v17, %v2133_v12 }
 0xf62   :  { %v2228_v22 = vpop.f32.mrf.mxu1 }
 0xf63   :  { %2273 = vst [vmem:[#allocation4] sm:$0xff] %v2227_v19 }
 0xf64   :  { %v2229_v25 = vpop.f32.mrf.mxu1 }
 0xf66   :  { %v2265_v26 = vpop.f32.mrf.mxu1 }
 0xf67   :  { %v2266_v27 = vadd.f32 %v2265_v26, %v2137_v23 }
 0xf68   :  { %v2267_v28 = vpop.f32.mrf.mxu1 }
 0xf69   :  { %2274 = vst [vmem:[#allocation4 + $0x18] sm:$0xff] %v2266_v27  ;;  %v2268_v29 = vadd.f32 %v2267_v28, %v2141_v49 }
 0xf6a   :  { %v2269_v30 = vpop.f32.mrf.mxu1 }
 0xf6b   :  { %2275 = vst [vmem:[#allocation4 + $0x8] sm:$0xff] %v2268_v29 }
 0xf6c   :  { %v2270_v31 = vpop.f32.mrf.mxu1 }
 0xf6d PF:  { %v7301_v32 = vld [vmem:[%s9538_s6 + $0xe4] ss:$16 sps:$4 sm:$0xff]   ;;  %2524 = vmatprep.mubr.bf16.mxu0 %v7778_v2  ;;  %2565 = vmatprep.mubr.bf16.mxu1 %v7778_v2  ;;  %v7303_v33 = vld [vmem:[%s9538_s6 + $0xe0] ss:$16 sps:$4 sm:$0xff]   ;;  %v7312_v36 = vld [vmem:[%s9538_s6 + $0xec] ss:$16 sps:$4 sm:$0xff]  }
 0xf6e   :  { %2492 = vmatprep.subr.bf16.mxu0 %v7301_v32  ;;  %v7304_v53 = vld [vmem:[%s9538_s6 + $0xc4] ss:$16 sps:$4 sm:$0xff]   ;;  %v7306_v34 = vld [vmem:[%s9538_s6 + $0xc0] ss:$16 sps:$4 sm:$0xff]   ;;  %v7315_v38 = vld [vmem:[%s9538_s6 + $0xe8] ss:$16 sps:$4 sm:$0xff]   ;;  %2533 = vmatprep.subr.bf16.mxu1 %v7312_v36 }
 0xf6f   :  { %2493 = vmatpush1.bf16.msra.mxu0 %v7303_v33  ;;  %v7307_v35 = vld [vmem:[%s9538_s6 + $0xa4] ss:$16 sps:$4 sm:$0xff]   ;;  %v7309_v39 = vld [vmem:[%s9538_s6 + $0xa0] ss:$16 sps:$4 sm:$0xff]   ;;  %2534 = vmatpush1.bf16.msra.mxu1 %v7315_v38  ;;  %v7318_v41 = vld [vmem:[%s9538_s6 + $0xcc] ss:$16 sps:$4 sm:$0xff]  }
 0xf70   :  { %2494 = vmatprep.subr.bf16.mxu0 %v7304_v53  ;;  %v7310_v40 = vld [vmem:[%s9538_s6 + $0x84] ss:$16 sps:$4 sm:$0xff]   ;;  %v7321_v42 = vld [vmem:[%s9538_s6 + $0xc8] ss:$16 sps:$4 sm:$0xff]   ;;  %2535 = vmatprep.subr.bf16.mxu1 %v7318_v41  ;;  %v7314_v43 = vld [vmem:[%s9538_s6 + $0x80] ss:$16 sps:$4 sm:$0xff]  }
 0xf71   :  { %v7316_v44 = vld [vmem:[%s9538_s6 + $0x64] ss:$16 sps:$4 sm:$0xff]   ;;  %v7324_v45 = vld [vmem:[%s9538_s6 + $0xac] ss:$16 sps:$4 sm:$0xff]   ;;  %v7327_v46 = vld [vmem:[%s9538_s6 + $0xa8] ss:$16 sps:$4 sm:$0xff]  }
 0xf72   :  { %v7330_v47 = vld [vmem:[%s9538_s6 + $0x8c] ss:$16 sps:$4 sm:$0xff]   ;;  %v7320_v48 = vld [vmem:[%s9538_s6 + $0x60] ss:$16 sps:$4 sm:$0xff]   ;;  %v7322_v50 = vld [vmem:[%s9538_s6 + $0x44] ss:$16 sps:$4 sm:$0xff]  }
 0xf73   :  { %2495 = vmatpush1.bf16.msra.mxu0 %v7306_v34  ;;  %2536 = vmatpush1.bf16.msra.mxu1 %v7321_v42  ;;  %v7333_v51 = vld [vmem:[%s9538_s6 + $0x88] ss:$16 sps:$4 sm:$0xff]   ;;  %v7336_v52 = vld [vmem:[%s9538_s6 + $0x6c] ss:$16 sps:$4 sm:$0xff]   ;;  %v7326_v54 = vld [vmem:[%s9538_s6 + $0x40] ss:$16 sps:$4 sm:$0xff]  }
 0xf74   :  { %2496 = vmatprep.subr.bf16.mxu0 %v7307_v35  ;;  %2537 = vmatprep.subr.bf16.mxu1 %v7324_v45  ;;  %v7328_v14 = vld [vmem:[%s9538_s6 + $0x24] ss:$16 sps:$4 sm:$0xff]   ;;  %v7339_v55 = vld [vmem:[%s9538_s6 + $0x68] ss:$16 sps:$4 sm:$0xff]   ;;  %v7332_v56 = vld [vmem:[%s9538_s6 + $0x20] ss:$16 sps:$4 sm:$0xff]  }
 0xf75   :  { %v7340_v57 = vld [vmem:[%s9538_s6 + $0x4c] ss:$16 sps:$4 sm:$0xff]   ;;  %v7334_v58 = vld [vmem:[%s9538_s6 + $0x4] ss:$16 sps:$4 sm:$0xff]   ;;  %v7342_v59 = vld [vmem:[%s9538_s6 + $0x48] ss:$16 sps:$4 sm:$0xff]  }
 0xf76   :  { %v7343_v60 = vld [vmem:[%s9538_s6 + $0x2c] ss:$16 sps:$4 sm:$0xff]   ;;  %v7338_v61 = vld [vmem:[%s9538_s6] ss:$16 sps:$4 sm:$0xff]   ;;  %v7345_v62 = vld [vmem:[%s9538_s6 + $0x28] ss:$16 sps:$4 sm:$0xff]  }
 0xf77   :  { %2497 = vmatpush1.bf16.msra.mxu0 %v7309_v39  ;;  %2538 = vmatpush1.bf16.msra.mxu1 %v7327_v46  ;;  %v7346_v18 = vld [vmem:[%s9538_s6 + $0xc] ss:$16 sps:$4 sm:$0xff]   ;;  %v7348_v63 = vld [vmem:[%s9538_s6 + $0x8] ss:$16 sps:$4 sm:$0xff]   ;;  %v7350_v1 = vld [vmem:[%s9540_s8 + $0x30] sm:$0xff]   ;;  %s6199_s14 = sld [smem:[#allocation6 + $0x2]] }
 0xf78   :  { %2498 = vmatprep.subr.bf16.mxu0 %v7310_v40  ;;  %2539 = vmatprep.subr.bf16.mxu1 %v7330_v47  ;;  %v7349_v0 = vld [vmem:[%s9540_s8 + $0x38] sm:$0xff]   ;;  %v7351_v3 = vld [vmem:[%s9540_s8 + $0x28] sm:$0xff]   ;;  %v7354_v5 = vld [vmem:[%s9540_s8 + $0x10] sm:$0xff]   ;;  %s6246_s20 = sld [smem:[#allocation6 + $0x3]] }
 0xf79   :  { %v7353_v4 = vld [vmem:[%s9540_s8 + $0x18] sm:$0xff]   ;;  %v7355_v6 = vld [vmem:[%s9540_s8 + $0x8] sm:$0xff]   ;;  %v7356_v7 = vld [vmem:[%s9540_s8] sm:$0xff]  }
 0xf7a   :  { %v6200_v8 = vld [vmem:[%s9533_s1 + $0x30] sm:$0xff]  ;;  %v2290_v15 = vld [vmem:[#allocation4] sm:$0xff]  ;;  %v6201_v23 = vld [vmem:[%s9533_s1 + $0x38] sm:$0xff] }
 0xf7b   :  { %2499 = vmatpush1.bf16.msra.mxu0 %v7314_v43  ;;  %2540 = vmatpush1.bf16.msra.mxu1 %v7333_v51  ;;  %v2285_v10 = vunpack.c.l.bf16 %v6200_v8  ;;  %v2289_v11 = vld [vmem:[#allocation4 + $0x10] sm:$0xff]  ;;  %v2286_v13 = vunpack.c.h.bf16 %v6200_v8  ;;  %v2288_v29 = vunpack.c.h.bf16 %v6201_v23  ;;  %v2292_v31 = vld [vmem:[#allocation4 + $0x8] sm:$0xff]  ;;  %v2287_v33 = vunpack.c.l.bf16 %v6201_v23  ;;  %v2291_v53 = vld [vmem:[#allocation4 + $0x18] sm:$0xff] }
 0xf7c   :  { %2500 = vmatprep.subr.bf16.mxu0 %v7316_v44  ;;  %2541 = vmatprep.subr.bf16.mxu1 %v7336_v52 }
 0xf7d   :  { %p2280_p10 = scmp.ne.s32.totalorder %s6199_s14, 0 }
 0xf7e   :  { %p2719_p11 = scmp.eq.s32.totalorder %s6246_s20, 0 }
 0xf7f   :  { %2501 = vmatpush1.bf16.msra.mxu0 %v7320_v48  ;;  %2542 = vmatpush1.bf16.msra.mxu1 %v7339_v55  ;;  %s2293_s15 = scalar_select %p2280_p10, 1, 0  ;;  %v7374_v8 = vld [vmem:[%s9536_s4 + $0x30] sm:$0xff] (%p2719_p11)   ;;  %vm7794_vm2 = vmmov (%p2719_p11), 0   ;;  %vm2926_vm5 = vcmask (%p2719_p11), 261120  }
 0xf80   :  { %2502 = vmatprep.subr.bf16.mxu0 %v7322_v50  ;;  %2543 = vmatprep.subr.bf16.mxu1 %v7340_v57  ;;  %v7378_v12 = vld [vmem:[%s9536_s4 + $0x10] sm:$0xff] (%p2719_p11)  }
 0xf81   :  { %v2294_v9 = vstv %s2293_s15  ;;  %v7383_v23 = vld [vmem:[%s9537_s5 + $0x20] ss:$16 sps:$4 sm:$0xff] (%p2719_p11)  }
 0xf82   :  { %vm8650_vm12 = vcmp.eq.s32.totalorder %v2294_v9, 1  ;;  %v7375_v9 = vld [vmem:[%s9536_s4 + $0x28] sm:$0xff] (%p2719_p11)  }
 0xf83   :  { %2503 = vmatpush1.bf16.msra.mxu0 %v7326_v54  ;;  %2544 = vmatpush1.bf16.msra.mxu1 %v7342_v59  ;;  %v2296_v16 = vsel %vm8650_vm12, %v2285_v10, %v2289_v11  ;;  %v2297_v19 = vsel %vm8650_vm12, %v2286_v13, %v2290_v15  ;;  %v2299_v34 = vsel %vm8650_vm12, %v2288_v29, %v2292_v31  ;;  %v6237_v59 = vld [vmem:[%s9541_s9] ss:$0 sm:$0xff]  ;;  %v7377_v11 = vld [vmem:[%s9536_s4 + $0x18] sm:$0xff] (%p2719_p11)   ;;  %v7379_v13 = vld [vmem:[%s9536_s4 + $0x8] sm:$0xff] (%p2719_p11)   ;;  %v7795_v31 = vmov (%p2719_p11), 1.0|1.0  }
 0xf84   :  { %2504 = vmatprep.subr.bf16.mxu0 %v7328_v14  ;;  %2545 = vmatprep.subr.bf16.mxu1 %v7343_v60  ;;  %v2298_v38 = vsel %vm8650_vm12, %v2287_v33, %v2291_v53  ;;  %v7376_v10 = vld [vmem:[%s9536_s4 + $0x20] sm:$0xff] (%p2719_p11)   ;;  %v7796_v33 = vmov (%p2719_p11), 0  }
 0xf87   :  { %2505 = vmatpush1.bf16.msra.mxu0 %v7332_v56  ;;  %2546 = vmatpush1.bf16.msra.mxu1 %v7345_v62 }
 0xf88   :  { %2506 = vmatprep.subr.bf16.mxu0 %v7334_v58  ;;  %2547 = vmatprep.subr.bf16.mxu1 %v7346_v18 }
 0xf8b   :  { %2507 = vmatpush1.bf16.msra.mxu0 %v7338_v61  ;;  %2548 = vmatpush1.bf16.msra.mxu1 %v7348_v63  ;;  %v2724_v63 = vlaneseq (%p2719_p11) }
 0xf8c   :  { %6810 = vmatprep.subr.bf16.mxu0 %v7779_v37 }
 0xf8e   :  { %2525 = vmatmul.mubr.bf16.vlgmr.msra.gmra.mxu0 %v8454_v24  ;;  %2566 = vmatmul.mubr.bf16.vlgmr.msra.gmra.mxu1 %v8454_v24  ;;  %v7352_v24 = vld [vmem:[%s9540_s8 + $0x20] sm:$0xff]  }
 0xf8f   :  { %6826 = vmatprep.mubr.msk.bf16.mxu0 %vm7780_vm0, %v7779_v37  ;;  %6811 = vmatpush3.bf16.msra.mxu0 %v7349_v0  ;;  %v2725_v0 = vand.u32 (%p2719_p11), 127, %v2724_v63 }
 0xf90   :  { %6812 = vmatprep.subr.bf16.mxu0 %v7779_v37  ;;  %2962 = vmatprep.mubr.bf16.mxu1 (%p2719_p11), %v7796_v33 }
 0xf91   :  { %vm2726_vm13 = vcmp.lt.s32.totalorder (%p2719_p11), %v2725_v0, 16 }
 0xf93   :  { %6813 = vmatpush3.bf16.msra.mxu0 %v7350_v1 }
 0xf94   :  { %6814 = vmatprep.subr.bf16.mxu0 %v7779_v37 }
 0xf97   :  { %6815 = vmatpush3.bf16.msra.mxu0 %v7351_v3 }
 0xf98   :  { %6816 = vmatprep.subr.bf16.mxu0 %v7779_v37 }
 0xf9b   :  { %6817 = vmatpush3.bf16.msra.mxu0 %v7352_v24 }
 0xf9c   :  { %6818 = vmatprep.subr.bf16.mxu0 %v7779_v37 }
 0xf9f   :  { %6819 = vmatpush3.bf16.msra.mxu0 %v7353_v4 }
 0xfa0   :  { %6820 = vmatprep.subr.bf16.mxu0 %v7779_v37 }
 0xfa3   :  { %6821 = vmatpush3.bf16.msra.mxu0 %v7354_v5 }
 0xfa4   :  { %6822 = vmatprep.subr.bf16.mxu0 %v7779_v37 }
 0xfa7   :  { %6823 = vmatpush3.bf16.msra.mxu0 %v7355_v6  ;;  %v7373_v6 = vld [vmem:[%s9536_s4 + $0x38] sm:$0xff] (%p2719_p11)  }
 0xfa8   :  { %6824 = vmatprep.subr.bf16.mxu0 %v7779_v37 }
 0xfab   :  { %6825 = vmatpush3.bf16.msra.mxu0 %v7356_v7  ;;  %v7793_v7 = vmov (%p2719_p11), 0.0  }
 0xfac   :  { %6830 = vmatprep.subr.bf16.mxu0 (%p2719_p11), %v7793_v7 }
0x104e   :  { %v2526_v17 = vpop.f32.mrf.mxu0  ;;  %v2567_v28 = vpop.f32.mrf.mxu1 }
0x104f   :  { %v2574_v21 = vadd.f32 %v2526_v17, %v2296_v16  ;;  %v2576_v40 = vadd.f32 %v2567_v28, %v2298_v38 }
0x1050   :  { %v2528_v22 = vpop.f32.mrf.mxu0  ;;  %v2569_v32 = vpop.f32.mrf.mxu1 }
0x1051   :  { %v6234_v25 = vmul.f32 -1.442695, %v2574_v21  ;;  %v2575_v49 = vadd.f32 %v2528_v22, %v2297_v19  ;;  %v2577_v39 = vadd.f32 %v2569_v32, %v2299_v34  ;;  %v7380_v21 = vld [vmem:[%s9536_s4] sm:$0xff] (%p2719_p11)   ;;  %v7389_v32 = vld [vmem:[%s9537_s5 + $0x2c] ss:$16 sps:$4 sm:$0xff] (%p2719_p11)  }
0x1052   :  { %v2530_v26 = vpop.f32.mrf.mxu0  ;;  %v2571_v35 = vpop.f32.mrf.mxu1  ;;  %v7381_v22 = vld [vmem:[%s9537_s5 + $0x24] ss:$16 sps:$4 sm:$0xff] (%p2719_p11)   ;;  %v7387_v34 = vld [vmem:[%s9537_s5 + $0x28] ss:$16 sps:$4 sm:$0xff] (%p2719_p11)  }
0x1053   :  { %7357 = vpow2.f32 %v6234_v25  ;;  %v6235_v27 = vmul.f32 -1.442695, %v2575_v49  ;;  %v6236_v41 = vmul.f32 -1.442695, %v2577_v39  ;;  %v7384_v25 = vld [vmem:[%s9537_s5 + $0x4] ss:$16 sps:$4 sm:$0xff] (%p2719_p11)   ;;  %2942 = vmatprep.subr.bf16.mxu1 (%p2719_p11), %v7381_v22 }
0x1054   :  { %v2531_v30 = vpop.f32.mrf.mxu0  ;;  %v2572_v36 = vpop.f32.mrf.mxu1  ;;  %2943 = vmatpush1.bf16.msra.mxu1 (%p2719_p11), %v7383_v23  ;;  %v7386_v49 = vld [vmem:[%s9537_s5] ss:$16 sps:$4 sm:$0xff] (%p2719_p11)  }
0x1055   :  { %7359 = vpow2.f32 %v6235_v27  ;;  %2944 = vmatprep.subr.bf16.mxu1 (%p2719_p11), %v7384_v25  ;;  %v7392_v36 = vld [vmem:[%s9537_s5 + $0xc] ss:$16 sps:$4 sm:$0xff] (%p2719_p11)  }
0x1056   :  { %7361 = vtanh.f32 %v2576_v40  ;;  %v7390_v40 = vld [vmem:[%s9537_s5 + $0x8] ss:$16 sps:$4 sm:$0xff] (%p2719_p11)  }
0x1057   :  { %7363 = vpow2.f32 %v6236_v41 }
0x1058   :  { %2945 = vmatpush1.bf16.msra.mxu1 (%p2719_p11), %v7386_v49 }
0x1059   :  { %2983 = vmatprep.subr.bf16.mxu1 (%p2719_p11), %v7389_v32 }
0x1060   :  { %v7358_v42 = vpop.eup %7357 }
0x1061   :  { %v2581_v43 = vadd.f32 1.0, %v7358_v42  ;;  %v2867_v42 = vshrl.u32 (%p2719_p11), %v2724_v63, 7 }
0x1062   :  { %v7360_v44 = vpop.eup %7359 }
0x1063   :  { %7365 = vrcp.f32 %v2581_v43  ;;  %v2587_v45 = vadd.f32 1.0, %v7360_v44  ;;  %v7362_v46 = vpop.eup %7361  ;;  %v2868_v43 = vsub.s32 (%p2719_p11), 0, %v2867_v42  ;;  %v2864_v44 = vld [vmem:[%s9539_s7] sm:$0xf] (%p2719_p11) }
0x1064   :  { %v7364_v47 = vpop.eup %7363 }
0x1065   :  { %7367 = vrcp.f32 %v2587_v45  ;;  %v2594_v51 = vadd.f32 1.0, %v7364_v47  ;;  %v2872_v45 = vsub.s32 (%p2719_p11), 1, %v2867_v42 }
0x1067   :  { %7369 = vrcp.f32 %v2594_v51  ;;  %v2873_v47 = vrot.slane (%p2719_p11), %v2864_v44, %v2872_v45  ;;  %v2876_v51 = vsub.s32 (%p2719_p11), 2, %v2867_v42 }
0x1070   :  { %v7366_v48 = vpop.eup %7365 }
0x1071   :  { %v2598_v54 = vmul.f32 %v7366_v48, %v7362_v46  ;;  %v2869_v46 = vrot.slane (%p2719_p11), %v2864_v44, %v2868_v43 }
0x1072   :  { %v7368_v50 = vpop.eup %7367 }
0x1073   :  { %v2597_v52 = vmul.f32 %v7368_v50, %v8451_v20 }
0x1074   :  { %v7370_v55 = vpop.eup %7369 }
0x1075   :  { %v8666_v14 = vadd.f32 %v2598_v54, %v2597_v52 }
0x1077   :  { %7371 = vtanh.f32 %v8666_v14 }
0x1084   :  { %v7372_v56 = vpop.eup %7371 }
0x1085   :  { %v2601_v57 = vmul.f32 %v7372_v56, %v7370_v55  ;;  %v2880_v55 = vsub.s32 (%p2719_p11), 3, %v2867_v42 }
0x1087   :  { %v8669_v58 = vpack.c.bf16 %v2601_v57, %v2601_v57  ;;  %v2877_v57 = vrot.slane (%p2719_p11), %v2864_v44, %v2876_v51 }
0x1089   :  { %6827 = vmatmul.mubr.bf16.vlgmr.msra.gmra.mxu0 %v8669_v58 }
0x108a   :  { %6831 = vmatpush3.bf16.msra.mxu0 (%p2719_p11), %v7373_v6  ;;  %6846 = vmatprep.mubr.msk.bf16.mxu0 (%p2719_p11), %vm7794_vm2, %v7793_v7 }
0x108b   :  { %6832 = vmatprep.subr.bf16.mxu0 (%p2719_p11), %v7793_v7 }
0x108e   :  { %6833 = vmatpush3.bf16.msra.mxu0 (%p2719_p11), %v7374_v8 }
0x108f   :  { %6834 = vmatprep.subr.bf16.mxu0 (%p2719_p11), %v7793_v7 }
0x1092   :  { %6835 = vmatpush3.bf16.msra.mxu0 (%p2719_p11), %v7375_v9 }
0x1093   :  { %6836 = vmatprep.subr.bf16.mxu0 (%p2719_p11), %v7793_v7 }
0x1096   :  { %6837 = vmatpush3.bf16.msra.mxu0 (%p2719_p11), %v7376_v10 }
0x1097   :  { %6838 = vmatprep.subr.bf16.mxu0 (%p2719_p11), %v7793_v7 }
0x109a   :  { %6839 = vmatpush3.bf16.msra.mxu0 (%p2719_p11), %v7377_v11 }
0x109b   :  { %6840 = vmatprep.subr.bf16.mxu0 (%p2719_p11), %v7793_v7 }
0x109e   :  { %6841 = vmatpush3.bf16.msra.mxu0 (%p2719_p11), %v7378_v12 }
0x109f   :  { %6842 = vmatprep.subr.bf16.mxu0 (%p2719_p11), %v7793_v7 }
0x10a2   :  { %6843 = vmatpush3.bf16.msra.mxu0 (%p2719_p11), %v7379_v13 }
0x10a3   :  { %6844 = vmatprep.subr.bf16.mxu0 (%p2719_p11), %v7793_v7 }
0x10a6   :  { %6845 = vmatpush3.bf16.msra.mxu0 (%p2719_p11), %v7380_v21 }
0x1149   :  { %v2708_v20 = vpop.f32.mrf.mxu0 }
0x114a   :  { %v2709_v60 = vadd.f32 %v6237_v59, %v2708_v20  ;;  %v2881_v20 = vrot.slane (%p2719_p11), %v2864_v44, %v2880_v55 }
0x114b   :  { %v6828_v61 = vpop.f32.mrf.mxu0  ;;  %2723 = sbr.rel (!%p2719_p11) target bundleno = 5260 (0x148c), region = 57 }
0x114c   :  { %2715 = vst [vmem:[#allocation7 + $0x18] sm:$0xff] %v2709_v60  ;;  %v2727_v1 = vsel (%p2719_p11), %vm2726_vm13, %v2709_v60, -1e+30 }
0x114d   :  { %v2711_v62 = vpop.f32.mrf.mxu0  ;;  %2728 = vmax.xlane.f32.xlu0 (%p2719_p11), %v2727_v1 }
0x114f   :  { %v6829_v18 = vpop.f32.mrf.mxu0 }
0x11d6   :  { %v2729_v3 = vpop.xlane.xlu0 %2728 }
0x11d7   :  { %vm2730_vm14 = vcmp.eq.f32.partialorder %v2727_v1, %v2729_v3 }
0x11d8   :  { %vm2731_vm15 = vmand %vm2730_vm14, %vm2726_vm13 }
0x11d9   :  { %v2732_v24 = vsel %vm2731_vm15, %v2725_v0, 128 }
0x11da   :  { %v2734_v4 = vshra.s32 %v2732_v24, 16  ;;  %v2733_v15 = vand.u32 65535, %v2732_v24 }
0x11dc   :  { %v2736_v5 = vcvt.s32.f32 %v2734_v4  ;;  %v2735_v17 = vcvt.s32.f32 %v2733_v15 }
0x11de   :  { %2737 = vmin.xlane.f32.xlu0 %v2736_v5 }
0x1267   :  { %v2738_v16 = vpop.xlane.xlu0 %2737 }
0x1268   :  { %vm2739_vm1 = vcmp.eq.f32.partialorder %v2736_v5, %v2738_v16  ;;  %v2744_v26 = vcvt.f32.s32 %v2738_v16 }
0x1269   :  { %v2740_v19 = vsel %vm2739_vm1, %v2735_v17, inf }
0x126a   :  { %2741 = vmin.xlane.f32.xlu1 %v2740_v19  ;;  %v2745_v28 = vshll.u32 %v2744_v26, 16 }
0x12f3   :  { %v2742_v27 = vpop.xlane.xlu1 %2741 }
0x12f4   :  { %v2743_v29 = vcvt.f32.s32 %v2742_v27 }
0x12f6   :  { %v2746_v30 = vadd.s32 %v2745_v28, %v2743_v29 }
0x12f8   :  { %vm2747_vm3 = vcmp.eq.s32.totalorder %v2725_v0, %v2746_v30 }
0x12f9   :  { %vm6257_vm4 = vmpackc.low %vm2747_vm3, %vm2747_vm3 }
0x12fa   :  { %6847 = vmatmul.mubr.msk.bf16.vlgmr.msra.gmra.mxu0 %vm6257_vm4, %v7795_v31 }
0x13ba   :  { %v2849_v53 = vpop.f32.mrf.mxu0 }
0x13bb   :  { %v2855_v35 = vpack.c.bf16 %v2849_v53, %v2849_v53 }
0x13bc   :  { %v6848_v38 = vpop.f32.mrf.mxu0 }
0x13bd   :  { %6267 = vmatmul.mubr.msk.bf16.vlgmr.msra.gmra.mxu1 %vm2926_vm5, %v2855_v35 }
0x13be   :  { %2984 = vmatpush1.bf16.msra.mxu1 %v7387_v34  ;;  %v2852_v39 = vpop.f32.mrf.mxu0  ;;  %3003 = vmatprep.mubr.bf16.mxu1 %v7796_v33 }
0x13bf   :  { %2985 = vmatprep.subr.bf16.mxu1 %v7392_v36 }
0x13c0   :  { %v6849_v41 = vpop.f32.mrf.mxu0 }
0x13c2   :  { %2986 = vmatpush1.bf16.msra.mxu1 %v7390_v40 }
0x13c5   :  { %6268 = vmatmul.mubr.msk.bf16.vlgmr.msra.gmra.mxu1 %vm2926_vm5, %v2855_v35 }
0x147d   :  { %v2964_v48 = vpop.f32.mrf.mxu1 }
0x147e   :  { %v2965_v50 = vadd.f32 %v2964_v48, %v2869_v46 }
0x147f   :  { %v2966_v52 = vpop.f32.mrf.mxu1 }
0x1480   :  { %3012 = vst [vmem:[#allocation4 + $0x10] sm:$0xff] %v2965_v50  ;;  %v2967_v54 = vadd.f32 %v2966_v52, %v2873_v47 }
0x1481   :  { %v2968_v56 = vpop.f32.mrf.mxu1 }
0x1482   :  { %3013 = vst [vmem:[#allocation4] sm:$0xff] %v2967_v54 }
0x1483   :  { %v2969_v59 = vpop.f32.mrf.mxu1 }
0x1485   :  { %v3005_v60 = vpop.f32.mrf.mxu1 }
0x1486   :  { %v3006_v61 = vadd.f32 %v3005_v60, %v2877_v57 }
0x1487   :  { %v3007_v62 = vpop.f32.mrf.mxu1 }
0x1488   :  { %3014 = vst [vmem:[#allocation4 + $0x18] sm:$0xff] %v3006_v61  ;;  %v3008_v18 = vadd.f32 %v3007_v62, %v2881_v20 }
0x1489   :  { %v3009_v63 = vpop.f32.mrf.mxu1 }
0x148a   :  { %3015 = vst [vmem:[#allocation4 + $0x8] sm:$0xff] %v3008_v18 }
0x148b   :  { %v3010_v0 = vpop.f32.mrf.mxu1 }
0x148c PF:  { %v7393_v1 = vld [vmem:[%s9538_s6 + $0xe4] ss:$16 sps:$4 sm:$0xff]   ;;  %3264 = vmatprep.mubr.bf16.mxu0 %v7778_v2  ;;  %3305 = vmatprep.mubr.bf16.mxu1 %v7778_v2  ;;  %v7395_v3 = vld [vmem:[%s9538_s6 + $0xe0] ss:$16 sps:$4 sm:$0xff]   ;;  %v7404_v6 = vld [vmem:[%s9538_s6 + $0xec] ss:$16 sps:$4 sm:$0xff]  }
0x148d   :  { %3232 = vmatprep.subr.bf16.mxu0 %v7393_v1  ;;  %v7396_v24 = vld [vmem:[%s9538_s6 + $0xc4] ss:$16 sps:$4 sm:$0xff]   ;;  %v7398_v4 = vld [vmem:[%s9538_s6 + $0xc0] ss:$16 sps:$4 sm:$0xff]   ;;  %v7407_v7 = vld [vmem:[%s9538_s6 + $0xe8] ss:$16 sps:$4 sm:$0xff]   ;;  %3273 = vmatprep.subr.bf16.mxu1 %v7404_v6 }
0x148e   :  { %3233 = vmatpush1.bf16.msra.mxu0 %v7395_v3  ;;  %v7399_v5 = vld [vmem:[%s9538_s6 + $0xa4] ss:$16 sps:$4 sm:$0xff]   ;;  %v7401_v8 = vld [vmem:[%s9538_s6 + $0xa0] ss:$16 sps:$4 sm:$0xff]   ;;  %3274 = vmatpush1.bf16.msra.mxu1 %v7407_v7  ;;  %v7410_v10 = vld [vmem:[%s9538_s6 + $0xcc] ss:$16 sps:$4 sm:$0xff]  }
0x148f   :  { %3234 = vmatprep.subr.bf16.mxu0 %v7396_v24  ;;  %v7402_v9 = vld [vmem:[%s9538_s6 + $0x84] ss:$16 sps:$4 sm:$0xff]   ;;  %v7413_v11 = vld [vmem:[%s9538_s6 + $0xc8] ss:$16 sps:$4 sm:$0xff]   ;;  %3275 = vmatprep.subr.bf16.mxu1 %v7410_v10  ;;  %v7406_v12 = vld [vmem:[%s9538_s6 + $0x80] ss:$16 sps:$4 sm:$0xff]  }
0x1490   :  { %v7408_v13 = vld [vmem:[%s9538_s6 + $0x64] ss:$16 sps:$4 sm:$0xff]   ;;  %v7416_v15 = vld [vmem:[%s9538_s6 + $0xac] ss:$16 sps:$4 sm:$0xff]   ;;  %v7419_v16 = vld [vmem:[%s9538_s6 + $0xa8] ss:$16 sps:$4 sm:$0xff]  }
0x1491   :  { %v7422_v17 = vld [vmem:[%s9538_s6 + $0x8c] ss:$16 sps:$4 sm:$0xff]   ;;  %v7412_v19 = vld [vmem:[%s9538_s6 + $0x60] ss:$16 sps:$4 sm:$0xff]   ;;  %v7414_v21 = vld [vmem:[%s9538_s6 + $0x44] ss:$16 sps:$4 sm:$0xff]  }
0x1492   :  { %3235 = vmatpush1.bf16.msra.mxu0 %v7398_v4  ;;  %3276 = vmatpush1.bf16.msra.mxu1 %v7413_v11  ;;  %v7425_v22 = vld [vmem:[%s9538_s6 + $0x88] ss:$16 sps:$4 sm:$0xff]   ;;  %v7428_v23 = vld [vmem:[%s9538_s6 + $0x6c] ss:$16 sps:$4 sm:$0xff]   ;;  %v7418_v25 = vld [vmem:[%s9538_s6 + $0x40] ss:$16 sps:$4 sm:$0xff]  }
0x1493   :  { %3236 = vmatprep.subr.bf16.mxu0 %v7399_v5  ;;  %3277 = vmatprep.subr.bf16.mxu1 %v7416_v15  ;;  %v7420_v49 = vld [vmem:[%s9538_s6 + $0x24] ss:$16 sps:$4 sm:$0xff]   ;;  %v7431_v26 = vld [vmem:[%s9538_s6 + $0x68] ss:$16 sps:$4 sm:$0xff]   ;;  %v7424_v27 = vld [vmem:[%s9538_s6 + $0x20] ss:$16 sps:$4 sm:$0xff]  }
0x1494   :  { %v7432_v28 = vld [vmem:[%s9538_s6 + $0x4c] ss:$16 sps:$4 sm:$0xff]   ;;  %v7426_v29 = vld [vmem:[%s9538_s6 + $0x4] ss:$16 sps:$4 sm:$0xff]   ;;  %v7434_v30 = vld [vmem:[%s9538_s6 + $0x48] ss:$16 sps:$4 sm:$0xff]  }
0x1495   :  { %v7435_v31 = vld [vmem:[%s9538_s6 + $0x2c] ss:$16 sps:$4 sm:$0xff]   ;;  %v7430_v32 = vld [vmem:[%s9538_s6] ss:$16 sps:$4 sm:$0xff]   ;;  %v7437_v33 = vld [vmem:[%s9538_s6 + $0x28] ss:$16 sps:$4 sm:$0xff]  }
0x1496   :  { %3237 = vmatpush1.bf16.msra.mxu0 %v7401_v8  ;;  %3278 = vmatpush1.bf16.msra.mxu1 %v7419_v16  ;;  %v7438_v53 = vld [vmem:[%s9538_s6 + $0xc] ss:$16 sps:$4 sm:$0xff]   ;;  %v7440_v34 = vld [vmem:[%s9538_s6 + $0x8] ss:$16 sps:$4 sm:$0xff]   ;;  %v7442_v36 = vld [vmem:[%s9540_s8 + $0x30] sm:$0xff]   ;;  %s6269_s21 = sld [smem:[#allocation6 + $0x3]] }
0x1497   :  { %3238 = vmatprep.subr.bf16.mxu0 %v7402_v9  ;;  %3279 = vmatprep.subr.bf16.mxu1 %v7422_v17  ;;  %v7441_v35 = vld [vmem:[%s9540_s8 + $0x38] sm:$0xff]   ;;  %v7443_v38 = vld [vmem:[%s9540_s8 + $0x28] sm:$0xff]   ;;  %v7446_v40 = vld [vmem:[%s9540_s8 + $0x10] sm:$0xff]   ;;  %s6316_s25 = sld [smem:[#allocation6 + $0x4]] }
0x1498   :  { %v7445_v39 = vld [vmem:[%s9540_s8 + $0x18] sm:$0xff]   ;;  %v7447_v41 = vld [vmem:[%s9540_s8 + $0x8] sm:$0xff]   ;;  %v7448_v42 = vld [vmem:[%s9540_s8] sm:$0xff]  }
0x1499   :  { %v6270_v43 = vld [vmem:[%s9533_s1 + $0x40] sm:$0xff]  ;;  %v3029_v46 = vld [vmem:[#allocation4 + $0x10] sm:$0xff]  ;;  %v6271_v57 = vld [vmem:[%s9533_s1 + $0x48] sm:$0xff] }
0x149a   :  { %3239 = vmatpush1.bf16.msra.mxu0 %v7406_v12  ;;  %3280 = vmatpush1.bf16.msra.mxu1 %v7425_v22  ;;  %v3025_v45 = vunpack.c.l.bf16 %v6270_v43  ;;  %v3026_v48 = vunpack.c.h.bf16 %v6270_v43  ;;  %v3030_v50 = vld [vmem:[#allocation4] sm:$0xff]  ;;  %v3028_v18 = vunpack.c.h.bf16 %v6271_v57  ;;  %v3032_v0 = vld [vmem:[#allocation4 + $0x8] sm:$0xff]  ;;  %v3027_v3 = vunpack.c.l.bf16 %v6271_v57  ;;  %v3031_v24 = vld [vmem:[#allocation4 + $0x18] sm:$0xff] }
0x149b   :  { %3240 = vmatprep.subr.bf16.mxu0 %v7408_v13  ;;  %3281 = vmatprep.subr.bf16.mxu1 %v7428_v23 }
0x149c   :  { %p3020_p12 = scmp.ne.s32.totalorder %s6269_s21, 0 }
0x149d   :  { %p3459_p13 = scmp.eq.s32.totalorder %s6316_s25, 0 }
0x149e   :  { %3241 = vmatpush1.bf16.msra.mxu0 %v7412_v19  ;;  %3282 = vmatpush1.bf16.msra.mxu1 %v7431_v26  ;;  %s3033_s22 = scalar_select %p3020_p12, 1, 0  ;;  %v7466_v43 = vld [vmem:[%s9536_s4 + $0x30] sm:$0xff] (%p3459_p13)   ;;  %vm7798_vm11 = vmmov (%p3459_p13), 0   ;;  %vm3666_vm14 = vcmask (%p3459_p13), 261120  }
0x149f   :  { %3242 = vmatprep.subr.bf16.mxu0 %v7414_v21  ;;  %3283 = vmatprep.subr.bf16.mxu1 %v7432_v28  ;;  %v7470_v47 = vld [vmem:[%s9536_s4 + $0x10] sm:$0xff] (%p3459_p13)  }
0x14a0   :  { %v3034_v44 = vstv %s3033_s22  ;;  %v7475_v57 = vld [vmem:[%s9537_s5 + $0x20] ss:$16 sps:$4 sm:$0xff] (%p3459_p13)  }
0x14a1   :  { %vm8865_vm6 = vcmp.eq.s32.totalorder %v3034_v44, 1  ;;  %v7467_v44 = vld [vmem:[%s9536_s4 + $0x28] sm:$0xff] (%p3459_p13)  }
0x14a2   :  { %3243 = vmatpush1.bf16.msra.mxu0 %v7418_v25  ;;  %3284 = vmatpush1.bf16.msra.mxu1 %v7434_v30  ;;  %v3036_v51 = vsel %vm8865_vm6, %v3025_v45, %v3029_v46  ;;  %v3037_v54 = vsel %vm8865_vm6, %v3026_v48, %v3030_v50  ;;  %v3039_v4 = vsel %vm8865_vm6, %v3028_v18, %v3032_v0  ;;  %v6307_v30 = vld [vmem:[%s9541_s9] ss:$0 sm:$0xff]  ;;  %v7469_v46 = vld [vmem:[%s9536_s4 + $0x18] sm:$0xff] (%p3459_p13)   ;;  %v7471_v48 = vld [vmem:[%s9536_s4 + $0x8] sm:$0xff] (%p3459_p13)   ;;  %v7799_v0 = vmov (%p3459_p13), 1.0|1.0  }
0x14a3   :  { %3244 = vmatprep.subr.bf16.mxu0 %v7420_v49  ;;  %3285 = vmatprep.subr.bf16.mxu1 %v7435_v31  ;;  %v3038_v7 = vsel %vm8865_vm6, %v3027_v3, %v3031_v24  ;;  %v7468_v45 = vld [vmem:[%s9536_s4 + $0x20] sm:$0xff] (%p3459_p13)   ;;  %v7800_v3 = vmov (%p3459_p13), 0  }
0x14a6   :  { %3245 = vmatpush1.bf16.msra.mxu0 %v7424_v27  ;;  %3286 = vmatpush1.bf16.msra.mxu1 %v7437_v33 }
0x14a7   :  { %3246 = vmatprep.subr.bf16.mxu0 %v7426_v29  ;;  %3287 = vmatprep.subr.bf16.mxu1 %v7438_v53 }
0x14aa   :  { %3247 = vmatpush1.bf16.msra.mxu0 %v7430_v32  ;;  %3288 = vmatpush1.bf16.msra.mxu1 %v7440_v34  ;;  %v3464_v34 = vlaneseq (%p3459_p13) }
0x14ab   :  { %6850 = vmatprep.subr.bf16.mxu0 %v7779_v37 }
0x14ad   :  { %3265 = vmatmul.mubr.bf16.vlgmr.msra.gmra.mxu0 %v8669_v58  ;;  %3306 = vmatmul.mubr.bf16.vlgmr.msra.gmra.mxu1 %v8669_v58  ;;  %v7444_v58 = vld [vmem:[%s9540_s8 + $0x20] sm:$0xff]  }
0x14ae   :  { %6866 = vmatprep.mubr.msk.bf16.mxu0 %vm7780_vm0, %v7779_v37  ;;  %6851 = vmatpush3.bf16.msra.mxu0 %v7441_v35  ;;  %v3465_v35 = vand.u32 (%p3459_p13), 127, %v3464_v34 }
0x14af   :  { %6852 = vmatprep.subr.bf16.mxu0 %v7779_v37  ;;  %3702 = vmatprep.mubr.bf16.mxu1 (%p3459_p13), %v7800_v3 }
0x14b0   :  { %vm3466_vm7 = vcmp.lt.s32.totalorder (%p3459_p13), %v3465_v35, 16 }
0x14b2   :  { %6853 = vmatpush3.bf16.msra.mxu0 %v7442_v36 }
0x14b3   :  { %6854 = vmatprep.subr.bf16.mxu0 %v7779_v37 }
0x14b6   :  { %6855 = vmatpush3.bf16.msra.mxu0 %v7443_v38 }
0x14b7   :  { %6856 = vmatprep.subr.bf16.mxu0 %v7779_v37 }
0x14ba   :  { %6857 = vmatpush3.bf16.msra.mxu0 %v7444_v58 }
0x14bb   :  { %6858 = vmatprep.subr.bf16.mxu0 %v7779_v37 }
0x14be   :  { %6859 = vmatpush3.bf16.msra.mxu0 %v7445_v39 }
0x14bf   :  { %6860 = vmatprep.subr.bf16.mxu0 %v7779_v37 }
0x14c2   :  { %6861 = vmatpush3.bf16.msra.mxu0 %v7446_v40 }
0x14c3   :  { %6862 = vmatprep.subr.bf16.mxu0 %v7779_v37 }
0x14c6   :  { %6863 = vmatpush3.bf16.msra.mxu0 %v7447_v41  ;;  %v7465_v41 = vld [vmem:[%s9536_s4 + $0x38] sm:$0xff] (%p3459_p13)  }
0x14c7   :  { %6864 = vmatprep.subr.bf16.mxu0 %v7779_v37 }
0x14ca   :  { %6865 = vmatpush3.bf16.msra.mxu0 %v7448_v42  ;;  %v7797_v42 = vmov (%p3459_p13), 0.0  }
0x14cb   :  { %6870 = vmatprep.subr.bf16.mxu0 (%p3459_p13), %v7797_v42 }
0x156d   :  { %v3266_v52 = vpop.f32.mrf.mxu0  ;;  %v3307_v62 = vpop.f32.mrf.mxu1 }
0x156e   :  { %v3314_v55 = vadd.f32 %v3266_v52, %v3036_v51  ;;  %v3316_v9 = vadd.f32 %v3307_v62, %v3038_v7 }
0x156f   :  { %v3268_v56 = vpop.f32.mrf.mxu0  ;;  %v3309_v1 = vpop.f32.mrf.mxu1 }
0x1570   :  { %v6304_v59 = vmul.f32 -1.442695, %v3314_v55  ;;  %v3315_v20 = vadd.f32 %v3268_v56, %v3037_v54  ;;  %v3317_v8 = vadd.f32 %v3309_v1, %v3039_v4  ;;  %v7472_v55 = vld [vmem:[%s9536_s4] sm:$0xff] (%p3459_p13)   ;;  %v7481_v1 = vld [vmem:[%s9537_s5 + $0x2c] ss:$16 sps:$4 sm:$0xff] (%p3459_p13)  }
0x1571   :  { %v3270_v60 = vpop.f32.mrf.mxu0  ;;  %v3311_v5 = vpop.f32.mrf.mxu1  ;;  %v7473_v56 = vld [vmem:[%s9537_s5 + $0x24] ss:$16 sps:$4 sm:$0xff] (%p3459_p13)   ;;  %v7479_v4 = vld [vmem:[%s9537_s5 + $0x28] ss:$16 sps:$4 sm:$0xff] (%p3459_p13)  }
0x1572   :  { %7449 = vpow2.f32 %v6304_v59  ;;  %v6305_v61 = vmul.f32 -1.442695, %v3315_v20  ;;  %v6306_v10 = vmul.f32 -1.442695, %v3317_v8  ;;  %v7476_v59 = vld [vmem:[%s9537_s5 + $0x4] ss:$16 sps:$4 sm:$0xff] (%p3459_p13)   ;;  %3682 = vmatprep.subr.bf16.mxu1 (%p3459_p13), %v7473_v56 }
0x1573   :  { %v3271_v63 = vpop.f32.mrf.mxu0  ;;  %v3312_v6 = vpop.f32.mrf.mxu1  ;;  %3683 = vmatpush1.bf16.msra.mxu1 (%p3459_p13), %v7475_v57  ;;  %v7478_v20 = vld [vmem:[%s9537_s5] ss:$16 sps:$4 sm:$0xff] (%p3459_p13)  }
0x1574   :  { %7451 = vpow2.f32 %v6305_v61  ;;  %3684 = vmatprep.subr.bf16.mxu1 (%p3459_p13), %v7476_v59  ;;  %v7484_v6 = vld [vmem:[%s9537_s5 + $0xc] ss:$16 sps:$4 sm:$0xff] (%p3459_p13)  }
0x1575   :  { %7453 = vtanh.f32 %v3316_v9  ;;  %v7482_v9 = vld [vmem:[%s9537_s5 + $0x8] ss:$16 sps:$4 sm:$0xff] (%p3459_p13)  }
0x1576   :  { %7455 = vpow2.f32 %v6306_v10 }
0x1577   :  { %3685 = vmatpush1.bf16.msra.mxu1 (%p3459_p13), %v7478_v20 }
0x1578   :  { %3723 = vmatprep.subr.bf16.mxu1 (%p3459_p13), %v7481_v1 }
0x157f   :  { %v7450_v11 = vpop.eup %7449 }
0x1580   :  { %v3321_v12 = vadd.f32 1.0, %v7450_v11  ;;  %v3607_v11 = vshrl.u32 (%p3459_p13), %v3464_v34, 7 }
0x1581   :  { %v7452_v13 = vpop.eup %7451 }
0x1582   :  { %7457 = vrcp.f32 %v3321_v12  ;;  %v3327_v15 = vadd.f32 1.0, %v7452_v13  ;;  %v7454_v16 = vpop.eup %7453  ;;  %v3608_v12 = vsub.s32 (%p3459_p13), 0, %v3607_v11  ;;  %v3604_v13 = vld [vmem:[%s9539_s7] sm:$0xf] (%p3459_p13) }
0x1583   :  { %v7456_v17 = vpop.eup %7455 }
0x1584   :  { %7459 = vrcp.f32 %v3327_v15  ;;  %v3334_v22 = vadd.f32 1.0, %v7456_v17  ;;  %v3612_v15 = vsub.s32 (%p3459_p13), 1, %v3607_v11 }
0x1586   :  { %7461 = vrcp.f32 %v3334_v22  ;;  %v3613_v17 = vrot.slane (%p3459_p13), %v3604_v13, %v3612_v15  ;;  %v3616_v22 = vsub.s32 (%p3459_p13), 2, %v3607_v11 }
0x158f   :  { %v7458_v19 = vpop.eup %7457 }
0x1590   :  { %v3338_v25 = vmul.f32 %v7458_v19, %v7454_v16  ;;  %v3609_v16 = vrot.slane (%p3459_p13), %v3604_v13, %v3608_v12 }
0x1591   :  { %v7460_v21 = vpop.eup %7459 }
0x1592   :  { %v3337_v23 = vmul.f32 %v7460_v21, %v8666_v14 }
0x1593   :  { %v7462_v26 = vpop.eup %7461 }
0x1594   :  { %v8881_v49 = vadd.f32 %v3338_v25, %v3337_v23 }
0x1596   :  { %7463 = vtanh.f32 %v8881_v49 }
0x15a3   :  { %v7464_v27 = vpop.eup %7463 }
0x15a4   :  { %v3341_v28 = vmul.f32 %v7464_v27, %v7462_v26  ;;  %v3620_v26 = vsub.s32 (%p3459_p13), 3, %v3607_v11 }
0x15a6   :  { %v8884_v29 = vpack.c.bf16 %v3341_v28, %v3341_v28  ;;  %v3617_v28 = vrot.slane (%p3459_p13), %v3604_v13, %v3616_v22 }
0x15a8   :  { %6867 = vmatmul.mubr.bf16.vlgmr.msra.gmra.mxu0 %v8884_v29 }
0x15a9   :  { %6871 = vmatpush3.bf16.msra.mxu0 (%p3459_p13), %v7465_v41  ;;  %6886 = vmatprep.mubr.msk.bf16.mxu0 (%p3459_p13), %vm7798_vm11, %v7797_v42 }
0x15aa   :  { %6872 = vmatprep.subr.bf16.mxu0 (%p3459_p13), %v7797_v42 }
0x15ad   :  { %6873 = vmatpush3.bf16.msra.mxu0 (%p3459_p13), %v7466_v43 }
0x15ae   :  { %6874 = vmatprep.subr.bf16.mxu0 (%p3459_p13), %v7797_v42 }
0x15b1   :  { %6875 = vmatpush3.bf16.msra.mxu0 (%p3459_p13), %v7467_v44 }
0x15b2   :  { %6876 = vmatprep.subr.bf16.mxu0 (%p3459_p13), %v7797_v42 }
0x15b5   :  { %6877 = vmatpush3.bf16.msra.mxu0 (%p3459_p13), %v7468_v45 }
0x15b6   :  { %6878 = vmatprep.subr.bf16.mxu0 (%p3459_p13), %v7797_v42 }
0x15b9   :  { %6879 = vmatpush3.bf16.msra.mxu0 (%p3459_p13), %v7469_v46 }
0x15ba   :  { %6880 = vmatprep.subr.bf16.mxu0 (%p3459_p13), %v7797_v42 }
0x15bd   :  { %6881 = vmatpush3.bf16.msra.mxu0 (%p3459_p13), %v7470_v47 }
0x15be   :  { %6882 = vmatprep.subr.bf16.mxu0 (%p3459_p13), %v7797_v42 }
0x15c1   :  { %6883 = vmatpush3.bf16.msra.mxu0 (%p3459_p13), %v7471_v48 }
0x15c2   :  { %6884 = vmatprep.subr.bf16.mxu0 (%p3459_p13), %v7797_v42 }
0x15c5   :  { %6885 = vmatpush3.bf16.msra.mxu0 (%p3459_p13), %v7472_v55 }
0x1668   :  { %v3448_v14 = vpop.f32.mrf.mxu0 }
0x1669   :  { %v3449_v31 = vadd.f32 %v6307_v30, %v3448_v14  ;;  %v3621_v14 = vrot.slane (%p3459_p13), %v3604_v13, %v3620_v26 }
0x166a   :  { %v6868_v32 = vpop.f32.mrf.mxu0  ;;  %3463 = sbr.rel (!%p3459_p13) target bundleno = 6571 (0x19ab), region = 61 }
0x166b   :  { %3455 = vst [vmem:[#allocation7 + $0x20] sm:$0xff] %v3449_v31  ;;  %v3467_v36 = vsel (%p3459_p13), %vm3466_vm7, %v3449_v31, -1e+30 }
0x166c   :  { %v3451_v33 = vpop.f32.mrf.mxu0  ;;  %3468 = vmax.xlane.f32.xlu0 (%p3459_p13), %v3467_v36 }
0x166e   :  { %v6869_v53 = vpop.f32.mrf.mxu0 }
0x16f5   :  { %v3469_v38 = vpop.xlane.xlu0 %3468 }
0x16f6   :  { %vm3470_vm8 = vcmp.eq.f32.partialorder %v3467_v36, %v3469_v38 }
0x16f7   :  { %vm3471_vm9 = vmand %vm3470_vm8, %vm3466_vm7 }
0x16f8   :  { %v3472_v58 = vsel %vm3471_vm9, %v3465_v35, 128 }
0x16f9   :  { %v3474_v39 = vshra.s32 %v3472_v58, 16  ;;  %v3473_v50 = vand.u32 65535, %v3472_v58 }
0x16fb   :  { %v3476_v40 = vcvt.s32.f32 %v3474_v39  ;;  %v3475_v52 = vcvt.s32.f32 %v3473_v50 }
0x16fd   :  { %3477 = vmin.xlane.f32.xlu0 %v3476_v40 }
0x1786   :  { %v3478_v51 = vpop.xlane.xlu0 %3477 }
0x1787   :  { %vm3479_vm10 = vcmp.eq.f32.partialorder %v3476_v40, %v3478_v51  ;;  %v3484_v60 = vcvt.f32.s32 %v3478_v51 }
0x1788   :  { %v3480_v54 = vsel %vm3479_vm10, %v3475_v52, inf }
0x1789   :  { %3481 = vmin.xlane.f32.xlu1 %v3480_v54  ;;  %v3485_v62 = vshll.u32 %v3484_v60, 16 }
0x1812   :  { %v3482_v61 = vpop.xlane.xlu1 %3481 }
0x1813   :  { %v3483_v18 = vcvt.f32.s32 %v3482_v61 }
0x1815   :  { %v3486_v63 = vadd.s32 %v3485_v62, %v3483_v18 }
0x1817   :  { %vm3487_vm12 = vcmp.eq.s32.totalorder %v3465_v35, %v3486_v63 }
0x1818   :  { %vm6327_vm13 = vmpackc.low %vm3487_vm12, %vm3487_vm12 }
0x1819   :  { %6887 = vmatmul.mubr.msk.bf16.vlgmr.msra.gmra.mxu0 %vm6327_vm13, %v7799_v0 }
0x18d9   :  { %v3589_v24 = vpop.f32.mrf.mxu0 }
0x18da   :  { %v3595_v5 = vpack.c.bf16 %v3589_v24, %v3589_v24 }
0x18db   :  { %v6888_v7 = vpop.f32.mrf.mxu0 }
0x18dc   :  { %6337 = vmatmul.mubr.msk.bf16.vlgmr.msra.gmra.mxu1 %vm3666_vm14, %v3595_v5 }
0x18dd   :  { %3724 = vmatpush1.bf16.msra.mxu1 %v7479_v4  ;;  %v3592_v8 = vpop.f32.mrf.mxu0  ;;  %3743 = vmatprep.mubr.bf16.mxu1 %v7800_v3 }
0x18de   :  { %3725 = vmatprep.subr.bf16.mxu1 %v7484_v6 }
0x18df   :  { %v6889_v10 = vpop.f32.mrf.mxu0 }
0x18e1   :  { %3726 = vmatpush1.bf16.msra.mxu1 %v7482_v9 }
0x18e4   :  { %6338 = vmatmul.mubr.msk.bf16.vlgmr.msra.gmra.mxu1 %vm3666_vm14, %v3595_v5 }
0x199c   :  { %v3704_v19 = vpop.f32.mrf.mxu1 }
0x199d   :  { %v3705_v21 = vadd.f32 %v3704_v19, %v3609_v16 }
0x199e   :  { %v3706_v23 = vpop.f32.mrf.mxu1 }
0x199f   :  { %3752 = vst [vmem:[#allocation4 + $0x10] sm:$0xff] %v3705_v21  ;;  %v3707_v25 = vadd.f32 %v3706_v23, %v3613_v17 }
0x19a0   :  { %v3708_v27 = vpop.f32.mrf.mxu1 }
0x19a1   :  { %3753 = vst [vmem:[#allocation4] sm:$0xff] %v3707_v25 }
0x19a2   :  { %v3709_v30 = vpop.f32.mrf.mxu1 }
0x19a4   :  { %v3745_v31 = vpop.f32.mrf.mxu1 }
0x19a5   :  { %v3746_v32 = vadd.f32 %v3745_v31, %v3617_v28 }
0x19a6   :  { %v3747_v33 = vpop.f32.mrf.mxu1 }
0x19a7   :  { %3754 = vst [vmem:[#allocation4 + $0x18] sm:$0xff] %v3746_v32  ;;  %v3748_v53 = vadd.f32 %v3747_v33, %v3621_v14 }
0x19a8   :  { %v3749_v34 = vpop.f32.mrf.mxu1 }
0x19a9   :  { %3755 = vst [vmem:[#allocation4 + $0x8] sm:$0xff] %v3748_v53 }
0x19aa   :  { %v3750_v35 = vpop.f32.mrf.mxu1 }
0x19ab PF:  { %v7485_v36 = vld [vmem:[%s9538_s6 + $0xe4] ss:$16 sps:$4 sm:$0xff]   ;;  %4004 = vmatprep.mubr.bf16.mxu0 %v7778_v2  ;;  %4045 = vmatprep.mubr.bf16.mxu1 %v7778_v2  ;;  %v7487_v38 = vld [vmem:[%s9538_s6 + $0xe0] ss:$16 sps:$4 sm:$0xff]   ;;  %v7496_v41 = vld [vmem:[%s9538_s6 + $0xec] ss:$16 sps:$4 sm:$0xff]  }
0x19ac   :  { %3972 = vmatprep.subr.bf16.mxu0 %v7485_v36  ;;  %v7488_v58 = vld [vmem:[%s9538_s6 + $0xc4] ss:$16 sps:$4 sm:$0xff]   ;;  %v7490_v39 = vld [vmem:[%s9538_s6 + $0xc0] ss:$16 sps:$4 sm:$0xff]   ;;  %v7499_v42 = vld [vmem:[%s9538_s6 + $0xe8] ss:$16 sps:$4 sm:$0xff]   ;;  %4013 = vmatprep.subr.bf16.mxu1 %v7496_v41 }
0x19ad   :  { %3973 = vmatpush1.bf16.msra.mxu0 %v7487_v38  ;;  %v7491_v40 = vld [vmem:[%s9538_s6 + $0xa4] ss:$16 sps:$4 sm:$0xff]   ;;  %v7493_v43 = vld [vmem:[%s9538_s6 + $0xa0] ss:$16 sps:$4 sm:$0xff]   ;;  %4014 = vmatpush1.bf16.msra.mxu1 %v7499_v42  ;;  %v7502_v45 = vld [vmem:[%s9538_s6 + $0xcc] ss:$16 sps:$4 sm:$0xff]  }
0x19ae   :  { %3974 = vmatprep.subr.bf16.mxu0 %v7488_v58  ;;  %v7494_v44 = vld [vmem:[%s9538_s6 + $0x84] ss:$16 sps:$4 sm:$0xff]   ;;  %v7505_v46 = vld [vmem:[%s9538_s6 + $0xc8] ss:$16 sps:$4 sm:$0xff]   ;;  %4015 = vmatprep.subr.bf16.mxu1 %v7502_v45  ;;  %v7498_v47 = vld [vmem:[%s9538_s6 + $0x80] ss:$16 sps:$4 sm:$0xff]  }
0x19af   :  { %v7500_v48 = vld [vmem:[%s9538_s6 + $0x64] ss:$16 sps:$4 sm:$0xff]   ;;  %v7508_v50 = vld [vmem:[%s9538_s6 + $0xac] ss:$16 sps:$4 sm:$0xff]   ;;  %v7511_v51 = vld [vmem:[%s9538_s6 + $0xa8] ss:$16 sps:$4 sm:$0xff]  }
0x19b0   :  { %v7514_v52 = vld [vmem:[%s9538_s6 + $0x8c] ss:$16 sps:$4 sm:$0xff]   ;;  %v7504_v54 = vld [vmem:[%s9538_s6 + $0x60] ss:$16 sps:$4 sm:$0xff]   ;;  %v7506_v55 = vld [vmem:[%s9538_s6 + $0x44] ss:$16 sps:$4 sm:$0xff]  }
0x19b1   :  { %3975 = vmatpush1.bf16.msra.mxu0 %v7490_v39  ;;  %4016 = vmatpush1.bf16.msra.mxu1 %v7505_v46  ;;  %v7517_v56 = vld [vmem:[%s9538_s6 + $0x88] ss:$16 sps:$4 sm:$0xff]   ;;  %v7520_v57 = vld [vmem:[%s9538_s6 + $0x6c] ss:$16 sps:$4 sm:$0xff]   ;;  %v7510_v59 = vld [vmem:[%s9538_s6 + $0x40] ss:$16 sps:$4 sm:$0xff]  }
0x19b2   :  { %3976 = vmatprep.subr.bf16.mxu0 %v7491_v40  ;;  %4017 = vmatprep.subr.bf16.mxu1 %v7508_v50  ;;  %v7512_v20 = vld [vmem:[%s9538_s6 + $0x24] ss:$16 sps:$4 sm:$0xff]   ;;  %v7523_v60 = vld [vmem:[%s9538_s6 + $0x68] ss:$16 sps:$4 sm:$0xff]   ;;  %v7516_v61 = vld [vmem:[%s9538_s6 + $0x20] ss:$16 sps:$4 sm:$0xff]  }
0x19b3   :  { %v7524_v62 = vld [vmem:[%s9538_s6 + $0x4c] ss:$16 sps:$4 sm:$0xff]   ;;  %v7518_v18 = vld [vmem:[%s9538_s6 + $0x4] ss:$16 sps:$4 sm:$0xff]   ;;  %v7526_v63 = vld [vmem:[%s9538_s6 + $0x48] ss:$16 sps:$4 sm:$0xff]  }
0x19b4   :  { %v7527_v0 = vld [vmem:[%s9538_s6 + $0x2c] ss:$16 sps:$4 sm:$0xff]   ;;  %v7522_v1 = vld [vmem:[%s9538_s6] ss:$16 sps:$4 sm:$0xff]   ;;  %v7529_v3 = vld [vmem:[%s9538_s6 + $0x28] ss:$16 sps:$4 sm:$0xff]  }
0x19b5   :  { %3977 = vmatpush1.bf16.msra.mxu0 %v7493_v43  ;;  %4018 = vmatpush1.bf16.msra.mxu1 %v7511_v51  ;;  %v7530_v24 = vld [vmem:[%s9538_s6 + $0xc] ss:$16 sps:$4 sm:$0xff]   ;;  %v7532_v4 = vld [vmem:[%s9538_s6 + $0x8] ss:$16 sps:$4 sm:$0xff]   ;;  %v7534_v6 = vld [vmem:[%s9540_s8 + $0x30] sm:$0xff]   ;;  %s6339_s27 = sld [smem:[#allocation6 + $0x4]] }
0x19b6   :  { %3978 = vmatprep.subr.bf16.mxu0 %v7494_v44  ;;  %4019 = vmatprep.subr.bf16.mxu1 %v7514_v52  ;;  %v7533_v5 = vld [vmem:[%s9540_s8 + $0x38] sm:$0xff]   ;;  %v7535_v7 = vld [vmem:[%s9540_s8 + $0x28] sm:$0xff]   ;;  %v7538_v9 = vld [vmem:[%s9540_s8 + $0x10] sm:$0xff]   ;;  %s6386_s13 = sld [smem:[#allocation6 + $0x5]] }
0x19b7   :  { %v7537_v8 = vld [vmem:[%s9540_s8 + $0x18] sm:$0xff]   ;;  %v7539_v10 = vld [vmem:[%s9540_s8 + $0x8] sm:$0xff]   ;;  %v7540_v11 = vld [vmem:[%s9540_s8] sm:$0xff]  }
0x19b8   :  { %v6340_v12 = vld [vmem:[%s9533_s1 + $0x50] sm:$0xff]  ;;  %v3770_v21 = vld [vmem:[#allocation4] sm:$0xff]  ;;  %v6341_v28 = vld [vmem:[%s9533_s1 + $0x58] sm:$0xff] }
0x19b9   :  { %3979 = vmatpush1.bf16.msra.mxu0 %v7498_v47  ;;  %4020 = vmatpush1.bf16.msra.mxu1 %v7517_v56  ;;  %v3765_v15 = vunpack.c.l.bf16 %v6340_v12  ;;  %v3769_v16 = vld [vmem:[#allocation4 + $0x10] sm:$0xff]  ;;  %v3766_v19 = vunpack.c.h.bf16 %v6340_v12  ;;  %v3768_v53 = vunpack.c.h.bf16 %v6341_v28  ;;  %v3772_v35 = vld [vmem:[#allocation4 + $0x8] sm:$0xff]  ;;  %v3767_v38 = vunpack.c.l.bf16 %v6341_v28  ;;  %v3771_v58 = vld [vmem:[#allocation4 + $0x18] sm:$0xff] }
0x19ba   :  { %3980 = vmatprep.subr.bf16.mxu0 %v7500_v48  ;;  %4021 = vmatprep.subr.bf16.mxu1 %v7520_v57 }
0x19bb   :  { %p3760_p0 = scmp.ne.s32.totalorder %s6339_s27, 0 }
0x19bc   :  { %p4199_p1 = scmp.eq.s32.totalorder %s6386_s13, 0 }
0x19bd   :  { %3981 = vmatpush1.bf16.msra.mxu0 %v7504_v54  ;;  %4022 = vmatpush1.bf16.msra.mxu1 %v7523_v60  ;;  %s3773_s28 = scalar_select %p3760_p0, 1, 0  ;;  %v7558_v12 = vld [vmem:[%s9536_s4 + $0x30] sm:$0xff] (%p4199_p1)   ;;  %vm7802_vm5 = vmmov (%p4199_p1), 0   ;;  %vm4406_vm8 = vcmask (%p4199_p1), 261120  }
0x19be   :  { %3982 = vmatprep.subr.bf16.mxu0 %v7506_v55  ;;  %4023 = vmatprep.subr.bf16.mxu1 %v7524_v62  ;;  %v7562_v17 = vld [vmem:[%s9536_s4 + $0x10] sm:$0xff] (%p4199_p1)  }
0x19bf   :  { %v3774_v13 = vstv %s3773_s28  ;;  %v7567_v28 = vld [vmem:[%s9537_s5 + $0x20] ss:$16 sps:$4 sm:$0xff] (%p4199_p1)  }
0x19c0   :  { %vm9080_vm15 = vcmp.eq.s32.totalorder %v3774_v13, 1  ;;  %v7559_v13 = vld [vmem:[%s9536_s4 + $0x28] sm:$0xff] (%p4199_p1)  }
0x19c1   :  { %3983 = vmatpush1.bf16.msra.mxu0 %v7510_v59  ;;  %4024 = vmatpush1.bf16.msra.mxu1 %v7526_v63  ;;  %v3776_v22 = vsel %vm9080_vm15, %v3765_v15, %v3769_v16  ;;  %v3777_v25 = vsel %vm9080_vm15, %v3766_v19, %v3770_v21  ;;  %v3779_v39 = vsel %vm9080_vm15, %v3768_v53, %v3772_v35  ;;  %v6377_v63 = vld [vmem:[%s9541_s9] ss:$0 sm:$0xff]  ;;  %v7561_v16 = vld [vmem:[%s9536_s4 + $0x18] sm:$0xff] (%p4199_p1)   ;;  %v7563_v19 = vld [vmem:[%s9536_s4 + $0x8] sm:$0xff] (%p4199_p1)   ;;  %v7803_v35 = vmov (%p4199_p1), 1.0|1.0  }
0x19c2   :  { %3984 = vmatprep.subr.bf16.mxu0 %v7512_v20  ;;  %4025 = vmatprep.subr.bf16.mxu1 %v7527_v0  ;;  %v3778_v42 = vsel %vm9080_vm15, %v3767_v38, %v3771_v58  ;;  %v7560_v15 = vld [vmem:[%s9536_s4 + $0x20] sm:$0xff] (%p4199_p1)   ;;  %v7804_v38 = vmov (%p4199_p1), 0  }
0x19c5   :  { %3985 = vmatpush1.bf16.msra.mxu0 %v7516_v61  ;;  %4026 = vmatpush1.bf16.msra.mxu1 %v7529_v3 }
0x19c6   :  { %3986 = vmatprep.subr.bf16.mxu0 %v7518_v18  ;;  %4027 = vmatprep.subr.bf16.mxu1 %v7530_v24 }
0x19c9   :  { %3987 = vmatpush1.bf16.msra.mxu0 %v7522_v1  ;;  %4028 = vmatpush1.bf16.msra.mxu1 %v7532_v4  ;;  %v4204_v4 = vlaneseq (%p4199_p1) }
0x19ca   :  { %6890 = vmatprep.subr.bf16.mxu0 %v7779_v37 }
0x19cc   :  { %4005 = vmatmul.mubr.bf16.vlgmr.msra.gmra.mxu0 %v8884_v29  ;;  %4046 = vmatmul.mubr.bf16.vlgmr.msra.gmra.mxu1 %v8884_v29  ;;  %v7536_v29 = vld [vmem:[%s9540_s8 + $0x20] sm:$0xff]  }
0x19cd   :  { %6906 = vmatprep.mubr.msk.bf16.mxu0 %vm7780_vm0, %v7779_v37  ;;  %6891 = vmatpush3.bf16.msra.mxu0 %v7533_v5  ;;  %v4205_v5 = vand.u32 (%p4199_p1), 127, %v4204_v4 }
0x19ce   :  { %6892 = vmatprep.subr.bf16.mxu0 %v7779_v37  ;;  %4442 = vmatprep.mubr.bf16.mxu1 (%p4199_p1), %v7804_v38 }
0x19cf   :  { %vm4206_vm1 = vcmp.lt.s32.totalorder (%p4199_p1), %v4205_v5, 16 }
0x19d1   :  { %6893 = vmatpush3.bf16.msra.mxu0 %v7534_v6 }
0x19d2   :  { %6894 = vmatprep.subr.bf16.mxu0 %v7779_v37 }
0x19d5   :  { %6895 = vmatpush3.bf16.msra.mxu0 %v7535_v7 }
0x19d6   :  { %6896 = vmatprep.subr.bf16.mxu0 %v7779_v37 }
0x19d9   :  { %6897 = vmatpush3.bf16.msra.mxu0 %v7536_v29 }
0x19da   :  { %6898 = vmatprep.subr.bf16.mxu0 %v7779_v37 }
0x19dd   :  { %6899 = vmatpush3.bf16.msra.mxu0 %v7537_v8 }
0x19de   :  { %6900 = vmatprep.subr.bf16.mxu0 %v7779_v37 }
0x19e1   :  { %6901 = vmatpush3.bf16.msra.mxu0 %v7538_v9 }
0x19e2   :  { %6902 = vmatprep.subr.bf16.mxu0 %v7779_v37 }
0x19e5   :  { %6903 = vmatpush3.bf16.msra.mxu0 %v7539_v10  ;;  %v7557_v10 = vld [vmem:[%s9536_s4 + $0x38] sm:$0xff] (%p4199_p1)  }
0x19e6   :  { %6904 = vmatprep.subr.bf16.mxu0 %v7779_v37 }
0x19e9   :  { %6905 = vmatpush3.bf16.msra.mxu0 %v7540_v11  ;;  %v7801_v11 = vmov (%p4199_p1), 0.0  }
0x19ea   :  { %6910 = vmatprep.subr.bf16.mxu0 (%p4199_p1), %v7801_v11 }
0x1a8c   :  { %v4006_v23 = vpop.f32.mrf.mxu0  ;;  %v4047_v33 = vpop.f32.mrf.mxu1 }
0x1a8d   :  { %v4054_v26 = vadd.f32 %v4006_v23, %v3776_v22  ;;  %v4056_v44 = vadd.f32 %v4047_v33, %v3778_v42 }
0x1a8e   :  { %v4008_v27 = vpop.f32.mrf.mxu0  ;;  %v4049_v36 = vpop.f32.mrf.mxu1 }
0x1a8f   :  { %v6374_v30 = vmul.f32 -1.442695, %v4054_v26  ;;  %v4055_v14 = vadd.f32 %v4008_v27, %v3777_v25  ;;  %v4057_v43 = vadd.f32 %v4049_v36, %v3779_v39  ;;  %v7564_v26 = vld [vmem:[%s9536_s4] sm:$0xff] (%p4199_p1)   ;;  %v7573_v36 = vld [vmem:[%s9537_s5 + $0x2c] ss:$16 sps:$4 sm:$0xff] (%p4199_p1)  }
0x1a90   :  { %v4010_v31 = vpop.f32.mrf.mxu0  ;;  %v4051_v40 = vpop.f32.mrf.mxu1  ;;  %v7565_v27 = vld [vmem:[%s9537_s5 + $0x24] ss:$16 sps:$4 sm:$0xff] (%p4199_p1)   ;;  %v7571_v39 = vld [vmem:[%s9537_s5 + $0x28] ss:$16 sps:$4 sm:$0xff] (%p4199_p1)  }
0x1a91   :  { %7541 = vpow2.f32 %v6374_v30  ;;  %v6375_v32 = vmul.f32 -1.442695, %v4055_v14  ;;  %v6376_v45 = vmul.f32 -1.442695, %v4057_v43  ;;  %v7568_v30 = vld [vmem:[%s9537_s5 + $0x4] ss:$16 sps:$4 sm:$0xff] (%p4199_p1)   ;;  %4422 = vmatprep.subr.bf16.mxu1 (%p4199_p1), %v7565_v27 }
0x1a92   :  { %v4011_v34 = vpop.f32.mrf.mxu0  ;;  %v4052_v41 = vpop.f32.mrf.mxu1  ;;  %4423 = vmatpush1.bf16.msra.mxu1 (%p4199_p1), %v7567_v28  ;;  %v7570_v14 = vld [vmem:[%s9537_s5] ss:$16 sps:$4 sm:$0xff] (%p4199_p1)  }
0x1a93   :  { %7543 = vpow2.f32 %v6375_v32  ;;  %4424 = vmatprep.subr.bf16.mxu1 (%p4199_p1), %v7568_v30  ;;  %v7576_v41 = vld [vmem:[%s9537_s5 + $0xc] ss:$16 sps:$4 sm:$0xff] (%p4199_p1)  }
0x1a94   :  { %7545 = vtanh.f32 %v4056_v44  ;;  %v7574_v44 = vld [vmem:[%s9537_s5 + $0x8] ss:$16 sps:$4 sm:$0xff] (%p4199_p1)  }
0x1a95   :  { %7547 = vpow2.f32 %v6376_v45 }
0x1a96   :  { %4425 = vmatpush1.bf16.msra.mxu1 (%p4199_p1), %v7570_v14 }
0x1a97   :  { %4463 = vmatprep.subr.bf16.mxu1 (%p4199_p1), %v7573_v36 }
0x1a9e   :  { %v7542_v46 = vpop.eup %7541 }
0x1a9f   :  { %v4061_v47 = vadd.f32 1.0, %v7542_v46  ;;  %v4347_v46 = vshrl.u32 (%p4199_p1), %v4204_v4, 7 }
0x1aa0   :  { %v7544_v48 = vpop.eup %7543 }
0x1aa1   :  { %7549 = vrcp.f32 %v4061_v47  ;;  %v4067_v50 = vadd.f32 1.0, %v7544_v48  ;;  %v7546_v51 = vpop.eup %7545  ;;  %v4348_v47 = vsub.s32 (%p4199_p1), 0, %v4347_v46  ;;  %v4344_v48 = vld [vmem:[%s9539_s7] sm:$0xf] (%p4199_p1) }
0x1aa2   :  { %v7548_v52 = vpop.eup %7547 }
0x1aa3   :  { %7551 = vrcp.f32 %v4067_v50  ;;  %v4074_v56 = vadd.f32 1.0, %v7548_v52  ;;  %v4352_v50 = vsub.s32 (%p4199_p1), 1, %v4347_v46 }
0x1aa5   :  { %7553 = vrcp.f32 %v4074_v56  ;;  %v4353_v52 = vrot.slane (%p4199_p1), %v4344_v48, %v4352_v50  ;;  %v4356_v56 = vsub.s32 (%p4199_p1), 2, %v4347_v46 }
0x1aae   :  { %v7550_v54 = vpop.eup %7549 }
0x1aaf   :  { %v4078_v59 = vmul.f32 %v7550_v54, %v7546_v51  ;;  %v4349_v51 = vrot.slane (%p4199_p1), %v4344_v48, %v4348_v47 }
0x1ab0   :  { %v7552_v55 = vpop.eup %7551 }
0x1ab1   :  { %v4077_v57 = vmul.f32 %v7552_v55, %v8881_v49 }
0x1ab2   :  { %v7554_v60 = vpop.eup %7553 }
0x1ab3   :  { %v9096_v20 = vadd.f32 %v4078_v59, %v4077_v57 }
0x1ab5   :  { %7555 = vtanh.f32 %v9096_v20 }
0x1ac2   :  { %v7556_v61 = vpop.eup %7555 }
0x1ac3   :  { %v4081_v62 = vmul.f32 %v7556_v61, %v7554_v60  ;;  %v4360_v60 = vsub.s32 (%p4199_p1), 3, %v4347_v46 }
0x1ac5   :  { %v9099_v18 = vpack.c.bf16 %v4081_v62, %v4081_v62  ;;  %v4357_v62 = vrot.slane (%p4199_p1), %v4344_v48, %v4356_v56 }
0x1ac7   :  { %6907 = vmatmul.mubr.bf16.vlgmr.msra.gmra.mxu0 %v9099_v18 }
0x1ac8   :  { %6911 = vmatpush3.bf16.msra.mxu0 (%p4199_p1), %v7557_v10  ;;  %6926 = vmatprep.mubr.msk.bf16.mxu0 (%p4199_p1), %vm7802_vm5, %v7801_v11 }
0x1ac9   :  { %6912 = vmatprep.subr.bf16.mxu0 (%p4199_p1), %v7801_v11 }
0x1acc   :  { %6913 = vmatpush3.bf16.msra.mxu0 (%p4199_p1), %v7558_v12 }
0x1acd   :  { %6914 = vmatprep.subr.bf16.mxu0 (%p4199_p1), %v7801_v11 }
0x1ad0   :  { %6915 = vmatpush3.bf16.msra.mxu0 (%p4199_p1), %v7559_v13 }
0x1ad1   :  { %6916 = vmatprep.subr.bf16.mxu0 (%p4199_p1), %v7801_v11 }
0x1ad4   :  { %6917 = vmatpush3.bf16.msra.mxu0 (%p4199_p1), %v7560_v15 }
0x1ad5   :  { %6918 = vmatprep.subr.bf16.mxu0 (%p4199_p1), %v7801_v11 }
0x1ad8   :  { %6919 = vmatpush3.bf16.msra.mxu0 (%p4199_p1), %v7561_v16 }
0x1ad9   :  { %6920 = vmatprep.subr.bf16.mxu0 (%p4199_p1), %v7801_v11 }
0x1adc   :  { %6921 = vmatpush3.bf16.msra.mxu0 (%p4199_p1), %v7562_v17 }
0x1add   :  { %6922 = vmatprep.subr.bf16.mxu0 (%p4199_p1), %v7801_v11 }
0x1ae0   :  { %6923 = vmatpush3.bf16.msra.mxu0 (%p4199_p1), %v7563_v19 }
0x1ae1   :  { %6924 = vmatprep.subr.bf16.mxu0 (%p4199_p1), %v7801_v11 }
0x1ae4   :  { %6925 = vmatpush3.bf16.msra.mxu0 (%p4199_p1), %v7564_v26 }
0x1b87   :  { %v4188_v49 = vpop.f32.mrf.mxu0 }
0x1b88   :  { %v4189_v0 = vadd.f32 %v6377_v63, %v4188_v49  ;;  %v4361_v49 = vrot.slane (%p4199_p1), %v4344_v48, %v4360_v60 }
0x1b89   :  { %v6908_v1 = vpop.f32.mrf.mxu0  ;;  %4203 = sbr.rel (!%p4199_p1) target bundleno = 7882 (0x1eca), region = 65 }
0x1b8a   :  { %4195 = vst [vmem:[#allocation7 + $0x28] sm:$0xff] %v4189_v0  ;;  %v4207_v6 = vsel (%p4199_p1), %vm4206_vm1, %v4189_v0, -1e+30 }
0x1b8b   :  { %v4191_v3 = vpop.f32.mrf.mxu0  ;;  %4208 = vmax.xlane.f32.xlu0 (%p4199_p1), %v4207_v6 }
0x1b8d   :  { %v6909_v24 = vpop.f32.mrf.mxu0 }
0x1c14   :  { %v4209_v7 = vpop.xlane.xlu0 %4208 }
0x1c15   :  { %vm4210_vm2 = vcmp.eq.f32.partialorder %v4207_v6, %v4209_v7 }
0x1c16   :  { %vm4211_vm3 = vmand %vm4210_vm2, %vm4206_vm1 }
0x1c17   :  { %v4212_v29 = vsel %vm4211_vm3, %v4205_v5, 128 }
0x1c18   :  { %v4214_v8 = vshra.s32 %v4212_v29, 16  ;;  %v4213_v21 = vand.u32 65535, %v4212_v29 }
0x1c1a   :  { %v4216_v9 = vcvt.s32.f32 %v4214_v8  ;;  %v4215_v23 = vcvt.s32.f32 %v4213_v21 }
0x1c1c   :  { %4217 = vmin.xlane.f32.xlu0 %v4216_v9 }
0x1ca5   :  { %v4218_v22 = vpop.xlane.xlu0 %4217 }
0x1ca6   :  { %vm4219_vm4 = vcmp.eq.f32.partialorder %v4216_v9, %v4218_v22  ;;  %v4224_v31 = vcvt.f32.s32 %v4218_v22 }
0x1ca7   :  { %v4220_v25 = vsel %vm4219_vm4, %v4215_v23, inf }
0x1ca8   :  { %4221 = vmin.xlane.f32.xlu1 %v4220_v25  ;;  %v4225_v33 = vshll.u32 %v4224_v31, 16 }
0x1d31   :  { %v4222_v32 = vpop.xlane.xlu1 %4221 }
0x1d32   :  { %v4223_v53 = vcvt.f32.s32 %v4222_v32 }
0x1d34   :  { %v4226_v34 = vadd.s32 %v4225_v33, %v4223_v53 }
0x1d36   :  { %vm4227_vm6 = vcmp.eq.s32.totalorder %v4205_v5, %v4226_v34 }
0x1d37   :  { %vm6397_vm7 = vmpackc.low %vm4227_vm6, %vm4227_vm6 }
0x1d38   :  { %6927 = vmatmul.mubr.msk.bf16.vlgmr.msra.gmra.mxu0 %vm6397_vm7, %v7803_v35 }
0x1df8   :  { %v4329_v58 = vpop.f32.mrf.mxu0 }
0x1df9   :  { %v4335_v40 = vpack.c.bf16 %v4329_v58, %v4329_v58 }
0x1dfa   :  { %v6928_v42 = vpop.f32.mrf.mxu0 }
0x1dfb   :  { %6407 = vmatmul.mubr.msk.bf16.vlgmr.msra.gmra.mxu1 %vm4406_vm8, %v4335_v40 }
0x1dfc   :  { %4464 = vmatpush1.bf16.msra.mxu1 %v7571_v39  ;;  %v4332_v43 = vpop.f32.mrf.mxu0  ;;  %4483 = vmatprep.mubr.bf16.mxu1 %v7804_v38 }
0x1dfd   :  { %4465 = vmatprep.subr.bf16.mxu1 %v7576_v41 }
0x1dfe   :  { %v6929_v45 = vpop.f32.mrf.mxu0 }
0x1e00   :  { %4466 = vmatpush1.bf16.msra.mxu1 %v7574_v44 }
0x1e03   :  { %6408 = vmatmul.mubr.msk.bf16.vlgmr.msra.gmra.mxu1 %vm4406_vm8, %v4335_v40 }
0x1ebb   :  { %v4444_v54 = vpop.f32.mrf.mxu1 }
0x1ebc   :  { %v4445_v55 = vadd.f32 %v4444_v54, %v4349_v51 }
0x1ebd   :  { %v4446_v57 = vpop.f32.mrf.mxu1 }
0x1ebe   :  { %4492 = vst [vmem:[#allocation4 + $0x10] sm:$0xff] %v4445_v55  ;;  %v4447_v59 = vadd.f32 %v4446_v57, %v4353_v52 }
0x1ebf   :  { %v4448_v61 = vpop.f32.mrf.mxu1 }
0x1ec0   :  { %4493 = vst [vmem:[#allocation4] sm:$0xff] %v4447_v59 }
0x1ec1   :  { %v4449_v63 = vpop.f32.mrf.mxu1 }
0x1ec3   :  { %v4485_v0 = vpop.f32.mrf.mxu1 }
0x1ec4   :  { %v4486_v1 = vadd.f32 %v4485_v0, %v4357_v62 }
0x1ec5   :  { %v4487_v3 = vpop.f32.mrf.mxu1 }
0x1ec6   :  { %4494 = vst [vmem:[#allocation4 + $0x18] sm:$0xff] %v4486_v1  ;;  %v4488_v24 = vadd.f32 %v4487_v3, %v4361_v49 }
0x1ec7   :  { %v4489_v4 = vpop.f32.mrf.mxu1 }
0x1ec8   :  { %4495 = vst [vmem:[#allocation4 + $0x8] sm:$0xff] %v4488_v24 }
0x1ec9   :  { %v4490_v5 = vpop.f32.mrf.mxu1 }
0x1eca PF:  { %v7577_v6 = vld [vmem:[%s9538_s6 + $0xe4] ss:$16 sps:$4 sm:$0xff]   ;;  %4744 = vmatprep.mubr.bf16.mxu0 %v7778_v2  ;;  %4785 = vmatprep.mubr.bf16.mxu1 %v7778_v2  ;;  %v7579_v7 = vld [vmem:[%s9538_s6 + $0xe0] ss:$16 sps:$4 sm:$0xff]   ;;  %v7588_v10 = vld [vmem:[%s9538_s6 + $0xec] ss:$16 sps:$4 sm:$0xff]  }
0x1ecb   :  { %4712 = vmatprep.subr.bf16.mxu0 %v7577_v6  ;;  %v7580_v29 = vld [vmem:[%s9538_s6 + $0xc4] ss:$16 sps:$4 sm:$0xff]   ;;  %v7582_v8 = vld [vmem:[%s9538_s6 + $0xc0] ss:$16 sps:$4 sm:$0xff]   ;;  %v7591_v11 = vld [vmem:[%s9538_s6 + $0xe8] ss:$16 sps:$4 sm:$0xff]   ;;  %4753 = vmatprep.subr.bf16.mxu1 %v7588_v10 }
0x1ecc   :  { %4713 = vmatpush1.bf16.msra.mxu0 %v7579_v7  ;;  %v7583_v9 = vld [vmem:[%s9538_s6 + $0xa4] ss:$16 sps:$4 sm:$0xff]   ;;  %v7585_v12 = vld [vmem:[%s9538_s6 + $0xa0] ss:$16 sps:$4 sm:$0xff]   ;;  %4754 = vmatpush1.bf16.msra.mxu1 %v7591_v11  ;;  %v7594_v15 = vld [vmem:[%s9538_s6 + $0xcc] ss:$16 sps:$4 sm:$0xff]  }
0x1ecd   :  { %4714 = vmatprep.subr.bf16.mxu0 %v7580_v29  ;;  %v7586_v13 = vld [vmem:[%s9538_s6 + $0x84] ss:$16 sps:$4 sm:$0xff]   ;;  %v7597_v16 = vld [vmem:[%s9538_s6 + $0xc8] ss:$16 sps:$4 sm:$0xff]   ;;  %4755 = vmatprep.subr.bf16.mxu1 %v7594_v15  ;;  %v7590_v17 = vld [vmem:[%s9538_s6 + $0x80] ss:$16 sps:$4 sm:$0xff]  }
0x1ece   :  { %v7592_v19 = vld [vmem:[%s9538_s6 + $0x64] ss:$16 sps:$4 sm:$0xff]   ;;  %v7600_v21 = vld [vmem:[%s9538_s6 + $0xac] ss:$16 sps:$4 sm:$0xff]   ;;  %v7603_v22 = vld [vmem:[%s9538_s6 + $0xa8] ss:$16 sps:$4 sm:$0xff]  }
0x1ecf   :  { %v7606_v23 = vld [vmem:[%s9538_s6 + $0x8c] ss:$16 sps:$4 sm:$0xff]   ;;  %v7596_v25 = vld [vmem:[%s9538_s6 + $0x60] ss:$16 sps:$4 sm:$0xff]   ;;  %v7598_v26 = vld [vmem:[%s9538_s6 + $0x44] ss:$16 sps:$4 sm:$0xff]  }
0x1ed0   :  { %4715 = vmatpush1.bf16.msra.mxu0 %v7582_v8  ;;  %4756 = vmatpush1.bf16.msra.mxu1 %v7597_v16  ;;  %v7609_v27 = vld [vmem:[%s9538_s6 + $0x88] ss:$16 sps:$4 sm:$0xff]   ;;  %v7612_v28 = vld [vmem:[%s9538_s6 + $0x6c] ss:$16 sps:$4 sm:$0xff]   ;;  %v7602_v30 = vld [vmem:[%s9538_s6 + $0x40] ss:$16 sps:$4 sm:$0xff]  }
0x1ed1   :  { %4716 = vmatprep.subr.bf16.mxu0 %v7583_v9  ;;  %4757 = vmatprep.subr.bf16.mxu1 %v7600_v21  ;;  %v7604_v14 = vld [vmem:[%s9538_s6 + $0x24] ss:$16 sps:$4 sm:$0xff]   ;;  %v7615_v31 = vld [vmem:[%s9538_s6 + $0x68] ss:$16 sps:$4 sm:$0xff]   ;;  %v7608_v32 = vld [vmem:[%s9538_s6 + $0x20] ss:$16 sps:$4 sm:$0xff]  }
0x1ed2   :  { %v7616_v33 = vld [vmem:[%s9538_s6 + $0x4c] ss:$16 sps:$4 sm:$0xff]   ;;  %v7610_v53 = vld [vmem:[%s9538_s6 + $0x4] ss:$16 sps:$4 sm:$0xff]   ;;  %v7618_v34 = vld [vmem:[%s9538_s6 + $0x48] ss:$16 sps:$4 sm:$0xff]  }
0x1ed3   :  { %v7619_v35 = vld [vmem:[%s9538_s6 + $0x2c] ss:$16 sps:$4 sm:$0xff]   ;;  %v7614_v36 = vld [vmem:[%s9538_s6] ss:$16 sps:$4 sm:$0xff]   ;;  %v7621_v38 = vld [vmem:[%s9538_s6 + $0x28] ss:$16 sps:$4 sm:$0xff]  }
0x1ed4   :  { %4717 = vmatpush1.bf16.msra.mxu0 %v7585_v12  ;;  %4758 = vmatpush1.bf16.msra.mxu1 %v7603_v22  ;;  %v7622_v58 = vld [vmem:[%s9538_s6 + $0xc] ss:$16 sps:$4 sm:$0xff]   ;;  %v7624_v39 = vld [vmem:[%s9538_s6 + $0x8] ss:$16 sps:$4 sm:$0xff]   ;;  %v7626_v41 = vld [vmem:[%s9540_s8 + $0x30] sm:$0xff]   ;;  %s6409_s15 = sld [smem:[#allocation6 + $0x5]] }
0x1ed5   :  { %4718 = vmatprep.subr.bf16.mxu0 %v7586_v13  ;;  %4759 = vmatprep.subr.bf16.mxu1 %v7606_v23  ;;  %v7625_v40 = vld [vmem:[%s9540_s8 + $0x38] sm:$0xff]   ;;  %v7627_v42 = vld [vmem:[%s9540_s8 + $0x28] sm:$0xff]   ;;  %v7630_v44 = vld [vmem:[%s9540_s8 + $0x10] sm:$0xff]   ;;  %s6456_s0 = sld [smem:[#allocation6 + $0x6]] }
0x1ed6   :  { %v7629_v43 = vld [vmem:[%s9540_s8 + $0x18] sm:$0xff]   ;;  %v7631_v45 = vld [vmem:[%s9540_s8 + $0x8] sm:$0xff]   ;;  %v7632_v46 = vld [vmem:[%s9540_s8] sm:$0xff]  }
0x1ed7   :  { %v6410_v47 = vld [vmem:[%s9533_s1 + $0x60] sm:$0xff]  ;;  %v4509_v51 = vld [vmem:[#allocation4 + $0x10] sm:$0xff]  ;;  %v6411_v62 = vld [vmem:[%s9533_s1 + $0x68] sm:$0xff] }
0x1ed8   :  { %4719 = vmatpush1.bf16.msra.mxu0 %v7590_v17  ;;  %4760 = vmatpush1.bf16.msra.mxu1 %v7609_v27  ;;  %v4505_v50 = vunpack.c.l.bf16 %v6410_v47  ;;  %v4506_v54 = vunpack.c.h.bf16 %v6410_v47  ;;  %v4510_v55 = vld [vmem:[#allocation4] sm:$0xff]  ;;  %v4508_v24 = vunpack.c.h.bf16 %v6411_v62  ;;  %v4512_v5 = vld [vmem:[#allocation4 + $0x8] sm:$0xff]  ;;  %v4507_v7 = vunpack.c.l.bf16 %v6411_v62  ;;  %v4511_v29 = vld [vmem:[#allocation4 + $0x18] sm:$0xff] }
0x1ed9   :  { %4720 = vmatprep.subr.bf16.mxu0 %v7592_v19  ;;  %4761 = vmatprep.subr.bf16.mxu1 %v7612_v28 }
0x1eda   :  { %p4500_p2 = scmp.ne.s32.totalorder %s6409_s15, 0 }
0x1edb   :  { %p4939_p3 = scmp.eq.s32.totalorder %s6456_s0, 0 }
0x1edc   :  { %4721 = vmatpush1.bf16.msra.mxu0 %v7596_v25  ;;  %4762 = vmatpush1.bf16.msra.mxu1 %v7615_v31  ;;  %s4513_s16 = scalar_select %p4500_p2, 1, 0  ;;  %v7650_v47 = vld [vmem:[%s9536_s4 + $0x30] sm:$0xff] (%p4939_p3)   ;;  %vm7806_vm14 = vmmov (%p4939_p3), 0   ;;  %vm5146_vm2 = vcmask (%p4939_p3), 261120  }
0x1edd   :  { %4722 = vmatprep.subr.bf16.mxu0 %v7598_v26  ;;  %4763 = vmatprep.subr.bf16.mxu1 %v7616_v33  ;;  %v7654_v52 = vld [vmem:[%s9536_s4 + $0x10] sm:$0xff] (%p4939_p3)  }
0x1ede   :  { %v4514_v48 = vstv %s4513_s16  ;;  %v7659_v62 = vld [vmem:[%s9537_s5 + $0x20] ss:$16 sps:$4 sm:$0xff] (%p4939_p3)  }
0x1edf   :  { %vm9295_vm9 = vcmp.eq.s32.totalorder %v4514_v48, 1  ;;  %v7651_v48 = vld [vmem:[%s9536_s4 + $0x28] sm:$0xff] (%p4939_p3)  }
0x1ee0   :  { %4723 = vmatpush1.bf16.msra.mxu0 %v7602_v30  ;;  %4764 = vmatpush1.bf16.msra.mxu1 %v7618_v34  ;;  %v4516_v56 = vsel %vm9295_vm9, %v4505_v50, %v4509_v51  ;;  %v4517_v59 = vsel %vm9295_vm9, %v4506_v54, %v4510_v55  ;;  %v4519_v8 = vsel %vm9295_vm9, %v4508_v24, %v4512_v5  ;;  %v6447_v34 = vld [vmem:[%s9541_s9] ss:$0 sm:$0xff]  ;;  %v7653_v51 = vld [vmem:[%s9536_s4 + $0x18] sm:$0xff] (%p4939_p3)   ;;  %v7655_v54 = vld [vmem:[%s9536_s4 + $0x8] sm:$0xff] (%p4939_p3)   ;;  %v7807_v5 = vmov (%p4939_p3), 1.0|1.0  }
0x1ee1   :  { %4724 = vmatprep.subr.bf16.mxu0 %v7604_v14  ;;  %4765 = vmatprep.subr.bf16.mxu1 %v7619_v35  ;;  %v4518_v11 = vsel %vm9295_vm9, %v4507_v7, %v4511_v29  ;;  %v7652_v50 = vld [vmem:[%s9536_s4 + $0x20] sm:$0xff] (%p4939_p3)   ;;  %v7808_v7 = vmov (%p4939_p3), 0  }
0x1ee4   :  { %4725 = vmatpush1.bf16.msra.mxu0 %v7608_v32  ;;  %4766 = vmatpush1.bf16.msra.mxu1 %v7621_v38 }
0x1ee5   :  { %4726 = vmatprep.subr.bf16.mxu0 %v7610_v53  ;;  %4767 = vmatprep.subr.bf16.mxu1 %v7622_v58 }
0x1ee8   :  { %4727 = vmatpush1.bf16.msra.mxu0 %v7614_v36  ;;  %4768 = vmatpush1.bf16.msra.mxu1 %v7624_v39  ;;  %v4944_v39 = vlaneseq (%p4939_p3) }
0x1ee9   :  { %6930 = vmatprep.subr.bf16.mxu0 %v7779_v37 }
0x1eeb   :  { %4745 = vmatmul.mubr.bf16.vlgmr.msra.gmra.mxu0 %v9099_v18  ;;  %4786 = vmatmul.mubr.bf16.vlgmr.msra.gmra.mxu1 %v9099_v18  ;;  %v7628_v18 = vld [vmem:[%s9540_s8 + $0x20] sm:$0xff]  }
0x1eec   :  { %6946 = vmatprep.mubr.msk.bf16.mxu0 %vm7780_vm0, %v7779_v37  ;;  %6931 = vmatpush3.bf16.msra.mxu0 %v7625_v40  ;;  %v4945_v40 = vand.u32 (%p4939_p3), 127, %v4944_v39 }
0x1eed   :  { %6932 = vmatprep.subr.bf16.mxu0 %v7779_v37  ;;  %5182 = vmatprep.mubr.bf16.mxu1 (%p4939_p3), %v7808_v7 }
0x1eee   :  { %vm4946_vm10 = vcmp.lt.s32.totalorder (%p4939_p3), %v4945_v40, 16 }
0x1ef0   :  { %6933 = vmatpush3.bf16.msra.mxu0 %v7626_v41 }
0x1ef1   :  { %6934 = vmatprep.subr.bf16.mxu0 %v7779_v37 }
0x1ef4   :  { %6935 = vmatpush3.bf16.msra.mxu0 %v7627_v42 }
0x1ef5   :  { %6936 = vmatprep.subr.bf16.mxu0 %v7779_v37 }
0x1ef8   :  { %6937 = vmatpush3.bf16.msra.mxu0 %v7628_v18 }
0x1ef9   :  { %6938 = vmatprep.subr.bf16.mxu0 %v7779_v37 }
0x1efc   :  { %6939 = vmatpush3.bf16.msra.mxu0 %v7629_v43 }
0x1efd   :  { %6940 = vmatprep.subr.bf16.mxu0 %v7779_v37 }
0x1f00   :  { %6941 = vmatpush3.bf16.msra.mxu0 %v7630_v44 }
0x1f01   :  { %6942 = vmatprep.subr.bf16.mxu0 %v7779_v37 }
0x1f04   :  { %6943 = vmatpush3.bf16.msra.mxu0 %v7631_v45  ;;  %v7649_v45 = vld [vmem:[%s9536_s4 + $0x38] sm:$0xff] (%p4939_p3)  }
0x1f05   :  { %6944 = vmatprep.subr.bf16.mxu0 %v7779_v37 }
0x1f08   :  { %6945 = vmatpush3.bf16.msra.mxu0 %v7632_v46  ;;  %v7805_v46 = vmov (%p4939_p3), 0.0  }
0x1f09   :  { %6950 = vmatprep.subr.bf16.mxu0 (%p4939_p3), %v7805_v46 }
0x1fab   :  { %v4746_v57 = vpop.f32.mrf.mxu0  ;;  %v4787_v3 = vpop.f32.mrf.mxu1 }
0x1fac   :  { %v4794_v60 = vadd.f32 %v4746_v57, %v4516_v56  ;;  %v4796_v13 = vadd.f32 %v4787_v3, %v4518_v11 }
0x1fad   :  { %v4748_v61 = vpop.f32.mrf.mxu0  ;;  %v4789_v6 = vpop.f32.mrf.mxu1 }
0x1fae   :  { %v6444_v63 = vmul.f32 -1.442695, %v4794_v60  ;;  %v4795_v49 = vadd.f32 %v4748_v61, %v4517_v59  ;;  %v4797_v12 = vadd.f32 %v4789_v6, %v4519_v8  ;;  %v7656_v60 = vld [vmem:[%s9536_s4] sm:$0xff] (%p4939_p3)   ;;  %v7665_v6 = vld [vmem:[%s9537_s5 + $0x2c] ss:$16 sps:$4 sm:$0xff] (%p4939_p3)  }
0x1faf   :  { %v4750_v0 = vpop.f32.mrf.mxu0  ;;  %v4791_v9 = vpop.f32.mrf.mxu1  ;;  %v7657_v61 = vld [vmem:[%s9537_s5 + $0x24] ss:$16 sps:$4 sm:$0xff] (%p4939_p3)   ;;  %v7663_v8 = vld [vmem:[%s9537_s5 + $0x28] ss:$16 sps:$4 sm:$0xff] (%p4939_p3)  }
0x1fb0   :  { %7633 = vpow2.f32 %v6444_v63  ;;  %v6445_v1 = vmul.f32 -1.442695, %v4795_v49  ;;  %v6446_v15 = vmul.f32 -1.442695, %v4797_v12  ;;  %v7660_v63 = vld [vmem:[%s9537_s5 + $0x4] ss:$16 sps:$4 sm:$0xff] (%p4939_p3)   ;;  %5162 = vmatprep.subr.bf16.mxu1 (%p4939_p3), %v7657_v61 }
0x1fb1   :  { %v4751_v4 = vpop.f32.mrf.mxu0  ;;  %v4792_v10 = vpop.f32.mrf.mxu1  ;;  %5163 = vmatpush1.bf16.msra.mxu1 (%p4939_p3), %v7659_v62  ;;  %v7662_v49 = vld [vmem:[%s9537_s5] ss:$16 sps:$4 sm:$0xff] (%p4939_p3)  }
0x1fb2   :  { %7635 = vpow2.f32 %v6445_v1  ;;  %5164 = vmatprep.subr.bf16.mxu1 (%p4939_p3), %v7660_v63  ;;  %v7668_v10 = vld [vmem:[%s9537_s5 + $0xc] ss:$16 sps:$4 sm:$0xff] (%p4939_p3)  }
0x1fb3   :  { %7637 = vtanh.f32 %v4796_v13  ;;  %v7666_v13 = vld [vmem:[%s9537_s5 + $0x8] ss:$16 sps:$4 sm:$0xff] (%p4939_p3)  }
0x1fb4   :  { %7639 = vpow2.f32 %v6446_v15 }
0x1fb5   :  { %5165 = vmatpush1.bf16.msra.mxu1 (%p4939_p3), %v7662_v49 }
0x1fb6   :  { %5203 = vmatprep.subr.bf16.mxu1 (%p4939_p3), %v7665_v6 }
0x1fbd   :  { %v7634_v16 = vpop.eup %7633 }
0x1fbe   :  { %v4801_v17 = vadd.f32 1.0, %v7634_v16  ;;  %v5087_v16 = vshrl.u32 (%p4939_p3), %v4944_v39, 7 }
0x1fbf   :  { %v7636_v19 = vpop.eup %7635 }
0x1fc0   :  { %7641 = vrcp.f32 %v4801_v17  ;;  %v4807_v21 = vadd.f32 1.0, %v7636_v19  ;;  %v7638_v22 = vpop.eup %7637  ;;  %v5088_v17 = vsub.s32 (%p4939_p3), 0, %v5087_v16  ;;  %v5084_v19 = vld [vmem:[%s9539_s7] sm:$0xf] (%p4939_p3) }
0x1fc1   :  { %v7640_v23 = vpop.eup %7639 }
0x1fc2   :  { %7643 = vrcp.f32 %v4807_v21  ;;  %v4814_v27 = vadd.f32 1.0, %v7640_v23  ;;  %v5092_v21 = vsub.s32 (%p4939_p3), 1, %v5087_v16 }
0x1fc4   :  { %7645 = vrcp.f32 %v4814_v27  ;;  %v5093_v23 = vrot.slane (%p4939_p3), %v5084_v19, %v5092_v21  ;;  %v5096_v27 = vsub.s32 (%p4939_p3), 2, %v5087_v16 }
0x1fcd   :  { %v7642_v25 = vpop.eup %7641 }
0x1fce   :  { %v4818_v30 = vmul.f32 %v7642_v25, %v7638_v22  ;;  %v5089_v22 = vrot.slane (%p4939_p3), %v5084_v19, %v5088_v17 }
0x1fcf   :  { %v7644_v26 = vpop.eup %7643 }
0x1fd0   :  { %v4817_v28 = vmul.f32 %v7644_v26, %v9096_v20 }
0x1fd1   :  { %v7646_v31 = vpop.eup %7645 }
0x1fd2   :  { %v9311_v14 = vadd.f32 %v4818_v30, %v4817_v28 }
0x1fd4   :  { %7647 = vtanh.f32 %v9311_v14 }
0x1fe1   :  { %v7648_v32 = vpop.eup %7647 }
0x1fe2   :  { %v4821_v33 = vmul.f32 %v7648_v32, %v7646_v31  ;;  %v5100_v31 = vsub.s32 (%p4939_p3), 3, %v5087_v16 }
0x1fe4   :  { %v9314_v53 = vpack.c.bf16 %v4821_v33, %v4821_v33  ;;  %v5097_v33 = vrot.slane (%p4939_p3), %v5084_v19, %v5096_v27 }
0x1fe6   :  { %6947 = vmatmul.mubr.bf16.vlgmr.msra.gmra.mxu0 %v9314_v53 }
0x1fe7   :  { %6951 = vmatpush3.bf16.msra.mxu0 (%p4939_p3), %v7649_v45  ;;  %6966 = vmatprep.mubr.msk.bf16.mxu0 (%p4939_p3), %vm7806_vm14, %v7805_v46 }
0x1fe8   :  { %6952 = vmatprep.subr.bf16.mxu0 (%p4939_p3), %v7805_v46 }
0x1feb   :  { %6953 = vmatpush3.bf16.msra.mxu0 (%p4939_p3), %v7650_v47 }
0x1fec   :  { %6954 = vmatprep.subr.bf16.mxu0 (%p4939_p3), %v7805_v46 }
0x1fef   :  { %6955 = vmatpush3.bf16.msra.mxu0 (%p4939_p3), %v7651_v48 }
0x1ff0   :  { %6956 = vmatprep.subr.bf16.mxu0 (%p4939_p3), %v7805_v46 }
0x1ff3   :  { %6957 = vmatpush3.bf16.msra.mxu0 (%p4939_p3), %v7652_v50 }
0x1ff4   :  { %6958 = vmatprep.subr.bf16.mxu0 (%p4939_p3), %v7805_v46 }
0x1ff7   :  { %6959 = vmatpush3.bf16.msra.mxu0 (%p4939_p3), %v7653_v51 }
0x1ff8   :  { %6960 = vmatprep.subr.bf16.mxu0 (%p4939_p3), %v7805_v46 }
0x1ffb   :  { %6961 = vmatpush3.bf16.msra.mxu0 (%p4939_p3), %v7654_v52 }
0x1ffc   :  { %6962 = vmatprep.subr.bf16.mxu0 (%p4939_p3), %v7805_v46 }
0x1fff   :  { %6963 = vmatpush3.bf16.msra.mxu0 (%p4939_p3), %v7655_v54 }
0x2000   :  { %6964 = vmatprep.subr.bf16.mxu0 (%p4939_p3), %v7805_v46 }
0x2003   :  { %6965 = vmatpush3.bf16.msra.mxu0 (%p4939_p3), %v7656_v60 }
0x20a6   :  { %v4928_v20 = vpop.f32.mrf.mxu0 }
0x20a7   :  { %v4929_v35 = vadd.f32 %v6447_v34, %v4928_v20  ;;  %v5101_v20 = vrot.slane (%p4939_p3), %v5084_v19, %v5100_v31 }
0x20a8   :  { %v6948_v36 = vpop.f32.mrf.mxu0  ;;  %4943 = sbr.rel (!%p4939_p3) target bundleno = 9193 (0x23e9), region = 69 }
0x20a9   :  { %4935 = vst [vmem:[#allocation7 + $0x30] sm:$0xff] %v4929_v35  ;;  %v4947_v41 = vsel (%p4939_p3), %vm4946_vm10, %v4929_v35, -1e+30 }
0x20aa   :  { %v4931_v38 = vpop.f32.mrf.mxu0  ;;  %4948 = vmax.xlane.f32.xlu0 (%p4939_p3), %v4947_v41 }
0x20ac   :  { %v6949_v58 = vpop.f32.mrf.mxu0 }
0x2133   :  { %v4949_v42 = vpop.xlane.xlu0 %4948 }
0x2134   :  { %vm4950_vm11 = vcmp.eq.f32.partialorder %v4947_v41, %v4949_v42 }
0x2135   :  { %vm4951_vm12 = vmand %vm4950_vm11, %vm4946_vm10 }
0x2136   :  { %v4952_v18 = vsel %vm4951_vm12, %v4945_v40, 128 }
0x2137   :  { %v4954_v43 = vshra.s32 %v4952_v18, 16  ;;  %v4953_v55 = vand.u32 65535, %v4952_v18 }
0x2139   :  { %v4956_v44 = vcvt.s32.f32 %v4954_v43  ;;  %v4955_v57 = vcvt.s32.f32 %v4953_v55 }
0x213b   :  { %4957 = vmin.xlane.f32.xlu0 %v4956_v44 }
0x21c4   :  { %v4958_v56 = vpop.xlane.xlu0 %4957 }
0x21c5   :  { %vm4959_vm13 = vcmp.eq.f32.partialorder %v4956_v44, %v4958_v56  ;;  %v4964_v0 = vcvt.f32.s32 %v4958_v56 }
0x21c6   :  { %v4960_v59 = vsel %vm4959_vm13, %v4955_v57, inf }
0x21c7   :  { %4961 = vmin.xlane.f32.xlu1 %v4960_v59  ;;  %v4965_v3 = vshll.u32 %v4964_v0, 16 }
0x2250   :  { %v4962_v1 = vpop.xlane.xlu1 %4961 }
0x2251   :  { %v4963_v24 = vcvt.f32.s32 %v4962_v1 }
0x2253   :  { %v4966_v4 = vadd.s32 %v4965_v3, %v4963_v24 }
0x2255   :  { %vm4967_vm15 = vcmp.eq.s32.totalorder %v4945_v40, %v4966_v4 }
0x2256   :  { %vm6467_vm1 = vmpackc.low %vm4967_vm15, %vm4967_vm15 }
0x2257   :  { %6967 = vmatmul.mubr.msk.bf16.vlgmr.msra.gmra.mxu0 %vm6467_vm1, %v7807_v5 }
0x2317   :  { %v5069_v29 = vpop.f32.mrf.mxu0 }
0x2318   :  { %v5075_v9 = vpack.c.bf16 %v5069_v29, %v5069_v29 }
0x2319   :  { %v6968_v11 = vpop.f32.mrf.mxu0 }
0x231a   :  { %6477 = vmatmul.mubr.msk.bf16.vlgmr.msra.gmra.mxu1 %vm5146_vm2, %v5075_v9 }
0x231b   :  { %5204 = vmatpush1.bf16.msra.mxu1 %v7663_v8  ;;  %v5072_v12 = vpop.f32.mrf.mxu0  ;;  %5223 = vmatprep.mubr.bf16.mxu1 %v7808_v7 }
0x231c   :  { %5205 = vmatprep.subr.bf16.mxu1 %v7668_v10 }
0x231d   :  { %v6969_v15 = vpop.f32.mrf.mxu0 }
0x231f   :  { %5206 = vmatpush1.bf16.msra.mxu1 %v7666_v13 }
0x2322   :  { %6478 = vmatmul.mubr.msk.bf16.vlgmr.msra.gmra.mxu1 %vm5146_vm2, %v5075_v9 }
0x23da   :  { %v5184_v25 = vpop.f32.mrf.mxu1 }
0x23db   :  { %v5185_v26 = vadd.f32 %v5184_v25, %v5089_v22 }
0x23dc   :  { %v5186_v28 = vpop.f32.mrf.mxu1 }
0x23dd   :  { %5232 = vst [vmem:[#allocation4 + $0x10] sm:$0xff] %v5185_v26  ;;  %v5187_v30 = vadd.f32 %v5186_v28, %v5093_v23 }
0x23de   :  { %v5188_v32 = vpop.f32.mrf.mxu1 }
0x23df   :  { %5233 = vst [vmem:[#allocation4] sm:$0xff] %v5187_v30 }
0x23e0   :  { %v5189_v34 = vpop.f32.mrf.mxu1 }
0x23e2   :  { %v5225_v35 = vpop.f32.mrf.mxu1 }
0x23e3   :  { %v5226_v36 = vadd.f32 %v5225_v35, %v5097_v33 }
0x23e4   :  { %v5227_v38 = vpop.f32.mrf.mxu1 }
0x23e5   :  { %5234 = vst [vmem:[#allocation4 + $0x18] sm:$0xff] %v5226_v36  ;;  %v5228_v58 = vadd.f32 %v5227_v38, %v5101_v20 }
0x23e6   :  { %v5229_v39 = vpop.f32.mrf.mxu1 }
0x23e7   :  { %5235 = vst [vmem:[#allocation4 + $0x8] sm:$0xff] %v5228_v58 }
0x23e8   :  { %v5230_v40 = vpop.f32.mrf.mxu1 }
0x23e9 PF:  { %v7669_v41 = vld [vmem:[%s9538_s6 + $0xe4] ss:$16 sps:$4 sm:$0xff]   ;;  %5484 = vmatprep.mubr.bf16.mxu0 %v7778_v2  ;;  %5525 = vmatprep.mubr.bf16.mxu1 %v7778_v2  ;;  %v7671_v42 = vld [vmem:[%s9538_s6 + $0xe0] ss:$16 sps:$4 sm:$0xff]   ;;  %v7680_v2 = vld [vmem:[%s9538_s6 + $0xec] ss:$16 sps:$4 sm:$0xff]  }
0x23ea   :  { %5452 = vmatprep.subr.bf16.mxu0 %v7669_v41  ;;  %v7672_v18 = vld [vmem:[%s9538_s6 + $0xc4] ss:$16 sps:$4 sm:$0xff]   ;;  %v7674_v43 = vld [vmem:[%s9538_s6 + $0xc0] ss:$16 sps:$4 sm:$0xff]   ;;  %v7683_v45 = vld [vmem:[%s9538_s6 + $0xe8] ss:$16 sps:$4 sm:$0xff]   ;;  %5493 = vmatprep.subr.bf16.mxu1 %v7680_v2 }
0x23eb   :  { %5453 = vmatpush1.bf16.msra.mxu0 %v7671_v42  ;;  %v7675_v44 = vld [vmem:[%s9538_s6 + $0xa4] ss:$16 sps:$4 sm:$0xff]   ;;  %v7677_v46 = vld [vmem:[%s9538_s6 + $0xa0] ss:$16 sps:$4 sm:$0xff]   ;;  %5494 = vmatpush1.bf16.msra.mxu1 %v7683_v45  ;;  %v7686_v48 = vld [vmem:[%s9538_s6 + $0xcc] ss:$16 sps:$4 sm:$0xff]  }
0x23ec   :  { %5454 = vmatprep.subr.bf16.mxu0 %v7672_v18  ;;  %v7678_v47 = vld [vmem:[%s9538_s6 + $0x84] ss:$16 sps:$4 sm:$0xff]   ;;  %v7689_v50 = vld [vmem:[%s9538_s6 + $0xc8] ss:$16 sps:$4 sm:$0xff]   ;;  %5495 = vmatprep.subr.bf16.mxu1 %v7686_v48  ;;  %v7682_v51 = vld [vmem:[%s9538_s6 + $0x80] ss:$16 sps:$4 sm:$0xff]  }
0x23ed   :  { %v7684_v52 = vld [vmem:[%s9538_s6 + $0x64] ss:$16 sps:$4 sm:$0xff]   ;;  %v7692_v54 = vld [vmem:[%s9538_s6 + $0xac] ss:$16 sps:$4 sm:$0xff]   ;;  %v7695_v55 = vld [vmem:[%s9538_s6 + $0xa8] ss:$16 sps:$4 sm:$0xff]  }
0x23ee   :  { %v7698_v56 = vld [vmem:[%s9538_s6 + $0x8c] ss:$16 sps:$4 sm:$0xff]   ;;  %v7688_v57 = vld [vmem:[%s9538_s6 + $0x60] ss:$16 sps:$4 sm:$0xff]   ;;  %v7690_v59 = vld [vmem:[%s9538_s6 + $0x44] ss:$16 sps:$4 sm:$0xff]  }
0x23ef   :  { %5455 = vmatpush1.bf16.msra.mxu0 %v7674_v43  ;;  %5496 = vmatpush1.bf16.msra.mxu1 %v7689_v50  ;;  %v7701_v60 = vld [vmem:[%s9538_s6 + $0x88] ss:$16 sps:$4 sm:$0xff]   ;;  %v7704_v61 = vld [vmem:[%s9538_s6 + $0x6c] ss:$16 sps:$4 sm:$0xff]   ;;  %v7694_v62 = vld [vmem:[%s9538_s6 + $0x40] ss:$16 sps:$4 sm:$0xff]  }
0x23f0   :  { %5456 = vmatprep.subr.bf16.mxu0 %v7675_v44  ;;  %5497 = vmatprep.subr.bf16.mxu1 %v7692_v54  ;;  %v7696_v63 = vld [vmem:[%s9538_s6 + $0x24] ss:$16 sps:$4 sm:$0xff]   ;;  %v7707_v49 = vld [vmem:[%s9538_s6 + $0x68] ss:$16 sps:$4 sm:$0xff]   ;;  %v7700_v0 = vld [vmem:[%s9538_s6 + $0x20] ss:$16 sps:$4 sm:$0xff]  }
0x23f1   :  { %v7708_v1 = vld [vmem:[%s9538_s6 + $0x4c] ss:$16 sps:$4 sm:$0xff]   ;;  %v7702_v3 = vld [vmem:[%s9538_s6 + $0x4] ss:$16 sps:$4 sm:$0xff]   ;;  %v7710_v24 = vld [vmem:[%s9538_s6 + $0x48] ss:$16 sps:$4 sm:$0xff]  }
0x23f2   :  { %v7711_v4 = vld [vmem:[%s9538_s6 + $0x2c] ss:$16 sps:$4 sm:$0xff]   ;;  %v7706_v5 = vld [vmem:[%s9538_s6] ss:$16 sps:$4 sm:$0xff]   ;;  %v7713_v6 = vld [vmem:[%s9538_s6 + $0x28] ss:$16 sps:$4 sm:$0xff]  }
0x23f3   :  { %5457 = vmatpush1.bf16.msra.mxu0 %v7677_v46  ;;  %5498 = vmatpush1.bf16.msra.mxu1 %v7695_v55  ;;  %v7714_v7 = vld [vmem:[%s9538_s6 + $0xc] ss:$16 sps:$4 sm:$0xff]   ;;  %v7716_v29 = vld [vmem:[%s9538_s6 + $0x8] ss:$16 sps:$4 sm:$0xff]   ;;  %v7718_v9 = vld [vmem:[%s9540_s8 + $0x30] sm:$0xff]   ;;  %s6479_s7 = sld [smem:[#allocation6 + $0x6]] }
0x23f4   :  { %5458 = vmatprep.subr.bf16.mxu0 %v7678_v47  ;;  %5499 = vmatprep.subr.bf16.mxu1 %v7698_v56  ;;  %v7717_v8 = vld [vmem:[%s9540_s8 + $0x38] sm:$0xff]   ;;  %v7719_v10 = vld [vmem:[%s9540_s8 + $0x28] sm:$0xff]   ;;  %v7722_v12 = vld [vmem:[%s9540_s8 + $0x10] sm:$0xff]  }
0x23f5   :  { %v7721_v11 = vld [vmem:[%s9540_s8 + $0x18] sm:$0xff]   ;;  %v7723_v13 = vld [vmem:[%s9540_s8 + $0x8] sm:$0xff]   ;;  %v7724_v15 = vld [vmem:[%s9540_s8] sm:$0xff]  }
0x23f6   :  { %v6480_v16 = vld [vmem:[%s9533_s1 + $0x70] sm:$0xff]  ;;  %v5250_v25 = vld [vmem:[#allocation4] sm:$0xff]  ;;  %v6481_v31 = vld [vmem:[%s9533_s1 + $0x78] sm:$0xff]  ;;  %s7809_s1 = smov [#allocation7]  }
0x23f7   :  { %5459 = vmatpush1.bf16.msra.mxu0 %v7682_v51  ;;  %5500 = vmatpush1.bf16.msra.mxu1 %v7701_v60  ;;  %v5245_v19 = vunpack.c.l.bf16 %v6480_v16  ;;  %v5249_v21 = vld [vmem:[#allocation4 + $0x10] sm:$0xff]  ;;  %v5246_v23 = vunpack.c.h.bf16 %v6480_v16  ;;  %v5248_v36 = vunpack.c.h.bf16 %v6481_v31  ;;  %v5252_v58 = vld [vmem:[#allocation4 + $0x8] sm:$0xff]  ;;  %v5247_v40 = vunpack.c.l.bf16 %v6481_v31  ;;  %v5251_v41 = vld [vmem:[#allocation4 + $0x18] sm:$0xff]  ;;  %s5983_s15 = sshll.u32 %s7809_s1, 4  ;;  %s5984_s15 = int_to_ptr.vmem [resolvable:$true] %s5983_s15 }
0x23f8   :  { %5460 = vmatprep.subr.bf16.mxu0 %v7684_v52  ;;  %5501 = vmatprep.subr.bf16.mxu1 %v7704_v61  ;;  %s7753_s18 = scalar_lea.vmem %s5984_s15, 1024  ;;  %p7758_p6 = scmp.lt.s32.totalorder %s5984_s15, %s5984_s15 }
0x23f9   :  { %p5240_p4 = scmp.ne.s32.totalorder %s6479_s7, 0  ;;  %p7754_p5 = scmp.ne.s32.totalorder %s5984_s15, %s7753_s18 }
0x23fa   :  { %p7759_p7 = scmp.lt.s32.totalorder %s7753_s18, %s7753_s18 }
0x23fb   :  { %5461 = vmatpush1.bf16.msra.mxu0 %v7688_v57  ;;  %5502 = vmatpush1.bf16.msra.mxu1 %v7707_v49  ;;  %s5253_s11 = scalar_select %p5240_p4, 1, 0 }
0x23fc   :  { %5462 = vmatprep.subr.bf16.mxu0 %v7690_v59  ;;  %5503 = vmatprep.subr.bf16.mxu1 %v7708_v1  ;;  %v6517_v1 = vld [vmem:[%s9541_s9] ss:$0 sm:$0xff]  ;;  %p7760_p8 = por %p7759_p7, %p7758_p6 }
0x23fd   :  { %v5254_v17 = vstv %s5253_s11 }
0x23fe   :  { %p7761_p9 = pnand %p7760_p8, %p7754_p5 }
0x23ff   :  { %5463 = vmatpush1.bf16.msra.mxu0 %v7694_v62  ;;  %5504 = vmatpush1.bf16.msra.mxu1 %v7710_v24 }
0x2400   :  { %5464 = vmatprep.subr.bf16.mxu0 %v7696_v63  ;;  %5505 = vmatprep.subr.bf16.mxu1 %v7711_v4 }
0x2403   :  { %5465 = vmatpush1.bf16.msra.mxu0 %v7700_v0  ;;  %5506 = vmatpush1.bf16.msra.mxu1 %v7713_v6 }
0x2404   :  { %5466 = vmatprep.subr.bf16.mxu0 %v7702_v3  ;;  %5507 = vmatprep.subr.bf16.mxu1 %v7714_v7 }
0x2407   :  { %5467 = vmatpush1.bf16.msra.mxu0 %v7706_v5  ;;  %5508 = vmatpush1.bf16.msra.mxu1 %v7716_v29 }
0x2408   :  { %6970 = vmatprep.subr.bf16.mxu0 %v7779_v37 }
0x240a   :  { %5485 = vmatmul.mubr.bf16.vlgmr.msra.gmra.mxu0 %v9314_v53  ;;  %5526 = vmatmul.mubr.bf16.vlgmr.msra.gmra.mxu1 %v9314_v53  ;;  %v7720_v53 = vld [vmem:[%s9540_s8 + $0x20] sm:$0xff]  }
0x240b   :  { %6986 = vmatprep.mubr.msk.bf16.mxu0 %vm7780_vm0, %v7779_v37  ;;  %6971 = vmatpush3.bf16.msra.mxu0 %v7717_v8  ;;  %vm9510_vm0 = vcmp.eq.s32.totalorder %v5254_v17, 1 }
0x240c   :  { %6972 = vmatprep.subr.bf16.mxu0 %v7779_v37  ;;  %v5257_v27 = vsel %vm9510_vm0, %v5246_v23, %v5250_v25  ;;  %v5259_v42 = vsel %vm9510_vm0, %v5248_v36, %v5252_v58  ;;  %v5258_v44 = vsel %vm9510_vm0, %v5247_v40, %v5251_v41 }
0x240f   :  { %6973 = vmatpush3.bf16.msra.mxu0 %v7718_v9 }
0x2410   :  { %6974 = vmatprep.subr.bf16.mxu0 %v7779_v37 }
0x2413   :  { %6975 = vmatpush3.bf16.msra.mxu0 %v7719_v10 }
0x2414   :  { %6976 = vmatprep.subr.bf16.mxu0 %v7779_v37 }
0x2417   :  { %6977 = vmatpush3.bf16.msra.mxu0 %v7720_v53 }
0x2418   :  { %6978 = vmatprep.subr.bf16.mxu0 %v7779_v37 }
0x241b   :  { %6979 = vmatpush3.bf16.msra.mxu0 %v7721_v11 }
0x241c   :  { %6980 = vmatprep.subr.bf16.mxu0 %v7779_v37 }
0x241f   :  { %6981 = vmatpush3.bf16.msra.mxu0 %v7722_v12 }
0x2420   :  { %6982 = vmatprep.subr.bf16.mxu0 %v7779_v37 }
0x2423   :  { %6983 = vmatpush3.bf16.msra.mxu0 %v7723_v13 }
0x2424   :  { %6984 = vmatprep.subr.bf16.mxu0 %v7779_v37  ;;  %v5256_v37 = vsel %vm9510_vm0, %v5245_v19, %v5249_v21 }
0x2427   :  { %6985 = vmatpush3.bf16.msra.mxu0 %v7724_v15 }
0x24ca   :  { %v5486_v26 = vpop.f32.mrf.mxu0  ;;  %v5527_v35 = vpop.f32.mrf.mxu1 }
0x24cb   :  { %v5534_v28 = vadd.f32 %v5486_v26, %v5256_v37  ;;  %v5536_v45 = vadd.f32 %v5527_v35, %v5258_v44 }
0x24cc   :  { %v5488_v30 = vpop.f32.mrf.mxu0  ;;  %v5529_v39 = vpop.f32.mrf.mxu1 }
0x24cd   :  { %v6514_v32 = vmul.f32 -1.442695, %v5534_v28  ;;  %v5535_v33 = vadd.f32 %v5488_v30, %v5257_v27  ;;  %v5537_v2 = vadd.f32 %v5529_v39, %v5259_v42 }
0x24ce   :  { %v5490_v34 = vpop.f32.mrf.mxu0  ;;  %v5531_v18 = vpop.f32.mrf.mxu1 }
0x24cf   :  { %7725 = vpow2.f32 %v6514_v32  ;;  %v6515_v20 = vmul.f32 -1.442695, %v5535_v33  ;;  %v6516_v46 = vmul.f32 -1.442695, %v5537_v2 }
0x24d0   :  { %v5491_v38 = vpop.f32.mrf.mxu0  ;;  %v5532_v43 = vpop.f32.mrf.mxu1 }
0x24d1   :  { %7727 = vpow2.f32 %v6515_v20 }
0x24d2   :  { %7729 = vtanh.f32 %v5536_v45 }
0x24d3   :  { %7731 = vpow2.f32 %v6516_v46 }
0x24dc   :  { %v7726_v47 = vpop.eup %7725 }
0x24dd   :  { %v5541_v48 = vadd.f32 1.0, %v7726_v47 }
0x24de   :  { %v7728_v50 = vpop.eup %7727 }
0x24df   :  { %7733 = vrcp.f32 %v5541_v48  ;;  %v5547_v51 = vadd.f32 1.0, %v7728_v50  ;;  %v7730_v52 = vpop.eup %7729 }
0x24e0   :  { %v7732_v54 = vpop.eup %7731 }
0x24e1   :  { %7735 = vrcp.f32 %v5547_v51  ;;  %v5554_v57 = vadd.f32 1.0, %v7732_v54 }
0x24e3   :  { %7737 = vrcp.f32 %v5554_v57 }
0x24ec   :  { %v7734_v55 = vpop.eup %7733 }
0x24ed   :  { %v5558_v60 = vmul.f32 %v7734_v55, %v7730_v52 }
0x24ee   :  { %v7736_v56 = vpop.eup %7735 }
0x24ef   :  { %v5557_v59 = vmul.f32 %v7736_v56, %v9311_v14 }
0x24f0   :  { %v7738_v62 = vpop.eup %7737 }
0x24f1   :  { %v5559_v61 = vadd.f32 %v5558_v60, %v5557_v59 }
0x24f3   :  { %7739 = vtanh.f32 %v5559_v61 }
0x2500   :  { %v7740_v63 = vpop.eup %7739 }
0x2501   :  { %v5561_v49 = vmul.f32 %v7740_v63, %v7738_v62 }
0x2503   :  { %v5562_v0 = vpack.c.bf16 %v5561_v49, %v5561_v49 }
0x2505   :  { %6987 = vmatmul.mubr.bf16.vlgmr.msra.gmra.mxu0 %v5562_v0 }
0x25c5   :  { %v5668_v3 = vpop.f32.mrf.mxu0 }
0x25c6   :  { %v5669_v24 = vadd.f32 %v6517_v1, %v5668_v3 }
0x25c7   :  { %v6988_v4 = vpop.f32.mrf.mxu0 }
0x25c8   :  { %5675 = vst [vmem:[#allocation7 + $0x38] sm:$0xff] %v5669_v24 }
0x25c9   :  { %v5671_v14 = vpop.f32.mrf.mxu0 }
0x25ca   :  { %7764 = shalt.err (!%p7761_p9)
}
0x25cb   :  { %s7810_s19 = smov 128   ;;  %s7811_s20 = smov 8   ;;  %v6989_v5 = vpop.f32.mrf.mxu0 }
0x25cc   :  { %5989 = dma.vmem_to_hbm [thread:$0]  %s5984_s15, 1024, %s9542_s10, [#allocation8], %s7810_s19, %s7810_s19, %s7811_s20  }
0x25cd   :  { %7775 = dma.done.wait [#allocation8], 1024  }
0x25ce   :  { %7776 = vsyncadd [#allocation8], 4294966272 }
0x25cf   :  { %5993 = vsyncpa [#allocation8], 1 }

</bundles_post_ra>
